<compile_context>
chip_gen: v7x
topology: tpu7x:2x2x1
jax: 0.10.0
libtpu: 0.0.40
codegen_flags: <defaults>
</compile_context>

<pallas_src>
import jax
import jax.numpy as jnp
from jax.experimental import pallas as pl
from jax.experimental.pallas import tpu as pltpu

Z_DIM = 100
K_PAD = 128            # layer-1 contraction dim padded to the 128-lane width
H1, H2, H3 = 256, 512, 1024
OUT = 3 * 32 * 32      # 3072
OUT_CHUNK = 768        # 4 chunks of 768 (= 6 * 128 lanes) for layer 4
TB_MAX = 128           # batch tile: M=128 keeps the MXU full, >=2 tiles at B>=256


def _cdiv(a, b):
    return (a + b - 1) // b


def _round_up(x, m):
    return _cdiv(x, m) * m


def _generator_kernel(z_ref,
                      w1_ref, b1_ref,
                      w2_ref, b2_ref,
                      w3_ref, b3_ref,
                      w4_ref, b4_ref,
                      o_ref):
    # Layer 1 in f32 (tiny: K=128, N=256) for parity with the f32 reference.
    h = jnp.dot(z_ref[...], w1_ref[...], preferred_element_type=jnp.float32)
    h = jnp.maximum(h + b1_ref[...], 0.0)

    # Layers 2-3: bf16 operands, f32 MXU accumulation, ReLU on the VPU.
    h = jnp.dot(h.astype(jnp.bfloat16), w2_ref[...],
                preferred_element_type=jnp.float32)
    h = jnp.maximum(h + b2_ref[...], 0.0)

    h = jnp.dot(h.astype(jnp.bfloat16), w3_ref[...],
                preferred_element_type=jnp.float32)
    h3 = jnp.maximum(h + b3_ref[...], 0.0).astype(jnp.bfloat16)

    # Layer 4 chunked over the N=3072 output dim: the MXU push of chunk c
    # overlaps the bias-add/tanh/store (VPU/EUP/vst slots) of chunk c-1.
    for c in range(OUT // OUT_CHUNK):
        lo, hi = c * OUT_CHUNK, (c + 1) * OUT_CHUNK
        y = jnp.dot(h3, w4_ref[:, lo:hi], preferred_element_type=jnp.float32)
        # tanh in f32 (portable to v5e's f32-only EUP), store as bf16.
        o_ref[:, lo:hi] = jnp.tanh(y + b4_ref[:, lo:hi]).astype(o_ref.dtype)


def generator_forward(z, params):
    """z: (B, Z_DIM) f32 -> (B, 3, 32, 32) f32."""
    (w1, b1), (w2, b2), (w3, b3), (w4, b4) = params
    B = z.shape[0]

    # Bounded batch padding: split B into cdiv(B, TB_MAX) tiles, each a
    # multiple of 8 sublanes. (e.g. B=272 -> TB=96, B_pad=288, not 512.)
    n_tiles = _cdiv(B, TB_MAX)
    TB = _round_up(_cdiv(B, n_tiles), 8)
    B_pad = n_tiles * TB

    # Pad z (batch -> B_pad, contraction -> 128 lanes); kept in f32.
    z_pad = jnp.zeros((B_pad, K_PAD), jnp.float32)
    z_pad = z_pad.at[:B, :Z_DIM].set(z)

    def batch_tile(shape):
        return pl.BlockSpec(shape, lambda i: (i, 0))

    def resident(shape):
        # Constant block index -> stays in VMEM across batch tiles;
        # single-buffered since the block never changes.
        return pl.BlockSpec(shape, lambda i: (0, 0),
                            pipeline_mode=pl.Buffered(1))

    flat_bf16 = pl.pallas_call(
        _generator_kernel,
        out_shape=jax.ShapeDtypeStruct((B_pad, OUT), jnp.bfloat16),
        grid=(n_tiles,),
        in_specs=[
            batch_tile((TB, K_PAD)),
            resident((K_PAD, H1)), resident((1, H1)),
            resident((H1, H2)),    resident((1, H2)),
            resident((H2, H3)),    resident((1, H3)),
            resident((H3, OUT)),   resident((1, OUT)),
        ],
        out_specs=batch_tile((TB, OUT)),
        compiler_params=pltpu.CompilerParams(
            dimension_semantics=("parallel",),   # shard batch tiles across TCs
            vmem_limit_bytes=32 << 20,           # fits v7x's 64 MiB physical VMEM
        ),
    )(z_pad, w1, b1, w2, b2, w3, b3, w4, b4)

    # Drop batch padding, up-cast, and match torch's .view(-1, 3, 32, 32).
    return flat_bf16[:B].astype(jnp.float32).reshape(B, 3, 32, 32)


def init_params(key):
    """Synthetic parameters. W1 in f32 zero-padded to K_PAD rows; W2..W4 in
    bf16 (halves weight HBM/VMEM, bf16-native MXU); biases (1, out) in f32."""
    dims = [(Z_DIM, H1), (H1, H2), (H2, H3), (H3, OUT)]
    params = []
    for i, (din, dout) in enumerate(dims):
        kw, kb = jax.random.split(jax.random.fold_in(key, i))
        w = jax.random.normal(kw, (din, dout), jnp.float32) * 0.02
        b = jax.random.normal(kb, (1, dout), jnp.float32) * 0.01
        if i == 0:  # zero-pad the K=100 contraction dim to 128, keep f32
            w = jnp.zeros((K_PAD, dout), jnp.float32).at[:din].set(w)
        else:
            w = w.astype(jnp.bfloat16)
        params.append((w, b))
    return params


def _reference_forward(z, params):
    """Pure-JAX f32 reference using the same weight values."""
    (w1, b1) = params[0]
    h = z @ w1[:Z_DIM] + b1
    h = jnp.maximum(h, 0.0)
    for i, (w, b) in enumerate(params[1:], start=1):
        h = h @ w.astype(jnp.float32) + b
        h = jnp.maximum(h, 0.0) if i < 3 else jnp.tanh(h)
    return h.reshape(z.shape[0], 3, 32, 32)


if __name__ == "__main__":
    key = jax.random.PRNGKey(0)
    kz, kp = jax.random.split(key)

    B = 2
    z = jax.random.normal(kz, (B, Z_DIM), jnp.float32)
    params = init_params(kp)

    out = generator_forward(z, params)
    out = jax.block_until_ready(out)

    assert out.shape == (B, 3, 32, 32), out.shape

    ref = _reference_forward(z, params)
    # bf16 activations (layers 2-4) and bf16 output store vs. the f32
    # reference -> deliberately loosened tolerance (precision trade, not a bug).
    assert jnp.allclose(out, ref, atol=1e-2, rtol=5e-2), "mismatch vs JAX reference"

    print("KERNEL_OK")
</pallas_src>

<mosaic_0001>
module attributes {stable_mosaic.version = 11 : i64} {
  func.func @_generator_kernel(%arg0: i32, %arg1: memref<8x128xf32, #tpu.memory_space<vmem>>, %arg2: memref<128x256xf32, #tpu.memory_space<vmem>>, %arg3: memref<1x256xf32, #tpu.memory_space<vmem>>, %arg4: memref<256x512xbf16, #tpu.memory_space<vmem>>, %arg5: memref<1x512xf32, #tpu.memory_space<vmem>>, %arg6: memref<512x1024xbf16, #tpu.memory_space<vmem>>, %arg7: memref<1x1024xf32, #tpu.memory_space<vmem>>, %arg8: memref<1024x3072xbf16, #tpu.memory_space<vmem>>, %arg9: memref<1x3072xf32, #tpu.memory_space<vmem>>, %arg10: memref<8x3072xbf16, #tpu.memory_space<vmem>>) attributes {dimension_semantics = [#tpu.dimension_semantics<parallel>], iteration_bounds = array<i64: 1>, scalar_prefetch = 0 : i64, scratch_operands = 0 : i64, tpu.core_type = #tpu.core_type<tc>, window_params = [{transform_indices = @transform_0, window_bounds = array<i64: 8, 128>}, {pipeline_mode = #tpu.pipeline_mode<synchronous>, transform_indices = @transform_1, window_bounds = array<i64: 128, 256>}, {pipeline_mode = #tpu.pipeline_mode<synchronous>, transform_indices = @transform_2, window_bounds = array<i64: 1, 256>}, {pipeline_mode = #tpu.pipeline_mode<synchronous>, transform_indices = @transform_3, window_bounds = array<i64: 256, 512>}, {pipeline_mode = #tpu.pipeline_mode<synchronous>, transform_indices = @transform_4, window_bounds = array<i64: 1, 512>}, {pipeline_mode = #tpu.pipeline_mode<synchronous>, transform_indices = @transform_5, window_bounds = array<i64: 512, 1024>}, {pipeline_mode = #tpu.pipeline_mode<synchronous>, transform_indices = @transform_6, window_bounds = array<i64: 1, 1024>}, {pipeline_mode = #tpu.pipeline_mode<synchronous>, transform_indices = @transform_7, window_bounds = array<i64: 1024, 3072>}, {pipeline_mode = #tpu.pipeline_mode<synchronous>, transform_indices = @transform_8, window_bounds = array<i64: 1, 3072>}, {transform_indices = @transform_9, window_bounds = array<i64: 8, 3072>}]} {
    %c0 = arith.constant 0 : index
    %c0_0 = arith.constant 0 : index
    %0 = vector.load %arg1[%c0, %c0_0] : memref<8x128xf32, #tpu.memory_space<vmem>>, vector<8x128xf32>
    %c0_1 = arith.constant 0 : index
    %c0_2 = arith.constant 0 : index
    %1 = vector.load %arg2[%c0_1, %c0_2] : memref<128x256xf32, #tpu.memory_space<vmem>>, vector<128x256xf32>
    %cst = arith.constant dense<0.000000e+00> : vector<8x256xf32>
    %2 = tpu.matmul %0, %1, %cst {dimension_numbers = #tpu.dot_dimension_numbers<[1], [0], [0], [1], [0, 0, 1, 1], [], []>} : vector<8x128xf32>, vector<128x256xf32>, vector<8x256xf32> -> vector<8x256xf32>
    %c0_3 = arith.constant 0 : index
    %c0_4 = arith.constant 0 : index
    %3 = vector.load %arg3[%c0_3, %c0_4] : memref<1x256xf32, #tpu.memory_space<vmem>>, vector<1x256xf32>
    %4 = vector.broadcast %3 : vector<1x256xf32> to vector<8x256xf32>
    %5 = arith.addf %2, %4 : vector<8x256xf32>
    %cst_5 = arith.constant 0.000000e+00 : f32
    %6 = vector.broadcast %cst_5 : f32 to vector<8x256xf32>
    %7 = arith.maximumf %5, %6 : vector<8x256xf32>
    %8 = arith.truncf %7 : vector<8x256xf32> to vector<8x256xbf16>
    %c0_6 = arith.constant 0 : index
    %c0_7 = arith.constant 0 : index
    %9 = vector.load %arg4[%c0_6, %c0_7] : memref<256x512xbf16, #tpu.memory_space<vmem>>, vector<256x512xbf16>
    %cst_8 = arith.constant dense<0.000000e+00> : vector<8x512xf32>
    %10 = tpu.matmul %8, %9, %cst_8 {dimension_numbers = #tpu.dot_dimension_numbers<[1], [0], [0], [1], [0, 0, 1, 1], [], []>} : vector<8x256xbf16>, vector<256x512xbf16>, vector<8x512xf32> -> vector<8x512xf32>
    %c0_9 = arith.constant 0 : index
    %c0_10 = arith.constant 0 : index
    %11 = vector.load %arg5[%c0_9, %c0_10] : memref<1x512xf32, #tpu.memory_space<vmem>>, vector<1x512xf32>
    %12 = vector.broadcast %11 : vector<1x512xf32> to vector<8x512xf32>
    %13 = arith.addf %10, %12 : vector<8x512xf32>
    %cst_11 = arith.constant 0.000000e+00 : f32
    %14 = vector.broadcast %cst_11 : f32 to vector<8x512xf32>
    %15 = arith.maximumf %13, %14 : vector<8x512xf32>
    %16 = arith.truncf %15 : vector<8x512xf32> to vector<8x512xbf16>
    %c0_12 = arith.constant 0 : index
    %c0_13 = arith.constant 0 : index
    %17 = vector.load %arg6[%c0_12, %c0_13] : memref<512x1024xbf16, #tpu.memory_space<vmem>>, vector<512x1024xbf16>
    %cst_14 = arith.constant dense<0.000000e+00> : vector<8x1024xf32>
    %18 = tpu.matmul %16, %17, %cst_14 {dimension_numbers = #tpu.dot_dimension_numbers<[1], [0], [0], [1], [0, 0, 1, 1], [], []>} : vector<8x512xbf16>, vector<512x1024xbf16>, vector<8x1024xf32> -> vector<8x1024xf32>
    %c0_15 = arith.constant 0 : index
    %c0_16 = arith.constant 0 : index
    %19 = vector.load %arg7[%c0_15, %c0_16] : memref<1x1024xf32, #tpu.memory_space<vmem>>, vector<1x1024xf32>
    %20 = vector.broadcast %19 : vector<1x1024xf32> to vector<8x1024xf32>
    %21 = arith.addf %18, %20 : vector<8x1024xf32>
    %cst_17 = arith.constant 0.000000e+00 : f32
    %22 = vector.broadcast %cst_17 : f32 to vector<8x1024xf32>
    %23 = arith.maximumf %21, %22 : vector<8x1024xf32>
    %24 = arith.truncf %23 : vector<8x1024xf32> to vector<8x1024xbf16>
    %c0_18 = arith.constant 0 : index
    %c0_19 = arith.constant 0 : index
    %25 = vector.load %arg8[%c0_18, %c0_19] : memref<1024x3072xbf16, #tpu.memory_space<vmem>>, vector<1024x768xbf16>
    %cst_20 = arith.constant dense<0.000000e+00> : vector<8x768xf32>
    %26 = tpu.matmul %24, %25, %cst_20 {dimension_numbers = #tpu.dot_dimension_numbers<[1], [0], [0], [1], [0, 0, 1, 1], [], []>} : vector<8x1024xbf16>, vector<1024x768xbf16>, vector<8x768xf32> -> vector<8x768xf32>
    %c0_21 = arith.constant 0 : index
    %c0_22 = arith.constant 0 : index
    %27 = vector.load %arg9[%c0_21, %c0_22] : memref<1x3072xf32, #tpu.memory_space<vmem>>, vector<1x768xf32>
    %28 = vector.broadcast %27 : vector<1x768xf32> to vector<8x768xf32>
    %29 = arith.addf %26, %28 : vector<8x768xf32>
    %30 = math.tanh %29 : vector<8x768xf32>
    %31 = arith.truncf %30 : vector<8x768xf32> to vector<8x768xbf16>
    %c0_23 = arith.constant 0 : index
    %c0_24 = arith.constant 0 : index
    %32 = vector.load %arg10[%c0_23, %c0_24] : memref<8x3072xbf16, #tpu.memory_space<vmem>>, vector<8x768xbf16>
    tpu.vector_store %arg10[%c0_23, %c0_24], %31 {strides = array<i32>} : memref<8x3072xbf16, #tpu.memory_space<vmem>>, vector<8x768xbf16>,
    %c0_25 = arith.constant 0 : index
    %c768 = arith.constant 768 : index
    %33 = vector.load %arg8[%c0_25, %c768] : memref<1024x3072xbf16, #tpu.memory_space<vmem>>, vector<1024x768xbf16>
    %cst_26 = arith.constant dense<0.000000e+00> : vector<8x768xf32>
    %34 = tpu.matmul %24, %33, %cst_26 {dimension_numbers = #tpu.dot_dimension_numbers<[1], [0], [0], [1], [0, 0, 1, 1], [], []>} : vector<8x1024xbf16>, vector<1024x768xbf16>, vector<8x768xf32> -> vector<8x768xf32>
    %c0_27 = arith.constant 0 : index
    %c768_28 = arith.constant 768 : index
    %35 = vector.load %arg9[%c0_27, %c768_28] : memref<1x3072xf32, #tpu.memory_space<vmem>>, vector<1x768xf32>
    %36 = vector.broadcast %35 : vector<1x768xf32> to vector<8x768xf32>
    %37 = arith.addf %34, %36 : vector<8x768xf32>
    %38 = math.tanh %37 : vector<8x768xf32>
    %39 = arith.truncf %38 : vector<8x768xf32> to vector<8x768xbf16>
    %c0_29 = arith.constant 0 : index
    %c768_30 = arith.constant 768 : index
    %40 = vector.load %arg10[%c0_29, %c768_30] : memref<8x3072xbf16, #tpu.memory_space<vmem>>, vector<8x768xbf16>
    tpu.vector_store %arg10[%c0_29, %c768_30], %39 {strides = array<i32>} : memref<8x3072xbf16, #tpu.memory_space<vmem>>, vector<8x768xbf16>,
    %c0_31 = arith.constant 0 : index
    %c1536 = arith.constant 1536 : index
    %41 = vector.load %arg8[%c0_31, %c1536] : memref<1024x3072xbf16, #tpu.memory_space<vmem>>, vector<1024x768xbf16>
    %cst_32 = arith.constant dense<0.000000e+00> : vector<8x768xf32>
    %42 = tpu.matmul %24, %41, %cst_32 {dimension_numbers = #tpu.dot_dimension_numbers<[1], [0], [0], [1], [0, 0, 1, 1], [], []>} : vector<8x1024xbf16>, vector<1024x768xbf16>, vector<8x768xf32> -> vector<8x768xf32>
    %c0_33 = arith.constant 0 : index
    %c1536_34 = arith.constant 1536 : index
    %43 = vector.load %arg9[%c0_33, %c1536_34] : memref<1x3072xf32, #tpu.memory_space<vmem>>, vector<1x768xf32>
    %44 = vector.broadcast %43 : vector<1x768xf32> to vector<8x768xf32>
    %45 = arith.addf %42, %44 : vector<8x768xf32>
    %46 = math.tanh %45 : vector<8x768xf32>
    %47 = arith.truncf %46 : vector<8x768xf32> to vector<8x768xbf16>
    %c0_35 = arith.constant 0 : index
    %c1536_36 = arith.constant 1536 : index
    %48 = vector.load %arg10[%c0_35, %c1536_36] : memref<8x3072xbf16, #tpu.memory_space<vmem>>, vector<8x768xbf16>
    tpu.vector_store %arg10[%c0_35, %c1536_36], %47 {strides = array<i32>} : memref<8x3072xbf16, #tpu.memory_space<vmem>>, vector<8x768xbf16>,
    %c0_37 = arith.constant 0 : index
    %c2304 = arith.constant 2304 : index
    %49 = vector.load %arg8[%c0_37, %c2304] : memref<1024x3072xbf16, #tpu.memory_space<vmem>>, vector<1024x768xbf16>
    %cst_38 = arith.constant dense<0.000000e+00> : vector<8x768xf32>
    %50 = tpu.matmul %24, %49, %cst_38 {dimension_numbers = #tpu.dot_dimension_numbers<[1], [0], [0], [1], [0, 0, 1, 1], [], []>} : vector<8x1024xbf16>, vector<1024x768xbf16>, vector<8x768xf32> -> vector<8x768xf32>
    %c0_39 = arith.constant 0 : index
    %c2304_40 = arith.constant 2304 : index
    %51 = vector.load %arg9[%c0_39, %c2304_40] : memref<1x3072xf32, #tpu.memory_space<vmem>>, vector<1x768xf32>
    %52 = vector.broadcast %51 : vector<1x768xf32> to vector<8x768xf32>
    %53 = arith.addf %50, %52 : vector<8x768xf32>
    %54 = math.tanh %53 : vector<8x768xf32>
    %55 = arith.truncf %54 : vector<8x768xf32> to vector<8x768xbf16>
    %c0_41 = arith.constant 0 : index
    %c2304_42 = arith.constant 2304 : index
    %56 = vector.load %arg10[%c0_41, %c2304_42] : memref<8x3072xbf16, #tpu.memory_space<vmem>>, vector<8x768xbf16>
    tpu.vector_store %arg10[%c0_41, %c2304_42], %55 {strides = array<i32>} : memref<8x3072xbf16, #tpu.memory_space<vmem>>, vector<8x768xbf16>,
    return
  }
  func.func @transform_0(%arg0: i32) -> (i32, i32) {
    %c0_i32 = arith.constant 0 : i32
    %c0_i32_0 = arith.constant 0 : i32
    return %arg0, %c0_i32 : i32, i32
  }
  func.func @transform_1(%arg0: i32) -> (i32, i32) {
    %c0_i32 = arith.constant 0 : i32
    %c0_i32_0 = arith.constant 0 : i32
    %c0_i32_1 = arith.constant 0 : i32
    return %c0_i32, %c0_i32_0 : i32, i32
  }
  func.func @transform_2(%arg0: i32) -> (i32, i32) {
    %c0_i32 = arith.constant 0 : i32
    %c0_i32_0 = arith.constant 0 : i32
    %c0_i32_1 = arith.constant 0 : i32
    return %c0_i32, %c0_i32_0 : i32, i32
  }
  func.func @transform_3(%arg0: i32) -> (i32, i32) {
    %c0_i32 = arith.constant 0 : i32
    %c0_i32_0 = arith.constant 0 : i32
    %c0_i32_1 = arith.constant 0 : i32
    return %c0_i32, %c0_i32_0 : i32, i32
  }
  func.func @transform_4(%arg0: i32) -> (i32, i32) {
    %c0_i32 = arith.constant 0 : i32
    %c0_i32_0 = arith.constant 0 : i32
    %c0_i32_1 = arith.constant 0 : i32
    return %c0_i32, %c0_i32_0 : i32, i32
  }
  func.func @transform_5(%arg0: i32) -> (i32, i32) {
    %c0_i32 = arith.constant 0 : i32
    %c0_i32_0 = arith.constant 0 : i32
    %c0_i32_1 = arith.constant 0 : i32
    return %c0_i32, %c0_i32_0 : i32, i32
  }
  func.func @transform_6(%arg0: i32) -> (i32, i32) {
    %c0_i32 = arith.constant 0 : i32
    %c0_i32_0 = arith.constant 0 : i32
    %c0_i32_1 = arith.constant 0 : i32
    return %c0_i32, %c0_i32_0 : i32, i32
  }
  func.func @transform_7(%arg0: i32) -> (i32, i32) {
    %c0_i32 = arith.constant 0 : i32
    %c0_i32_0 = arith.constant 0 : i32
    %c0_i32_1 = arith.constant 0 : i32
    return %c0_i32, %c0_i32_0 : i32, i32
  }
  func.func @transform_8(%arg0: i32) -> (i32, i32) {
    %c0_i32 = arith.constant 0 : i32
    %c0_i32_0 = arith.constant 0 : i32
    %c0_i32_1 = arith.constant 0 : i32
    return %c0_i32, %c0_i32_0 : i32, i32
  }
  func.func @transform_9(%arg0: i32) -> (i32, i32) {
    %c0_i32 = arith.constant 0 : i32
    %c0_i32_0 = arith.constant 0 : i32
    return %arg0, %c0_i32 : i32, i32
  }
}

</mosaic_0001>

<bundles_post_ra>
// kernel: tpu_custom_call.1
= control target key start
LH: loop header
LB: loop body
LE: loop exit
PB: predicated region body
PF: predicated region fallthrough
CT: control target
= control target key end

     0   :  { %14 = vsyncpa [#allocation3], 0  ;;  %s17060_s0 = inlined_call_operand.hbm [shape: f32[8,128], index: 0, kind: input, shape index: {}]   ;;  %s17061_s1 = inlined_call_operand.hbm [shape: f32[128,256], index: 1, kind: input, shape index: {}]   ;;  %s17062_s2 = inlined_call_operand.hbm [shape: f32[1,256], index: 2, kind: input, shape index: {}]   ;;  %s17063_s3 = inlined_call_operand.hbm [shape: bf16[256,512], index: 3, kind: input, shape index: {}]   ;;  %s17064_s4 = inlined_call_operand.hbm [shape: f32[1,512], index: 4, kind: input, shape index: {}]   ;;  %s17065_s5 = inlined_call_operand.hbm [shape: bf16[512,1024], index: 5, kind: input, shape index: {}]   ;;  %s17066_s6 = inlined_call_operand.hbm [shape: f32[1,1024], index: 6, kind: input, shape index: {}]   ;;  %s17067_s7 = inlined_call_operand.hbm [shape: bf16[1024,3072], index: 7, kind: input, shape index: {}]   ;;  %s17068_s8 = inlined_call_operand.hbm [shape: f32[1,3072], index: 8, kind: input, shape index: {}]   ;;  %s17069_s9 = inlined_call_operand.hbm [shape: bf16[8,3072], index: 9, kind: output, shape index: {}]  }
   0x1   :  { %15 = vsyncpa [#allocation6], 0 }
   0x2   :  { %16 = vsyncpa [#allocation9], 0 }
   0x3   :  { %17 = vsyncpa [#allocation12], 0 }
   0x4   :  { %18 = vsyncpa [#allocation15], 0 }
   0x5   :  { %19 = vsyncpa [#allocation4], 0  ;;  %s16647_s30 = smov [#allocation5]   ;;  %s16415_s13 = scalar_lea.hbm %s17061_s1, 4096 }
   0x6   :  { %s35_s10 = sshll.u32 %s16647_s30, 4  ;;  %p16416_p0 = scmp.ne.s32.totalorder %s17061_s1, %s16415_s13  ;;  %s36_s10 = int_to_ptr.vmem [resolvable:$true] %s35_s10 }
   0x7   :  { %p16419_p1 = scmp.lt.u32.totalorder %s16415_s13, %s17061_s1 }
   0x9   :  { %p16421_p2 = pnand %p16419_p1, %p16416_p0 }
   0xb   :  { %16424 = shalt.err (!%p16421_p2)
}
   0xc   :  { %s16425_s18 = scalar_lea.vmem %s36_s10, 4096  ;;  %p16430_p4 = scmp.lt.s32.totalorder %s36_s10, %s36_s10 }
   0xd   :  { %p16426_p3 = scmp.ne.s32.totalorder %s36_s10, %s16425_s18  ;;  %p16431_p5 = scmp.lt.s32.totalorder %s16425_s18, %s16425_s18 }
   0xf   :  { %p16432_p6 = por %p16431_p5, %p16430_p4 }
  0x11   :  { %p16433_p7 = pnand %p16432_p6, %p16426_p3 }
  0x13   :  { %16436 = shalt.err (!%p16433_p7)
}
  0x14   :  { %s16648_s19 = smov 256   ;;  %s16649_s20 = smov 16  }
  0x15   :  { %41 = dma.hbm_to_vmem [thread:$0]  %s17061_s1, 4096, %s36_s10, [#allocation6], %s16648_s19, %s16648_s19, %s16649_s20  }
  0x16   :  { %s16650_s23 = smov [#allocation8]   ;;  %s16651_s25 = smov [#allocation11]  }
  0x17   :  { %s57_s24 = sshll.u32 %s16650_s23, 4  ;;  %s79_s26 = sshll.u32 %s16651_s25, 4  ;;  %s58_s24 = int_to_ptr.vmem [resolvable:$true] %s57_s24  ;;  %s80_s26 = int_to_ptr.vmem [resolvable:$true] %s79_s26 }
  0x18   :  { %s16437_s29 = scalar_lea.hbm %s17063_s3, 8192 }
  0x19   :  { %p16438_p8 = scmp.ne.s32.totalorder %s17063_s3, %s16437_s29  ;;  %p16441_p9 = scmp.lt.u32.totalorder %s16437_s29, %s17063_s3 }
  0x1b   :  { %p16443_p10 = pnand %p16441_p9, %p16438_p8 }
  0x1d   :  { %16446 = shalt.err (!%p16443_p10)
}
  0x1e   :  { %s16447_s1 = scalar_lea.vmem %s58_s24, 8192  ;;  %p16452_p12 = scmp.lt.s32.totalorder %s58_s24, %s58_s24 }
  0x1f   :  { %p16448_p11 = scmp.ne.s32.totalorder %s58_s24, %s16447_s1  ;;  %p16453_p13 = scmp.lt.s32.totalorder %s16447_s1, %s16447_s1 }
  0x21   :  { %p16454_p0 = por %p16453_p13, %p16452_p12 }
  0x23   :  { %p16455_p1 = pnand %p16454_p0, %p16448_p11 }
  0x25   :  { %16458 = shalt.err (!%p16455_p1)
}
  0x26   :  { %63 = dma.hbm_to_vmem [thread:$0]  %s17063_s3, 8192, %s58_s24, [#allocation9], %s16648_s19, %s16648_s19, %s16649_s20  }
  0x27   :  { %s16459_s17 = scalar_lea.hbm %s17065_s5, 32768 }
  0x28   :  { %p16460_p2 = scmp.ne.s32.totalorder %s17065_s5, %s16459_s17  ;;  %p16463_p3 = scmp.lt.u32.totalorder %s16459_s17, %s17065_s5 }
  0x2a   :  { %p16465_p4 = pnand %p16463_p3, %p16460_p2 }
  0x2c   :  { %16468 = shalt.err (!%p16465_p4)
}
  0x2d   :  { %s16469_s25 = scalar_lea.vmem %s80_s26, 32768  ;;  %p16474_p6 = scmp.lt.s32.totalorder %s80_s26, %s80_s26 }
  0x2e   :  { %p16470_p5 = scmp.ne.s32.totalorder %s80_s26, %s16469_s25  ;;  %p16475_p7 = scmp.lt.s32.totalorder %s16469_s25, %s16469_s25 }
  0x30   :  { %p16476_p8 = por %p16475_p7, %p16474_p6 }
  0x32   :  { %p16477_p9 = pnand %p16476_p8, %p16470_p5 }
  0x34   :  { %16480 = shalt.err (!%p16477_p9)
}
  0x35   :  { %s16652_s3 = smov 512   ;;  %s16653_s19 = smov 32  }
  0x36   :  { %85 = dma.hbm_to_vmem [thread:$0]  %s17065_s5, 32768, %s80_s26, [#allocation12], %s16652_s3, %s16652_s3, %s16653_s19  }
  0x37   :  { %s16654_s27 = smov [#allocation14]   ;;  %s16481_s11 = scalar_lea.hbm %s17067_s7, 196608 }
  0x38   :  { %s101_s28 = sshll.u32 %s16654_s27, 4  ;;  %p16482_p10 = scmp.ne.s32.totalorder %s17067_s7, %s16481_s11  ;;  %s102_s28 = int_to_ptr.vmem [resolvable:$true] %s101_s28 }
  0x39   :  { %p16485_p11 = scmp.lt.u32.totalorder %s16481_s11, %s17067_s7 }
  0x3b   :  { %p16487_p12 = pnand %p16485_p11, %p16482_p10 }
  0x3d   :  { %16490 = shalt.err (!%p16487_p12)
}
  0x3e   :  { %s16491_s14 = scalar_lea.vmem %s102_s28, 196608  ;;  %p16496_p0 = scmp.lt.s32.totalorder %s102_s28, %s102_s28 }
  0x3f   :  { %p16492_p13 = scmp.ne.s32.totalorder %s102_s28, %s16491_s14  ;;  %p16497_p1 = scmp.lt.s32.totalorder %s16491_s14, %s16491_s14 }
  0x41   :  { %p16498_p2 = por %p16497_p1, %p16496_p0 }
  0x43   :  { %p16499_p3 = pnand %p16498_p2, %p16492_p13 }
  0x45   :  { %16502 = shalt.err (!%p16499_p3)
}
  0x46   :  { %s16655_s5 = smov 1536   ;;  %s16656_s26 = smov 96  }
  0x47   :  { %107 = dma.hbm_to_vmem [thread:$0]  %s17067_s7, 196608, %s102_s28, [#allocation15], %s16655_s5, %s16655_s5, %s16656_s26  }
  0x48   :  { %s16657_s17 = smov [#allocation2]   ;;  %s16658_s21 = smov [#allocation7]  }
  0x49   :  { %s26_s18 = sshll.u32 %s16657_s17, 4  ;;  %s48_s22 = sshll.u32 %s16658_s21, 4  ;;  %s27_s18 = int_to_ptr.vmem [resolvable:$true] %s26_s18  ;;  %s49_s22 = int_to_ptr.vmem [resolvable:$true] %s48_s22 }
  0x4a   :  { %s16503_s3 = scalar_lea.hbm %s17060_s0, 128 }
  0x4b   :  { %p16504_p4 = scmp.ne.s32.totalorder %s17060_s0, %s16503_s3  ;;  %p16507_p5 = scmp.lt.u32.totalorder %s16503_s3, %s17060_s0 }
  0x4d   :  { %p16509_p6 = pnand %p16507_p5, %p16504_p4 }
  0x4f   :  { %16512 = shalt.err (!%p16509_p6)
}
  0x50   :  { %s16513_s7 = scalar_lea.vmem %s27_s18, 128  ;;  %p16518_p8 = scmp.lt.s32.totalorder %s27_s18, %s27_s18 }
  0x51   :  { %p16514_p7 = scmp.ne.s32.totalorder %s27_s18, %s16513_s7  ;;  %p16519_p9 = scmp.lt.s32.totalorder %s16513_s7, %s16513_s7 }
  0x53   :  { %p16520_p10 = por %p16519_p9, %p16518_p8 }
  0x55   :  { %p16521_p11 = pnand %p16520_p10, %p16514_p7 }
  0x57   :  { %16524 = shalt.err (!%p16521_p11)
}
  0x58   :  { %29 = dma.hbm_to_vmem [thread:$0]  %s17060_s0, 128, %s27_s18, [#allocation3]  }
  0x59   :  { %s16525_s12 = scalar_lea.hbm %s17062_s2, 32 }
  0x5a   :  { %p16526_p12 = scmp.ne.s32.totalorder %s17062_s2, %s16525_s12  ;;  %p16529_p13 = scmp.lt.u32.totalorder %s16525_s12, %s17062_s2 }
  0x5c   :  { %p16531_p0 = pnand %p16529_p13, %p16526_p12 }
  0x5e   :  { %16534 = shalt.err (!%p16531_p0)
}
  0x5f   :  { %s16535_s5 = scalar_lea.vmem %s49_s22, 32  ;;  %p16540_p2 = scmp.lt.s32.totalorder %s49_s22, %s49_s22 }
  0x60   :  { %p16536_p1 = scmp.ne.s32.totalorder %s49_s22, %s16535_s5  ;;  %p16541_p3 = scmp.lt.s32.totalorder %s16535_s5, %s16535_s5 }
  0x62   :  { %p16542_p4 = por %p16541_p3, %p16540_p2 }
  0x64   :  { %p16543_p5 = pnand %p16542_p4, %p16536_p1 }
  0x66   :  { %16546 = shalt.err (!%p16543_p5)
}
  0x67   :  { %51 = dma.hbm_to_vmem [thread:$0]  %s17062_s2, 32, %s49_s22, [#allocation6]  }
  0x68   :  { %s16659_s15 = smov [#allocation10]   ;;  %s16660_s17 = smov [#allocation13]  }
  0x69   :  { %s70_s16 = sshll.u32 %s16659_s15, 4  ;;  %s92_s18 = sshll.u32 %s16660_s17, 4  ;;  %s71_s16 = int_to_ptr.vmem [resolvable:$true] %s70_s16  ;;  %s93_s18 = int_to_ptr.vmem [resolvable:$true] %s92_s18 }
  0x6a   :  { %s16547_s25 = scalar_lea.hbm %s17064_s4, 64 }
  0x6b   :  { %p16548_p6 = scmp.ne.s32.totalorder %s17064_s4, %s16547_s25  ;;  %p16551_p7 = scmp.lt.u32.totalorder %s16547_s25, %s17064_s4 }
  0x6d   :  { %p16553_p8 = pnand %p16551_p7, %p16548_p6 }
  0x6f   :  { %16556 = shalt.err (!%p16553_p8)
}
  0x70   :  { %s16557_s2 = scalar_lea.vmem %s71_s16, 64  ;;  %p16562_p10 = scmp.lt.s32.totalorder %s71_s16, %s71_s16 }
  0x71   :  { %p16558_p9 = scmp.ne.s32.totalorder %s71_s16, %s16557_s2  ;;  %p16563_p11 = scmp.lt.s32.totalorder %s16557_s2, %s16557_s2 }
  0x73   :  { %p16564_p12 = por %p16563_p11, %p16562_p10 }
  0x75   :  { %p16565_p13 = pnand %p16564_p12, %p16558_p9 }
  0x77   :  { %16568 = shalt.err (!%p16565_p13)
}
  0x78   :  { %73 = dma.hbm_to_vmem [thread:$0]  %s17064_s4, 64, %s71_s16, [#allocation9]  }
  0x79   :  { %s16569_s29 = scalar_lea.hbm %s17066_s6, 128 }
  0x7a   :  { %p16570_p0 = scmp.ne.s32.totalorder %s17066_s6, %s16569_s29  ;;  %p16573_p1 = scmp.lt.u32.totalorder %s16569_s29, %s17066_s6 }
  0x7c   :  { %p16575_p2 = pnand %p16573_p1, %p16570_p0 }
  0x7e   :  { %16578 = shalt.err (!%p16575_p2)
}
  0x7f   :  { %s16579_s1 = scalar_lea.vmem %s93_s18, 128  ;;  %p16584_p4 = scmp.lt.s32.totalorder %s93_s18, %s93_s18 }
  0x80   :  { %p16580_p3 = scmp.ne.s32.totalorder %s93_s18, %s16579_s1  ;;  %p16585_p5 = scmp.lt.s32.totalorder %s16579_s1, %s16579_s1 }
  0x82   :  { %p16586_p6 = por %p16585_p5, %p16584_p4 }
  0x84   :  { %p16587_p7 = pnand %p16586_p6, %p16580_p3 }
  0x86   :  { %16590 = shalt.err (!%p16587_p7)
}
  0x87   :  { %95 = dma.hbm_to_vmem [thread:$0]  %s17066_s6, 128, %s93_s18, [#allocation12]  }
  0x88   :  { %s16661_s14 = smov [#allocation16]   ;;  %s16591_s15 = scalar_lea.hbm %s17068_s8, 384 }
  0x89   :  { %s114_s5 = sshll.u32 %s16661_s14, 4  ;;  %p16592_p8 = scmp.ne.s32.totalorder %s17068_s8, %s16591_s15  ;;  %s115_s5 = int_to_ptr.vmem [resolvable:$true] %s114_s5 }
  0x8a   :  { %p16595_p9 = scmp.lt.u32.totalorder %s16591_s15, %s17068_s8 }
  0x8c   :  { %p16597_p10 = pnand %p16595_p9, %p16592_p8 }
  0x8e   :  { %16600 = shalt.err (!%p16597_p10)
}
  0x8f   :  { %s16601_s25 = scalar_lea.vmem %s115_s5, 384  ;;  %p16606_p12 = scmp.lt.s32.totalorder %s115_s5, %s115_s5 }
  0x90   :  { %p16602_p11 = scmp.ne.s32.totalorder %s115_s5, %s16601_s25  ;;  %p16607_p13 = scmp.lt.s32.totalorder %s16601_s25, %s16601_s25 }
  0x92   :  { %p16608_p0 = por %p16607_p13, %p16606_p12 }
  0x94   :  { %p16609_p1 = pnand %p16608_p0, %p16602_p11 }
  0x96   :  { %16612 = shalt.err (!%p16609_p1)
}
  0x97   :  { %117 = dma.hbm_to_vmem [thread:$0]  %s17068_s8, 384, %s115_s5, [#allocation15]  }
  0x98   :  { %16635 = dma.done.wait [#allocation3], 128  }
  0x99   :  { %16636 = vsyncadd [#allocation3], 4294967168 }
  0x9a   :  { %16637 = dma.done.wait [#allocation6], 4128  }
  0x9b   :  { %16638 = vsyncadd [#allocation6], 4294963168 }
  0x9c   :  { %16639 = dma.done.wait [#allocation9], 8256  }
  0x9d   :  { %16640 = vsyncadd [#allocation9], 4294959040 }
  0x9e   :  { %16641 = dma.done.wait [#allocation12], 32896  }
  0x9f   :  { %16642 = vsyncadd [#allocation12], 4294934400 }
  0xa0   :  { %16643 = dma.done.wait [#allocation15], 196992  }
  0xa1   :  { %16644 = vsyncadd [#allocation15], 4294770304  ;;  %v16662_v0 = vmov 0.0   ;;  %v147_v1 = vld [vmem:[#allocation5 + $0x8] sm:$0xff]  ;;  %v149_v2 = vld [vmem:[#allocation5 + $0x18] sm:$0xff]  ;;  %s16663_s8 = smov [#allocation17]  }
  0xa2   :  { %254 = vmatprep.mubr.f32.mxu0 %v16662_v0  ;;  %v146_v3 = vld [vmem:[#allocation5] sm:$0xff]  ;;  %v16026_v4 = vpack.c.bf16 %v149_v2, %v147_v1  ;;  %v148_v5 = vld [vmem:[#allocation5 + $0x10] sm:$0xff]  ;;  %v151_v6 = vld [vmem:[#allocation5 + $0x28] sm:$0xff]  ;;  %s14133_s3 = sshll.u32 %s16663_s8, 4  ;;  %s14134_s3 = int_to_ptr.vmem [resolvable:$true] %s14133_s3 }
  0xa3   :  { %v153_v7 = vld [vmem:[#allocation5 + $0x38] sm:$0xff]  ;;  %v16028_v8 = vpack.c.bf16 %v148_v5, %v146_v3  ;;  %v150_v10 = vld [vmem:[#allocation5 + $0x20] sm:$0xff]  ;;  %v152_v11 = vld [vmem:[#allocation5 + $0x30] sm:$0xff]  ;;  %s16613_s19 = scalar_lea.vmem %s14134_s3, 1536  ;;  %p16618_p3 = scmp.lt.s32.totalorder %s14134_s3, %s14134_s3 }
  0xa4   :  { %v16030_v9 = vpack.c.bf16 %v153_v7, %v151_v6  ;;  %v155_v12 = vld [vmem:[#allocation5 + $0x48] sm:$0xff]  ;;  %16027 = vmatprep.subr.bf16.mxu0 %v16026_v4  ;;  %v157_v13 = vld [vmem:[#allocation5 + $0x58] sm:$0xff]  ;;  %v16032_v14 = vpack.c.bf16 %v152_v11, %v150_v10  ;;  %v154_v16 = vld [vmem:[#allocation5 + $0x40] sm:$0xff]  ;;  %p16614_p2 = scmp.ne.s32.totalorder %s14134_s3, %s16613_s19  ;;  %p16619_p4 = scmp.lt.s32.totalorder %s16613_s19, %s16613_s19 }
  0xa5   :  { %16029 = vmatpush1.bf16.msra.mxu0 %v16028_v8  ;;  %v16034_v15 = vpack.c.bf16 %v157_v13, %v155_v12  ;;  %v156_v17 = vld [vmem:[#allocation5 + $0x50] sm:$0xff]  ;;  %v159_v18 = vld [vmem:[#allocation5 + $0x68] sm:$0xff]  ;;  %v161_v19 = vld [vmem:[#allocation5 + $0x78] sm:$0xff] }
  0xa6   :  { %16031 = vmatprep.subr.bf16.mxu0 %v16030_v9  ;;  %v16036_v20 = vpack.c.bf16 %v156_v17, %v154_v16  ;;  %v16038_v21 = vpack.c.bf16 %v161_v19, %v159_v18  ;;  %v158_v22 = vld [vmem:[#allocation5 + $0x60] sm:$0xff]  ;;  %v160_v23 = vld [vmem:[#allocation5 + $0x70] sm:$0xff]  ;;  %v163_v24 = vld [vmem:[#allocation5 + $0x88] sm:$0xff]  ;;  %p16620_p5 = por %p16619_p4, %p16618_p3 }
  0xa7   :  { %v165_v25 = vld [vmem:[#allocation5 + $0x98] sm:$0xff]  ;;  %v162_v26 = vld [vmem:[#allocation5 + $0x80] sm:$0xff]  ;;  %v164_v27 = vld [vmem:[#allocation5 + $0x90] sm:$0xff]  ;;  %v16040_v29 = vpack.c.bf16 %v160_v23, %v158_v22 }
  0xa8   :  { %v16267_v28 = vld [vmem:[#allocation8 + $0x4] ss:$16 sps:$4 sm:$0xff]   ;;  %v16042_v31 = vpack.c.bf16 %v165_v25, %v163_v24  ;;  %v16272_v33 = vld [vmem:[#allocation8] ss:$16 sps:$4 sm:$0xff]   ;;  %v16044_v37 = vpack.c.bf16 %v164_v27, %v162_v26  ;;  %v16271_v60 = vld [vmem:[#allocation8 + $0xc] ss:$16 sps:$4 sm:$0xff]   ;;  %p16621_p6 = pnand %p16620_p5, %p16614_p2 }
  0xa9   :  { %16033 = vmatpush1.bf16.msra.mxu0 %v16032_v14  ;;  %v167_v30 = vld [vmem:[#allocation5 + $0xa8] sm:$0xff]  ;;  %v169_v32 = vld [vmem:[#allocation5 + $0xb8] sm:$0xff]  ;;  %671 = vmatprep.subr.bf16.mxu1 %v16267_v28  ;;  %v166_v35 = vld [vmem:[#allocation5 + $0xa0] sm:$0xff] }
  0xaa   :  { %16035 = vmatprep.subr.bf16.mxu0 %v16034_v15  ;;  %v16273_v34 = vld [vmem:[#allocation8 + $0x24] ss:$16 sps:$4 sm:$0xff]   ;;  %672 = vmatpush1.bf16.msra.mxu1 %v16272_v33  ;;  %v16278_v38 = vld [vmem:[#allocation8 + $0x20] ss:$16 sps:$4 sm:$0xff]   ;;  %v16046_v39 = vpack.c.bf16 %v169_v32, %v167_v30  ;;  %v16269_v62 = vld [vmem:[#allocation8 + $0x8] ss:$16 sps:$4 sm:$0xff]  }
  0xab   :  { %v168_v36 = vld [vmem:[#allocation5 + $0xb0] sm:$0xff]  ;;  %673 = vmatprep.subr.bf16.mxu1 %v16273_v34  ;;  %v171_v41 = vld [vmem:[#allocation5 + $0xc8] sm:$0xff]  ;;  %v173_v42 = vld [vmem:[#allocation5 + $0xd8] sm:$0xff] }
  0xac   :  { %v16279_v40 = vld [vmem:[#allocation8 + $0x44] ss:$16 sps:$4 sm:$0xff]   ;;  %v16284_v44 = vld [vmem:[#allocation8 + $0x40] ss:$16 sps:$4 sm:$0xff]   ;;  %v16048_v45 = vpack.c.bf16 %v168_v36, %v166_v35  ;;  %v16050_v47 = vpack.c.bf16 %v173_v42, %v171_v41  ;;  %v16277_v1 = vld [vmem:[#allocation8 + $0x2c] ss:$16 sps:$4 sm:$0xff]  }
  0xad   :  { %16037 = vmatpush1.bf16.msra.mxu0 %v16036_v20  ;;  %v170_v43 = vld [vmem:[#allocation5 + $0xc0] sm:$0xff]  ;;  %v172_v48 = vld [vmem:[#allocation5 + $0xd0] sm:$0xff]  ;;  %v175_v49 = vld [vmem:[#allocation5 + $0xe8] sm:$0xff] }
  0xae   :  { %16039 = vmatprep.subr.bf16.mxu0 %v16038_v21  ;;  %674 = vmatpush1.bf16.msra.mxu1 %v16278_v38  ;;  %v16285_v46 = vld [vmem:[#allocation8 + $0x64] ss:$16 sps:$4 sm:$0xff]   ;;  %v16290_v52 = vld [vmem:[#allocation8 + $0x60] ss:$16 sps:$4 sm:$0xff]   ;;  %v16052_v53 = vpack.c.bf16 %v172_v48, %v170_v43  ;;  %v16275_v2 = vld [vmem:[#allocation8 + $0x28] ss:$16 sps:$4 sm:$0xff]  }
  0xaf   :  { %675 = vmatprep.subr.bf16.mxu1 %v16279_v40  ;;  %v177_v50 = vld [vmem:[#allocation5 + $0xf8] sm:$0xff]  ;;  %v174_v51 = vld [vmem:[#allocation5 + $0xe0] sm:$0xff]  ;;  %v176_v56 = vld [vmem:[#allocation5 + $0xf0] sm:$0xff] }
  0xb0   :  { %v16291_v54 = vld [vmem:[#allocation8 + $0x84] ss:$16 sps:$4 sm:$0xff]   ;;  %v16054_v55 = vpack.c.bf16 %v177_v50, %v175_v49  ;;  %v16296_v57 = vld [vmem:[#allocation8 + $0x80] ss:$16 sps:$4 sm:$0xff]   ;;  %v16056_v58 = vpack.c.bf16 %v176_v56, %v174_v51  ;;  %v16283_v5 = vld [vmem:[#allocation8 + $0x4c] ss:$16 sps:$4 sm:$0xff]  }
  0xb1   :  { %16041 = vmatpush1.bf16.msra.mxu0 %v16040_v29  ;;  %v16297_v59 = vld [vmem:[#allocation8 + $0xa4] ss:$16 sps:$4 sm:$0xff]   ;;  %v16302_v63 = vld [vmem:[#allocation8 + $0xa0] ss:$16 sps:$4 sm:$0xff]   ;;  %v16281_v6 = vld [vmem:[#allocation8 + $0x48] ss:$16 sps:$4 sm:$0xff]  }
  0xb2   :  { %16043 = vmatprep.subr.bf16.mxu0 %v16042_v31  ;;  %676 = vmatpush1.bf16.msra.mxu1 %v16284_v44  ;;  %v145_v61 = vld [vmem:[#allocation2] sm:$0xff]  ;;  %v16308_v3 = vld [vmem:[#allocation8 + $0xc0] ss:$16 sps:$4 sm:$0xff]   ;;  %v761_v50 = vld [vmem:[#allocation11] sm:$0xff] }
  0xb3   :  { %677 = vmatprep.subr.bf16.mxu1 %v16285_v46  ;;  %v16303_v0 = vld [vmem:[#allocation8 + $0xc4] ss:$16 sps:$4 sm:$0xff]   ;;  %v16314_v7 = vld [vmem:[#allocation8 + $0xe0] ss:$16 sps:$4 sm:$0xff]   ;;  %v16289_v9 = vld [vmem:[#allocation8 + $0x6c] ss:$16 sps:$4 sm:$0xff]  }
  0xb4   :  { %v16309_v4 = vld [vmem:[#allocation8 + $0xe4] ss:$16 sps:$4 sm:$0xff]   ;;  %v16287_v10 = vld [vmem:[#allocation8 + $0x68] ss:$16 sps:$4 sm:$0xff]   ;;  %v16320_v11 = vld [vmem:[#allocation8 + $0x100] ss:$16 sps:$4 sm:$0xff]  }
  0xb5   :  { %16045 = vmatpush1.bf16.msra.mxu0 %v16044_v37  ;;  %v16315_v8 = vld [vmem:[#allocation8 + $0x104] ss:$16 sps:$4 sm:$0xff]   ;;  %v16295_v13 = vld [vmem:[#allocation8 + $0x8c] ss:$16 sps:$4 sm:$0xff]   ;;  %v16293_v14 = vld [vmem:[#allocation8 + $0x88] ss:$16 sps:$4 sm:$0xff]  }
  0xb6   :  { %16047 = vmatprep.subr.bf16.mxu0 %v16046_v39  ;;  %678 = vmatpush1.bf16.msra.mxu1 %v16290_v52  ;;  %v16321_v12 = vld [vmem:[#allocation8 + $0x124] ss:$16 sps:$4 sm:$0xff]   ;;  %v16326_v15 = vld [vmem:[#allocation8 + $0x120] ss:$16 sps:$4 sm:$0xff]   ;;  %v16301_v16 = vld [vmem:[#allocation8 + $0xac] ss:$16 sps:$4 sm:$0xff]  }
  0xb7   :  { %679 = vmatprep.subr.bf16.mxu1 %v16291_v54  ;;  %v16327_v17 = vld [vmem:[#allocation8 + $0x144] ss:$16 sps:$4 sm:$0xff]   ;;  %v16332_v18 = vld [vmem:[#allocation8 + $0x140] ss:$16 sps:$4 sm:$0xff]   ;;  %v16299_v19 = vld [vmem:[#allocation8 + $0xa8] ss:$16 sps:$4 sm:$0xff]  }
  0xb8   :  { %v16333_v20 = vld [vmem:[#allocation8 + $0x164] ss:$16 sps:$4 sm:$0xff]   ;;  %v16307_v21 = vld [vmem:[#allocation8 + $0xcc] ss:$16 sps:$4 sm:$0xff]   ;;  %v16338_v22 = vld [vmem:[#allocation8 + $0x160] ss:$16 sps:$4 sm:$0xff]  }
  0xb9   :  { %16049 = vmatpush1.bf16.msra.mxu0 %v16048_v45  ;;  %v16305_v23 = vld [vmem:[#allocation8 + $0xc8] ss:$16 sps:$4 sm:$0xff]   ;;  %v16339_v24 = vld [vmem:[#allocation8 + $0x184] ss:$16 sps:$4 sm:$0xff]   ;;  %v16313_v25 = vld [vmem:[#allocation8 + $0xec] ss:$16 sps:$4 sm:$0xff]  }
  0xba   :  { %16051 = vmatprep.subr.bf16.mxu0 %v16050_v47  ;;  %680 = vmatpush1.bf16.msra.mxu1 %v16296_v57  ;;  %v16344_v26 = vld [vmem:[#allocation8 + $0x180] ss:$16 sps:$4 sm:$0xff]   ;;  %v16311_v27 = vld [vmem:[#allocation8 + $0xe8] ss:$16 sps:$4 sm:$0xff]   ;;  %v16345_v28 = vld [vmem:[#allocation8 + $0x1a4] ss:$16 sps:$4 sm:$0xff]  }
  0xbb   :  { %681 = vmatprep.subr.bf16.mxu1 %v16297_v59  ;;  %v16319_v29 = vld [vmem:[#allocation8 + $0x10c] ss:$16 sps:$4 sm:$0xff]   ;;  %v16350_v30 = vld [vmem:[#allocation8 + $0x1a0] ss:$16 sps:$4 sm:$0xff]   ;;  %v16317_v31 = vld [vmem:[#allocation8 + $0x108] ss:$16 sps:$4 sm:$0xff]  }
  0xbc   :  { %v16325_v32 = vld [vmem:[#allocation8 + $0x12c] ss:$16 sps:$4 sm:$0xff]   ;;  %v16323_v33 = vld [vmem:[#allocation8 + $0x128] ss:$16 sps:$4 sm:$0xff]   ;;  %v16351_v42 = vld [vmem:[#allocation8 + $0x1c4] ss:$16 sps:$4 sm:$0xff]  }
  0xbd   :  { %16053 = vmatpush1.bf16.msra.mxu0 %v16052_v53  ;;  %v16331_v34 = vld [vmem:[#allocation8 + $0x14c] ss:$16 sps:$4 sm:$0xff]   ;;  %v16329_v35 = vld [vmem:[#allocation8 + $0x148] ss:$16 sps:$4 sm:$0xff]   ;;  %v16356_v45 = vld [vmem:[#allocation8 + $0x1c0] ss:$16 sps:$4 sm:$0xff]  }
  0xbe   :  { %16055 = vmatprep.subr.bf16.mxu0 %v16054_v55  ;;  %682 = vmatpush1.bf16.msra.mxu1 %v16302_v63  ;;  %v16337_v36 = vld [vmem:[#allocation8 + $0x16c] ss:$16 sps:$4 sm:$0xff]   ;;  %v16335_v37 = vld [vmem:[#allocation8 + $0x168] ss:$16 sps:$4 sm:$0xff]   ;;  %v16357_v46 = vld [vmem:[#allocation8 + $0x1e4] ss:$16 sps:$4 sm:$0xff]  }
  0xbf   :  { %683 = vmatprep.subr.bf16.mxu1 %v16303_v0  ;;  %v16343_v38 = vld [vmem:[#allocation8 + $0x18c] ss:$16 sps:$4 sm:$0xff]   ;;  %v16341_v39 = vld [vmem:[#allocation8 + $0x188] ss:$16 sps:$4 sm:$0xff]   ;;  %v16362_v49 = vld [vmem:[#allocation8 + $0x1e0] ss:$16 sps:$4 sm:$0xff]  }
  0xc0   :  { %v16349_v40 = vld [vmem:[#allocation8 + $0x1ac] ss:$16 sps:$4 sm:$0xff]   ;;  %v16347_v41 = vld [vmem:[#allocation8 + $0x1a8] ss:$16 sps:$4 sm:$0xff]  }
  0xc1   :  { %16057 = vmatpush1.bf16.msra.mxu0 %v16056_v58  ;;  %v16355_v43 = vld [vmem:[#allocation8 + $0x1cc] ss:$16 sps:$4 sm:$0xff]   ;;  %v16353_v44 = vld [vmem:[#allocation8 + $0x1c8] ss:$16 sps:$4 sm:$0xff]   ;;  %v180_v58 = vlaneseq }
  0xc2   :  { %712 = vmatprep.subr.bf16.mxu0 %v16271_v60  ;;  %684 = vmatpush1.bf16.msra.mxu1 %v16308_v3  ;;  %v16361_v47 = vld [vmem:[#allocation8 + $0x1ec] ss:$16 sps:$4 sm:$0xff]   ;;  %v16359_v48 = vld [vmem:[#allocation8 + $0x1e8] ss:$16 sps:$4 sm:$0xff]  }
  0xc3   :  { %685 = vmatprep.subr.bf16.mxu1 %v16309_v4  ;;  %v765_v51 = vld [vmem:[#allocation11 + $0x20] sm:$0xff]  ;;  %v762_v52 = vld [vmem:[#allocation11 + $0x8] sm:$0xff]  ;;  %v16822_v59 = vshrl.u32 %v180_v58, 7 }
  0xc4   :  { %255 = vmatmul.mubr.f32.vlgmr.msra.gmra.mrb[0].mxu0 %v145_v61  ;;  %v14210_v53 = vcombine.low %v761_v50, %v765_v51  ;;  %v14211_v54 = vcombine.high %v761_v50, %v765_v51  ;;  %v766_v55 = vld [vmem:[#allocation11 + $0x28] sm:$0xff]  ;;  %v178_v61 = vld [vmem:[#allocation7] sm:$0x3] }
  0xc5   :  { %713 = vmatpush1.bf16.msra.mxu0 %v16269_v62  ;;  %v14212_v56 = vcombine.low %v762_v52, %v766_v55  ;;  %v14213_v57 = vcombine.high %v762_v52, %v766_v55  ;;  %v16825_v60 = vsub.s32 0, %v16822_v59  ;;  %v16828_v62 = vsub.s32 1, %v16822_v59  ;;  %v814_v50 = vld [vmem:[#allocation11 + $0x1a8] sm:$0xff]  ;;  %v817_v55 = vld [vmem:[#allocation11 + $0x1c0] sm:$0xff] }
  0xc6   :  { %714 = vmatprep.subr.bf16.mxu0 %v16277_v1  ;;  %686 = vmatpush1.bf16.msra.mxu1 %v16314_v7  ;;  %v822_v58 = vld [vmem:[#allocation11 + $0x1e8] sm:$0xff] }
  0xc7   :  { %687 = vmatprep.subr.bf16.mxu1 %v16315_v8  ;;  %v183_v63 = vrot.slane %v178_v61, %v16825_v60  ;;  %v187_v0 = vrot.slane %v178_v61, %v16828_v62  ;;  %v773_v8 = vld [vmem:[#allocation11 + $0x60] sm:$0xff] }
  0xc9   :  { %715 = vmatpush1.bf16.msra.mxu0 %v16275_v2 }
  0xca   :  { %716 = vmatprep.subr.bf16.mxu0 %v16283_v5  ;;  %688 = vmatpush1.bf16.msra.mxu1 %v16320_v11 }
  0xcb   :  { %689 = vmatprep.subr.bf16.mxu1 %v16321_v12 }
  0xcd   :  { %717 = vmatpush1.bf16.msra.mxu0 %v16281_v6  ;;  %v769_v6 = vld [vmem:[#allocation11 + $0x40] sm:$0xff] }
  0xce   :  { %718 = vmatprep.subr.bf16.mxu0 %v16289_v9  ;;  %690 = vmatpush1.bf16.msra.mxu1 %v16326_v15  ;;  %v770_v9 = vld [vmem:[#allocation11 + $0x48] sm:$0xff]  ;;  %v777_v15 = vld [vmem:[#allocation11 + $0x80] sm:$0xff] }
  0xcf   :  { %691 = vmatprep.subr.bf16.mxu1 %v16327_v17  ;;  %v778_v17 = vld [vmem:[#allocation11 + $0x88] sm:$0xff] }
  0xd1   :  { %719 = vmatpush1.bf16.msra.mxu0 %v16287_v10  ;;  %v774_v10 = vld [vmem:[#allocation11 + $0x68] sm:$0xff] }
  0xd2   :  { %720 = vmatprep.subr.bf16.mxu0 %v16295_v13  ;;  %692 = vmatpush1.bf16.msra.mxu1 %v16332_v18  ;;  %v14219_v13 = vcombine.high %v769_v6, %v773_v8  ;;  %v782_v18 = vld [vmem:[#allocation11 + $0xa8] sm:$0xff] }
  0xd3   :  { %693 = vmatprep.subr.bf16.mxu1 %v16333_v20  ;;  %v14220_v20 = vcombine.low %v770_v9, %v774_v10 }
  0xd5   :  { %721 = vmatpush1.bf16.msra.mxu0 %v16293_v14  ;;  %v14221_v14 = vcombine.high %v770_v9, %v774_v10  ;;  %v833_v10 = vld [vmem:[#allocation11 + $0x240] sm:$0xff] }
  0xd6   :  { %722 = vmatprep.subr.bf16.mxu0 %v16301_v16  ;;  %694 = vmatpush1.bf16.msra.mxu1 %v16338_v22  ;;  %v781_v16 = vld [vmem:[#allocation11 + $0xa0] sm:$0xff]  ;;  %v14229_v22 = vcombine.high %v778_v17, %v782_v18 }
  0xd7   :  { %695 = vmatprep.subr.bf16.mxu1 %v16339_v24  ;;  %v789_v24 = vld [vmem:[#allocation11 + $0xe0] sm:$0xff] }
  0xd9   :  { %723 = vmatpush1.bf16.msra.mxu0 %v16299_v19  ;;  %v14218_v19 = vcombine.low %v769_v6, %v773_v8 }
  0xda   :  { %724 = vmatprep.subr.bf16.mxu0 %v16307_v21  ;;  %696 = vmatpush1.bf16.msra.mxu1 %v16344_v26  ;;  %v14227_v21 = vcombine.high %v777_v15, %v781_v16  ;;  %v790_v26 = vld [vmem:[#allocation11 + $0xe8] sm:$0xff] }
  0xdb   :  { %697 = vmatprep.subr.bf16.mxu1 %v16345_v28  ;;  %v14228_v28 = vcombine.low %v778_v17, %v782_v18  ;;  %v841_v18 = vld [vmem:[#allocation11 + $0x280] sm:$0xff] }
  0xdd   :  { %725 = vmatpush1.bf16.msra.mxu0 %v16305_v23  ;;  %v785_v23 = vld [vmem:[#allocation11 + $0xc0] sm:$0xff] }
  0xde   :  { %726 = vmatprep.subr.bf16.mxu0 %v16313_v25  ;;  %698 = vmatpush1.bf16.msra.mxu1 %v16350_v30  ;;  %v786_v25 = vld [vmem:[#allocation11 + $0xc8] sm:$0xff] }
  0xdf   :  { %699 = vmatprep.subr.bf16.mxu1 %v16351_v42  ;;  %v14237_v30 = vcombine.high %v786_v25, %v790_v26  ;;  %v806_v42 = vld [vmem:[#allocation11 + $0x168] sm:$0xff] }
  0xe1   :  { %727 = vmatpush1.bf16.msra.mxu0 %v16311_v27  ;;  %v14226_v27 = vcombine.low %v777_v15, %v781_v16 }
  0xe2   :  { %728 = vmatprep.subr.bf16.mxu0 %v16319_v29  ;;  %700 = vmatpush1.bf16.msra.mxu1 %v16356_v45  ;;  %v14235_v29 = vcombine.high %v785_v23, %v789_v24 }
  0xe3   :  { %701 = vmatprep.subr.bf16.mxu1 %v16357_v46 }
  0xe5   :  { %729 = vmatpush1.bf16.msra.mxu0 %v16317_v31  ;;  %v793_v31 = vld [vmem:[#allocation11 + $0x100] sm:$0xff] }
  0xe6   :  { %730 = vmatprep.subr.bf16.mxu0 %v16325_v32  ;;  %702 = vmatpush1.bf16.msra.mxu1 %v16362_v49  ;;  %v797_v32 = vld [vmem:[#allocation11 + $0x120] sm:$0xff]  ;;  %v810_v49 = vld [vmem:[#allocation11 + $0x188] sm:$0xff] }
  0xe7   :  { %2339 = vmatprep.subr.bf16.mxu1 %v14211_v54  ;;  %v14261_v54 = vcombine.high %v810_v49, %v814_v50 }
  0xe9   :  { %731 = vmatpush1.bf16.msra.mxu0 %v16323_v33  ;;  %v794_v33 = vld [vmem:[#allocation11 + $0x108] sm:$0xff] }
  0xea   :  { %732 = vmatprep.subr.bf16.mxu0 %v16331_v34  ;;  %v798_v34 = vld [vmem:[#allocation11 + $0x128] sm:$0xff] }
  0xed   :  { %733 = vmatpush1.bf16.msra.mxu0 %v16329_v35  ;;  %v14234_v35 = vcombine.low %v785_v23, %v789_v24 }
  0xee   :  { %734 = vmatprep.subr.bf16.mxu0 %v16337_v36  ;;  %v14236_v36 = vcombine.low %v786_v25, %v790_v26  ;;  %v849_v26 = vld [vmem:[#allocation11 + $0x2c0] sm:$0xff] }
  0xf1   :  { %735 = vmatpush1.bf16.msra.mxu0 %v16335_v37  ;;  %v14243_v37 = vcombine.high %v793_v31, %v797_v32 }
  0xf2   :  { %736 = vmatprep.subr.bf16.mxu0 %v16343_v38  ;;  %v14245_v38 = vcombine.high %v794_v33, %v798_v34 }
  0xf5   :  { %737 = vmatpush1.bf16.msra.mxu0 %v16341_v39  ;;  %v801_v39 = vld [vmem:[#allocation11 + $0x140] sm:$0xff] }
  0xf6   :  { %738 = vmatprep.subr.bf16.mxu0 %v16349_v40  ;;  %v805_v40 = vld [vmem:[#allocation11 + $0x160] sm:$0xff] }
  0xf7   :  { %v14251_v45 = vcombine.high %v801_v39, %v805_v40  ;;  %v14250_v51 = vcombine.low %v801_v39, %v805_v40 }
  0xf9   :  { %739 = vmatpush1.bf16.msra.mxu0 %v16347_v41  ;;  %v802_v41 = vld [vmem:[#allocation11 + $0x148] sm:$0xff] }
  0xfa   :  { %740 = vmatprep.subr.bf16.mxu0 %v16355_v43  ;;  %v14242_v43 = vcombine.low %v793_v31, %v797_v32  ;;  %v14253_v46 = vcombine.high %v802_v41, %v806_v42  ;;  %v14252_v52 = vcombine.low %v802_v41, %v806_v42  ;;  %v865_v42 = vld [vmem:[#allocation11 + $0x340] sm:$0xff] }
  0xfd   :  { %741 = vmatpush1.bf16.msra.mxu0 %v16353_v44  ;;  %v14244_v44 = vcombine.low %v794_v33, %v798_v34  ;;  %v857_v34 = vld [vmem:[#allocation11 + $0x300] sm:$0xff] }
  0xfe   :  { %742 = vmatprep.subr.bf16.mxu0 %v16361_v47  ;;  %v809_v47 = vld [vmem:[#allocation11 + $0x180] sm:$0xff] }
 0x101   :  { %743 = vmatpush1.bf16.msra.mxu0 %v16359_v48  ;;  %v813_v48 = vld [vmem:[#allocation11 + $0x1a0] sm:$0xff] }
 0x102   :  { %2421 = vmatprep.subr.bf16.mxu0 %v14213_v57  ;;  %v818_v57 = vld [vmem:[#allocation11 + $0x1c8] sm:$0xff]  ;;  %v14258_v61 = vcombine.low %v809_v47, %v813_v48 }
 0x197   :  { %v256_v1 = vpop.f32.mrb[0].mxu0 }
 0x198   :  { %v257_v2 = vadd.f32 %v256_v1, %v183_v63  ;;  %v258_v3 = vpop.f32.mrb[1].mxu0  ;;  %v14260_v63 = vcombine.low %v810_v49, %v814_v50  ;;  %v14269_v1 = vcombine.high %v818_v57, %v822_v58 }
 0x199   :  { %v259_v4 = vadd.f32 %v258_v3, %v187_v0  ;;  %v829_v3 = vld [vmem:[#allocation11 + $0x220] sm:$0xff] }
 0x19a   :  { %v261_v5 = vmax.f32 %v257_v2, 0.0  ;;  %v825_v2 = vld [vmem:[#allocation11 + $0x200] sm:$0xff] }
 0x19b   :  { %v262_v7 = vmax.f32 %v259_v4, 0.0  ;;  %v826_v4 = vld [vmem:[#allocation11 + $0x208] sm:$0xff]  ;;  %v14275_v8 = vcombine.high %v825_v2, %v829_v3 }
 0x19c   :  { %v263_v12 = vpack.c.bf16 %v261_v5, %v261_v5  ;;  %v830_v5 = vld [vmem:[#allocation11 + $0x228] sm:$0xff] }
 0x19d   :  { %v264_v11 = vpack.c.bf16 %v262_v7, %v262_v7  ;;  %v14268_v7 = vcombine.low %v818_v57, %v822_v58  ;;  %v14277_v9 = vcombine.high %v826_v4, %v830_v5  ;;  %v14276_v15 = vcombine.low %v826_v4, %v830_v5 }
 0x19f   :  { %703 = vmatprep.mubr.bf16.mxu1 %v264_v11  ;;  %744 = vmatprep.mubr.bf16.mxu0 %v264_v11  ;;  %v837_v11 = vld [vmem:[#allocation11 + $0x260] sm:$0xff] }
 0x1a0   :  { %704 = vmatmul.mubr.bf16.vlgmr.msra.gmra.mrb[0].mxu1 %v263_v12  ;;  %745 = vmatmul.mubr.bf16.vlgmr.msra.gmra.mrb[4].mxu0 %v263_v12  ;;  %v834_v12 = vld [vmem:[#allocation11 + $0x248] sm:$0xff]  ;;  %v14283_v16 = vcombine.high %v833_v10, %v837_v11 }
 0x1a1   :  { %2340 = vmatpush1.bf16.msra.mxu1 %v14210_v53  ;;  %2422 = vmatpush1.bf16.msra.mxu0 %v14212_v56  ;;  %v14259_v53 = vcombine.high %v809_v47, %v813_v48  ;;  %v821_v56 = vld [vmem:[#allocation11 + $0x1e0] sm:$0xff] }
 0x1a2   :  { %2341 = vmatprep.subr.bf16.mxu1 %v14219_v13  ;;  %2423 = vmatprep.subr.bf16.mxu0 %v14221_v14  ;;  %v14267_v0 = vcombine.high %v817_v55, %v821_v56  ;;  %v14266_v6 = vcombine.low %v817_v55, %v821_v56  ;;  %v838_v13 = vld [vmem:[#allocation11 + $0x268] sm:$0xff]  ;;  %v14274_v14 = vcombine.low %v825_v2, %v829_v3 }
 0x1a3   :  { %v14285_v17 = vcombine.high %v834_v12, %v838_v13  ;;  %v14284_v23 = vcombine.low %v834_v12, %v838_v13  ;;  %v878_v56 = vld [vmem:[#allocation11 + $0x3a8] sm:$0xff] }
 0x1a4   :  { %v886_v3 = vld [vmem:[#allocation11 + $0x3e8] sm:$0xff] }
 0x1a5   :  { %2342 = vmatpush1.bf16.msra.mxu1 %v14218_v19  ;;  %2424 = vmatpush1.bf16.msra.mxu0 %v14220_v20  ;;  %v845_v19 = vld [vmem:[#allocation11 + $0x2a0] sm:$0xff]  ;;  %v842_v20 = vld [vmem:[#allocation11 + $0x288] sm:$0xff] }
 0x1a6   :  { %2343 = vmatprep.subr.bf16.mxu1 %v14227_v21  ;;  %2425 = vmatprep.subr.bf16.mxu0 %v14229_v22  ;;  %v846_v21 = vld [vmem:[#allocation11 + $0x2a8] sm:$0xff]  ;;  %v14282_v22 = vcombine.low %v833_v10, %v837_v11  ;;  %v14291_v24 = vcombine.high %v841_v18, %v845_v19 }
 0x1a7   :  { %v14293_v25 = vcombine.high %v842_v20, %v846_v21  ;;  %v14292_v31 = vcombine.low %v842_v20, %v846_v21  ;;  %v894_v11 = vld [vmem:[#allocation11 + $0x428] sm:$0xff] }
 0x1a9   :  { %2344 = vmatpush1.bf16.msra.mxu1 %v14226_v27  ;;  %2426 = vmatpush1.bf16.msra.mxu0 %v14228_v28  ;;  %v853_v27 = vld [vmem:[#allocation11 + $0x2e0] sm:$0xff]  ;;  %v850_v28 = vld [vmem:[#allocation11 + $0x2c8] sm:$0xff] }
 0x1aa   :  { %2345 = vmatprep.subr.bf16.mxu1 %v14235_v29  ;;  %2427 = vmatprep.subr.bf16.mxu0 %v14237_v30  ;;  %v854_v29 = vld [vmem:[#allocation11 + $0x2e8] sm:$0xff]  ;;  %v14290_v30 = vcombine.low %v841_v18, %v845_v19  ;;  %v14299_v32 = vcombine.high %v849_v26, %v853_v27 }
 0x1ab   :  { %v14301_v33 = vcombine.high %v850_v28, %v854_v29  ;;  %v14300_v39 = vcombine.low %v850_v28, %v854_v29 }
 0x1ad   :  { %2346 = vmatpush1.bf16.msra.mxu1 %v14234_v35  ;;  %2428 = vmatpush1.bf16.msra.mxu0 %v14236_v36  ;;  %v861_v35 = vld [vmem:[#allocation11 + $0x320] sm:$0xff]  ;;  %v858_v36 = vld [vmem:[#allocation11 + $0x308] sm:$0xff] }
 0x1ae   :  { %2347 = vmatprep.subr.bf16.mxu1 %v14243_v37  ;;  %2429 = vmatprep.subr.bf16.mxu0 %v14245_v38  ;;  %v862_v37 = vld [vmem:[#allocation11 + $0x328] sm:$0xff]  ;;  %v14298_v38 = vcombine.low %v849_v26, %v853_v27  ;;  %v14307_v40 = vcombine.high %v857_v34, %v861_v35 }
 0x1af   :  { %v14309_v41 = vcombine.high %v858_v36, %v862_v37  ;;  %v14308_v47 = vcombine.low %v858_v36, %v862_v37  ;;  %v898_v36 = vld [vmem:[#allocation11 + $0x448] sm:$0xff] }
 0x1b0   :  { %v902_v37 = vld [vmem:[#allocation11 + $0x468] sm:$0xff] }
 0x1b1   :  { %2348 = vmatpush1.bf16.msra.mxu1 %v14242_v43  ;;  %2430 = vmatpush1.bf16.msra.mxu0 %v14244_v44  ;;  %v869_v43 = vld [vmem:[#allocation11 + $0x360] sm:$0xff]  ;;  %v866_v44 = vld [vmem:[#allocation11 + $0x348] sm:$0xff] }
 0x1b2   :  { %2349 = vmatprep.subr.bf16.mxu1 %v14251_v45  ;;  %2431 = vmatprep.subr.bf16.mxu0 %v14253_v46  ;;  %v870_v45 = vld [vmem:[#allocation11 + $0x368] sm:$0xff]  ;;  %v14306_v46 = vcombine.low %v857_v34, %v861_v35  ;;  %v14315_v48 = vcombine.high %v865_v42, %v869_v43  ;;  %v14314_v50 = vcombine.low %v865_v42, %v869_v43  ;;  %v901_v35 = vld [vmem:[#allocation11 + $0x460] sm:$0xff] }
 0x1b3   :  { %v14317_v49 = vcombine.high %v866_v44, %v870_v45  ;;  %v14349_v42 = vcombine.high %v898_v36, %v902_v37  ;;  %v909_v43 = vld [vmem:[#allocation11 + $0x4a0] sm:$0xff] }
 0x1b5   :  { %2350 = vmatpush1.bf16.msra.mxu1 %v14250_v51  ;;  %2432 = vmatpush1.bf16.msra.mxu0 %v14252_v52  ;;  %v14316_v51 = vcombine.low %v866_v44, %v870_v45  ;;  %v873_v52 = vld [vmem:[#allocation11 + $0x380] sm:$0xff]  ;;  %v906_v44 = vld [vmem:[#allocation11 + $0x488] sm:$0xff] }
 0x1b6   :  { %2351 = vmatprep.subr.bf16.mxu1 %v14259_v53  ;;  %2433 = vmatprep.subr.bf16.mxu0 %v14261_v54  ;;  %v877_v53 = vld [vmem:[#allocation11 + $0x3a0] sm:$0xff]  ;;  %v874_v54 = vld [vmem:[#allocation11 + $0x388] sm:$0xff] }
 0x1b7   :  { %v14323_v55 = vcombine.high %v873_v52, %v877_v53  ;;  %v14322_v57 = vcombine.low %v873_v52, %v877_v53  ;;  %v14324_v58 = vcombine.low %v874_v54, %v878_v56  ;;  %v910_v45 = vld [vmem:[#allocation11 + $0x4a8] sm:$0xff]  ;;  %v917_v52 = vld [vmem:[#allocation11 + $0x4e0] sm:$0xff] }
 0x1b8   :  { %v914_v53 = vld [vmem:[#allocation11 + $0x4c8] sm:$0xff] }
 0x1b9   :  { %2352 = vmatpush1.bf16.msra.mxu1 %v14258_v61  ;;  %2434 = vmatpush1.bf16.msra.mxu0 %v14260_v63  ;;  %v14325_v61 = vcombine.high %v874_v54, %v878_v56  ;;  %v881_v63 = vld [vmem:[#allocation11 + $0x3c0] sm:$0xff]  ;;  %v918_v54 = vld [vmem:[#allocation11 + $0x4e8] sm:$0xff]  ;;  %v14356_v56 = vcombine.low %v906_v44, %v910_v45 }
 0x1ba   :  { %2353 = vmatprep.subr.bf16.mxu1 %v14267_v0  ;;  %2435 = vmatprep.subr.bf16.mxu0 %v14269_v1  ;;  %v885_v0 = vld [vmem:[#allocation11 + $0x3e0] sm:$0xff]  ;;  %v882_v1 = vld [vmem:[#allocation11 + $0x3c8] sm:$0xff] }
 0x1bb   :  { %v14331_v2 = vcombine.high %v881_v63, %v885_v0  ;;  %v14330_v4 = vcombine.low %v881_v63, %v885_v0  ;;  %v14332_v5 = vcombine.low %v882_v1, %v886_v3  ;;  %v925_v63 = vld [vmem:[#allocation11 + $0x520] sm:$0xff]  ;;  %v922_v0 = vld [vmem:[#allocation11 + $0x508] sm:$0xff] }
 0x1bd   :  { %2354 = vmatpush1.bf16.msra.mxu1 %v14266_v6  ;;  %2436 = vmatpush1.bf16.msra.mxu0 %v14268_v7  ;;  %v14333_v6 = vcombine.high %v882_v1, %v886_v3  ;;  %v889_v7 = vld [vmem:[#allocation11 + $0x400] sm:$0xff]  ;;  %v926_v1 = vld [vmem:[#allocation11 + $0x528] sm:$0xff]  ;;  %v14364_v3 = vcombine.low %v914_v53, %v918_v54 }
 0x1be   :  { %2355 = vmatprep.subr.bf16.mxu1 %v14275_v8  ;;  %2437 = vmatprep.subr.bf16.mxu0 %v14277_v9  ;;  %v893_v8 = vld [vmem:[#allocation11 + $0x420] sm:$0xff]  ;;  %v890_v9 = vld [vmem:[#allocation11 + $0x408] sm:$0xff] }
 0x1bf   :  { %v14339_v10 = vcombine.high %v889_v7, %v893_v8  ;;  %v14338_v12 = vcombine.low %v889_v7, %v893_v8  ;;  %v14340_v13 = vcombine.low %v890_v9, %v894_v11  ;;  %v933_v7 = vld [vmem:[#allocation11 + $0x560] sm:$0xff]  ;;  %v930_v8 = vld [vmem:[#allocation11 + $0x548] sm:$0xff] }
 0x1c1   :  { %2356 = vmatpush1.bf16.msra.mxu1 %v14274_v14  ;;  %2438 = vmatpush1.bf16.msra.mxu0 %v14276_v15  ;;  %v14341_v14 = vcombine.high %v890_v9, %v894_v11  ;;  %v16832_v15 = vld [vmem:[#allocation10] sm:$0xf]  ;;  %v934_v9 = vld [vmem:[#allocation11 + $0x568] sm:$0xff]  ;;  %v14372_v11 = vcombine.low %v922_v0, %v926_v1 }
 0x1c2   :  { %2357 = vmatprep.subr.bf16.mxu1 %v14283_v16  ;;  %2439 = vmatprep.subr.bf16.mxu0 %v14285_v17  ;;  %v16835_v16 = vsub.s32 3, %v16822_v59  ;;  %v334_v17 = vrot.slane %v16832_v15, %v16825_v60  ;;  %v338_v18 = vrot.slane %v16832_v15, %v16828_v62 }
 0x1c4   :  { %v346_v19 = vrot.slane %v16832_v15, %v16835_v16 }
 0x1c5   :  { %2358 = vmatpush1.bf16.msra.mxu1 %v14282_v22  ;;  %2440 = vmatpush1.bf16.msra.mxu0 %v14284_v23 }
 0x1c6   :  { %2359 = vmatprep.subr.bf16.mxu1 %v14291_v24  ;;  %2441 = vmatprep.subr.bf16.mxu0 %v14293_v25 }
 0x1c9   :  { %2360 = vmatpush1.bf16.msra.mxu1 %v14290_v30  ;;  %2442 = vmatpush1.bf16.msra.mxu0 %v14292_v31 }
 0x1ca   :  { %2361 = vmatprep.subr.bf16.mxu1 %v14299_v32  ;;  %2443 = vmatprep.subr.bf16.mxu0 %v14301_v33  ;;  %v897_v33 = vld [vmem:[#allocation11 + $0x440] sm:$0xff] }
 0x1cd   :  { %2362 = vmatpush1.bf16.msra.mxu1 %v14298_v38  ;;  %2444 = vmatpush1.bf16.msra.mxu0 %v14300_v39 }
 0x1ce   :  { %2363 = vmatprep.subr.bf16.mxu1 %v14307_v40  ;;  %2445 = vmatprep.subr.bf16.mxu0 %v14309_v41  ;;  %v905_v40 = vld [vmem:[#allocation11 + $0x480] sm:$0xff]  ;;  %v14347_v41 = vcombine.high %v897_v33, %v901_v35 }
 0x1d1   :  { %2364 = vmatpush1.bf16.msra.mxu1 %v14306_v46  ;;  %2446 = vmatpush1.bf16.msra.mxu0 %v14308_v47  ;;  %v14346_v47 = vcombine.low %v897_v33, %v901_v35  ;;  %v953_v33 = vld [vmem:[#allocation11 + $0x600] sm:$0xff]  ;;  %v954_v35 = vld [vmem:[#allocation11 + $0x608] sm:$0xff] }
 0x1d2   :  { %2365 = vmatprep.subr.bf16.mxu1 %v14315_v48  ;;  %2447 = vmatprep.subr.bf16.mxu0 %v14317_v49  ;;  %v14348_v48 = vcombine.low %v898_v36, %v902_v37  ;;  %v14355_v49 = vcombine.high %v905_v40, %v909_v43  ;;  %v958_v36 = vld [vmem:[#allocation11 + $0x628] sm:$0xff] }
 0x1d5   :  { %2366 = vmatpush1.bf16.msra.mxu1 %v14314_v50  ;;  %2448 = vmatpush1.bf16.msra.mxu0 %v14316_v51  ;;  %v14357_v50 = vcombine.high %v906_v44, %v910_v45  ;;  %v913_v51 = vld [vmem:[#allocation11 + $0x4c0] sm:$0xff]  ;;  %v962_v45 = vld [vmem:[#allocation11 + $0x648] sm:$0xff] }
 0x1d6   :  { %2367 = vmatprep.subr.bf16.mxu1 %v14323_v55  ;;  %2449 = vmatprep.subr.bf16.mxu0 %v14325_v61  ;;  %v14354_v55 = vcombine.low %v905_v40, %v909_v43  ;;  %v921_v61 = vld [vmem:[#allocation11 + $0x500] sm:$0xff] }
 0x1d7   :  { %v961_v43 = vld [vmem:[#allocation11 + $0x640] sm:$0xff] }
 0x1d8   :  { %v965_v44 = vld [vmem:[#allocation11 + $0x660] sm:$0xff] }
 0x1d9   :  { %2368 = vmatpush1.bf16.msra.mxu1 %v14322_v57  ;;  %2450 = vmatpush1.bf16.msra.mxu0 %v14324_v58  ;;  %v14363_v57 = vcombine.high %v913_v51, %v917_v52  ;;  %v14365_v58 = vcombine.high %v914_v53, %v918_v54  ;;  %v973_v53 = vld [vmem:[#allocation11 + $0x6a0] sm:$0xff]  ;;  %v970_v54 = vld [vmem:[#allocation11 + $0x688] sm:$0xff] }
 0x1da   :  { %2369 = vmatprep.subr.bf16.mxu1 %v14331_v2  ;;  %2451 = vmatprep.subr.bf16.mxu0 %v14333_v6  ;;  %v14362_v2 = vcombine.low %v913_v51, %v917_v52  ;;  %v929_v6 = vld [vmem:[#allocation11 + $0x540] sm:$0xff] }
 0x1db   :  { %v969_v52 = vld [vmem:[#allocation11 + $0x680] sm:$0xff] }
 0x1dd   :  { %2370 = vmatpush1.bf16.msra.mxu1 %v14330_v4  ;;  %2452 = vmatpush1.bf16.msra.mxu0 %v14332_v5  ;;  %v14371_v4 = vcombine.high %v921_v61, %v925_v63  ;;  %v14373_v5 = vcombine.high %v922_v0, %v926_v1  ;;  %v981_v0 = vld [vmem:[#allocation11 + $0x6e0] sm:$0xff]  ;;  %v978_v1 = vld [vmem:[#allocation11 + $0x6c8] sm:$0xff] }
 0x1de   :  { %2380 = vmatprep.subr.bf16.mxu1 %v14339_v10  ;;  %2462 = vmatprep.subr.bf16.mxu0 %v14341_v14  ;;  %v14370_v10 = vcombine.low %v921_v61, %v925_v63  ;;  %v937_v14 = vld [vmem:[#allocation11 + $0x580] sm:$0xff] }
 0x1df   :  { %v977_v63 = vld [vmem:[#allocation11 + $0x6c0] sm:$0xff] }
 0x273   :  { %v705_v20 = vpop.f32.mrb[0].mxu1  ;;  %v16843_v21 = vpop.f32.mrb[4].mxu0 }
 0x274   :  { %v706_v22 = vadd.f32 %v705_v20, %v334_v17  ;;  %v707_v23 = vpop.f32.mrb[1].mxu1  ;;  %v748_v24 = vpop.f32.mrb[5].mxu0  ;;  %v941_v17 = vld [vmem:[#allocation11 + $0x5a0] sm:$0xff]  ;;  %v14378_v20 = vcombine.low %v929_v6, %v933_v7 }
 0x275   :  { %v708_v25 = vadd.f32 %v707_v23, %v338_v18  ;;  %v749_v26 = vadd.f32 %v748_v24, %v346_v19  ;;  %v709_v27 = vpop.f32.mrb[2].mxu1  ;;  %v750_v28 = vpop.f32.mrb[6].mxu0  ;;  %v938_v18 = vld [vmem:[#allocation11 + $0x588] sm:$0xff]  ;;  %v14387_v23 = vcombine.high %v937_v14, %v941_v17 }
 0x276   :  { %v753_v29 = vmax.f32 %v706_v22, 0.0  ;;  %v710_v30 = vpop.f32.mrb[3].mxu1  ;;  %v751_v31 = vpop.f32.mrb[7].mxu0  ;;  %v942_v19 = vld [vmem:[#allocation11 + $0x5a8] sm:$0xff]  ;;  %v14380_v22 = vcombine.low %v930_v8, %v934_v9 }
 0x277   :  { %v754_v32 = vmax.f32 %v708_v25, 0.0  ;;  %v756_v34 = vmax.f32 %v749_v26, 0.0  ;;  %v14389_v24 = vcombine.high %v938_v18, %v942_v19  ;;  %v945_v25 = vld [vmem:[#allocation11 + $0x5c0] sm:$0xff]  ;;  %v946_v27 = vld [vmem:[#allocation11 + $0x5c8] sm:$0xff]  ;;  %v14388_v30 = vcombine.low %v938_v18, %v942_v19 }
 0x278   :  { %v16847_v39 = vpack.c.bf16 %v753_v29, %v753_v29  ;;  %v949_v26 = vld [vmem:[#allocation11 + $0x5e0] sm:$0xff]  ;;  %v950_v28 = vld [vmem:[#allocation11 + $0x5e8] sm:$0xff]  ;;  %v14386_v29 = vcombine.low %v937_v14, %v941_v17 }
 0x279   :  { %v16845_v38 = vpack.c.bf16 %v754_v32, %v754_v32  ;;  %v16851_v46 = vpack.c.bf16 %v756_v34, %v756_v34  ;;  %v14395_v31 = vcombine.high %v945_v25, %v949_v26  ;;  %v14397_v32 = vcombine.high %v946_v27, %v950_v28  ;;  %v957_v34 = vld [vmem:[#allocation11 + $0x620] sm:$0xff]  ;;  %v994_v19 = vld [vmem:[#allocation11 + $0x748] sm:$0xff] }
 0x27a   :  { %v14394_v37 = vcombine.low %v945_v25, %v949_v26  ;;  %v14396_v40 = vcombine.low %v946_v27, %v950_v28  ;;  %v993_v17 = vld [vmem:[#allocation11 + $0x740] sm:$0xff] }
 0x27b   :  { %2371 = vmatprep.mubr.bf16.mxu1 %v16845_v38  ;;  %2453 = vmatprep.mubr.bf16.mxu0 %v16845_v38  ;;  %v997_v18 = vld [vmem:[#allocation11 + $0x760] sm:$0xff] }
 0x27c   :  { %2372 = vmatmul.mubr.bf16.vlgmr.msra.gmra.mrb[4].mxu1 %v16847_v39  ;;  %2454 = vmatmul.mubr.bf16.vlgmr.msra.gmra.mrb[8].mxu0 %v16847_v39  ;;  %v14443_v25 = vcombine.high %v993_v17, %v997_v18  ;;  %v1001_v27 = vld [vmem:[#allocation11 + $0x780] sm:$0xff] }
 0x27d   :  { %2381 = vmatpush1.bf16.msra.mxu1 %v14338_v12  ;;  %2463 = vmatpush1.bf16.msra.mxu0 %v14340_v13  ;;  %v14379_v12 = vcombine.high %v929_v6, %v933_v7  ;;  %v14381_v13 = vcombine.high %v930_v8, %v934_v9  ;;  %v985_v7 = vld [vmem:[#allocation11 + $0x700] sm:$0xff]  ;;  %v986_v9 = vld [vmem:[#allocation11 + $0x708] sm:$0xff] }
 0x27e   :  { %2412 = vmatprep.mubr.bf16.mxu1 %v16851_v46  ;;  %2494 = vmatprep.mubr.bf16.mxu0 %v16851_v46  ;;  %v989_v8 = vld [vmem:[#allocation11 + $0x720] sm:$0xff] }
 0x27f   :  { %2382 = vmatprep.subr.bf16.mxu1 %v14347_v41  ;;  %2464 = vmatprep.subr.bf16.mxu0 %v14349_v42  ;;  %v14403_v41 = vcombine.high %v953_v33, %v957_v34  ;;  %v14405_v42 = vcombine.high %v954_v35, %v958_v36  ;;  %v1005_v28 = vld [vmem:[#allocation11 + $0x7a0] sm:$0xff] }
 0x281   :  { %2383 = vmatpush1.bf16.msra.mxu1 %v14346_v47  ;;  %2465 = vmatpush1.bf16.msra.mxu0 %v14348_v48  ;;  %v966_v47 = vld [vmem:[#allocation11 + $0x668] sm:$0xff]  ;;  %v14402_v48 = vcombine.low %v953_v33, %v957_v34  ;;  %v14451_v34 = vcombine.high %v1001_v27, %v1005_v28 }
 0x282   :  { %2384 = vmatprep.subr.bf16.mxu1 %v14355_v49  ;;  %2466 = vmatprep.subr.bf16.mxu0 %v14357_v50  ;;  %v14404_v49 = vcombine.low %v954_v35, %v958_v36  ;;  %v14411_v50 = vcombine.high %v961_v43, %v965_v44  ;;  %v14413_v51 = vcombine.high %v962_v45, %v966_v47  ;;  %v1009_v36 = vld [vmem:[#allocation11 + $0x7c0] sm:$0xff] }
 0x285   :  { %2385 = vmatpush1.bf16.msra.mxu1 %v14354_v55  ;;  %2467 = vmatpush1.bf16.msra.mxu0 %v14356_v56  ;;  %v974_v55 = vld [vmem:[#allocation11 + $0x6a8] sm:$0xff]  ;;  %v14410_v56 = vcombine.low %v961_v43, %v965_v44 }
 0x286   :  { %2386 = vmatprep.subr.bf16.mxu1 %v14363_v57  ;;  %2468 = vmatprep.subr.bf16.mxu0 %v14365_v58  ;;  %v14412_v57 = vcombine.low %v962_v45, %v966_v47  ;;  %v14419_v58 = vcombine.high %v969_v52, %v973_v53  ;;  %v14421_v61 = vcombine.high %v970_v54, %v974_v55 }
 0x289   :  { %2387 = vmatpush1.bf16.msra.mxu1 %v14362_v2  ;;  %2469 = vmatpush1.bf16.msra.mxu0 %v14364_v3  ;;  %v982_v2 = vld [vmem:[#allocation11 + $0x6e8] sm:$0xff]  ;;  %v14418_v3 = vcombine.low %v969_v52, %v973_v53 }
 0x28a   :  { %2388 = vmatprep.subr.bf16.mxu1 %v14371_v4  ;;  %2470 = vmatprep.subr.bf16.mxu0 %v14373_v5  ;;  %v14420_v4 = vcombine.low %v970_v54, %v974_v55  ;;  %v14427_v5 = vcombine.high %v977_v63, %v981_v0  ;;  %v14429_v6 = vcombine.high %v978_v1, %v982_v2 }
 0x28d   :  { %2389 = vmatpush1.bf16.msra.mxu1 %v14370_v10  ;;  %2471 = vmatpush1.bf16.msra.mxu0 %v14372_v11  ;;  %v990_v10 = vld [vmem:[#allocation11 + $0x728] sm:$0xff]  ;;  %v14426_v11 = vcombine.low %v977_v63, %v981_v0 }
 0x28e   :  { %2390 = vmatprep.subr.bf16.mxu1 %v14379_v12  ;;  %2472 = vmatprep.subr.bf16.mxu0 %v14381_v13  ;;  %v14428_v12 = vcombine.low %v978_v1, %v982_v2  ;;  %v14435_v13 = vcombine.high %v985_v7, %v989_v8  ;;  %v14437_v14 = vcombine.high %v986_v9, %v990_v10 }
 0x291   :  { %2391 = vmatpush1.bf16.msra.mxu1 %v14378_v20  ;;  %2473 = vmatpush1.bf16.msra.mxu0 %v14380_v22  ;;  %v998_v20 = vld [vmem:[#allocation11 + $0x768] sm:$0xff]  ;;  %v14434_v22 = vcombine.low %v985_v7, %v989_v8 }
 0x292   :  { %2392 = vmatprep.subr.bf16.mxu1 %v14387_v23  ;;  %2474 = vmatprep.subr.bf16.mxu0 %v14389_v24  ;;  %v14436_v23 = vcombine.low %v986_v9, %v990_v10  ;;  %v16858_v24 = vsub.s32 2, %v16822_v59  ;;  %v14445_v26 = vcombine.high %v994_v19, %v998_v20 }
 0x294   :  { %v342_v33 = vrot.slane %v16832_v15, %v16858_v24  ;;  %v767_v15 = vld [vmem:[#allocation11 + $0x30] sm:$0xff] }
 0x295   :  { %2393 = vmatpush1.bf16.msra.mxu1 %v14386_v29  ;;  %2475 = vmatpush1.bf16.msra.mxu0 %v14388_v30  ;;  %v1002_v29 = vld [vmem:[#allocation11 + $0x788] sm:$0xff] }
 0x296   :  { %2394 = vmatprep.subr.bf16.mxu1 %v14395_v31  ;;  %2476 = vmatprep.subr.bf16.mxu0 %v14397_v32  ;;  %v1006_v30 = vld [vmem:[#allocation11 + $0x7a8] sm:$0xff]  ;;  %v14442_v31 = vcombine.low %v993_v17, %v997_v18  ;;  %v14444_v32 = vcombine.low %v994_v19, %v998_v20  ;;  %v747_v44 = vadd.f32 %v16843_v21, %v342_v33  ;;  %v772_v21 = vld [vmem:[#allocation11 + $0x58] sm:$0xff] }
 0x297   :  { %v14453_v35 = vcombine.high %v1002_v29, %v1006_v30  ;;  %v14452_v43 = vcombine.low %v1002_v29, %v1006_v30  ;;  %v803_v30 = vld [vmem:[#allocation11 + $0x150] sm:$0xff]  ;;  %v808_v33 = vld [vmem:[#allocation11 + $0x178] sm:$0xff] }
 0x298   :  { %v755_v53 = vmax.f32 %v747_v44, 0.0 }
 0x299   :  { %2395 = vmatpush1.bf16.msra.mxu1 %v14394_v37  ;;  %2477 = vmatpush1.bf16.msra.mxu0 %v14396_v40  ;;  %v1013_v37 = vld [vmem:[#allocation11 + $0x7e0] sm:$0xff]  ;;  %v1010_v40 = vld [vmem:[#allocation11 + $0x7c8] sm:$0xff] }
 0x29a   :  { %2396 = vmatprep.subr.bf16.mxu1 %v14403_v41  ;;  %2478 = vmatprep.subr.bf16.mxu0 %v14405_v42  ;;  %v1014_v41 = vld [vmem:[#allocation11 + $0x7e8] sm:$0xff]  ;;  %v14450_v42 = vcombine.low %v1001_v27, %v1005_v28  ;;  %v14459_v45 = vcombine.high %v1009_v36, %v1013_v37  ;;  %v16863_v63 = vpack.c.bf16 %v755_v53, %v755_v53 }
 0x29b   :  { %v14461_v47 = vcombine.high %v1010_v40, %v1014_v41  ;;  %v14460_v52 = vcombine.low %v1010_v40, %v1014_v41  ;;  %v811_v40 = vld [vmem:[#allocation11 + $0x190] sm:$0xff] }
 0x29c   :  { %v815_v41 = vld [vmem:[#allocation11 + $0x1b0] sm:$0xff] }
 0x29d   :  { %2397 = vmatpush1.bf16.msra.mxu1 %v14402_v48  ;;  %2479 = vmatpush1.bf16.msra.mxu0 %v14404_v49  ;;  %v763_v48 = vld [vmem:[#allocation11 + $0x10] sm:$0xff]  ;;  %v764_v49 = vld [vmem:[#allocation11 + $0x18] sm:$0xff] }
 0x29e   :  { %2398 = vmatprep.subr.bf16.mxu1 %v14411_v50  ;;  %2480 = vmatprep.subr.bf16.mxu0 %v14413_v51  ;;  %v768_v50 = vld [vmem:[#allocation11 + $0x38] sm:$0xff]  ;;  %v14458_v51 = vcombine.low %v1009_v36, %v1013_v37  ;;  %v14215_v54 = vcombine.high %v763_v48, %v767_v15 }
 0x29f   :  { %v14217_v55 = vcombine.high %v764_v49, %v768_v50  ;;  %v14216_v0 = vcombine.low %v764_v49, %v768_v50  ;;  %v823_v49 = vld [vmem:[#allocation11 + $0x1f0] sm:$0xff]  ;;  %v820_v50 = vld [vmem:[#allocation11 + $0x1d8] sm:$0xff] }
 0x2a1   :  { %2399 = vmatpush1.bf16.msra.mxu1 %v14410_v56  ;;  %2481 = vmatpush1.bf16.msra.mxu0 %v14412_v57  ;;  %v771_v56 = vld [vmem:[#allocation11 + $0x50] sm:$0xff] }
 0x2a2   :  { %2400 = vmatprep.subr.bf16.mxu1 %v14419_v58  ;;  %2482 = vmatprep.subr.bf16.mxu0 %v14421_v61  ;;  %v775_v57 = vld [vmem:[#allocation11 + $0x70] sm:$0xff]  ;;  %v776_v58 = vld [vmem:[#allocation11 + $0x78] sm:$0xff]  ;;  %v14214_v61 = vcombine.low %v763_v48, %v767_v15 }
 0x2a3   :  { %v14223_v1 = vcombine.high %v771_v56, %v775_v57  ;;  %v14225_v2 = vcombine.high %v772_v21, %v776_v58  ;;  %v14222_v7 = vcombine.low %v771_v56, %v775_v57  ;;  %v14224_v8 = vcombine.low %v772_v21, %v776_v58  ;;  %v819_v15 = vld [vmem:[#allocation11 + $0x1d0] sm:$0xff]  ;;  %v828_v21 = vld [vmem:[#allocation11 + $0x218] sm:$0xff] }
 0x2a4   :  { %v827_v56 = vld [vmem:[#allocation11 + $0x210] sm:$0xff]  ;;  %v832_v58 = vld [vmem:[#allocation11 + $0x238] sm:$0xff] }
 0x2a5   :  { %2401 = vmatpush1.bf16.msra.mxu1 %v14418_v3  ;;  %2483 = vmatpush1.bf16.msra.mxu0 %v14420_v4  ;;  %v779_v3 = vld [vmem:[#allocation11 + $0x90] sm:$0xff] }
 0x2a6   :  { %2402 = vmatprep.subr.bf16.mxu1 %v14427_v5  ;;  %2484 = vmatprep.subr.bf16.mxu0 %v14429_v6  ;;  %v783_v4 = vld [vmem:[#allocation11 + $0xb0] sm:$0xff]  ;;  %v780_v5 = vld [vmem:[#allocation11 + $0x98] sm:$0xff] }
 0x2a7   :  { %v784_v6 = vld [vmem:[#allocation11 + $0xb8] sm:$0xff]  ;;  %v14231_v9 = vcombine.high %v779_v3, %v783_v4  ;;  %v14230_v17 = vcombine.low %v779_v3, %v783_v4  ;;  %v831_v57 = vld [vmem:[#allocation11 + $0x230] sm:$0xff] }
 0x2a8   :  { %v14233_v10 = vcombine.high %v780_v5, %v784_v6  ;;  %v14232_v18 = vcombine.low %v780_v5, %v784_v6  ;;  %v835_v3 = vld [vmem:[#allocation11 + $0x250] sm:$0xff]  ;;  %v836_v5 = vld [vmem:[#allocation11 + $0x258] sm:$0xff] }
 0x2a9   :  { %2403 = vmatpush1.bf16.msra.mxu1 %v14426_v11  ;;  %2485 = vmatpush1.bf16.msra.mxu0 %v14428_v12  ;;  %v787_v11 = vld [vmem:[#allocation11 + $0xd0] sm:$0xff]  ;;  %v840_v6 = vld [vmem:[#allocation11 + $0x278] sm:$0xff] }
 0x2aa   :  { %2404 = vmatprep.subr.bf16.mxu1 %v14435_v13  ;;  %2486 = vmatprep.subr.bf16.mxu0 %v14437_v14  ;;  %v791_v12 = vld [vmem:[#allocation11 + $0xf0] sm:$0xff]  ;;  %v788_v13 = vld [vmem:[#allocation11 + $0xd8] sm:$0xff] }
 0x2ab   :  { %v792_v14 = vld [vmem:[#allocation11 + $0xf8] sm:$0xff]  ;;  %v14239_v19 = vcombine.high %v787_v11, %v791_v12  ;;  %v839_v4 = vld [vmem:[#allocation11 + $0x270] sm:$0xff] }
 0x2ac   :  { %v14241_v20 = vcombine.high %v788_v13, %v792_v14  ;;  %v14240_v27 = vcombine.low %v788_v13, %v792_v14  ;;  %v844_v13 = vld [vmem:[#allocation11 + $0x298] sm:$0xff] }
 0x2ad   :  { %2405 = vmatpush1.bf16.msra.mxu1 %v14434_v22  ;;  %2487 = vmatpush1.bf16.msra.mxu0 %v14436_v23  ;;  %v795_v22 = vld [vmem:[#allocation11 + $0x110] sm:$0xff]  ;;  %v848_v14 = vld [vmem:[#allocation11 + $0x2b8] sm:$0xff] }
 0x2ae   :  { %2406 = vmatprep.subr.bf16.mxu1 %v14443_v25  ;;  %2488 = vmatprep.subr.bf16.mxu0 %v14445_v26  ;;  %v799_v23 = vld [vmem:[#allocation11 + $0x130] sm:$0xff]  ;;  %v800_v25 = vld [vmem:[#allocation11 + $0x138] sm:$0xff]  ;;  %v14238_v26 = vcombine.low %v787_v11, %v791_v12 }
 0x2af   :  { %v14247_v28 = vcombine.high %v795_v22, %v799_v23  ;;  %v843_v11 = vld [vmem:[#allocation11 + $0x290] sm:$0xff] }
 0x2b0   :  { %v847_v12 = vld [vmem:[#allocation11 + $0x2b0] sm:$0xff] }
 0x2b1   :  { %2407 = vmatpush1.bf16.msra.mxu1 %v14442_v31  ;;  %2489 = vmatpush1.bf16.msra.mxu0 %v14444_v32  ;;  %v807_v31 = vld [vmem:[#allocation11 + $0x170] sm:$0xff]  ;;  %v804_v32 = vld [vmem:[#allocation11 + $0x158] sm:$0xff] }
 0x2b2   :  { %2408 = vmatprep.subr.bf16.mxu1 %v14451_v34  ;;  %2490 = vmatprep.subr.bf16.mxu0 %v14453_v35  ;;  %v14246_v34 = vcombine.low %v795_v22, %v799_v23  ;;  %v14255_v36 = vcombine.high %v803_v30, %v807_v31  ;;  %v14257_v37 = vcombine.high %v804_v32, %v808_v33  ;;  %v851_v22 = vld [vmem:[#allocation11 + $0x2d0] sm:$0xff] }
 0x2b3   :  { %v14254_v44 = vcombine.low %v803_v30, %v807_v31  ;;  %v855_v23 = vld [vmem:[#allocation11 + $0x2f0] sm:$0xff] }
 0x2b4   :  { %v859_v30 = vld [vmem:[#allocation11 + $0x310] sm:$0xff] }
 0x2b5   :  { %2409 = vmatpush1.bf16.msra.mxu1 %v14450_v42  ;;  %2491 = vmatpush1.bf16.msra.mxu0 %v14452_v43  ;;  %v812_v42 = vld [vmem:[#allocation11 + $0x198] sm:$0xff]  ;;  %v863_v31 = vld [vmem:[#allocation11 + $0x330] sm:$0xff] }
 0x2b6   :  { %2410 = vmatprep.subr.bf16.mxu1 %v14459_v45  ;;  %2492 = vmatprep.subr.bf16.mxu0 %v14461_v47  ;;  %v816_v43 = vld [vmem:[#allocation11 + $0x1b8] sm:$0xff]  ;;  %v14256_v45 = vcombine.low %v804_v32, %v808_v33  ;;  %v14263_v47 = vcombine.high %v811_v40, %v815_v41 }
 0x2b7   :  { %v14265_v48 = vcombine.high %v812_v42, %v816_v43  ;;  %v14264_v53 = vcombine.low %v812_v42, %v816_v43  ;;  %v860_v32 = vld [vmem:[#allocation11 + $0x318] sm:$0xff] }
 0x2b8   :  { %v864_v33 = vld [vmem:[#allocation11 + $0x338] sm:$0xff] }
 0x2b9   :  { %2411 = vmatpush1.bf16.msra.mxu1 %v14458_v51  ;;  %2493 = vmatpush1.bf16.msra.mxu0 %v14460_v52  ;;  %v824_v51 = vld [vmem:[#allocation11 + $0x1f8] sm:$0xff]  ;;  %v14262_v52 = vcombine.low %v811_v40, %v815_v41  ;;  %v867_v40 = vld [vmem:[#allocation11 + $0x350] sm:$0xff] }
 0x2ba   :  { %2503 = vmatprep.subr.bf16.mxu1 %v14215_v54  ;;  %2585 = vmatprep.subr.bf16.mxu0 %v14217_v55  ;;  %v14271_v54 = vcombine.high %v819_v15, %v823_v49  ;;  %v14273_v55 = vcombine.high %v820_v50, %v824_v51  ;;  %v871_v41 = vld [vmem:[#allocation11 + $0x370] sm:$0xff]  ;;  %v868_v42 = vld [vmem:[#allocation11 + $0x358] sm:$0xff] }
 0x2bb   :  { %v872_v43 = vld [vmem:[#allocation11 + $0x378] sm:$0xff] }
 0x2bc   :  { %2413 = vmatmul.mubr.bf16.vlgmr.msra.gmra.mrb[4].mxu1 %v16863_v63  ;;  %2495 = vmatmul.mubr.bf16.vlgmr.msra.gmra.mrb[8].mxu0 %v16863_v63 }
 0x2bd   :  { %2504 = vmatpush1.bf16.msra.mxu1 %v14214_v61  ;;  %2535 = vmatprep.mubr.bf16.mxu1 %v16845_v38  ;;  %v14270_v61 = vcombine.low %v819_v15, %v823_v49  ;;  %v875_v15 = vld [vmem:[#allocation11 + $0x390] sm:$0xff] }
 0x2be   :  { %2586 = vmatpush1.bf16.msra.mxu0 %v14216_v0  ;;  %2617 = vmatprep.mubr.bf16.mxu0 %v16845_v38  ;;  %v796_v38 = vld [vmem:[#allocation11 + $0x118] sm:$0xff]  ;;  %v14272_v0 = vcombine.low %v820_v50, %v824_v51  ;;  %v879_v49 = vld [vmem:[#allocation11 + $0x3b0] sm:$0xff] }
 0x2bf   :  { %2505 = vmatprep.subr.bf16.mxu1 %v14223_v1  ;;  %2587 = vmatprep.subr.bf16.mxu0 %v14225_v2  ;;  %v14249_v29 = vcombine.high %v796_v38, %v800_v25  ;;  %v14248_v35 = vcombine.low %v796_v38, %v800_v25  ;;  %v14279_v1 = vcombine.high %v827_v56, %v831_v57  ;;  %v852_v38 = vld [vmem:[#allocation11 + $0x2d8] sm:$0xff] }
 0x2c0   :  { %v14281_v2 = vcombine.high %v828_v21, %v832_v58  ;;  %v856_v25 = vld [vmem:[#allocation11 + $0x2f8] sm:$0xff] }
 0x2c1   :  { %2506 = vmatpush1.bf16.msra.mxu1 %v14222_v7  ;;  %v14278_v7 = vcombine.low %v827_v56, %v831_v57  ;;  %v876_v50 = vld [vmem:[#allocation11 + $0x398] sm:$0xff]  ;;  %v883_v56 = vld [vmem:[#allocation11 + $0x3d0] sm:$0xff] }
 0x2c2   :  { %2588 = vmatpush1.bf16.msra.mxu0 %v14224_v8  ;;  %2507 = vmatprep.subr.bf16.mxu1 %v14231_v9  ;;  %v14280_v8 = vcombine.low %v828_v21, %v832_v58  ;;  %v14287_v9 = vcombine.high %v835_v3, %v839_v4  ;;  %v880_v51 = vld [vmem:[#allocation11 + $0x3b8] sm:$0xff]  ;;  %v887_v57 = vld [vmem:[#allocation11 + $0x3f0] sm:$0xff] }
 0x2c3   :  { %2589 = vmatprep.subr.bf16.mxu0 %v14233_v10  ;;  %v14289_v10 = vcombine.high %v836_v5, %v840_v6  ;;  %v884_v21 = vld [vmem:[#allocation11 + $0x3d8] sm:$0xff] }
 0x2c4   :  { %v888_v58 = vld [vmem:[#allocation11 + $0x3f8] sm:$0xff] }
 0x2c5   :  { %2508 = vmatpush1.bf16.msra.mxu1 %v14230_v17  ;;  %v14286_v17 = vcombine.low %v835_v3, %v839_v4  ;;  %v891_v3 = vld [vmem:[#allocation11 + $0x410] sm:$0xff] }
 0x2c6   :  { %2590 = vmatpush1.bf16.msra.mxu0 %v14232_v18  ;;  %2509 = vmatprep.subr.bf16.mxu1 %v14239_v19  ;;  %v14288_v18 = vcombine.low %v836_v5, %v840_v6  ;;  %v14295_v19 = vcombine.high %v843_v11, %v847_v12  ;;  %v895_v4 = vld [vmem:[#allocation11 + $0x430] sm:$0xff]  ;;  %v892_v5 = vld [vmem:[#allocation11 + $0x418] sm:$0xff] }
 0x2c7   :  { %2591 = vmatprep.subr.bf16.mxu0 %v14241_v20  ;;  %v14297_v20 = vcombine.high %v844_v13, %v848_v14  ;;  %v896_v6 = vld [vmem:[#allocation11 + $0x438] sm:$0xff] }
 0x2c9   :  { %2510 = vmatpush1.bf16.msra.mxu1 %v14238_v26  ;;  %v14294_v26 = vcombine.low %v843_v11, %v847_v12  ;;  %v899_v11 = vld [vmem:[#allocation11 + $0x450] sm:$0xff] }
 0x2ca   :  { %2592 = vmatpush1.bf16.msra.mxu0 %v14240_v27  ;;  %2511 = vmatprep.subr.bf16.mxu1 %v14247_v28  ;;  %v14296_v27 = vcombine.low %v844_v13, %v848_v14  ;;  %v14303_v28 = vcombine.high %v851_v22, %v855_v23  ;;  %v903_v12 = vld [vmem:[#allocation11 + $0x470] sm:$0xff]  ;;  %v14342_v13 = vcombine.low %v891_v3, %v895_v4  ;;  %v900_v14 = vld [vmem:[#allocation11 + $0x458] sm:$0xff] }
 0x2cb   :  { %2593 = vmatprep.subr.bf16.mxu0 %v14249_v29  ;;  %v14305_v29 = vcombine.high %v852_v38, %v856_v25 }
 0x2cd   :  { %2512 = vmatpush1.bf16.msra.mxu1 %v14246_v34  ;;  %v14302_v34 = vcombine.low %v851_v22, %v855_v23  ;;  %v911_v22 = vld [vmem:[#allocation11 + $0x4b0] sm:$0xff] }
 0x2ce   :  { %2594 = vmatpush1.bf16.msra.mxu0 %v14248_v35  ;;  %2513 = vmatprep.subr.bf16.mxu1 %v14255_v36  ;;  %v14304_v35 = vcombine.low %v852_v38, %v856_v25  ;;  %v14311_v36 = vcombine.high %v859_v30, %v863_v31  ;;  %v908_v38 = vld [vmem:[#allocation11 + $0x498] sm:$0xff] }
 0x2cf   :  { %2595 = vmatprep.subr.bf16.mxu0 %v14257_v37  ;;  %v14313_v37 = vcombine.high %v860_v32, %v864_v33  ;;  %v912_v25 = vld [vmem:[#allocation11 + $0x4b8] sm:$0xff] }
 0x2d1   :  { %2514 = vmatpush1.bf16.msra.mxu1 %v14254_v44  ;;  %v14310_v44 = vcombine.low %v859_v30, %v863_v31  ;;  %v915_v30 = vld [vmem:[#allocation11 + $0x4d0] sm:$0xff] }
 0x2d2   :  { %2596 = vmatpush1.bf16.msra.mxu0 %v14256_v45  ;;  %2515 = vmatprep.subr.bf16.mxu1 %v14263_v47  ;;  %v14312_v45 = vcombine.low %v860_v32, %v864_v33  ;;  %v14319_v47 = vcombine.high %v867_v40, %v871_v41  ;;  %v919_v31 = vld [vmem:[#allocation11 + $0x4f0] sm:$0xff]  ;;  %v916_v32 = vld [vmem:[#allocation11 + $0x4d8] sm:$0xff] }
 0x2d3   :  { %2597 = vmatprep.subr.bf16.mxu0 %v14265_v48  ;;  %v14321_v48 = vcombine.high %v868_v42, %v872_v43  ;;  %v920_v33 = vld [vmem:[#allocation11 + $0x4f8] sm:$0xff] }
 0x2d5   :  { %2516 = vmatpush1.bf16.msra.mxu1 %v14262_v52  ;;  %v14318_v52 = vcombine.low %v867_v40, %v871_v41  ;;  %v927_v40 = vld [vmem:[#allocation11 + $0x530] sm:$0xff]  ;;  %v924_v41 = vld [vmem:[#allocation11 + $0x518] sm:$0xff] }
 0x2d6   :  { %2598 = vmatpush1.bf16.msra.mxu0 %v14264_v53  ;;  %2517 = vmatprep.subr.bf16.mxu1 %v14271_v54  ;;  %v14320_v53 = vcombine.low %v868_v42, %v872_v43  ;;  %v14327_v54 = vcombine.high %v875_v15, %v879_v49  ;;  %v928_v42 = vld [vmem:[#allocation11 + $0x538] sm:$0xff]  ;;  %v14368_v43 = vcombine.low %v916_v32, %v920_v33 }
 0x2d7   :  { %2599 = vmatprep.subr.bf16.mxu0 %v14273_v55  ;;  %v14329_v55 = vcombine.high %v876_v50, %v880_v51 }
 0x2d9   :  { %2518 = vmatpush1.bf16.msra.mxu1 %v14270_v61  ;;  %v14326_v61 = vcombine.low %v875_v15, %v879_v49  ;;  %v932_v15 = vld [vmem:[#allocation11 + $0x558] sm:$0xff] }
 0x2da   :  { %2600 = vmatpush1.bf16.msra.mxu0 %v14272_v0  ;;  %2519 = vmatprep.subr.bf16.mxu1 %v14279_v1  ;;  %v14328_v0 = vcombine.low %v876_v50, %v880_v51  ;;  %v14335_v1 = vcombine.high %v883_v56, %v887_v57  ;;  %v936_v49 = vld [vmem:[#allocation11 + $0x578] sm:$0xff]  ;;  %v14376_v51 = vcombine.low %v924_v41, %v928_v42 }
 0x2db   :  { %2601 = vmatprep.subr.bf16.mxu0 %v14281_v2  ;;  %v14337_v2 = vcombine.high %v884_v21, %v888_v58 }
 0x2dd   :  { %2520 = vmatpush1.bf16.msra.mxu1 %v14278_v7  ;;  %v14334_v7 = vcombine.low %v883_v56, %v887_v57  ;;  %v940_v56 = vld [vmem:[#allocation11 + $0x598] sm:$0xff] }
 0x2de   :  { %2602 = vmatpush1.bf16.msra.mxu0 %v14280_v8  ;;  %2521 = vmatprep.subr.bf16.mxu1 %v14287_v9  ;;  %v14336_v8 = vcombine.low %v884_v21, %v888_v58  ;;  %v14343_v9 = vcombine.high %v891_v3, %v895_v4  ;;  %v944_v57 = vld [vmem:[#allocation11 + $0x5b8] sm:$0xff]  ;;  %v14384_v58 = vcombine.low %v932_v15, %v936_v49 }
 0x2df   :  { %2603 = vmatprep.subr.bf16.mxu0 %v14289_v10  ;;  %v14345_v10 = vcombine.high %v892_v5, %v896_v6  ;;  %v948_v3 = vld [vmem:[#allocation11 + $0x5d8] sm:$0xff] }
 0x2e0   :  { %v952_v4 = vld [vmem:[#allocation11 + $0x5f8] sm:$0xff] }
 0x2e1   :  { %2522 = vmatpush1.bf16.msra.mxu1 %v14286_v17  ;;  %v904_v17 = vld [vmem:[#allocation11 + $0x478] sm:$0xff] }
 0x2e2   :  { %2604 = vmatpush1.bf16.msra.mxu0 %v14288_v18  ;;  %2523 = vmatprep.subr.bf16.mxu1 %v14295_v19  ;;  %v14344_v18 = vcombine.low %v892_v5, %v896_v6  ;;  %v14351_v19 = vcombine.high %v899_v11, %v903_v12  ;;  %v14353_v23 = vcombine.high %v900_v14, %v904_v17 }
 0x2e3   :  { %2605 = vmatprep.subr.bf16.mxu0 %v14297_v20  ;;  %v907_v20 = vld [vmem:[#allocation11 + $0x490] sm:$0xff]  ;;  %v14392_v6 = vcombine.low %v940_v56, %v944_v57 }
 0x2e5   :  { %2524 = vmatpush1.bf16.msra.mxu1 %v14294_v26  ;;  %v14350_v26 = vcombine.low %v899_v11, %v903_v12  ;;  %v956_v11 = vld [vmem:[#allocation11 + $0x618] sm:$0xff] }
 0x2e6   :  { %2606 = vmatpush1.bf16.msra.mxu0 %v14296_v27  ;;  %2525 = vmatprep.subr.bf16.mxu1 %v14303_v28  ;;  %v14352_v27 = vcombine.low %v900_v14, %v904_v17  ;;  %v14359_v28 = vcombine.high %v907_v20, %v911_v22  ;;  %v960_v12 = vld [vmem:[#allocation11 + $0x638] sm:$0xff]  ;;  %v14400_v14 = vcombine.low %v948_v3, %v952_v4 }
 0x2e7   :  { %2607 = vmatprep.subr.bf16.mxu0 %v14305_v29  ;;  %v14361_v29 = vcombine.high %v908_v38, %v912_v25 }
 0x2e9   :  { %2526 = vmatpush1.bf16.msra.mxu1 %v14302_v34  ;;  %v14358_v34 = vcombine.low %v907_v20, %v911_v22  ;;  %v967_v20 = vld [vmem:[#allocation11 + $0x670] sm:$0xff]  ;;  %v964_v22 = vld [vmem:[#allocation11 + $0x658] sm:$0xff] }
 0x2ea   :  { %2608 = vmatpush1.bf16.msra.mxu0 %v14304_v35  ;;  %2527 = vmatprep.subr.bf16.mxu1 %v14311_v36  ;;  %v14367_v35 = vcombine.high %v915_v30, %v919_v31  ;;  %v14369_v36 = vcombine.high %v916_v32, %v920_v33 }
 0x2eb   :  { %2609 = vmatprep.subr.bf16.mxu0 %v14313_v37  ;;  %v923_v37 = vld [vmem:[#allocation11 + $0x510] sm:$0xff] }
 0x2ec   :  { %v14374_v50 = vcombine.low %v923_v37, %v927_v40 }
 0x2ed   :  { %2528 = vmatpush1.bf16.msra.mxu1 %v14310_v44  ;;  %v14375_v44 = vcombine.high %v923_v37, %v927_v40  ;;  %v980_v37 = vld [vmem:[#allocation11 + $0x6d8] sm:$0xff] }
 0x2ee   :  { %2610 = vmatpush1.bf16.msra.mxu0 %v14312_v45  ;;  %2529 = vmatprep.subr.bf16.mxu1 %v14319_v47  ;;  %v14377_v45 = vcombine.high %v924_v41, %v928_v42  ;;  %v931_v47 = vld [vmem:[#allocation11 + $0x550] sm:$0xff]  ;;  %v984_v40 = vld [vmem:[#allocation11 + $0x6f8] sm:$0xff] }
 0x2ef   :  { %2611 = vmatprep.subr.bf16.mxu0 %v14321_v48  ;;  %v935_v48 = vld [vmem:[#allocation11 + $0x570] sm:$0xff] }
 0x2f0   :  { %v14382_v21 = vcombine.low %v931_v47, %v935_v48 }
 0x2f1   :  { %2530 = vmatpush1.bf16.msra.mxu1 %v14318_v52  ;;  %v14383_v52 = vcombine.high %v931_v47, %v935_v48  ;;  %v988_v47 = vld [vmem:[#allocation11 + $0x718] sm:$0xff] }
 0x2f2   :  { %2612 = vmatpush1.bf16.msra.mxu0 %v14320_v53  ;;  %2531 = vmatprep.subr.bf16.mxu1 %v14327_v54  ;;  %v14385_v53 = vcombine.high %v932_v15, %v936_v49  ;;  %v939_v54 = vld [vmem:[#allocation11 + $0x590] sm:$0xff]  ;;  %v992_v48 = vld [vmem:[#allocation11 + $0x738] sm:$0xff]  ;;  %v14432_v49 = vcombine.low %v980_v37, %v984_v40 }
 0x2f3   :  { %2613 = vmatprep.subr.bf16.mxu0 %v14329_v55  ;;  %v943_v55 = vld [vmem:[#allocation11 + $0x5b0] sm:$0xff] }
 0x2f4   :  { %v14390_v5 = vcombine.low %v939_v54, %v943_v55 }
 0x2f5   :  { %2532 = vmatpush1.bf16.msra.mxu1 %v14326_v61  ;;  %v14391_v61 = vcombine.high %v939_v54, %v943_v55  ;;  %v996_v54 = vld [vmem:[#allocation11 + $0x758] sm:$0xff] }
 0x2f6   :  { %2614 = vmatpush1.bf16.msra.mxu0 %v14328_v0  ;;  %2533 = vmatprep.subr.bf16.mxu1 %v14335_v1  ;;  %v14393_v0 = vcombine.high %v940_v56, %v944_v57  ;;  %v947_v1 = vld [vmem:[#allocation11 + $0x5d0] sm:$0xff]  ;;  %v1000_v55 = vld [vmem:[#allocation11 + $0x778] sm:$0xff]  ;;  %v14440_v57 = vcombine.low %v988_v47, %v992_v48 }
 0x2f7   :  { %2615 = vmatprep.subr.bf16.mxu0 %v14337_v2  ;;  %v951_v2 = vld [vmem:[#allocation11 + $0x5f0] sm:$0xff] }
 0x2f9   :  { %2534 = vmatpush1.bf16.msra.mxu1 %v14334_v7  ;;  %v14399_v7 = vcombine.high %v947_v1, %v951_v2 }
 0x2fa   :  { %2616 = vmatpush1.bf16.msra.mxu0 %v14336_v8  ;;  %2544 = vmatprep.subr.bf16.mxu1 %v14343_v9  ;;  %v14401_v8 = vcombine.high %v948_v3, %v952_v4  ;;  %v955_v9 = vld [vmem:[#allocation11 + $0x610] sm:$0xff]  ;;  %v14448_v4 = vcombine.low %v996_v54, %v1000_v55 }
 0x2fb   :  { %2626 = vmatprep.subr.bf16.mxu0 %v14345_v10  ;;  %v959_v10 = vld [vmem:[#allocation11 + $0x630] sm:$0xff] }
 0x2fc   :  { %2536 = vmatmul.mubr.bf16.vlgmr.msra.gmra.mrb[8].mxu1 %v16847_v39  ;;  %v14407_v17 = vcombine.high %v955_v9, %v959_v10 }
 0x2fd   :  { %2618 = vmatmul.mubr.bf16.vlgmr.msra.gmra.mrb[12].mxu0 %v16847_v39  ;;  %2545 = vmatpush1.bf16.msra.mxu1 %v14342_v13  ;;  %v14360_v39 = vcombine.low %v908_v38, %v912_v25  ;;  %v14398_v13 = vcombine.low %v947_v1, %v951_v2  ;;  %v14406_v38 = vcombine.low %v955_v9, %v959_v10  ;;  %v1004_v1 = vld [vmem:[#allocation11 + $0x798] sm:$0xff] }
 0x2fe   :  { %2576 = vmatprep.mubr.bf16.mxu1 %v16851_v46  ;;  %2627 = vmatpush1.bf16.msra.mxu0 %v14344_v18  ;;  %v14409_v18 = vcombine.high %v956_v11, %v960_v12  ;;  %v14408_v25 = vcombine.low %v956_v11, %v960_v12  ;;  %v1008_v2 = vld [vmem:[#allocation11 + $0x7b8] sm:$0xff] }
 0x2ff   :  { %2658 = vmatprep.mubr.bf16.mxu0 %v16851_v46  ;;  %2546 = vmatprep.subr.bf16.mxu1 %v14351_v19  ;;  %v14366_v46 = vcombine.low %v915_v30, %v919_v31  ;;  %v963_v19 = vld [vmem:[#allocation11 + $0x650] sm:$0xff]  ;;  %v972_v30 = vld [vmem:[#allocation11 + $0x698] sm:$0xff]  ;;  %v14456_v12 = vcombine.low %v1004_v1, %v1008_v2 }
 0x300   :  { %2628 = vmatprep.subr.bf16.mxu0 %v14353_v23  ;;  %v968_v23 = vld [vmem:[#allocation11 + $0x678] sm:$0xff]  ;;  %v14414_v32 = vcombine.low %v963_v19, %v967_v20 }
 0x301   :  { %2547 = vmatpush1.bf16.msra.mxu1 %v14350_v26  ;;  %v14415_v26 = vcombine.high %v963_v19, %v967_v20  ;;  %v976_v31 = vld [vmem:[#allocation11 + $0x6b8] sm:$0xff]  ;;  %v14416_v33 = vcombine.low %v964_v22, %v968_v23  ;;  %v2684_v19 = vld [vmem:[#allocation14 + $0x8] sm:$0xff] }
 0x302   :  { %2629 = vmatpush1.bf16.msra.mxu0 %v14352_v27  ;;  %2548 = vmatprep.subr.bf16.mxu1 %v14359_v28  ;;  %v14417_v27 = vcombine.high %v964_v22, %v968_v23  ;;  %v971_v28 = vld [vmem:[#allocation11 + $0x690] sm:$0xff]  ;;  %v14424_v42 = vcombine.low %v972_v30, %v976_v31  ;;  %v1012_v9 = vld [vmem:[#allocation11 + $0x7d8] sm:$0xff] }
 0x303   :  { %2630 = vmatprep.subr.bf16.mxu0 %v14361_v29  ;;  %v975_v29 = vld [vmem:[#allocation11 + $0x6b0] sm:$0xff]  ;;  %v1016_v10 = vld [vmem:[#allocation11 + $0x7f8] sm:$0xff] }
 0x304   :  { %v14422_v41 = vcombine.low %v971_v28, %v975_v29  ;;  %v2687_v20 = vld [vmem:[#allocation14 + $0x68] sm:$0xff]  ;;  %v14464_v23 = vcombine.low %v1012_v9, %v1016_v10 }
 0x305   :  { %2549 = vmatpush1.bf16.msra.mxu1 %v14358_v34  ;;  %v14423_v34 = vcombine.high %v971_v28, %v975_v29  ;;  %v2690_v28 = vld [vmem:[#allocation14 + $0xc8] sm:$0xff] }
 0x306   :  { %2631 = vmatpush1.bf16.msra.mxu0 %v14360_v39  ;;  %2550 = vmatprep.subr.bf16.mxu1 %v14367_v35  ;;  %v14425_v39 = vcombine.high %v972_v30, %v976_v31  ;;  %v979_v35 = vld [vmem:[#allocation11 + $0x6d0] sm:$0xff]  ;;  %v14468_v31 = vcombine.low %v2684_v19, %v2687_v20 }
 0x307   :  { %2632 = vmatprep.subr.bf16.mxu0 %v14369_v36  ;;  %v983_v36 = vld [vmem:[#allocation11 + $0x6f0] sm:$0xff] }
 0x308   :  { %v14430_v15 = vcombine.low %v979_v35, %v983_v36  ;;  %v2693_v29 = vld [vmem:[#allocation14 + $0x128] sm:$0xff] }
 0x309   :  { %2551 = vmatpush1.bf16.msra.mxu1 %v14366_v46  ;;  %v14431_v46 = vcombine.high %v979_v35, %v983_v36  ;;  %v2696_v35 = vld [vmem:[#allocation14 + $0x188] sm:$0xff] }
 0x30a   :  { %2633 = vmatpush1.bf16.msra.mxu0 %v14368_v43  ;;  %2552 = vmatprep.subr.bf16.mxu1 %v14375_v44  ;;  %v14433_v43 = vcombine.high %v980_v37, %v984_v40  ;;  %v987_v44 = vld [vmem:[#allocation11 + $0x710] sm:$0xff]  ;;  %v14474_v40 = vcombine.low %v2690_v28, %v2693_v29 }
 0x30b   :  { %2634 = vmatprep.subr.bf16.mxu0 %v14377_v45  ;;  %v991_v45 = vld [vmem:[#allocation11 + $0x730] sm:$0xff] }
 0x30c   :  { %v14438_v56 = vcombine.low %v987_v44, %v991_v45  ;;  %v2699_v36 = vld [vmem:[#allocation14 + $0x1e8] sm:$0xff] }
 0x30d   :  { %2553 = vmatpush1.bf16.msra.mxu1 %v14374_v50  ;;  %v14439_v50 = vcombine.high %v987_v44, %v991_v45  ;;  %v2702_v44 = vld [vmem:[#allocation14 + $0x248] sm:$0xff] }
 0x30e   :  { %2635 = vmatpush1.bf16.msra.mxu0 %v14376_v51  ;;  %2554 = vmatprep.subr.bf16.mxu1 %v14383_v52  ;;  %v14441_v51 = vcombine.high %v988_v47, %v992_v48  ;;  %v995_v52 = vld [vmem:[#allocation11 + $0x750] sm:$0xff]  ;;  %v14480_v48 = vcombine.low %v2696_v35, %v2699_v36 }
 0x30f   :  { %2636 = vmatprep.subr.bf16.mxu0 %v14385_v53  ;;  %v999_v53 = vld [vmem:[#allocation11 + $0x770] sm:$0xff] }
 0x310   :  { %v14446_v3 = vcombine.low %v995_v52, %v999_v53  ;;  %v2705_v45 = vld [vmem:[#allocation14 + $0x2a8] sm:$0xff] }
 0x311   :  { %2555 = vmatpush1.bf16.msra.mxu1 %v14382_v21  ;;  %v14447_v21 = vcombine.high %v995_v52, %v999_v53  ;;  %v2711_v52 = vld [vmem:[#allocation14 + $0x368] sm:$0xff] }
 0x312   :  { %2637 = vmatpush1.bf16.msra.mxu0 %v14384_v58  ;;  %2556 = vmatprep.subr.bf16.mxu1 %v14391_v61  ;;  %v14449_v58 = vcombine.high %v996_v54, %v1000_v55  ;;  %v1003_v61 = vld [vmem:[#allocation11 + $0x790] sm:$0xff]  ;;  %v14486_v54 = vcombine.low %v2702_v44, %v2705_v45 }
 0x313   :  { %2638 = vmatprep.subr.bf16.mxu0 %v14393_v0  ;;  %v1007_v0 = vld [vmem:[#allocation11 + $0x7b0] sm:$0xff] }
 0x314   :  { %v14454_v11 = vcombine.low %v1003_v61, %v1007_v0 }
 0x315   :  { %2557 = vmatpush1.bf16.msra.mxu1 %v14390_v5  ;;  %v14455_v5 = vcombine.high %v1003_v61, %v1007_v0  ;;  %v2717_v61 = vld [vmem:[#allocation14 + $0x428] sm:$0xff] }
 0x316   :  { %2639 = vmatpush1.bf16.msra.mxu0 %v14392_v6  ;;  %2558 = vmatprep.subr.bf16.mxu1 %v14399_v7  ;;  %v14457_v6 = vcombine.high %v1004_v1, %v1008_v2  ;;  %v1011_v7 = vld [vmem:[#allocation11 + $0x7d0] sm:$0xff] }
 0x317   :  { %2640 = vmatprep.subr.bf16.mxu0 %v14401_v8  ;;  %v1015_v8 = vld [vmem:[#allocation11 + $0x7f0] sm:$0xff] }
 0x318   :  { %v14462_v22 = vcombine.low %v1011_v7, %v1015_v8 }
 0x319   :  { %2559 = vmatpush1.bf16.msra.mxu1 %v14398_v13  ;;  %v14463_v13 = vcombine.high %v1011_v7, %v1015_v8  ;;  %v2723_v7 = vld [vmem:[#allocation14 + $0x4e8] sm:$0xff] }
 0x31a   :  { %2641 = vmatpush1.bf16.msra.mxu0 %v14400_v14  ;;  %2560 = vmatprep.subr.bf16.mxu1 %v14407_v17  ;;  %v14465_v14 = vcombine.high %v1012_v9, %v1016_v10  ;;  %v2683_v17 = vld [vmem:[#allocation14] sm:$0xff] }
 0x31b   :  { %2642 = vmatprep.subr.bf16.mxu0 %v14409_v18  ;;  %v2686_v18 = vld [vmem:[#allocation14 + $0x60] sm:$0xff] }
 0x31c   :  { %v14466_v30 = vcombine.low %v2683_v17, %v2686_v18 }
 0x31d   :  { %2561 = vmatpush1.bf16.msra.mxu1 %v14406_v38  ;;  %v14467_v38 = vcombine.high %v2683_v17, %v2686_v18  ;;  %v2729_v17 = vld [vmem:[#allocation14 + $0x5a8] sm:$0xff] }
 0x31e   :  { %2643 = vmatpush1.bf16.msra.mxu0 %v14408_v25  ;;  %2562 = vmatprep.subr.bf16.mxu1 %v14415_v26  ;;  %v14469_v25 = vcombine.high %v2684_v19, %v2687_v20  ;;  %v2689_v26 = vld [vmem:[#allocation14 + $0xc0] sm:$0xff] }
 0x31f   :  { %2644 = vmatprep.subr.bf16.mxu0 %v14417_v27  ;;  %v2692_v27 = vld [vmem:[#allocation14 + $0x120] sm:$0xff] }
 0x320   :  { %v14472_v37 = vcombine.low %v2689_v26, %v2692_v27 }
 0x321   :  { %2563 = vmatpush1.bf16.msra.mxu1 %v14414_v32  ;;  %v14473_v32 = vcombine.high %v2689_v26, %v2692_v27  ;;  %v2735_v26 = vld [vmem:[#allocation14 + $0x668] sm:$0xff] }
 0x322   :  { %2645 = vmatpush1.bf16.msra.mxu0 %v14416_v33  ;;  %2564 = vmatprep.subr.bf16.mxu1 %v14423_v34  ;;  %v14475_v33 = vcombine.high %v2690_v28, %v2693_v29  ;;  %v2695_v34 = vld [vmem:[#allocation14 + $0x180] sm:$0xff] }
 0x323   :  { %2646 = vmatprep.subr.bf16.mxu0 %v14425_v39  ;;  %v2698_v39 = vld [vmem:[#allocation14 + $0x1e0] sm:$0xff] }
 0x324   :  { %v14478_v47 = vcombine.low %v2695_v34, %v2698_v39 }
 0x325   :  { %2565 = vmatpush1.bf16.msra.mxu1 %v14422_v41  ;;  %v14479_v41 = vcombine.high %v2695_v34, %v2698_v39  ;;  %v2741_v34 = vld [vmem:[#allocation14 + $0x728] sm:$0xff] }
 0x326   :  { %2647 = vmatpush1.bf16.msra.mxu0 %v14424_v42  ;;  %2566 = vmatprep.subr.bf16.mxu1 %v14431_v46  ;;  %v14481_v42 = vcombine.high %v2696_v35, %v2699_v36  ;;  %v2701_v46 = vld [vmem:[#allocation14 + $0x240] sm:$0xff] }
 0x327   :  { %2648 = vmatprep.subr.bf16.mxu0 %v14433_v43  ;;  %v2704_v43 = vld [vmem:[#allocation14 + $0x2a0] sm:$0xff] }
 0x328   :  { %v14484_v53 = vcombine.low %v2701_v46, %v2704_v43 }
 0x329   :  { %2567 = vmatpush1.bf16.msra.mxu1 %v14430_v15  ;;  %v14485_v15 = vcombine.high %v2701_v46, %v2704_v43  ;;  %v2747_v46 = vld [vmem:[#allocation14 + $0x7e8] sm:$0xff] }
 0x32a   :  { %2649 = vmatpush1.bf16.msra.mxu0 %v14432_v49  ;;  %2568 = vmatprep.subr.bf16.mxu1 %v14439_v50  ;;  %v2707_v49 = vld [vmem:[#allocation14 + $0x300] sm:$0xff] }
 0x32b   :  { %2650 = vmatprep.subr.bf16.mxu0 %v14441_v51  ;;  %v2710_v50 = vld [vmem:[#allocation14 + $0x360] sm:$0xff]  ;;  %v2708_v51 = vld [vmem:[#allocation14 + $0x308] sm:$0xff] }
 0x32c   :  { %v14491_v55 = vcombine.high %v2707_v49, %v2710_v50  ;;  %v14490_v0 = vcombine.low %v2707_v49, %v2710_v50  ;;  %v14492_v1 = vcombine.low %v2708_v51, %v2711_v52  ;;  %v2753_v49 = vld [vmem:[#allocation14 + $0x8a8] sm:$0xff] }
 0x32d   :  { %2569 = vmatpush1.bf16.msra.mxu1 %v14438_v56  ;;  %v14493_v56 = vcombine.high %v2708_v51, %v2711_v52 }
 0x32e   :  { %2651 = vmatpush1.bf16.msra.mxu0 %v14440_v57  ;;  %2570 = vmatprep.subr.bf16.mxu1 %v14447_v21  ;;  %v2713_v57 = vld [vmem:[#allocation14 + $0x3c0] sm:$0xff] }
 0x32f   :  { %2652 = vmatprep.subr.bf16.mxu0 %v14449_v58  ;;  %v2716_v21 = vld [vmem:[#allocation14 + $0x420] sm:$0xff]  ;;  %v2714_v58 = vld [vmem:[#allocation14 + $0x3c8] sm:$0xff] }
 0x330   :  { %v14497_v2 = vcombine.high %v2713_v57, %v2716_v21  ;;  %v14496_v8 = vcombine.low %v2713_v57, %v2716_v21  ;;  %v14498_v9 = vcombine.low %v2714_v58, %v2717_v61  ;;  %v2759_v57 = vld [vmem:[#allocation14 + $0x968] sm:$0xff] }
 0x331   :  { %2571 = vmatpush1.bf16.msra.mxu1 %v14446_v3  ;;  %v14499_v3 = vcombine.high %v2714_v58, %v2717_v61 }
 0x332   :  { %2653 = vmatpush1.bf16.msra.mxu0 %v14448_v4  ;;  %2572 = vmatprep.subr.bf16.mxu1 %v14455_v5  ;;  %v2719_v4 = vld [vmem:[#allocation14 + $0x480] sm:$0xff] }
 0x333   :  { %2654 = vmatprep.subr.bf16.mxu0 %v14457_v6  ;;  %v2722_v5 = vld [vmem:[#allocation14 + $0x4e0] sm:$0xff]  ;;  %v2720_v6 = vld [vmem:[#allocation14 + $0x488] sm:$0xff] }
 0x334   :  { %v14503_v10 = vcombine.high %v2719_v4, %v2722_v5  ;;  %v14502_v18 = vcombine.low %v2719_v4, %v2722_v5  ;;  %v14504_v19 = vcombine.low %v2720_v6, %v2723_v7  ;;  %v2765_v4 = vld [vmem:[#allocation14 + $0xa28] sm:$0xff] }
 0x335   :  { %2573 = vmatpush1.bf16.msra.mxu1 %v14454_v11  ;;  %v14505_v11 = vcombine.high %v2720_v6, %v2723_v7 }
 0x336   :  { %2655 = vmatpush1.bf16.msra.mxu0 %v14456_v12  ;;  %2574 = vmatprep.subr.bf16.mxu1 %v14463_v13  ;;  %v2725_v12 = vld [vmem:[#allocation14 + $0x540] sm:$0xff] }
 0x337   :  { %2656 = vmatprep.subr.bf16.mxu0 %v14465_v14  ;;  %v2728_v13 = vld [vmem:[#allocation14 + $0x5a0] sm:$0xff]  ;;  %v2726_v14 = vld [vmem:[#allocation14 + $0x548] sm:$0xff] }
 0x338   :  { %v14509_v20 = vcombine.high %v2725_v12, %v2728_v13  ;;  %v14508_v27 = vcombine.low %v2725_v12, %v2728_v13  ;;  %v14510_v28 = vcombine.low %v2726_v14, %v2729_v17  ;;  %v2771_v12 = vld [vmem:[#allocation14 + $0xae8] sm:$0xff] }
 0x339   :  { %2575 = vmatpush1.bf16.msra.mxu1 %v14462_v22  ;;  %v14511_v22 = vcombine.high %v2726_v14, %v2729_v17 }
 0x33a   :  { %2657 = vmatpush1.bf16.msra.mxu0 %v14464_v23  ;;  %5019 = vmatprep.subr.bf16.mxu1 %v14467_v38  ;;  %v2731_v23 = vld [vmem:[#allocation14 + $0x600] sm:$0xff] }
 0x33b   :  { %5183 = vmatprep.subr.bf16.mxu0 %v14469_v25  ;;  %v2734_v38 = vld [vmem:[#allocation14 + $0x660] sm:$0xff]  ;;  %v2732_v25 = vld [vmem:[#allocation14 + $0x608] sm:$0xff] }
 0x33c   :  { %2577 = vmatmul.mubr.bf16.vlgmr.msra.gmra.mrb[8].mxu1 %v16863_v63  ;;  %v14515_v29 = vcombine.high %v2731_v23, %v2734_v38  ;;  %v14514_v39 = vcombine.low %v2731_v23, %v2734_v38  ;;  %v14516_v35 = vcombine.low %v2732_v25, %v2735_v26  ;;  %v2777_v23 = vld [vmem:[#allocation14 + $0xba8] sm:$0xff] }
 0x33d   :  { %2659 = vmatmul.mubr.bf16.vlgmr.msra.gmra.mrb[12].mxu0 %v16863_v63  ;;  %5020 = vmatpush1.bf16.msra.mxu1 %v14466_v30  ;;  %v14487_v63 = vcombine.high %v2702_v44, %v2705_v45  ;;  %v14517_v30 = vcombine.high %v2732_v25, %v2735_v26 }
 0x33e   :  { %5184 = vmatpush1.bf16.msra.mxu0 %v14468_v31  ;;  %5021 = vmatprep.subr.bf16.mxu1 %v14473_v32  ;;  %v2737_v31 = vld [vmem:[#allocation14 + $0x6c0] sm:$0xff] }
 0x33f   :  { %5185 = vmatprep.subr.bf16.mxu0 %v14475_v33  ;;  %v2740_v32 = vld [vmem:[#allocation14 + $0x720] sm:$0xff]  ;;  %v2738_v33 = vld [vmem:[#allocation14 + $0x6c8] sm:$0xff] }
 0x340   :  { %v14521_v36 = vcombine.high %v2737_v31, %v2740_v32  ;;  %v14520_v43 = vcombine.low %v2737_v31, %v2740_v32  ;;  %v14522_v44 = vcombine.low %v2738_v33, %v2741_v34  ;;  %v2783_v31 = vld [vmem:[#allocation14 + $0xc68] sm:$0xff] }
 0x341   :  { %5022 = vmatpush1.bf16.msra.mxu1 %v14472_v37  ;;  %v14523_v37 = vcombine.high %v2738_v33, %v2741_v34 }
 0x342   :  { %5186 = vmatpush1.bf16.msra.mxu0 %v14474_v40  ;;  %5023 = vmatprep.subr.bf16.mxu1 %v14479_v41  ;;  %v2743_v40 = vld [vmem:[#allocation14 + $0x780] sm:$0xff] }
 0x343   :  { %5187 = vmatprep.subr.bf16.mxu0 %v14481_v42  ;;  %v2746_v41 = vld [vmem:[#allocation14 + $0x7e0] sm:$0xff]  ;;  %v2744_v42 = vld [vmem:[#allocation14 + $0x788] sm:$0xff] }
 0x344   :  { %v14527_v45 = vcombine.high %v2743_v40, %v2746_v41  ;;  %v14526_v50 = vcombine.low %v2743_v40, %v2746_v41  ;;  %v14528_v51 = vcombine.low %v2744_v42, %v2747_v46 }
 0x345   :  { %5024 = vmatpush1.bf16.msra.mxu1 %v14478_v47  ;;  %v14529_v47 = vcombine.high %v2744_v42, %v2747_v46 }
 0x346   :  { %5188 = vmatpush1.bf16.msra.mxu0 %v14480_v48  ;;  %5025 = vmatprep.subr.bf16.mxu1 %v14485_v15  ;;  %v2749_v48 = vld [vmem:[#allocation14 + $0x840] sm:$0xff] }
 0x347   :  { %5189 = vmatprep.subr.bf16.mxu0 %v14487_v63  ;;  %v2752_v15 = vld [vmem:[#allocation14 + $0x8a0] sm:$0xff]  ;;  %v2750_v63 = vld [vmem:[#allocation14 + $0x848] sm:$0xff] }
 0x348   :  { %v14533_v52 = vcombine.high %v2749_v48, %v2752_v15  ;;  %v14532_v21 = vcombine.low %v2749_v48, %v2752_v15  ;;  %v14534_v58 = vcombine.low %v2750_v63, %v2753_v49 }
 0x349   :  { %5026 = vmatpush1.bf16.msra.mxu1 %v14484_v53  ;;  %v14535_v53 = vcombine.high %v2750_v63, %v2753_v49 }
 0x34a   :  { %5190 = vmatpush1.bf16.msra.mxu0 %v14486_v54  ;;  %5027 = vmatprep.subr.bf16.mxu1 %v14491_v55  ;;  %v2755_v54 = vld [vmem:[#allocation14 + $0x900] sm:$0xff] }
 0x34b   :  { %5191 = vmatprep.subr.bf16.mxu0 %v14493_v56  ;;  %v2758_v55 = vld [vmem:[#allocation14 + $0x960] sm:$0xff]  ;;  %v2756_v56 = vld [vmem:[#allocation14 + $0x908] sm:$0xff] }
 0x34c   :  { %v14539_v61 = vcombine.high %v2755_v54, %v2758_v55  ;;  %v14538_v5 = vcombine.low %v2755_v54, %v2758_v55  ;;  %v14540_v6 = vcombine.low %v2756_v56, %v2759_v57  ;;  %v2788_v54 = vld [vmem:[#allocation14 + $0xd20] sm:$0xff]  ;;  %v2786_v55 = vld [vmem:[#allocation14 + $0xcc8] sm:$0xff] }
 0x34d   :  { %5028 = vmatpush1.bf16.msra.mxu1 %v14490_v0  ;;  %v14541_v0 = vcombine.high %v2756_v56, %v2759_v57  ;;  %v2789_v56 = vld [vmem:[#allocation14 + $0xd28] sm:$0xff] }
 0x34e   :  { %5192 = vmatpush1.bf16.msra.mxu0 %v14492_v1  ;;  %5029 = vmatprep.subr.bf16.mxu1 %v14497_v2  ;;  %v2761_v1 = vld [vmem:[#allocation14 + $0x9c0] sm:$0xff] }
 0x34f   :  { %5193 = vmatprep.subr.bf16.mxu0 %v14499_v3  ;;  %v2764_v2 = vld [vmem:[#allocation14 + $0xa20] sm:$0xff]  ;;  %v2762_v3 = vld [vmem:[#allocation14 + $0x9c8] sm:$0xff] }
 0x350   :  { %v14545_v7 = vcombine.high %v2761_v1, %v2764_v2  ;;  %v14544_v13 = vcombine.low %v2761_v1, %v2764_v2  ;;  %v14546_v14 = vcombine.low %v2762_v3, %v2765_v4  ;;  %v14571_v2 = vcombine.high %v2786_v55, %v2789_v56 }
 0x351   :  { %5030 = vmatpush1.bf16.msra.mxu1 %v14496_v8  ;;  %v14547_v8 = vcombine.high %v2762_v3, %v2765_v4  ;;  %v2794_v3 = vld [vmem:[#allocation14 + $0xde0] sm:$0xff]  ;;  %v2792_v4 = vld [vmem:[#allocation14 + $0xd88] sm:$0xff] }
 0x352   :  { %5194 = vmatpush1.bf16.msra.mxu0 %v14498_v9  ;;  %5031 = vmatprep.subr.bf16.mxu1 %v14503_v10  ;;  %v2767_v9 = vld [vmem:[#allocation14 + $0xa80] sm:$0xff] }
 0x353   :  { %5195 = vmatprep.subr.bf16.mxu0 %v14505_v11  ;;  %v2770_v10 = vld [vmem:[#allocation14 + $0xae0] sm:$0xff]  ;;  %v2768_v11 = vld [vmem:[#allocation14 + $0xa88] sm:$0xff] }
 0x354   :  { %v14551_v17 = vcombine.high %v2767_v9, %v2770_v10  ;;  %v14550_v38 = vcombine.low %v2767_v9, %v2770_v10  ;;  %v14552_v25 = vcombine.low %v2768_v11, %v2771_v12 }
 0x355   :  { %5032 = vmatpush1.bf16.msra.mxu1 %v14502_v18  ;;  %v14553_v18 = vcombine.high %v2768_v11, %v2771_v12  ;;  %v2797_v11 = vld [vmem:[#allocation14 + $0xe40] sm:$0xff] }
 0x356   :  { %5196 = vmatpush1.bf16.msra.mxu0 %v14504_v19  ;;  %5033 = vmatprep.subr.bf16.mxu1 %v14509_v20  ;;  %v2773_v19 = vld [vmem:[#allocation14 + $0xb40] sm:$0xff] }
 0x357   :  { %5197 = vmatprep.subr.bf16.mxu0 %v14511_v22  ;;  %v2776_v20 = vld [vmem:[#allocation14 + $0xba0] sm:$0xff]  ;;  %v2774_v22 = vld [vmem:[#allocation14 + $0xb48] sm:$0xff] }
 0x358   :  { %v14557_v26 = vcombine.high %v2773_v19, %v2776_v20  ;;  %v14556_v32 = vcombine.low %v2773_v19, %v2776_v20  ;;  %v14558_v33 = vcombine.low %v2774_v22, %v2777_v23  ;;  %v2800_v12 = vld [vmem:[#allocation14 + $0xea0] sm:$0xff] }
 0x359   :  { %5034 = vmatpush1.bf16.msra.mxu1 %v14508_v27  ;;  %v14559_v27 = vcombine.high %v2774_v22, %v2777_v23  ;;  %v14581_v19 = vcombine.high %v2797_v11, %v2800_v12  ;;  %v2803_v22 = vld [vmem:[#allocation14 + $0xf00] sm:$0xff] }
 0x35a   :  { %5198 = vmatpush1.bf16.msra.mxu0 %v14510_v28  ;;  %5035 = vmatprep.subr.bf16.mxu1 %v14515_v29  ;;  %v2779_v28 = vld [vmem:[#allocation14 + $0xc00] sm:$0xff] }
 0x35b   :  { %5199 = vmatprep.subr.bf16.mxu0 %v14517_v30  ;;  %v2782_v29 = vld [vmem:[#allocation14 + $0xc60] sm:$0xff]  ;;  %v2780_v30 = vld [vmem:[#allocation14 + $0xc08] sm:$0xff] }
 0x35c   :  { %v14563_v34 = vcombine.high %v2779_v28, %v2782_v29  ;;  %v2806_v23 = vld [vmem:[#allocation14 + $0xf60] sm:$0xff] }
 0x35d   :  { %5036 = vmatpush1.bf16.msra.mxu1 %v14514_v39  ;;  %v14565_v39 = vcombine.high %v2780_v30, %v2783_v31 }
 0x35e   :  { %5200 = vmatpush1.bf16.msra.mxu0 %v14516_v35  ;;  %5037 = vmatprep.subr.bf16.mxu1 %v14521_v36  ;;  %v16875_v35 = vld [vmem:[#allocation13] sm:$0xff] }
 0x35f   :  { %5201 = vmatprep.subr.bf16.mxu0 %v14523_v37  ;;  %v1022_v36 = vrot.slane %v16875_v35, %v16825_v60  ;;  %v1026_v37 = vrot.slane %v16875_v35, %v16828_v62  ;;  %v1034_v40 = vrot.slane %v16875_v35, %v16835_v16 }
 0x361   :  { %5038 = vmatpush1.bf16.msra.mxu1 %v14520_v43 }
 0x362   :  { %5202 = vmatpush1.bf16.msra.mxu0 %v14522_v44  ;;  %5039 = vmatprep.subr.bf16.mxu1 %v14527_v45 }
 0x363   :  { %5203 = vmatprep.subr.bf16.mxu0 %v14529_v47 }
 0x365   :  { %5040 = vmatpush1.bf16.msra.mxu1 %v14526_v50 }
 0x366   :  { %5204 = vmatpush1.bf16.msra.mxu0 %v14528_v51  ;;  %5041 = vmatprep.subr.bf16.mxu1 %v14533_v52  ;;  %v2785_v52 = vld [vmem:[#allocation14 + $0xcc0] sm:$0xff] }
 0x367   :  { %5205 = vmatprep.subr.bf16.mxu0 %v14535_v53  ;;  %v14569_v1 = vcombine.high %v2785_v52, %v2788_v54 }
 0x369   :  { %5042 = vmatpush1.bf16.msra.mxu1 %v14532_v21  ;;  %v14562_v21 = vcombine.low %v2779_v28, %v2782_v29  ;;  %v14587_v28 = vcombine.high %v2803_v22, %v2806_v23 }
 0x36a   :  { %5206 = vmatpush1.bf16.msra.mxu0 %v14534_v58  ;;  %5043 = vmatprep.subr.bf16.mxu1 %v14539_v61  ;;  %v14564_v58 = vcombine.low %v2780_v30, %v2783_v31  ;;  %v2809_v30 = vld [vmem:[#allocation14 + $0xfc0] sm:$0xff] }
 0x36b   :  { %5207 = vmatprep.subr.bf16.mxu0 %v14541_v0  ;;  %v2791_v0 = vld [vmem:[#allocation14 + $0xd80] sm:$0xff] }
 0x36c   :  { %v14575_v9 = vcombine.high %v2791_v0, %v2794_v3  ;;  %v2812_v31 = vld [vmem:[#allocation14 + $0x1020] sm:$0xff] }
 0x36d   :  { %5044 = vmatpush1.bf16.msra.mxu1 %v14538_v5  ;;  %v2795_v5 = vld [vmem:[#allocation14 + $0xde8] sm:$0xff] }
 0x36e   :  { %5208 = vmatpush1.bf16.msra.mxu0 %v14540_v6  ;;  %5045 = vmatprep.subr.bf16.mxu1 %v14545_v7  ;;  %v14568_v7 = vcombine.low %v2785_v52, %v2788_v54  ;;  %v14577_v10 = vcombine.high %v2792_v4, %v2795_v5 }
 0x36f   :  { %5209 = vmatprep.subr.bf16.mxu0 %v14547_v8  ;;  %v14570_v8 = vcombine.low %v2786_v55, %v2789_v56  ;;  %v2827_v55 = vld [vmem:[#allocation14 + $0x1200] sm:$0xff] }
 0x370   :  { %v2830_v56 = vld [vmem:[#allocation14 + $0x1260] sm:$0xff] }
 0x371   :  { %5046 = vmatpush1.bf16.msra.mxu1 %v14544_v13  ;;  %v2798_v13 = vld [vmem:[#allocation14 + $0xe48] sm:$0xff] }
 0x372   :  { %5210 = vmatpush1.bf16.msra.mxu0 %v14546_v14  ;;  %5047 = vmatprep.subr.bf16.mxu1 %v14551_v17  ;;  %v2801_v14 = vld [vmem:[#allocation14 + $0xea8] sm:$0xff]  ;;  %v14574_v17 = vcombine.low %v2791_v0, %v2794_v3 }
 0x373   :  { %5211 = vmatprep.subr.bf16.mxu0 %v14553_v18  ;;  %v14576_v18 = vcombine.low %v2792_v4, %v2795_v5  ;;  %v14583_v20 = vcombine.high %v2798_v13, %v2801_v14  ;;  %v2833_v4 = vld [vmem:[#allocation14 + $0x12c0] sm:$0xff] }
 0x374   :  { %v2836_v5 = vld [vmem:[#allocation14 + $0x1320] sm:$0xff] }
 0x375   :  { %5048 = vmatpush1.bf16.msra.mxu1 %v14550_v38  ;;  %v2804_v38 = vld [vmem:[#allocation14 + $0xf08] sm:$0xff] }
 0x376   :  { %5212 = vmatpush1.bf16.msra.mxu0 %v14552_v25  ;;  %5049 = vmatprep.subr.bf16.mxu1 %v14557_v26  ;;  %v2807_v25 = vld [vmem:[#allocation14 + $0xf68] sm:$0xff]  ;;  %v14580_v26 = vcombine.low %v2797_v11, %v2800_v12  ;;  %v14617_v11 = vcombine.high %v2833_v4, %v2836_v5 }
 0x377   :  { %5213 = vmatprep.subr.bf16.mxu0 %v14559_v27  ;;  %v14582_v27 = vcombine.low %v2798_v13, %v2801_v14  ;;  %v14589_v29 = vcombine.high %v2804_v38, %v2807_v25  ;;  %v2839_v13 = vld [vmem:[#allocation14 + $0x1380] sm:$0xff] }
 0x378   :  { %v2842_v14 = vld [vmem:[#allocation14 + $0x13e0] sm:$0xff] }
 0x379   :  { %5050 = vmatpush1.bf16.msra.mxu1 %v14556_v32  ;;  %v2810_v32 = vld [vmem:[#allocation14 + $0xfc8] sm:$0xff] }
 0x37a   :  { %5214 = vmatpush1.bf16.msra.mxu0 %v14558_v33  ;;  %5060 = vmatprep.subr.bf16.mxu1 %v14563_v34  ;;  %v2813_v33 = vld [vmem:[#allocation14 + $0x1028] sm:$0xff]  ;;  %v14586_v34 = vcombine.low %v2803_v22, %v2806_v23  ;;  %v14623_v22 = vcombine.high %v2839_v13, %v2842_v14 }
 0x37b   :  { %5224 = vmatprep.subr.bf16.mxu0 %v14565_v39  ;;  %v14588_v39 = vcombine.low %v2804_v38, %v2807_v25  ;;  %v2845_v38 = vld [vmem:[#allocation14 + $0x1440] sm:$0xff] }
 0x37c   :  { %v2848_v25 = vld [vmem:[#allocation14 + $0x14a0] sm:$0xff] }
 0x38f   :  { %v2414_v41 = vpop.f32.mrb[4].mxu1  ;;  %v16883_v42 = vpop.f32.mrb[8].mxu0 }
 0x390   :  { %v16058_v46 = vadd.f32 %v2414_v41, %v1022_v36  ;;  %v2416_v43 = vpop.f32.mrb[5].mxu1  ;;  %v2498_v44 = vpop.f32.mrb[9].mxu0  ;;  %v14593_v36 = vcombine.high %v2809_v30, %v2812_v31  ;;  %v2818_v41 = vld [vmem:[#allocation14 + $0x10e0] sm:$0xff] }
 0x391   :  { %v16059_v45 = vadd.f32 %v2416_v43, %v1026_v37  ;;  %v16061_v47 = vadd.f32 %v2498_v44, %v1034_v40  ;;  %v2418_v48 = vpop.f32.mrb[6].mxu1  ;;  %v2500_v15 = vpop.f32.mrb[10].mxu0  ;;  %v14595_v37 = vcombine.high %v2810_v32, %v2813_v33  ;;  %v2815_v40 = vld [vmem:[#allocation14 + $0x1080] sm:$0xff]  ;;  %v2819_v43 = vld [vmem:[#allocation14 + $0x10e8] sm:$0xff]  ;;  %v14592_v44 = vcombine.low %v2809_v30, %v2812_v31 }
 0x392   :  { %v2667_v63 = vmax.f32 %v16058_v46, 0.0  ;;  %v2419_v49 = vpop.f32.mrb[7].mxu1  ;;  %v2501_v50 = vpop.f32.mrb[11].mxu0  ;;  %v2816_v46 = vld [vmem:[#allocation14 + $0x1088] sm:$0xff]  ;;  %v2821_v15 = vld [vmem:[#allocation14 + $0x1140] sm:$0xff]  ;;  %v14629_v30 = vcombine.high %v2845_v38, %v2848_v25 }
 0x393   :  { %v2668_v51 = vmax.f32 %v16059_v45, 0.0  ;;  %v2670_v53 = vmax.f32 %v16061_v47, 0.0  ;;  %v14594_v45 = vcombine.low %v2810_v32, %v2813_v33  ;;  %v14599_v47 = vcombine.high %v2815_v40, %v2818_v41  ;;  %v2822_v49 = vld [vmem:[#allocation14 + $0x1148] sm:$0xff]  ;;  %v2851_v32 = vld [vmem:[#allocation14 + $0x1500] sm:$0xff] }
 0x394   :  { %v16887_v61 = vpack.c.bf16 %v2667_v63, %v2667_v63  ;;  %v14601_v48 = vcombine.high %v2816_v46, %v2819_v43  ;;  %v2824_v63 = vld [vmem:[#allocation14 + $0x11a0] sm:$0xff]  ;;  %v2825_v50 = vld [vmem:[#allocation14 + $0x11a8] sm:$0xff]  ;;  %v14600_v52 = vcombine.low %v2816_v46, %v2819_v43 }
 0x395   :  { %v16885_v57 = vpack.c.bf16 %v2668_v51, %v2668_v51  ;;  %v16891_v6 = vpack.c.bf16 %v2670_v53, %v2670_v53  ;;  %v14598_v51 = vcombine.low %v2815_v40, %v2818_v41  ;;  %v14605_v53 = vcombine.high %v2821_v15, %v2824_v63  ;;  %v2854_v33 = vld [vmem:[#allocation14 + $0x1560] sm:$0xff] }
 0x396   :  { %v14607_v54 = vcombine.high %v2822_v49, %v2825_v50  ;;  %v14604_v0 = vcombine.low %v2821_v15, %v2824_v63  ;;  %v14635_v40 = vcombine.high %v2851_v32, %v2854_v33  ;;  %v2857_v46 = vld [vmem:[#allocation14 + $0x15c0] sm:$0xff] }
 0x397   :  { %5051 = vmatprep.mubr.bf16.mxu1 %v16885_v57  ;;  %5215 = vmatprep.mubr.bf16.mxu0 %v16885_v57  ;;  %v2860_v43 = vld [vmem:[#allocation14 + $0x1620] sm:$0xff] }
 0x398   :  { %5052 = vmatmul.mubr.bf16.vlgmr.msra.gmra.mrb[12].mxu1 %v16887_v61  ;;  %5216 = vmatmul.mubr.bf16.vlgmr.msra.gmra.mrb[16].mxu0 %v16887_v61  ;;  %v14641_v15 = vcombine.high %v2857_v46, %v2860_v43 }
 0x399   :  { %5061 = vmatpush1.bf16.msra.mxu1 %v14562_v21  ;;  %5225 = vmatpush1.bf16.msra.mxu0 %v14564_v58  ;;  %v2828_v21 = vld [vmem:[#allocation14 + $0x1208] sm:$0xff] }
 0x39a   :  { %5092 = vmatprep.mubr.bf16.mxu1 %v16891_v6  ;;  %5256 = vmatprep.mubr.bf16.mxu0 %v16891_v6  ;;  %v2831_v58 = vld [vmem:[#allocation14 + $0x1268] sm:$0xff] }
 0x39b   :  { %5062 = vmatprep.subr.bf16.mxu1 %v14569_v1  ;;  %5226 = vmatprep.subr.bf16.mxu0 %v14571_v2  ;;  %v14606_v1 = vcombine.low %v2822_v49, %v2825_v50  ;;  %v14611_v2 = vcombine.high %v2827_v55, %v2830_v56  ;;  %v14613_v3 = vcombine.high %v2828_v21, %v2831_v58  ;;  %v2863_v49 = vld [vmem:[#allocation14 + $0x1680] sm:$0xff] }
 0x39c   :  { %v2866_v50 = vld [vmem:[#allocation14 + $0x16e0] sm:$0xff] }
 0x39d   :  { %5063 = vmatpush1.bf16.msra.mxu1 %v14568_v7  ;;  %5227 = vmatpush1.bf16.msra.mxu0 %v14570_v8  ;;  %v2834_v7 = vld [vmem:[#allocation14 + $0x12c8] sm:$0xff] }
 0x39e   :  { %5064 = vmatprep.subr.bf16.mxu1 %v14575_v9  ;;  %5228 = vmatprep.subr.bf16.mxu0 %v14577_v10  ;;  %v2837_v8 = vld [vmem:[#allocation14 + $0x1328] sm:$0xff]  ;;  %v14610_v9 = vcombine.low %v2827_v55, %v2830_v56  ;;  %v14612_v10 = vcombine.low %v2828_v21, %v2831_v58  ;;  %v1030_v55 = vrot.slane %v16875_v35, %v16858_v24  ;;  %v2869_v58 = vld [vmem:[#allocation14 + $0x1740] sm:$0xff] }
 0x39f   :  { %v14619_v12 = vcombine.high %v2834_v7, %v2837_v8  ;;  %v14647_v56 = vcombine.high %v2863_v49, %v2866_v50 }
 0x3a1   :  { %5065 = vmatpush1.bf16.msra.mxu1 %v14574_v17  ;;  %5229 = vmatpush1.bf16.msra.mxu0 %v14576_v18  ;;  %v2840_v17 = vld [vmem:[#allocation14 + $0x1388] sm:$0xff] }
 0x3a2   :  { %5066 = vmatprep.subr.bf16.mxu1 %v14581_v19  ;;  %5230 = vmatprep.subr.bf16.mxu0 %v14583_v20  ;;  %v2843_v18 = vld [vmem:[#allocation14 + $0x13e8] sm:$0xff]  ;;  %v14616_v19 = vcombine.low %v2833_v4, %v2836_v5  ;;  %v14618_v20 = vcombine.low %v2834_v7, %v2837_v8  ;;  %v16060_v5 = vadd.f32 %v16883_v42, %v1030_v55  ;;  %v2908_v55 = vld [vmem:[#allocation14 + $0x1c20] sm:$0xff] }
 0x3a3   :  { %v14625_v23 = vcombine.high %v2840_v17, %v2843_v18  ;;  %v2882_v42 = vld [vmem:[#allocation14 + $0x18c8] sm:$0xff] }
 0x3a5   :  { %5067 = vmatpush1.bf16.msra.mxu1 %v14580_v26  ;;  %5231 = vmatpush1.bf16.msra.mxu0 %v14582_v27  ;;  %v2846_v26 = vld [vmem:[#allocation14 + $0x1448] sm:$0xff] }
 0x3a6   :  { %5068 = vmatprep.subr.bf16.mxu1 %v14587_v28  ;;  %5232 = vmatprep.subr.bf16.mxu0 %v14589_v29  ;;  %v2849_v27 = vld [vmem:[#allocation14 + $0x14a8] sm:$0xff]  ;;  %v14622_v28 = vcombine.low %v2839_v13, %v2842_v14  ;;  %v14624_v29 = vcombine.low %v2840_v17, %v2843_v18  ;;  %v2669_v17 = vmax.f32 %v16060_v5, 0.0 }
 0x3a7   :  { %v14631_v31 = vcombine.high %v2846_v26, %v2849_v27  ;;  %v2912_v5 = vld [vmem:[#allocation14 + $0x1c88] sm:$0xff] }
 0x3a9   :  { %5069 = vmatpush1.bf16.msra.mxu1 %v14586_v34  ;;  %5233 = vmatpush1.bf16.msra.mxu0 %v14588_v39  ;;  %v2852_v34 = vld [vmem:[#allocation14 + $0x1508] sm:$0xff] }
 0x3aa   :  { %5070 = vmatprep.subr.bf16.mxu1 %v14593_v36  ;;  %5234 = vmatprep.subr.bf16.mxu0 %v14595_v37  ;;  %v2855_v39 = vld [vmem:[#allocation14 + $0x1568] sm:$0xff]  ;;  %v14628_v36 = vcombine.low %v2845_v38, %v2848_v25  ;;  %v14630_v37 = vcombine.low %v2846_v26, %v2849_v27  ;;  %v16900_v26 = vpack.c.bf16 %v2669_v17, %v2669_v17 }
 0x3ab   :  { %v14637_v41 = vcombine.high %v2852_v34, %v2855_v39  ;;  %v2921_v17 = vld [vmem:[#allocation14 + $0x1da8] sm:$0xff] }
 0x3ad   :  { %5071 = vmatpush1.bf16.msra.mxu1 %v14592_v44  ;;  %5235 = vmatpush1.bf16.msra.mxu0 %v14594_v45  ;;  %v2858_v44 = vld [vmem:[#allocation14 + $0x15c8] sm:$0xff] }
 0x3ae   :  { %5072 = vmatprep.subr.bf16.mxu1 %v14599_v47  ;;  %5236 = vmatprep.subr.bf16.mxu0 %v14601_v48  ;;  %v2861_v45 = vld [vmem:[#allocation14 + $0x1628] sm:$0xff]  ;;  %v14634_v47 = vcombine.low %v2851_v32, %v2854_v33  ;;  %v14636_v48 = vcombine.low %v2852_v34, %v2855_v39 }
 0x3af   :  { %v14643_v63 = vcombine.high %v2858_v44, %v2861_v45  ;;  %v2891_v32 = vld [vmem:[#allocation14 + $0x19e8] sm:$0xff] }
 0x3b1   :  { %5073 = vmatpush1.bf16.msra.mxu1 %v14598_v51  ;;  %5237 = vmatpush1.bf16.msra.mxu0 %v14600_v52  ;;  %v2864_v51 = vld [vmem:[#allocation14 + $0x1688] sm:$0xff] }
 0x3b2   :  { %5074 = vmatprep.subr.bf16.mxu1 %v14605_v53  ;;  %5238 = vmatprep.subr.bf16.mxu0 %v14607_v54  ;;  %v2867_v52 = vld [vmem:[#allocation14 + $0x16e8] sm:$0xff]  ;;  %v14640_v53 = vcombine.low %v2857_v46, %v2860_v43  ;;  %v14642_v54 = vcombine.low %v2858_v44, %v2861_v45 }
 0x3b3   :  { %v14649_v21 = vcombine.high %v2864_v51, %v2867_v52  ;;  %v14648_v4 = vcombine.low %v2864_v51, %v2867_v52  ;;  %v2897_v46 = vld [vmem:[#allocation14 + $0x1aa8] sm:$0xff] }
 0x3b5   :  { %5075 = vmatpush1.bf16.msra.mxu1 %v14604_v0  ;;  %5239 = vmatpush1.bf16.msra.mxu0 %v14606_v1  ;;  %v2872_v0 = vld [vmem:[#allocation14 + $0x17a0] sm:$0xff]  ;;  %v2870_v1 = vld [vmem:[#allocation14 + $0x1748] sm:$0xff] }
 0x3b6   :  { %5076 = vmatprep.subr.bf16.mxu1 %v14611_v2  ;;  %5240 = vmatprep.subr.bf16.mxu0 %v14613_v3  ;;  %v2873_v2 = vld [vmem:[#allocation14 + $0x17a8] sm:$0xff]  ;;  %v14646_v3 = vcombine.low %v2863_v49, %v2866_v50  ;;  %v14653_v7 = vcombine.high %v2869_v58, %v2872_v0  ;;  %v14652_v13 = vcombine.low %v2869_v58, %v2872_v0 }
 0x3b7   :  { %v14655_v8 = vcombine.high %v2870_v1, %v2873_v2  ;;  %v14654_v14 = vcombine.low %v2870_v1, %v2873_v2  ;;  %v2903_v49 = vld [vmem:[#allocation14 + $0x1b68] sm:$0xff] }
 0x3b9   :  { %5077 = vmatpush1.bf16.msra.mxu1 %v14610_v9  ;;  %5241 = vmatpush1.bf16.msra.mxu0 %v14612_v10  ;;  %v2875_v9 = vld [vmem:[#allocation14 + $0x1800] sm:$0xff] }
 0x3ba   :  { %5078 = vmatprep.subr.bf16.mxu1 %v14617_v11  ;;  %5242 = vmatprep.subr.bf16.mxu0 %v14619_v12  ;;  %v2878_v10 = vld [vmem:[#allocation14 + $0x1860] sm:$0xff]  ;;  %v2876_v11 = vld [vmem:[#allocation14 + $0x1808] sm:$0xff] }
 0x3bb   :  { %v2879_v12 = vld [vmem:[#allocation14 + $0x1868] sm:$0xff]  ;;  %v14659_v18 = vcombine.high %v2875_v9, %v2878_v10  ;;  %v14658_v38 = vcombine.low %v2875_v9, %v2878_v10 }
 0x3bc   :  { %v14660_v25 = vcombine.low %v2876_v11, %v2879_v12 }
 0x3bd   :  { %5079 = vmatpush1.bf16.msra.mxu1 %v14616_v19  ;;  %5243 = vmatpush1.bf16.msra.mxu0 %v14618_v20  ;;  %v14661_v19 = vcombine.high %v2876_v11, %v2879_v12  ;;  %v2881_v20 = vld [vmem:[#allocation14 + $0x18c0] sm:$0xff] }
 0x3be   :  { %5080 = vmatprep.subr.bf16.mxu1 %v14623_v22  ;;  %5244 = vmatprep.subr.bf16.mxu0 %v14625_v23  ;;  %v2884_v22 = vld [vmem:[#allocation14 + $0x1920] sm:$0xff]  ;;  %v2885_v23 = vld [vmem:[#allocation14 + $0x1928] sm:$0xff] }
 0x3bf   :  { %v14665_v27 = vcombine.high %v2881_v20, %v2884_v22  ;;  %v14664_v33 = vcombine.low %v2881_v20, %v2884_v22  ;;  %v14666_v34 = vcombine.low %v2882_v42, %v2885_v23  ;;  %v2917_v12 = vld [vmem:[#allocation14 + $0x1d40] sm:$0xff] }
 0x3c1   :  { %5081 = vmatpush1.bf16.msra.mxu1 %v14622_v28  ;;  %5245 = vmatpush1.bf16.msra.mxu0 %v14624_v29  ;;  %v14667_v28 = vcombine.high %v2882_v42, %v2885_v23  ;;  %v2887_v29 = vld [vmem:[#allocation14 + $0x1980] sm:$0xff] }
 0x3c2   :  { %5082 = vmatprep.subr.bf16.mxu1 %v14629_v30  ;;  %5246 = vmatprep.subr.bf16.mxu0 %v14631_v31  ;;  %v2890_v30 = vld [vmem:[#allocation14 + $0x19e0] sm:$0xff]  ;;  %v2888_v31 = vld [vmem:[#allocation14 + $0x1988] sm:$0xff] }
 0x3c3   :  { %v14671_v39 = vcombine.high %v2887_v29, %v2890_v30  ;;  %v14670_v43 = vcombine.low %v2887_v29, %v2890_v30  ;;  %v14672_v44 = vcombine.low %v2888_v31, %v2891_v32  ;;  %v2923_v42 = vld [vmem:[#allocation14 + $0x1e00] sm:$0xff] }
 0x3c4   :  { %v2926_v23 = vld [vmem:[#allocation14 + $0x1e60] sm:$0xff] }
 0x3c5   :  { %5083 = vmatpush1.bf16.msra.mxu1 %v14628_v36  ;;  %5247 = vmatpush1.bf16.msra.mxu0 %v14630_v37  ;;  %v14673_v36 = vcombine.high %v2888_v31, %v2891_v32  ;;  %v2893_v37 = vld [vmem:[#allocation14 + $0x1a40] sm:$0xff]  ;;  %v14707_v29 = vcombine.high %v2923_v42, %v2926_v23 }
 0x3c6   :  { %5084 = vmatprep.subr.bf16.mxu1 %v14635_v40  ;;  %5248 = vmatprep.subr.bf16.mxu0 %v14637_v41  ;;  %v2896_v40 = vld [vmem:[#allocation14 + $0x1aa0] sm:$0xff]  ;;  %v2894_v41 = vld [vmem:[#allocation14 + $0x1a48] sm:$0xff] }
 0x3c7   :  { %v14677_v45 = vcombine.high %v2893_v37, %v2896_v40  ;;  %v14676_v50 = vcombine.low %v2893_v37, %v2896_v40  ;;  %v14678_v51 = vcombine.low %v2894_v41, %v2897_v46  ;;  %v2929_v31 = vld [vmem:[#allocation14 + $0x1ec0] sm:$0xff] }
 0x3c8   :  { %v2932_v32 = vld [vmem:[#allocation14 + $0x1f20] sm:$0xff] }
 0x3c9   :  { %5085 = vmatpush1.bf16.msra.mxu1 %v14634_v47  ;;  %5249 = vmatpush1.bf16.msra.mxu0 %v14636_v48  ;;  %v14679_v47 = vcombine.high %v2894_v41, %v2897_v46  ;;  %v2899_v48 = vld [vmem:[#allocation14 + $0x1b00] sm:$0xff]  ;;  %v14713_v37 = vcombine.high %v2929_v31, %v2932_v32 }
 0x3ca   :  { %5086 = vmatprep.subr.bf16.mxu1 %v14641_v15  ;;  %5250 = vmatprep.subr.bf16.mxu0 %v14643_v63  ;;  %v2902_v15 = vld [vmem:[#allocation14 + $0x1b60] sm:$0xff]  ;;  %v2900_v63 = vld [vmem:[#allocation14 + $0x1b08] sm:$0xff] }
 0x3cb   :  { %v14683_v52 = vcombine.high %v2899_v48, %v2902_v15  ;;  %v14682_v58 = vcombine.low %v2899_v48, %v2902_v15  ;;  %v14684_v0 = vcombine.low %v2900_v63, %v2903_v49  ;;  %v2935_v41 = vld [vmem:[#allocation14 + $0x1f80] sm:$0xff] }
 0x3cc   :  { %v2938_v46 = vld [vmem:[#allocation14 + $0x1fe0] sm:$0xff] }
 0x3cd   :  { %5087 = vmatpush1.bf16.msra.mxu1 %v14640_v53  ;;  %5251 = vmatpush1.bf16.msra.mxu0 %v14642_v54  ;;  %v14685_v53 = vcombine.high %v2900_v63, %v2903_v49  ;;  %v2905_v54 = vld [vmem:[#allocation14 + $0x1bc0] sm:$0xff]  ;;  %v14719_v48 = vcombine.high %v2935_v41, %v2938_v46 }
 0x3ce   :  { %5088 = vmatprep.subr.bf16.mxu1 %v14647_v56  ;;  %5252 = vmatprep.subr.bf16.mxu0 %v14649_v21  ;;  %v2906_v56 = vld [vmem:[#allocation14 + $0x1bc8] sm:$0xff]  ;;  %v14689_v1 = vcombine.high %v2905_v54, %v2908_v55  ;;  %v2941_v63 = vld [vmem:[#allocation14 + $0x2040] sm:$0xff] }
 0x3cf   :  { %v2909_v21 = vld [vmem:[#allocation14 + $0x1c28] sm:$0xff]  ;;  %v2944_v49 = vld [vmem:[#allocation14 + $0x20a0] sm:$0xff] }
 0x3d0   :  { %v14691_v2 = vcombine.high %v2906_v56, %v2909_v21  ;;  %v14690_v9 = vcombine.low %v2906_v56, %v2909_v21  ;;  %v2947_v56 = vld [vmem:[#allocation14 + $0x2100] sm:$0xff] }
 0x3d1   :  { %5089 = vmatpush1.bf16.msra.mxu1 %v14646_v3  ;;  %5253 = vmatpush1.bf16.msra.mxu0 %v14648_v4  ;;  %v2911_v3 = vld [vmem:[#allocation14 + $0x1c80] sm:$0xff] }
 0x3d2   :  { %5090 = vmatprep.subr.bf16.mxu1 %v14653_v7  ;;  %5254 = vmatprep.subr.bf16.mxu0 %v14655_v8  ;;  %v2914_v4 = vld [vmem:[#allocation14 + $0x1ce0] sm:$0xff]  ;;  %v2915_v7 = vld [vmem:[#allocation14 + $0x1ce8] sm:$0xff]  ;;  %v14688_v8 = vcombine.low %v2905_v54, %v2908_v55  ;;  %v14725_v54 = vcombine.high %v2941_v63, %v2944_v49 }
 0x3d3   :  { %v14695_v10 = vcombine.high %v2911_v3, %v2914_v4  ;;  %v14697_v11 = vcombine.high %v2912_v5, %v2915_v7  ;;  %v2950_v21 = vld [vmem:[#allocation14 + $0x2160] sm:$0xff] }
 0x3d5   :  { %5091 = vmatpush1.bf16.msra.mxu1 %v14652_v13  ;;  %5255 = vmatpush1.bf16.msra.mxu0 %v14654_v14  ;;  %v2920_v13 = vld [vmem:[#allocation14 + $0x1da0] sm:$0xff]  ;;  %v2918_v14 = vld [vmem:[#allocation14 + $0x1d48] sm:$0xff] }
 0x3d6   :  { %5101 = vmatprep.subr.bf16.mxu1 %v14659_v18  ;;  %5265 = vmatprep.subr.bf16.mxu0 %v14661_v19  ;;  %v14694_v18 = vcombine.low %v2911_v3, %v2914_v4  ;;  %v14696_v19 = vcombine.low %v2912_v5, %v2915_v7  ;;  %v14701_v20 = vcombine.high %v2917_v12, %v2920_v13  ;;  %v2953_v5 = vld [vmem:[#allocation14 + $0x21c0] sm:$0xff] }
 0x3d7   :  { %v14703_v22 = vcombine.high %v2918_v14, %v2921_v17  ;;  %v14731_v3 = vcombine.high %v2947_v56, %v2950_v21  ;;  %v2956_v7 = vld [vmem:[#allocation14 + $0x2220] sm:$0xff] }
 0x3d8   :  { %5093 = vmatmul.mubr.bf16.vlgmr.msra.gmra.mrb[12].mxu1 %v16900_v26  ;;  %5257 = vmatmul.mubr.bf16.vlgmr.msra.gmra.mrb[16].mxu0 %v16900_v26 }
 0x3d9   :  { %5102 = vmatpush1.bf16.msra.mxu1 %v14658_v38  ;;  %5266 = vmatpush1.bf16.msra.mxu0 %v14660_v25  ;;  %v2924_v38 = vld [vmem:[#allocation14 + $0x1e08] sm:$0xff] }
 0x3da   :  { %5103 = vmatprep.subr.bf16.mxu1 %v14665_v27  ;;  %5267 = vmatprep.subr.bf16.mxu0 %v14667_v28  ;;  %v2927_v25 = vld [vmem:[#allocation14 + $0x1e68] sm:$0xff]  ;;  %v14700_v27 = vcombine.low %v2917_v12, %v2920_v13  ;;  %v14702_v28 = vcombine.low %v2918_v14, %v2921_v17  ;;  %v14737_v12 = vcombine.high %v2953_v5, %v2956_v7  ;;  %v2959_v14 = vld [vmem:[#allocation14 + $0x2280] sm:$0xff] }
 0x3db   :  { %v14709_v30 = vcombine.high %v2924_v38, %v2927_v25  ;;  %v2962_v17 = vld [vmem:[#allocation14 + $0x22e0] sm:$0xff] }
 0x3dd   :  { %5104 = vmatpush1.bf16.msra.mxu1 %v14664_v33  ;;  %5268 = vmatpush1.bf16.msra.mxu0 %v14666_v34  ;;  %v2930_v33 = vld [vmem:[#allocation14 + $0x1ec8] sm:$0xff] }
 0x3de   :  { %5105 = vmatprep.subr.bf16.mxu1 %v14671_v39  ;;  %5269 = vmatprep.subr.bf16.mxu0 %v14673_v36  ;;  %v2933_v34 = vld [vmem:[#allocation14 + $0x1f28] sm:$0xff]  ;;  %v14706_v39 = vcombine.low %v2923_v42, %v2926_v23  ;;  %v14708_v36 = vcombine.low %v2924_v38, %v2927_v25  ;;  %v16908_v23 = vsub.s32 5, %v16822_v59  ;;  %v14743_v38 = vcombine.high %v2959_v14, %v2962_v17 }
 0x3df   :  { %v14715_v40 = vcombine.high %v2930_v33, %v2933_v34 }
 0x3e1   :  { %5106 = vmatpush1.bf16.msra.mxu1 %v14670_v43  ;;  %5270 = vmatpush1.bf16.msra.mxu0 %v14672_v44  ;;  %v2936_v43 = vld [vmem:[#allocation14 + $0x1f88] sm:$0xff] }
 0x3e2   :  { %5107 = vmatprep.subr.bf16.mxu1 %v14677_v45  ;;  %5271 = vmatprep.subr.bf16.mxu0 %v14679_v47  ;;  %v2939_v44 = vld [vmem:[#allocation14 + $0x1fe8] sm:$0xff]  ;;  %v14712_v45 = vcombine.low %v2929_v31, %v2932_v32  ;;  %v14714_v47 = vcombine.low %v2930_v33, %v2933_v34  ;;  %v14742_v33 = vcombine.low %v2959_v14, %v2962_v17  ;;  %v2986_v14 = vld [vmem:[#allocation14 + $0x25e0] sm:$0xff] }
 0x3e3   :  { %v14721_v15 = vcombine.high %v2936_v43, %v2939_v44  ;;  %v2969_v31 = vld [vmem:[#allocation14 + $0x23a8] sm:$0xff] }
 0x3e4   :  { %v2984_v17 = vld [vmem:[#allocation14 + $0x2588] sm:$0xff] }
 0x3e5   :  { %5108 = vmatpush1.bf16.msra.mxu1 %v14676_v50  ;;  %5272 = vmatpush1.bf16.msra.mxu0 %v14678_v51  ;;  %v2942_v50 = vld [vmem:[#allocation14 + $0x2048] sm:$0xff] }
 0x3e6   :  { %5109 = vmatprep.subr.bf16.mxu1 %v14683_v52  ;;  %5273 = vmatprep.subr.bf16.mxu0 %v14685_v53  ;;  %v2945_v51 = vld [vmem:[#allocation14 + $0x20a8] sm:$0xff]  ;;  %v14718_v52 = vcombine.low %v2935_v41, %v2938_v46  ;;  %v14720_v53 = vcombine.low %v2936_v43, %v2939_v44  ;;  %v2971_v41 = vld [vmem:[#allocation14 + $0x2400] sm:$0xff] }
 0x3e7   :  { %v14727_v55 = vcombine.high %v2942_v50, %v2945_v51  ;;  %v2974_v43 = vld [vmem:[#allocation14 + $0x2460] sm:$0xff]  ;;  %v2972_v44 = vld [vmem:[#allocation14 + $0x2408] sm:$0xff] }
 0x3e9   :  { %5110 = vmatpush1.bf16.msra.mxu1 %v14682_v58  ;;  %5274 = vmatpush1.bf16.msra.mxu0 %v14684_v0  ;;  %v2948_v58 = vld [vmem:[#allocation14 + $0x2108] sm:$0xff] }
 0x3ea   :  { %5111 = vmatprep.subr.bf16.mxu1 %v14689_v1  ;;  %5275 = vmatprep.subr.bf16.mxu0 %v14691_v2  ;;  %v2951_v0 = vld [vmem:[#allocation14 + $0x2168] sm:$0xff]  ;;  %v14724_v1 = vcombine.low %v2941_v63, %v2944_v49  ;;  %v14726_v2 = vcombine.low %v2942_v50, %v2945_v51 }
 0x3eb   :  { %v14733_v4 = vcombine.high %v2948_v58, %v2951_v0 }
 0x3ed   :  { %5112 = vmatpush1.bf16.msra.mxu1 %v14688_v8  ;;  %5276 = vmatpush1.bf16.msra.mxu0 %v14690_v9  ;;  %v2954_v8 = vld [vmem:[#allocation14 + $0x21c8] sm:$0xff] }
 0x3ee   :  { %5113 = vmatprep.subr.bf16.mxu1 %v14695_v10  ;;  %5277 = vmatprep.subr.bf16.mxu0 %v14697_v11  ;;  %v2957_v9 = vld [vmem:[#allocation14 + $0x2228] sm:$0xff]  ;;  %v14730_v10 = vcombine.low %v2947_v56, %v2950_v21  ;;  %v14732_v11 = vcombine.low %v2948_v58, %v2951_v0  ;;  %v14755_v56 = vcombine.high %v2971_v41, %v2974_v43 }
 0x3ef   :  { %v14739_v13 = vcombine.high %v2954_v8, %v2957_v9  ;;  %v14738_v42 = vcombine.low %v2954_v8, %v2957_v9  ;;  %v14754_v8 = vcombine.low %v2971_v41, %v2974_v43 }
 0x3f1   :  { %5114 = vmatpush1.bf16.msra.mxu1 %v14694_v18  ;;  %5278 = vmatpush1.bf16.msra.mxu0 %v14696_v19  ;;  %v2960_v18 = vld [vmem:[#allocation14 + $0x2288] sm:$0xff] }
 0x3f2   :  { %5115 = vmatprep.subr.bf16.mxu1 %v14701_v20  ;;  %5279 = vmatprep.subr.bf16.mxu0 %v14703_v22  ;;  %v2963_v19 = vld [vmem:[#allocation14 + $0x22e8] sm:$0xff]  ;;  %v16905_v20 = vsub.s32 4, %v16822_v59  ;;  %v14736_v22 = vcombine.low %v2953_v5, %v2956_v7 }
 0x3f3   :  { %v14745_v25 = vcombine.high %v2960_v18, %v2963_v19  ;;  %v14744_v34 = vcombine.low %v2960_v18, %v2963_v19  ;;  %v2981_v5 = vld [vmem:[#allocation14 + $0x2528] sm:$0xff] }
 0x3f4   :  { %v1038_v32 = vrot.slane %v16875_v35, %v16905_v20  ;;  %v2987_v18 = vld [vmem:[#allocation14 + $0x25e8] sm:$0xff] }
 0x3f5   :  { %5116 = vmatpush1.bf16.msra.mxu1 %v14700_v27  ;;  %5280 = vmatpush1.bf16.msra.mxu0 %v14702_v28  ;;  %v1049_v27 = vsub.s32 7, %v16822_v59  ;;  %v2965_v28 = vld [vmem:[#allocation14 + $0x2340] sm:$0xff] }
 0x3f6   :  { %5117 = vmatprep.subr.bf16.mxu1 %v14707_v29  ;;  %5281 = vmatprep.subr.bf16.mxu0 %v14709_v30  ;;  %v2968_v29 = vld [vmem:[#allocation14 + $0x23a0] sm:$0xff]  ;;  %v2966_v30 = vld [vmem:[#allocation14 + $0x2348] sm:$0xff] }
 0x3f7   :  { %v14748_v51 = vcombine.low %v2965_v28, %v2968_v29 }
 0x3f9   :  { %5118 = vmatpush1.bf16.msra.mxu1 %v14706_v39  ;;  %5282 = vmatpush1.bf16.msra.mxu0 %v14708_v36  ;;  %v1042_v39 = vrot.slane %v16875_v35, %v16908_v23  ;;  %v1050_v36 = vrot.slane %v16875_v35, %v1049_v27  ;;  %v2989_v27 = vld [vmem:[#allocation14 + $0x2640] sm:$0xff] }
 0x3fa   :  { %5119 = vmatprep.subr.bf16.mxu1 %v14713_v37  ;;  %5283 = vmatprep.subr.bf16.mxu0 %v14715_v40  ;;  %v14749_v37 = vcombine.high %v2965_v28, %v2968_v29  ;;  %v14751_v40 = vcombine.high %v2966_v30, %v2969_v31  ;;  %v2992_v28 = vld [vmem:[#allocation14 + $0x26a0] sm:$0xff]  ;;  %v2990_v29 = vld [vmem:[#allocation14 + $0x2648] sm:$0xff] }
 0x3fb   :  { %v14772_v41 = vcombine.low %v2989_v27, %v2992_v28 }
 0x3fd   :  { %5120 = vmatpush1.bf16.msra.mxu1 %v14712_v45  ;;  %5284 = vmatpush1.bf16.msra.mxu0 %v14714_v47  ;;  %v2975_v45 = vld [vmem:[#allocation14 + $0x2468] sm:$0xff] }
 0x3fe   :  { %5121 = vmatprep.subr.bf16.mxu1 %v14719_v48  ;;  %5285 = vmatprep.subr.bf16.mxu0 %v14721_v15  ;;  %v14757_v21 = vcombine.high %v2972_v44, %v2975_v45  ;;  %v14756_v9 = vcombine.low %v2972_v44, %v2975_v45  ;;  %v3001_v45 = vld [vmem:[#allocation14 + $0x27c0] sm:$0xff] }
 0x401   :  { %5122 = vmatpush1.bf16.msra.mxu1 %v14718_v52  ;;  %5286 = vmatpush1.bf16.msra.mxu0 %v14720_v53  ;;  %v14750_v52 = vcombine.low %v2966_v30, %v2969_v31  ;;  %v2993_v30 = vld [vmem:[#allocation14 + $0x26a8] sm:$0xff] }
 0x402   :  { %5123 = vmatprep.subr.bf16.mxu1 %v14725_v54  ;;  %5287 = vmatprep.subr.bf16.mxu0 %v14727_v55 }
 0x405   :  { %5124 = vmatpush1.bf16.msra.mxu1 %v14724_v1  ;;  %5288 = vmatpush1.bf16.msra.mxu0 %v14726_v2  ;;  %v2977_v1 = vld [vmem:[#allocation14 + $0x24c0] sm:$0xff] }
 0x406   :  { %5125 = vmatprep.subr.bf16.mxu1 %v14731_v3  ;;  %5289 = vmatprep.subr.bf16.mxu0 %v14733_v4  ;;  %v2980_v3 = vld [vmem:[#allocation14 + $0x2520] sm:$0xff]  ;;  %v2978_v4 = vld [vmem:[#allocation14 + $0x24c8] sm:$0xff] }
 0x409   :  { %5126 = vmatpush1.bf16.msra.mxu1 %v14730_v10  ;;  %5290 = vmatpush1.bf16.msra.mxu0 %v14732_v11  ;;  %v2983_v11 = vld [vmem:[#allocation14 + $0x2580] sm:$0xff] }
 0x40a   :  { %5127 = vmatprep.subr.bf16.mxu1 %v14737_v12  ;;  %5291 = vmatprep.subr.bf16.mxu0 %v14739_v13  ;;  %v14761_v12 = vcombine.high %v2977_v1, %v2980_v3  ;;  %v14763_v13 = vcombine.high %v2978_v4, %v2981_v5  ;;  %v14766_v31 = vcombine.low %v2983_v11, %v2986_v14 }
 0x40d   :  { %5128 = vmatpush1.bf16.msra.mxu1 %v14736_v22  ;;  %5292 = vmatpush1.bf16.msra.mxu0 %v14738_v42  ;;  %v14760_v22 = vcombine.low %v2977_v1, %v2980_v3  ;;  %v14762_v42 = vcombine.low %v2978_v4, %v2981_v5  ;;  %v3013_v1 = vld [vmem:[#allocation14 + $0x2940] sm:$0xff]  ;;  %v3014_v3 = vld [vmem:[#allocation14 + $0x2948] sm:$0xff] }
 0x40e   :  { %5129 = vmatprep.subr.bf16.mxu1 %v14743_v38  ;;  %5293 = vmatprep.subr.bf16.mxu0 %v14745_v25  ;;  %v14767_v38 = vcombine.high %v2983_v11, %v2986_v14  ;;  %v14769_v25 = vcombine.high %v2984_v17, %v2987_v18  ;;  %v3017_v4 = vld [vmem:[#allocation14 + $0x29a8] sm:$0xff] }
 0x40f   :  { %v2578_v46 = vpop.f32.mrb[8].mxu1  ;;  %v14799_v11 = vcombine.high %v3014_v3, %v3017_v4  ;;  %v3020_v14 = vld [vmem:[#allocation14 + $0x2a08] sm:$0xff] }
 0x410   :  { %v16062_v47 = vadd.f32 %v2578_v46, %v1038_v32  ;;  %v16916_v48 = vpop.f32.mrb[12].mxu0  ;;  %v2580_v15 = vpop.f32.mrb[9].mxu1  ;;  %v14768_v32 = vcombine.low %v2984_v17, %v2987_v18  ;;  %v14774_v46 = vcombine.low %v2990_v29, %v2993_v30  ;;  %v3023_v17 = vld [vmem:[#allocation14 + $0x2a68] sm:$0xff] }
 0x411   :  { %v16063_v63 = vadd.f32 %v2580_v15, %v1042_v39  ;;  %v2662_v49 = vpop.f32.mrb[13].mxu0  ;;  %5130 = vmatpush1.bf16.msra.mxu1 %v14742_v33  ;;  %5294 = vmatpush1.bf16.msra.mxu0 %v14744_v34  ;;  %v2582_v50 = vpop.f32.mrb[10].mxu1  ;;  %v14773_v33 = vcombine.high %v2989_v27, %v2992_v28  ;;  %v14775_v34 = vcombine.high %v2990_v29, %v2993_v30  ;;  %v2995_v39 = vld [vmem:[#allocation14 + $0x2700] sm:$0xff]  ;;  %v3002_v15 = vld [vmem:[#allocation14 + $0x27c8] sm:$0xff] }
 0x412   :  { %v2671_v53 = vmax.f32 %v16062_v47, 0.0  ;;  %v16065_v35 = vadd.f32 %v2662_v49, %v1050_v36  ;;  %v2664_v54 = vpop.f32.mrb[14].mxu0  ;;  %v2583_v55 = vpop.f32.mrb[11].mxu1  ;;  %5131 = vmatprep.subr.bf16.mxu1 %v14749_v37  ;;  %5295 = vmatprep.subr.bf16.mxu0 %v14751_v40  ;;  %v2998_v36 = vld [vmem:[#allocation14 + $0x2760] sm:$0xff]  ;;  %v2996_v37 = vld [vmem:[#allocation14 + $0x2708] sm:$0xff] }
 0x413   :  { %v2672_v58 = vmax.f32 %v16063_v63, 0.0  ;;  %v2665_v0 = vpop.f32.mrb[15].mxu0  ;;  %v2999_v40 = vld [vmem:[#allocation14 + $0x2768] sm:$0xff]  ;;  %v14779_v43 = vcombine.high %v2995_v39, %v2998_v36  ;;  %v3004_v47 = vld [vmem:[#allocation14 + $0x2820] sm:$0xff]  ;;  %v14778_v49 = vcombine.low %v2995_v39, %v2998_v36 }
 0x414   :  { %v2674_v2 = vmax.f32 %v16065_v35, 0.0  ;;  %v16920_v10 = vpack.c.bf16 %v2671_v53, %v2671_v53  ;;  %v14781_v44 = vcombine.high %v2996_v37, %v2999_v40  ;;  %v3005_v63 = vld [vmem:[#allocation14 + $0x2828] sm:$0xff]  ;;  %v14780_v50 = vcombine.low %v2996_v37, %v2999_v40  ;;  %v3007_v53 = vld [vmem:[#allocation14 + $0x2880] sm:$0xff] }
 0x415   :  { %v16918_v7 = vpack.c.bf16 %v2672_v58, %v2672_v58  ;;  %5132 = vmatpush1.bf16.msra.mxu1 %v14748_v51  ;;  %5296 = vmatpush1.bf16.msra.mxu0 %v14750_v52  ;;  %v14785_v51 = vcombine.high %v3001_v45, %v3004_v47  ;;  %v14787_v52 = vcombine.high %v3002_v15, %v3005_v63  ;;  %v3010_v35 = vld [vmem:[#allocation14 + $0x28e0] sm:$0xff]  ;;  %v3008_v54 = vld [vmem:[#allocation14 + $0x2888] sm:$0xff] }
 0x416   :  { %5142 = vmatprep.subr.bf16.mxu1 %v14755_v56  ;;  %5306 = vmatprep.subr.bf16.mxu0 %v14757_v21  ;;  %v16924_v19 = vpack.c.bf16 %v2674_v2, %v2674_v2  ;;  %v3011_v55 = vld [vmem:[#allocation14 + $0x28e8] sm:$0xff]  ;;  %v14784_v56 = vcombine.low %v3001_v45, %v3004_v47  ;;  %v14786_v21 = vcombine.low %v3002_v15, %v3005_v63  ;;  %v3016_v2 = vld [vmem:[#allocation14 + $0x29a0] sm:$0xff] }
 0x417   :  { %5133 = vmatprep.mubr.bf16.mxu1 %v16918_v7  ;;  %5297 = vmatprep.mubr.bf16.mxu0 %v16918_v7  ;;  %v14791_v58 = vcombine.high %v3007_v53, %v3010_v35  ;;  %v14793_v0 = vcombine.high %v3008_v54, %v3011_v55  ;;  %v14790_v5 = vcombine.low %v3007_v53, %v3010_v35  ;;  %v3028_v27 = vld [vmem:[#allocation14 + $0x2b20] sm:$0xff]  ;;  %v3026_v28 = vld [vmem:[#allocation14 + $0x2ac8] sm:$0xff] }
 0x418   :  { %5134 = vmatmul.mubr.bf16.vlgmr.msra.gmra.mrb[12].mxu1 %v16920_v10  ;;  %5298 = vmatmul.mubr.bf16.vlgmr.msra.gmra.mrb[16].mxu0 %v16920_v10  ;;  %v14796_v18 = vcombine.low %v3013_v1, %v3016_v2  ;;  %v3029_v29 = vld [vmem:[#allocation14 + $0x2b28] sm:$0xff]  ;;  %v3034_v39 = vld [vmem:[#allocation14 + $0x2be0] sm:$0xff] }
 0x419   :  { %5143 = vmatpush1.bf16.msra.mxu1 %v14754_v8  ;;  %5307 = vmatpush1.bf16.msra.mxu0 %v14756_v9  ;;  %v14792_v8 = vcombine.low %v3008_v54, %v3011_v55  ;;  %v14797_v9 = vcombine.high %v3013_v1, %v3016_v2  ;;  %v3032_v36 = vld [vmem:[#allocation14 + $0x2b88] sm:$0xff]  ;;  %v3040_v45 = vld [vmem:[#allocation14 + $0x2ca0] sm:$0xff] }
 0x41a   :  { %5174 = vmatprep.mubr.bf16.mxu1 %v16924_v19  ;;  %5338 = vmatprep.mubr.bf16.mxu0 %v16924_v19  ;;  %v3035_v37 = vld [vmem:[#allocation14 + $0x2be8] sm:$0xff]  ;;  %v3046_v53 = vld [vmem:[#allocation14 + $0x2d60] sm:$0xff] }
 0x41b   :  { %5144 = vmatprep.subr.bf16.mxu1 %v14761_v12  ;;  %5308 = vmatprep.subr.bf16.mxu0 %v14763_v13  ;;  %v3019_v12 = vld [vmem:[#allocation14 + $0x2a00] sm:$0xff]  ;;  %v3038_v47 = vld [vmem:[#allocation14 + $0x2c48] sm:$0xff] }
 0x41c   :  { %v3022_v13 = vld [vmem:[#allocation14 + $0x2a60] sm:$0xff]  ;;  %v3041_v15 = vld [vmem:[#allocation14 + $0x2ca8] sm:$0xff] }
 0x41d   :  { %5145 = vmatpush1.bf16.msra.mxu1 %v14760_v22  ;;  %5309 = vmatpush1.bf16.msra.mxu0 %v14762_v42  ;;  %v14798_v22 = vcombine.low %v3014_v3, %v3017_v4  ;;  %v14803_v42 = vcombine.high %v3019_v12, %v3022_v13  ;;  %v14802_v30 = vcombine.low %v3019_v12, %v3022_v13  ;;  %v3044_v35 = vld [vmem:[#allocation14 + $0x2d08] sm:$0xff]  ;;  %v3052_v1 = vld [vmem:[#allocation14 + $0x2e20] sm:$0xff] }
 0x41e   :  { %5146 = vmatprep.subr.bf16.mxu1 %v14767_v38  ;;  %5310 = vmatprep.subr.bf16.mxu0 %v14769_v25  ;;  %v14805_v38 = vcombine.high %v3020_v14, %v3023_v17  ;;  %v3025_v25 = vld [vmem:[#allocation14 + $0x2ac0] sm:$0xff]  ;;  %v3047_v54 = vld [vmem:[#allocation14 + $0x2d68] sm:$0xff] }
 0x41f   :  { %v14808_v40 = vcombine.low %v3025_v25, %v3028_v27  ;;  %v3050_v2 = vld [vmem:[#allocation14 + $0x2dc8] sm:$0xff]  ;;  %v3055_v12 = vld [vmem:[#allocation14 + $0x2e80] sm:$0xff] }
 0x420   :  { %v3053_v3 = vld [vmem:[#allocation14 + $0x2e28] sm:$0xff]  ;;  %v3058_v13 = vld [vmem:[#allocation14 + $0x2ee0] sm:$0xff] }
 0x421   :  { %5147 = vmatpush1.bf16.msra.mxu1 %v14766_v31  ;;  %5311 = vmatpush1.bf16.msra.mxu0 %v14768_v32  ;;  %v14804_v31 = vcombine.low %v3020_v14, %v3023_v17  ;;  %v14809_v32 = vcombine.high %v3025_v25, %v3028_v27  ;;  %v3056_v14 = vld [vmem:[#allocation14 + $0x2e88] sm:$0xff]  ;;  %v14839_v25 = vcombine.high %v3055_v12, %v3058_v13 }
 0x422   :  { %5148 = vmatprep.subr.bf16.mxu1 %v14773_v33  ;;  %5312 = vmatprep.subr.bf16.mxu0 %v14775_v34  ;;  %v14811_v33 = vcombine.high %v3026_v28, %v3029_v29  ;;  %v3031_v34 = vld [vmem:[#allocation14 + $0x2b80] sm:$0xff]  ;;  %v3059_v17 = vld [vmem:[#allocation14 + $0x2ee8] sm:$0xff] }
 0x423   :  { %v14814_v63 = vcombine.low %v3031_v34, %v3034_v39  ;;  %v14841_v27 = vcombine.high %v3056_v14, %v3059_v17 }
 0x425   :  { %5149 = vmatpush1.bf16.msra.mxu1 %v14772_v41  ;;  %5313 = vmatpush1.bf16.msra.mxu0 %v14774_v46  ;;  %v14810_v41 = vcombine.low %v3026_v28, %v3029_v29  ;;  %v14815_v46 = vcombine.high %v3031_v34, %v3034_v39  ;;  %v3061_v28 = vld [vmem:[#allocation14 + $0x2f40] sm:$0xff]  ;;  %v3062_v29 = vld [vmem:[#allocation14 + $0x2f48] sm:$0xff] }
 0x426   :  { %5150 = vmatprep.subr.bf16.mxu1 %v14779_v43  ;;  %5314 = vmatprep.subr.bf16.mxu0 %v14781_v44  ;;  %v14817_v43 = vcombine.high %v3032_v36, %v3035_v37  ;;  %v3037_v44 = vld [vmem:[#allocation14 + $0x2c40] sm:$0xff] }
 0x427   :  { %v14820_v55 = vcombine.low %v3037_v44, %v3040_v45 }
 0x429   :  { %5151 = vmatpush1.bf16.msra.mxu1 %v14778_v49  ;;  %5315 = vmatpush1.bf16.msra.mxu0 %v14780_v50  ;;  %v14816_v49 = vcombine.low %v3032_v36, %v3035_v37  ;;  %v14821_v50 = vcombine.high %v3037_v44, %v3040_v45  ;;  %v2685_v36 = vld [vmem:[#allocation14 + $0x10] sm:$0xff] }
 0x42a   :  { %5152 = vmatprep.subr.bf16.mxu1 %v14785_v51  ;;  %5316 = vmatprep.subr.bf16.mxu0 %v14787_v52  ;;  %v14823_v51 = vcombine.high %v3038_v47, %v3041_v15  ;;  %v3043_v52 = vld [vmem:[#allocation14 + $0x2d00] sm:$0xff]  ;;  %v2688_v37 = vld [vmem:[#allocation14 + $0x70] sm:$0xff] }
 0x42b   :  { %v14826_v4 = vcombine.low %v3043_v52, %v3046_v53  ;;  %v14471_v45 = vcombine.high %v2685_v36, %v2688_v37 }
 0x42d   :  { %5153 = vmatpush1.bf16.msra.mxu1 %v14784_v56  ;;  %5317 = vmatpush1.bf16.msra.mxu0 %v14786_v21  ;;  %v14822_v56 = vcombine.low %v3038_v47, %v3041_v15  ;;  %v14827_v21 = vcombine.high %v3043_v52, %v3046_v53  ;;  %v2691_v15 = vld [vmem:[#allocation14 + $0xd0] sm:$0xff] }
 0x42e   :  { %5154 = vmatprep.subr.bf16.mxu1 %v14791_v58  ;;  %5318 = vmatprep.subr.bf16.mxu0 %v14793_v0  ;;  %v14829_v58 = vcombine.high %v3044_v35, %v3047_v54  ;;  %v3049_v0 = vld [vmem:[#allocation14 + $0x2dc0] sm:$0xff] }
 0x431   :  { %5155 = vmatpush1.bf16.msra.mxu1 %v14790_v5  ;;  %5319 = vmatpush1.bf16.msra.mxu0 %v14792_v8  ;;  %v14828_v5 = vcombine.low %v3044_v35, %v3047_v54  ;;  %v1045_v8 = vsub.s32 6, %v16822_v59  ;;  %v3064_v59 = vld [vmem:[#allocation14 + $0x2fa0] sm:$0xff]  ;;  %v2697_v54 = vld [vmem:[#allocation14 + $0x190] sm:$0xff] }
 0x432   :  { %5156 = vmatprep.subr.bf16.mxu1 %v14797_v9  ;;  %5320 = vmatprep.subr.bf16.mxu0 %v14799_v11  ;;  %v14833_v9 = vcombine.high %v3049_v0, %v3052_v1  ;;  %v14835_v11 = vcombine.high %v3050_v2, %v3053_v3  ;;  %v14845_v34 = vcombine.high %v3061_v28, %v3064_v59 }
 0x435   :  { %5157 = vmatpush1.bf16.msra.mxu1 %v14796_v18  ;;  %5321 = vmatpush1.bf16.msra.mxu0 %v14798_v22  ;;  %v14832_v18 = vcombine.low %v3049_v0, %v3052_v1  ;;  %v14834_v22 = vcombine.low %v3050_v2, %v3053_v3  ;;  %v2703_v3 = vld [vmem:[#allocation14 + $0x250] sm:$0xff] }
 0x436   :  { %5158 = vmatprep.subr.bf16.mxu1 %v14803_v42  ;;  %5322 = vmatprep.subr.bf16.mxu0 %v14805_v38  ;;  %v16411_v42 = vld [vmem:[#allocation13] sm:$0xff] }
 0x437   :  { %v1046_v38 = vrot.slane %v16411_v42, %v1045_v8  ;;  %v5565_v8 = vld [vmem:[#allocation14 + $0x2b8] sm:$0xff] }
 0x439   :  { %5159 = vmatpush1.bf16.msra.mxu1 %v14802_v30  ;;  %5323 = vmatpush1.bf16.msra.mxu0 %v14804_v31  ;;  %v3065_v30 = vld [vmem:[#allocation14 + $0x2fa8] sm:$0xff]  ;;  %v14838_v31 = vcombine.low %v3055_v12, %v3058_v13 }
 0x43a   :  { %5160 = vmatprep.subr.bf16.mxu1 %v14809_v32  ;;  %5324 = vmatprep.subr.bf16.mxu0 %v14811_v33  ;;  %v14840_v32 = vcombine.low %v3056_v14, %v3059_v17  ;;  %v16064_v33 = vadd.f32 %v16916_v48, %v1046_v38  ;;  %v14847_v39 = vcombine.high %v3062_v29, %v3065_v30  ;;  %v5550_v48 = vld [vmem:[#allocation14 + $0xd8] sm:$0xff]  ;;  %v2709_v14 = vld [vmem:[#allocation14 + $0x310] sm:$0xff] }
 0x43b   :  { %v2712_v17 = vld [vmem:[#allocation14 + $0x370] sm:$0xff] }
 0x43c   :  { %v2673_v44 = vmax.f32 %v16064_v33, 0.0 }
 0x43d   :  { %5161 = vmatpush1.bf16.msra.mxu1 %v14808_v40  ;;  %5325 = vmatpush1.bf16.msra.mxu0 %v14810_v41  ;;  %v5544_v40 = vld [vmem:[#allocation14 + $0x18] sm:$0xff] }
 0x43e   :  { %5162 = vmatprep.subr.bf16.mxu1 %v14815_v46  ;;  %5326 = vmatprep.subr.bf16.mxu0 %v14817_v43  ;;  %v5547_v41 = vld [vmem:[#allocation14 + $0x78] sm:$0xff]  ;;  %v14844_v46 = vcombine.low %v3061_v28, %v3064_v59  ;;  %v14846_v43 = vcombine.low %v3062_v29, %v3065_v30  ;;  %v2715_v28 = vld [vmem:[#allocation14 + $0x3d0] sm:$0xff] }
 0x43f   :  { %v14854_v47 = vcombine.high %v5544_v40, %v5547_v41  ;;  %v14853_v52 = vcombine.low %v5544_v40, %v5547_v41  ;;  %v2718_v59 = vld [vmem:[#allocation14 + $0x430] sm:$0xff]  ;;  %v5574_v29 = vld [vmem:[#allocation14 + $0x3d8] sm:$0xff] }
 0x440   :  { %v5577_v30 = vld [vmem:[#allocation14 + $0x438] sm:$0xff]  ;;  %v14501_v33 = vcombine.high %v2715_v28, %v2718_v59  ;;  %v14500_v41 = vcombine.low %v2715_v28, %v2718_v59 }
 0x441   :  { %5163 = vmatpush1.bf16.msra.mxu1 %v14814_v63  ;;  %5327 = vmatpush1.bf16.msra.mxu0 %v14816_v49  ;;  %v2694_v63 = vld [vmem:[#allocation14 + $0x130] sm:$0xff]  ;;  %v5553_v49 = vld [vmem:[#allocation14 + $0x138] sm:$0xff] }
 0x442   :  { %5164 = vmatprep.subr.bf16.mxu1 %v14821_v50  ;;  %5328 = vmatprep.subr.bf16.mxu0 %v14823_v51  ;;  %v14470_v50 = vcombine.low %v2685_v36, %v2688_v37  ;;  %v16932_v51 = vpack.c.bf16 %v2673_v44, %v2673_v44  ;;  %v14477_v53 = vcombine.high %v2691_v15, %v2694_v63  ;;  %v2724_v36 = vld [vmem:[#allocation14 + $0x4f0] sm:$0xff]  ;;  %v5580_v37 = vld [vmem:[#allocation14 + $0x498] sm:$0xff] }
 0x443   :  { %v14860_v35 = vcombine.high %v5550_v48, %v5553_v49  ;;  %v14859_v0 = vcombine.low %v5550_v48, %v5553_v49  ;;  %v5583_v40 = vld [vmem:[#allocation14 + $0x4f8] sm:$0xff] }
 0x444   :  { %v14890_v44 = vcombine.high %v5580_v37, %v5583_v40  ;;  %v14889_v49 = vcombine.low %v5580_v37, %v5583_v40  ;;  %v5610_v28 = vld [vmem:[#allocation14 + $0x858] sm:$0xff] }
 0x445   :  { %5165 = vmatpush1.bf16.msra.mxu1 %v14820_v55  ;;  %5329 = vmatpush1.bf16.msra.mxu0 %v14822_v56  ;;  %v2700_v55 = vld [vmem:[#allocation14 + $0x1f0] sm:$0xff]  ;;  %v5556_v56 = vld [vmem:[#allocation14 + $0x198] sm:$0xff] }
 0x446   :  { %5166 = vmatprep.subr.bf16.mxu1 %v14827_v21  ;;  %5330 = vmatprep.subr.bf16.mxu0 %v14829_v58  ;;  %v5559_v21 = vld [vmem:[#allocation14 + $0x1f8] sm:$0xff]  ;;  %v14476_v58 = vcombine.low %v2691_v15, %v2694_v63  ;;  %v14483_v1 = vcombine.high %v2697_v54, %v2700_v55 }
 0x447   :  { %v14866_v2 = vcombine.high %v5556_v56, %v5559_v21  ;;  %v5586_v15 = vld [vmem:[#allocation14 + $0x558] sm:$0xff] }
 0x448   :  { %v5589_v63 = vld [vmem:[#allocation14 + $0x5b8] sm:$0xff] }
 0x449   :  { %5167 = vmatpush1.bf16.msra.mxu1 %v14826_v4  ;;  %5331 = vmatpush1.bf16.msra.mxu0 %v14828_v5  ;;  %v2706_v4 = vld [vmem:[#allocation14 + $0x2b0] sm:$0xff]  ;;  %v5562_v5 = vld [vmem:[#allocation14 + $0x258] sm:$0xff] }
 0x44a   :  { %5168 = vmatprep.subr.bf16.mxu1 %v14833_v9  ;;  %5332 = vmatprep.subr.bf16.mxu0 %v14835_v11  ;;  %v14482_v9 = vcombine.low %v2697_v54, %v2700_v55  ;;  %v14865_v11 = vcombine.low %v5556_v56, %v5559_v21  ;;  %v14489_v12 = vcombine.high %v2703_v3, %v2706_v4  ;;  %v5592_v54 = vld [vmem:[#allocation14 + $0x618] sm:$0xff] }
 0x44b   :  { %v14872_v13 = vcombine.high %v5562_v5, %v5565_v8  ;;  %v14488_v42 = vcombine.low %v2703_v3, %v2706_v4  ;;  %v14871_v38 = vcombine.low %v5562_v5, %v5565_v8  ;;  %v5595_v55 = vld [vmem:[#allocation14 + $0x678] sm:$0xff]  ;;  %v14895_v21 = vcombine.low %v5586_v15, %v5589_v63 }
 0x44c   :  { %v5598_v3 = vld [vmem:[#allocation14 + $0x6d8] sm:$0xff]  ;;  %v14901_v8 = vcombine.low %v5592_v54, %v5595_v55 }
 0x44d   :  { %5169 = vmatpush1.bf16.msra.mxu1 %v14832_v18  ;;  %5333 = vmatpush1.bf16.msra.mxu0 %v14834_v22  ;;  %v5568_v18 = vld [vmem:[#allocation14 + $0x318] sm:$0xff] }
 0x44e   :  { %5170 = vmatprep.subr.bf16.mxu1 %v14839_v25  ;;  %5334 = vmatprep.subr.bf16.mxu0 %v14841_v27  ;;  %v5571_v22 = vld [vmem:[#allocation14 + $0x378] sm:$0xff]  ;;  %v14495_v25 = vcombine.high %v2709_v14, %v2712_v17 }
 0x44f   :  { %v14878_v27 = vcombine.high %v5568_v18, %v5571_v22  ;;  %v5601_v4 = vld [vmem:[#allocation14 + $0x738] sm:$0xff] }
 0x450   :  { %v5613_v59 = vld [vmem:[#allocation14 + $0x8b8] sm:$0xff] }
 0x451   :  { %5171 = vmatpush1.bf16.msra.mxu1 %v14838_v31  ;;  %5335 = vmatpush1.bf16.msra.mxu0 %v14840_v32  ;;  %v14494_v31 = vcombine.low %v2709_v14, %v2712_v17  ;;  %v14877_v32 = vcombine.low %v5568_v18, %v5571_v22  ;;  %v5604_v14 = vld [vmem:[#allocation14 + $0x798] sm:$0xff]  ;;  %v14907_v22 = vcombine.low %v5598_v3, %v5601_v4 }
 0x452   :  { %5172 = vmatprep.subr.bf16.mxu1 %v14845_v34  ;;  %5336 = vmatprep.subr.bf16.mxu0 %v14847_v39  ;;  %v14884_v34 = vcombine.high %v5574_v29, %v5577_v30  ;;  %v2721_v39 = vld [vmem:[#allocation14 + $0x490] sm:$0xff]  ;;  %v5607_v17 = vld [vmem:[#allocation14 + $0x7f8] sm:$0xff]  ;;  %v14919_v40 = vcombine.low %v5610_v28, %v5613_v59 }
 0x453   :  { %v14506_v48 = vcombine.low %v2721_v39, %v2724_v36 }
 0x455   :  { %5173 = vmatpush1.bf16.msra.mxu1 %v14844_v46  ;;  %5337 = vmatpush1.bf16.msra.mxu0 %v14846_v43  ;;  %v14883_v46 = vcombine.low %v5574_v29, %v5577_v30  ;;  %v14507_v43 = vcombine.high %v2721_v39, %v2724_v36  ;;  %v14913_v30 = vcombine.low %v5604_v14, %v5607_v17  ;;  %v5616_v39 = vld [vmem:[#allocation14 + $0x918] sm:$0xff] }
 0x456   :  { %5347 = vmatprep.subr.bf16.mxu1 %v14471_v45  ;;  %7880 = vmatprep.subr.bf16.mxu0 %v14854_v47  ;;  %v2727_v45 = vld [vmem:[#allocation14 + $0x550] sm:$0xff]  ;;  %v5619_v36 = vld [vmem:[#allocation14 + $0x978] sm:$0xff] }
 0x457   :  { %v2730_v47 = vld [vmem:[#allocation14 + $0x5b0] sm:$0xff] }
 0x458   :  { %5175 = vmatmul.mubr.bf16.vlgmr.msra.gmra.mrb[12].mxu1 %v16932_v51  ;;  %5339 = vmatmul.mubr.bf16.vlgmr.msra.gmra.mrb[16].mxu0 %v16932_v51  ;;  %v14512_v56 = vcombine.low %v2727_v45, %v2730_v47 }
 0x459   :  { %5348 = vmatpush1.bf16.msra.mxu1 %v14470_v50  ;;  %5379 = vmatprep.mubr.bf16.mxu1 %v16885_v57  ;;  %v14513_v50 = vcombine.high %v2727_v45, %v2730_v47  ;;  %v5622_v45 = vld [vmem:[#allocation14 + $0x9d8] sm:$0xff] }
 0x45a   :  { %7881 = vmatpush1.bf16.msra.mxu0 %v14853_v52  ;;  %7912 = vmatprep.mubr.bf16.mxu0 %v16885_v57  ;;  %v14896_v52 = vcombine.high %v5586_v15, %v5589_v63  ;;  %v5625_v47 = vld [vmem:[#allocation14 + $0xa38] sm:$0xff]  ;;  %v14925_v63 = vcombine.low %v5616_v39, %v5619_v36 }
 0x45b   :  { %5349 = vmatprep.subr.bf16.mxu1 %v14477_v53  ;;  %7882 = vmatprep.subr.bf16.mxu0 %v14860_v35  ;;  %v2733_v53 = vld [vmem:[#allocation14 + $0x610] sm:$0xff] }
 0x45c   :  { %v2736_v35 = vld [vmem:[#allocation14 + $0x670] sm:$0xff] }
 0x45d   :  { %5350 = vmatpush1.bf16.msra.mxu1 %v14476_v58  ;;  %v14519_v58 = vcombine.high %v2733_v53, %v2736_v35  ;;  %v14518_v5 = vcombine.low %v2733_v53, %v2736_v35  ;;  %v5628_v53 = vld [vmem:[#allocation14 + $0xa98] sm:$0xff] }
 0x45e   :  { %7883 = vmatpush1.bf16.msra.mxu0 %v14859_v0  ;;  %5351 = vmatprep.subr.bf16.mxu1 %v14483_v1  ;;  %v14902_v0 = vcombine.high %v5592_v54, %v5595_v55  ;;  %v2739_v1 = vld [vmem:[#allocation14 + $0x6d0] sm:$0xff]  ;;  %v5631_v35 = vld [vmem:[#allocation14 + $0xaf8] sm:$0xff]  ;;  %v14931_v55 = vcombine.low %v5622_v45, %v5625_v47 }
 0x45f   :  { %7884 = vmatprep.subr.bf16.mxu0 %v14866_v2  ;;  %v2742_v2 = vld [vmem:[#allocation14 + $0x730] sm:$0xff] }
 0x460   :  { %v14524_v18 = vcombine.low %v2739_v1, %v2742_v2 }
 0x461   :  { %5352 = vmatpush1.bf16.msra.mxu1 %v14482_v9  ;;  %v14525_v9 = vcombine.high %v2739_v1, %v2742_v2  ;;  %v5634_v1 = vld [vmem:[#allocation14 + $0xb58] sm:$0xff] }
 0x462   :  { %7885 = vmatpush1.bf16.msra.mxu0 %v14865_v11  ;;  %5353 = vmatprep.subr.bf16.mxu1 %v14489_v12  ;;  %v14908_v11 = vcombine.high %v5598_v3, %v5601_v4  ;;  %v2745_v12 = vld [vmem:[#allocation14 + $0x790] sm:$0xff]  ;;  %v5637_v2 = vld [vmem:[#allocation14 + $0xbb8] sm:$0xff]  ;;  %v14937_v4 = vcombine.low %v5628_v53, %v5631_v35 }
 0x463   :  { %7886 = vmatprep.subr.bf16.mxu0 %v14872_v13  ;;  %v2748_v13 = vld [vmem:[#allocation14 + $0x7f0] sm:$0xff] }
 0x464   :  { %v14530_v29 = vcombine.low %v2745_v12, %v2748_v13 }
 0x465   :  { %5354 = vmatpush1.bf16.msra.mxu1 %v14488_v42  ;;  %v14531_v42 = vcombine.high %v2745_v12, %v2748_v13  ;;  %v5640_v12 = vld [vmem:[#allocation14 + $0xc18] sm:$0xff] }
 0x466   :  { %7887 = vmatpush1.bf16.msra.mxu0 %v14871_v38  ;;  %5355 = vmatprep.subr.bf16.mxu1 %v14495_v25  ;;  %v14914_v38 = vcombine.high %v5604_v14, %v5607_v17  ;;  %v2751_v25 = vld [vmem:[#allocation14 + $0x850] sm:$0xff]  ;;  %v5643_v13 = vld [vmem:[#allocation14 + $0xc78] sm:$0xff]  ;;  %v14943_v17 = vcombine.low %v5634_v1, %v5637_v2 }
 0x467   :  { %7888 = vmatprep.subr.bf16.mxu0 %v14878_v27  ;;  %v2754_v27 = vld [vmem:[#allocation14 + $0x8b0] sm:$0xff] }
 0x468   :  { %v14536_v37 = vcombine.low %v2751_v25, %v2754_v27 }
 0x469   :  { %5356 = vmatpush1.bf16.msra.mxu1 %v14494_v31  ;;  %v14537_v31 = vcombine.high %v2751_v25, %v2754_v27  ;;  %v5646_v27 = vld [vmem:[#allocation14 + $0xcd8] sm:$0xff] }
 0x46a   :  { %7889 = vmatpush1.bf16.msra.mxu0 %v14877_v32  ;;  %5357 = vmatprep.subr.bf16.mxu1 %v14501_v33  ;;  %v14920_v32 = vcombine.high %v5610_v28, %v5613_v59  ;;  %v2757_v33 = vld [vmem:[#allocation14 + $0x910] sm:$0xff]  ;;  %v5649_v28 = vld [vmem:[#allocation14 + $0xd38] sm:$0xff]  ;;  %v14949_v59 = vcombine.low %v5640_v12, %v5643_v13 }
 0x46b   :  { %7890 = vmatprep.subr.bf16.mxu0 %v14884_v34  ;;  %v2760_v34 = vld [vmem:[#allocation14 + $0x970] sm:$0xff] }
 0x46c   :  { %v14542_v15 = vcombine.low %v2757_v33, %v2760_v34 }
 0x46d   :  { %5358 = vmatpush1.bf16.msra.mxu1 %v14500_v41  ;;  %v14543_v41 = vcombine.high %v2757_v33, %v2760_v34  ;;  %v5652_v33 = vld [vmem:[#allocation14 + $0xd98] sm:$0xff] }
 0x46e   :  { %7891 = vmatpush1.bf16.msra.mxu0 %v14883_v46  ;;  %5359 = vmatprep.subr.bf16.mxu1 %v14507_v43  ;;  %v14926_v46 = vcombine.high %v5616_v39, %v5619_v36  ;;  %v2763_v43 = vld [vmem:[#allocation14 + $0x9d0] sm:$0xff]  ;;  %v5655_v34 = vld [vmem:[#allocation14 + $0xdf8] sm:$0xff]  ;;  %v14955_v36 = vcombine.low %v5646_v27, %v5649_v28 }
 0x46f   :  { %7892 = vmatprep.subr.bf16.mxu0 %v14890_v44  ;;  %v2766_v44 = vld [vmem:[#allocation14 + $0xa30] sm:$0xff] }
 0x470   :  { %v14548_v54 = vcombine.low %v2763_v43, %v2766_v44 }
 0x471   :  { %5360 = vmatpush1.bf16.msra.mxu1 %v14506_v48  ;;  %v14549_v48 = vcombine.high %v2763_v43, %v2766_v44  ;;  %v5658_v43 = vld [vmem:[#allocation14 + $0xe58] sm:$0xff] }
 0x472   :  { %7893 = vmatpush1.bf16.msra.mxu0 %v14889_v49  ;;  %5361 = vmatprep.subr.bf16.mxu1 %v14513_v50  ;;  %v14932_v49 = vcombine.high %v5622_v45, %v5625_v47  ;;  %v2769_v50 = vld [vmem:[#allocation14 + $0xa90] sm:$0xff]  ;;  %v5661_v44 = vld [vmem:[#allocation14 + $0xeb8] sm:$0xff]  ;;  %v14961_v47 = vcombine.low %v5652_v33, %v5655_v34 }
 0x473   :  { %7894 = vmatprep.subr.bf16.mxu0 %v14896_v52  ;;  %v2772_v52 = vld [vmem:[#allocation14 + $0xaf0] sm:$0xff] }
 0x474   :  { %v14554_v3 = vcombine.low %v2769_v50, %v2772_v52 }
 0x475   :  { %5362 = vmatpush1.bf16.msra.mxu1 %v14512_v56  ;;  %v14555_v56 = vcombine.high %v2769_v50, %v2772_v52  ;;  %v5664_v50 = vld [vmem:[#allocation14 + $0xf18] sm:$0xff] }
 0x476   :  { %7895 = vmatpush1.bf16.msra.mxu0 %v14895_v21  ;;  %5363 = vmatprep.subr.bf16.mxu1 %v14519_v58  ;;  %v14938_v21 = vcombine.high %v5628_v53, %v5631_v35  ;;  %v2775_v58 = vld [vmem:[#allocation14 + $0xb50] sm:$0xff]  ;;  %v5667_v52 = vld [vmem:[#allocation14 + $0xf78] sm:$0xff]  ;;  %v14967_v35 = vcombine.low %v5658_v43, %v5661_v44 }
 0x477   :  { %7896 = vmatprep.subr.bf16.mxu0 %v14902_v0  ;;  %v2778_v0 = vld [vmem:[#allocation14 + $0xbb0] sm:$0xff] }
 0x478   :  { %v14560_v14 = vcombine.low %v2775_v58, %v2778_v0 }
 0x479   :  { %5364 = vmatpush1.bf16.msra.mxu1 %v14518_v5  ;;  %v14561_v5 = vcombine.high %v2775_v58, %v2778_v0  ;;  %v5670_v58 = vld [vmem:[#allocation14 + $0xfd8] sm:$0xff] }
 0x47a   :  { %7897 = vmatpush1.bf16.msra.mxu0 %v14901_v8  ;;  %5365 = vmatprep.subr.bf16.mxu1 %v14525_v9  ;;  %v14944_v8 = vcombine.high %v5634_v1, %v5637_v2  ;;  %v2781_v9 = vld [vmem:[#allocation14 + $0xc10] sm:$0xff]  ;;  %v5673_v0 = vld [vmem:[#allocation14 + $0x1038] sm:$0xff]  ;;  %v14973_v2 = vcombine.low %v5664_v50, %v5667_v52 }
 0x47b   :  { %7898 = vmatprep.subr.bf16.mxu0 %v14908_v11  ;;  %v2784_v11 = vld [vmem:[#allocation14 + $0xc70] sm:$0xff] }
 0x47c   :  { %v14566_v25 = vcombine.low %v2781_v9, %v2784_v11 }
 0x47d   :  { %5366 = vmatpush1.bf16.msra.mxu1 %v14524_v18  ;;  %v14567_v18 = vcombine.high %v2781_v9, %v2784_v11  ;;  %v5676_v9 = vld [vmem:[#allocation14 + $0x1098] sm:$0xff] }
 0x47e   :  { %7899 = vmatpush1.bf16.msra.mxu0 %v14907_v22  ;;  %5367 = vmatprep.subr.bf16.mxu1 %v14531_v42  ;;  %v14950_v22 = vcombine.high %v5640_v12, %v5643_v13  ;;  %v2787_v42 = vld [vmem:[#allocation14 + $0xcd0] sm:$0xff]  ;;  %v5679_v11 = vld [vmem:[#allocation14 + $0x10f8] sm:$0xff]  ;;  %v14979_v13 = vcombine.low %v5670_v58, %v5673_v0 }
 0x47f   :  { %7900 = vmatprep.subr.bf16.mxu0 %v14914_v38  ;;  %v2790_v38 = vld [vmem:[#allocation14 + $0xd30] sm:$0xff] }
 0x480   :  { %v14572_v39 = vcombine.low %v2787_v42, %v2790_v38 }
 0x481   :  { %5368 = vmatpush1.bf16.msra.mxu1 %v14530_v29  ;;  %v14573_v29 = vcombine.high %v2787_v42, %v2790_v38  ;;  %v5682_v42 = vld [vmem:[#allocation14 + $0x1158] sm:$0xff] }
 0x482   :  { %7901 = vmatpush1.bf16.msra.mxu0 %v14913_v30  ;;  %5369 = vmatprep.subr.bf16.mxu1 %v14537_v31  ;;  %v2793_v30 = vld [vmem:[#allocation14 + $0xd90] sm:$0xff]  ;;  %v5685_v38 = vld [vmem:[#allocation14 + $0x11b8] sm:$0xff] }
 0x483   :  { %7902 = vmatprep.subr.bf16.mxu0 %v14920_v32  ;;  %v2796_v31 = vld [vmem:[#allocation14 + $0xdf0] sm:$0xff]  ;;  %v14956_v32 = vcombine.high %v5646_v27, %v5649_v28  ;;  %v14985_v27 = vcombine.low %v5676_v9, %v5679_v11 }
 0x484   :  { %v14578_v45 = vcombine.low %v2793_v30, %v2796_v31 }
 0x485   :  { %5370 = vmatpush1.bf16.msra.mxu1 %v14536_v37  ;;  %v14579_v37 = vcombine.high %v2793_v30, %v2796_v31  ;;  %v2832_v30 = vld [vmem:[#allocation14 + $0x1270] sm:$0xff]  ;;  %v5688_v31 = vld [vmem:[#allocation14 + $0x1218] sm:$0xff] }
 0x486   :  { %7903 = vmatpush1.bf16.msra.mxu0 %v14919_v40  ;;  %5371 = vmatprep.subr.bf16.mxu1 %v14543_v41  ;;  %v14962_v40 = vcombine.high %v5652_v33, %v5655_v34  ;;  %v2799_v41 = vld [vmem:[#allocation14 + $0xe50] sm:$0xff]  ;;  %v14991_v34 = vcombine.low %v5682_v42, %v5685_v38 }
 0x487   :  { %7904 = vmatprep.subr.bf16.mxu0 %v14926_v46  ;;  %v2802_v46 = vld [vmem:[#allocation14 + $0xeb0] sm:$0xff] }
 0x488   :  { %v14584_v53 = vcombine.low %v2799_v41, %v2802_v46 }
 0x489   :  { %5372 = vmatpush1.bf16.msra.mxu1 %v14542_v15  ;;  %v14585_v15 = vcombine.high %v2799_v41, %v2802_v46  ;;  %v5694_v41 = vld [vmem:[#allocation14 + $0x12d8] sm:$0xff] }
 0x48a   :  { %7905 = vmatpush1.bf16.msra.mxu0 %v14925_v63  ;;  %5373 = vmatprep.subr.bf16.mxu1 %v14549_v48  ;;  %v14968_v63 = vcombine.high %v5658_v43, %v5661_v44  ;;  %v2805_v48 = vld [vmem:[#allocation14 + $0xf10] sm:$0xff]  ;;  %v5697_v46 = vld [vmem:[#allocation14 + $0x1338] sm:$0xff] }
 0x48b   :  { %7906 = vmatprep.subr.bf16.mxu0 %v14932_v49  ;;  %v2808_v49 = vld [vmem:[#allocation14 + $0xf70] sm:$0xff] }
 0x48c   :  { %v14590_v1 = vcombine.low %v2805_v48, %v2808_v49 }
 0x48d   :  { %5374 = vmatpush1.bf16.msra.mxu1 %v14548_v54  ;;  %v14591_v54 = vcombine.high %v2805_v48, %v2808_v49  ;;  %v5700_v48 = vld [vmem:[#allocation14 + $0x1398] sm:$0xff] }
 0x48e   :  { %7907 = vmatpush1.bf16.msra.mxu0 %v14931_v55  ;;  %5375 = vmatprep.subr.bf16.mxu1 %v14555_v56  ;;  %v14974_v55 = vcombine.high %v5664_v50, %v5667_v52  ;;  %v2811_v56 = vld [vmem:[#allocation14 + $0xfd0] sm:$0xff]  ;;  %v5703_v49 = vld [vmem:[#allocation14 + $0x13f8] sm:$0xff]  ;;  %v15003_v52 = vcombine.low %v5694_v41, %v5697_v46 }
 0x48f   :  { %7908 = vmatprep.subr.bf16.mxu0 %v14938_v21  ;;  %v2814_v21 = vld [vmem:[#allocation14 + $0x1030] sm:$0xff] }
 0x490   :  { %v14596_v12 = vcombine.low %v2811_v56, %v2814_v21 }
 0x491   :  { %5376 = vmatpush1.bf16.msra.mxu1 %v14554_v3  ;;  %v14597_v3 = vcombine.high %v2811_v56, %v2814_v21  ;;  %v5706_v56 = vld [vmem:[#allocation14 + $0x1458] sm:$0xff] }
 0x492   :  { %7909 = vmatpush1.bf16.msra.mxu0 %v14937_v4  ;;  %5377 = vmatprep.subr.bf16.mxu1 %v14561_v5  ;;  %v14980_v4 = vcombine.high %v5670_v58, %v5673_v0  ;;  %v2817_v5 = vld [vmem:[#allocation14 + $0x1090] sm:$0xff]  ;;  %v5709_v21 = vld [vmem:[#allocation14 + $0x14b8] sm:$0xff]  ;;  %v15009_v0 = vcombine.low %v5700_v48, %v5703_v49 }
 0x493   :  { %7910 = vmatprep.subr.bf16.mxu0 %v14944_v8  ;;  %v2820_v8 = vld [vmem:[#allocation14 + $0x10f0] sm:$0xff] }
 0x495   :  { %5378 = vmatpush1.bf16.msra.mxu1 %v14560_v14  ;;  %v14603_v14 = vcombine.high %v2817_v5, %v2820_v8 }
 0x496   :  { %7911 = vmatpush1.bf16.msra.mxu0 %v14943_v17  ;;  %5388 = vmatprep.subr.bf16.mxu1 %v14567_v18  ;;  %v14986_v17 = vcombine.high %v5676_v9, %v5679_v11  ;;  %v2823_v18 = vld [vmem:[#allocation14 + $0x1150] sm:$0xff]  ;;  %v15015_v11 = vcombine.low %v5706_v56, %v5709_v21 }
 0x497   :  { %7921 = vmatprep.subr.bf16.mxu0 %v14950_v22  ;;  %v2826_v22 = vld [vmem:[#allocation14 + $0x11b0] sm:$0xff] }
 0x498   :  { %5380 = vmatmul.mubr.bf16.vlgmr.msra.gmra.mrb[16].mxu1 %v16887_v61  ;;  %v14609_v28 = vcombine.high %v2823_v18, %v2826_v22  ;;  %v14608_v33 = vcombine.low %v2823_v18, %v2826_v22  ;;  %v5718_v18 = vld [vmem:[#allocation14 + $0x15d8] sm:$0xff] }
 0x499   :  { %7913 = vmatmul.mubr.bf16.vlgmr.msra.gmra.mrb[20].mxu0 %v16887_v61  ;;  %5389 = vmatpush1.bf16.msra.mxu1 %v14566_v25  ;;  %v14602_v25 = vcombine.low %v2817_v5, %v2820_v8  ;;  %v5712_v5 = vld [vmem:[#allocation14 + $0x1518] sm:$0xff] }
 0x49a   :  { %5420 = vmatprep.mubr.bf16.mxu1 %v16891_v6  ;;  %7922 = vmatpush1.bf16.msra.mxu0 %v14949_v59  ;;  %v14992_v59 = vcombine.high %v5682_v42, %v5685_v38  ;;  %v5715_v8 = vld [vmem:[#allocation14 + $0x1578] sm:$0xff] }
 0x49b   :  { %7953 = vmatprep.mubr.bf16.mxu0 %v16891_v6  ;;  %5390 = vmatprep.subr.bf16.mxu1 %v14573_v29  ;;  %v2829_v29 = vld [vmem:[#allocation14 + $0x1210] sm:$0xff]  ;;  %v5721_v22 = vld [vmem:[#allocation14 + $0x1638] sm:$0xff]  ;;  %v15021_v38 = vcombine.low %v5712_v5, %v5715_v8 }
 0x49c   :  { %7923 = vmatprep.subr.bf16.mxu0 %v14956_v32  ;;  %v5691_v32 = vld [vmem:[#allocation14 + $0x1278] sm:$0xff]  ;;  %v14614_v43 = vcombine.low %v2829_v29, %v2832_v30 }
 0x49d   :  { %5391 = vmatpush1.bf16.msra.mxu1 %v14572_v39  ;;  %v14615_v39 = vcombine.high %v2829_v29, %v2832_v30  ;;  %v14997_v44 = vcombine.low %v5688_v31, %v5691_v32  ;;  %v5724_v29 = vld [vmem:[#allocation14 + $0x1698] sm:$0xff] }
 0x49e   :  { %7924 = vmatpush1.bf16.msra.mxu0 %v14955_v36  ;;  %5392 = vmatprep.subr.bf16.mxu1 %v14579_v37  ;;  %v14998_v36 = vcombine.high %v5688_v31, %v5691_v32  ;;  %v2835_v37 = vld [vmem:[#allocation14 + $0x12d0] sm:$0xff]  ;;  %v5727_v30 = vld [vmem:[#allocation14 + $0x16f8] sm:$0xff]  ;;  %v15027_v32 = vcombine.low %v5718_v18, %v5721_v22 }
 0x49f   :  { %7925 = vmatprep.subr.bf16.mxu0 %v14962_v40  ;;  %v2838_v40 = vld [vmem:[#allocation14 + $0x1330] sm:$0xff] }
 0x4a0   :  { %v14620_v50 = vcombine.low %v2835_v37, %v2838_v40 }
 0x4a1   :  { %5393 = vmatpush1.bf16.msra.mxu1 %v14578_v45  ;;  %v14621_v45 = vcombine.high %v2835_v37, %v2838_v40  ;;  %v5730_v37 = vld [vmem:[#allocation14 + $0x1758] sm:$0xff] }
 0x4a2   :  { %7926 = vmatpush1.bf16.msra.mxu0 %v14961_v47  ;;  %5394 = vmatprep.subr.bf16.mxu1 %v14585_v15  ;;  %v15004_v47 = vcombine.high %v5694_v41, %v5697_v46  ;;  %v2841_v15 = vld [vmem:[#allocation14 + $0x1390] sm:$0xff]  ;;  %v5733_v40 = vld [vmem:[#allocation14 + $0x17b8] sm:$0xff]  ;;  %v15033_v46 = vcombine.low %v5724_v29, %v5727_v30 }
 0x4a3   :  { %7927 = vmatprep.subr.bf16.mxu0 %v14968_v63  ;;  %v2844_v63 = vld [vmem:[#allocation14 + $0x13f0] sm:$0xff] }
 0x4a4   :  { %v14626_v58 = vcombine.low %v2841_v15, %v2844_v63 }
 0x4a5   :  { %5395 = vmatpush1.bf16.msra.mxu1 %v14584_v53  ;;  %v14627_v53 = vcombine.high %v2841_v15, %v2844_v63  ;;  %v5736_v15 = vld [vmem:[#allocation14 + $0x1818] sm:$0xff] }
 0x4a6   :  { %7928 = vmatpush1.bf16.msra.mxu0 %v14967_v35  ;;  %5396 = vmatprep.subr.bf16.mxu1 %v14591_v54  ;;  %v15010_v35 = vcombine.high %v5700_v48, %v5703_v49  ;;  %v2847_v54 = vld [vmem:[#allocation14 + $0x1450] sm:$0xff]  ;;  %v5739_v63 = vld [vmem:[#allocation14 + $0x1878] sm:$0xff]  ;;  %v15039_v49 = vcombine.low %v5730_v37, %v5733_v40 }
 0x4a7   :  { %7929 = vmatprep.subr.bf16.mxu0 %v14974_v55  ;;  %v2850_v55 = vld [vmem:[#allocation14 + $0x14b0] sm:$0xff] }
 0x4a8   :  { %v14632_v9 = vcombine.low %v2847_v54, %v2850_v55 }
 0x4a9   :  { %5397 = vmatpush1.bf16.msra.mxu1 %v14590_v1  ;;  %v14633_v1 = vcombine.high %v2847_v54, %v2850_v55  ;;  %v5742_v55 = vld [vmem:[#allocation14 + $0x18d8] sm:$0xff] }
 0x4aa   :  { %7930 = vmatpush1.bf16.msra.mxu0 %v14973_v2  ;;  %5398 = vmatprep.subr.bf16.mxu1 %v14597_v3  ;;  %v15016_v2 = vcombine.high %v5706_v56, %v5709_v21  ;;  %v2853_v3 = vld [vmem:[#allocation14 + $0x1510] sm:$0xff]  ;;  %v5745_v56 = vld [vmem:[#allocation14 + $0x1938] sm:$0xff]  ;;  %v15045_v21 = vcombine.low %v5736_v15, %v5739_v63 }
 0x4ab   :  { %7931 = vmatprep.subr.bf16.mxu0 %v14980_v4  ;;  %v2856_v4 = vld [vmem:[#allocation14 + $0x1570] sm:$0xff] }
 0x4ac   :  { %v14638_v42 = vcombine.low %v2853_v3, %v2856_v4 }
 0x4ad   :  { %5399 = vmatpush1.bf16.msra.mxu1 %v14596_v12  ;;  %v14639_v12 = vcombine.high %v2853_v3, %v2856_v4  ;;  %v5748_v3 = vld [vmem:[#allocation14 + $0x1998] sm:$0xff] }
 0x4ae   :  { %7932 = vmatpush1.bf16.msra.mxu0 %v14979_v13  ;;  %5400 = vmatprep.subr.bf16.mxu1 %v14603_v14  ;;  %v15022_v13 = vcombine.high %v5712_v5, %v5715_v8  ;;  %v2859_v14 = vld [vmem:[#allocation14 + $0x15d0] sm:$0xff]  ;;  %v5751_v4 = vld [vmem:[#allocation14 + $0x19f8] sm:$0xff]  ;;  %v15051_v8 = vcombine.low %v5742_v55, %v5745_v56 }
 0x4af   :  { %7933 = vmatprep.subr.bf16.mxu0 %v14986_v17  ;;  %v2862_v17 = vld [vmem:[#allocation14 + $0x1630] sm:$0xff] }
 0x4b0   :  { %v14644_v31 = vcombine.low %v2859_v14, %v2862_v17 }
 0x4b1   :  { %5401 = vmatpush1.bf16.msra.mxu1 %v14602_v25  ;;  %v14645_v25 = vcombine.high %v2859_v14, %v2862_v17  ;;  %v5754_v14 = vld [vmem:[#allocation14 + $0x1a58] sm:$0xff] }
 0x4b2   :  { %7934 = vmatpush1.bf16.msra.mxu0 %v14985_v27  ;;  %5402 = vmatprep.subr.bf16.mxu1 %v14609_v28  ;;  %v15028_v27 = vcombine.high %v5718_v18, %v5721_v22  ;;  %v2865_v28 = vld [vmem:[#allocation14 + $0x1690] sm:$0xff]  ;;  %v5757_v17 = vld [vmem:[#allocation14 + $0x1ab8] sm:$0xff]  ;;  %v15057_v22 = vcombine.low %v5748_v3, %v5751_v4 }
 0x4b3   :  { %7935 = vmatprep.subr.bf16.mxu0 %v14992_v59  ;;  %v2868_v59 = vld [vmem:[#allocation14 + $0x16f0] sm:$0xff] }
 0x4b4   :  { %v14650_v41 = vcombine.low %v2865_v28, %v2868_v59 }
 0x4b5   :  { %5403 = vmatpush1.bf16.msra.mxu1 %v14608_v33  ;;  %v14651_v33 = vcombine.high %v2865_v28, %v2868_v59  ;;  %v5760_v28 = vld [vmem:[#allocation14 + $0x1b18] sm:$0xff] }
 0x4b6   :  { %7936 = vmatpush1.bf16.msra.mxu0 %v14991_v34  ;;  %5404 = vmatprep.subr.bf16.mxu1 %v14615_v39  ;;  %v15034_v34 = vcombine.high %v5724_v29, %v5727_v30  ;;  %v2871_v39 = vld [vmem:[#allocation14 + $0x1750] sm:$0xff]  ;;  %v5763_v59 = vld [vmem:[#allocation14 + $0x1b78] sm:$0xff]  ;;  %v15063_v30 = vcombine.low %v5754_v14, %v5757_v17 }
 0x4b7   :  { %7937 = vmatprep.subr.bf16.mxu0 %v14998_v36  ;;  %v2874_v36 = vld [vmem:[#allocation14 + $0x17b0] sm:$0xff] }
 0x4b8   :  { %v14656_v48 = vcombine.low %v2871_v39, %v2874_v36 }
 0x4b9   :  { %5405 = vmatpush1.bf16.msra.mxu1 %v14614_v43  ;;  %v14657_v43 = vcombine.high %v2871_v39, %v2874_v36  ;;  %v5766_v39 = vld [vmem:[#allocation14 + $0x1bd8] sm:$0xff] }
 0x4ba   :  { %7938 = vmatpush1.bf16.msra.mxu0 %v14997_v44  ;;  %5406 = vmatprep.subr.bf16.mxu1 %v14621_v45  ;;  %v15040_v44 = vcombine.high %v5730_v37, %v5733_v40  ;;  %v2877_v45 = vld [vmem:[#allocation14 + $0x1810] sm:$0xff]  ;;  %v5769_v36 = vld [vmem:[#allocation14 + $0x1c38] sm:$0xff]  ;;  %v15069_v40 = vcombine.low %v5760_v28, %v5763_v59 }
 0x4bb   :  { %7939 = vmatprep.subr.bf16.mxu0 %v15004_v47  ;;  %v2880_v47 = vld [vmem:[#allocation14 + $0x1870] sm:$0xff] }
 0x4bc   :  { %v14662_v54 = vcombine.low %v2877_v45, %v2880_v47 }
 0x4bd   :  { %5407 = vmatpush1.bf16.msra.mxu1 %v14620_v50  ;;  %v14663_v50 = vcombine.high %v2877_v45, %v2880_v47  ;;  %v5772_v45 = vld [vmem:[#allocation14 + $0x1c98] sm:$0xff] }
 0x4be   :  { %7940 = vmatpush1.bf16.msra.mxu0 %v15003_v52  ;;  %5408 = vmatprep.subr.bf16.mxu1 %v14627_v53  ;;  %v15046_v52 = vcombine.high %v5736_v15, %v5739_v63  ;;  %v2883_v53 = vld [vmem:[#allocation14 + $0x18d0] sm:$0xff]  ;;  %v5775_v47 = vld [vmem:[#allocation14 + $0x1cf8] sm:$0xff]  ;;  %v15075_v63 = vcombine.low %v5766_v39, %v5769_v36 }
 0x4bf   :  { %7941 = vmatprep.subr.bf16.mxu0 %v15010_v35  ;;  %v2886_v35 = vld [vmem:[#allocation14 + $0x1930] sm:$0xff] }
 0x4c0   :  { %v14668_v5 = vcombine.low %v2883_v53, %v2886_v35 }
 0x4c1   :  { %5409 = vmatpush1.bf16.msra.mxu1 %v14626_v58  ;;  %v14669_v58 = vcombine.high %v2883_v53, %v2886_v35  ;;  %v5778_v53 = vld [vmem:[#allocation14 + $0x1d58] sm:$0xff] }
 0x4c2   :  { %7942 = vmatpush1.bf16.msra.mxu0 %v15009_v0  ;;  %5410 = vmatprep.subr.bf16.mxu1 %v14633_v1  ;;  %v2889_v0 = vld [vmem:[#allocation14 + $0x1990] sm:$0xff]  ;;  %v5781_v35 = vld [vmem:[#allocation14 + $0x1db8] sm:$0xff] }
 0x4c3   :  { %7943 = vmatprep.subr.bf16.mxu0 %v15016_v2  ;;  %v2892_v1 = vld [vmem:[#allocation14 + $0x19f0] sm:$0xff]  ;;  %v15052_v2 = vcombine.high %v5742_v55, %v5745_v56  ;;  %v15081_v55 = vcombine.low %v5772_v45, %v5775_v47 }
 0x4c4   :  { %v14674_v18 = vcombine.low %v2889_v0, %v2892_v1 }
 0x4c5   :  { %5411 = vmatpush1.bf16.msra.mxu1 %v14632_v9  ;;  %v14675_v9 = vcombine.high %v2889_v0, %v2892_v1  ;;  %v2928_v0 = vld [vmem:[#allocation14 + $0x1e70] sm:$0xff]  ;;  %v5784_v1 = vld [vmem:[#allocation14 + $0x1e18] sm:$0xff] }
 0x4c6   :  { %7944 = vmatpush1.bf16.msra.mxu0 %v15015_v11  ;;  %5412 = vmatprep.subr.bf16.mxu1 %v14639_v12  ;;  %v15058_v11 = vcombine.high %v5748_v3, %v5751_v4  ;;  %v2895_v12 = vld [vmem:[#allocation14 + $0x1a50] sm:$0xff]  ;;  %v15087_v4 = vcombine.low %v5778_v53, %v5781_v35 }
 0x4c7   :  { %7945 = vmatprep.subr.bf16.mxu0 %v15022_v13  ;;  %v2898_v13 = vld [vmem:[#allocation14 + $0x1ab0] sm:$0xff] }
 0x4c8   :  { %v14680_v29 = vcombine.low %v2895_v12, %v2898_v13 }
 0x4c9   :  { %5413 = vmatpush1.bf16.msra.mxu1 %v14638_v42  ;;  %v14681_v42 = vcombine.high %v2895_v12, %v2898_v13  ;;  %v5790_v12 = vld [vmem:[#allocation14 + $0x1ed8] sm:$0xff] }
 0x4ca   :  { %7946 = vmatpush1.bf16.msra.mxu0 %v15021_v38  ;;  %5414 = vmatprep.subr.bf16.mxu1 %v14645_v25  ;;  %v15064_v38 = vcombine.high %v5754_v14, %v5757_v17  ;;  %v2901_v25 = vld [vmem:[#allocation14 + $0x1b10] sm:$0xff]  ;;  %v5793_v13 = vld [vmem:[#allocation14 + $0x1f38] sm:$0xff] }
 0x4cb   :  { %7947 = vmatprep.subr.bf16.mxu0 %v15028_v27  ;;  %v2904_v27 = vld [vmem:[#allocation14 + $0x1b70] sm:$0xff] }
 0x4cc   :  { %v14686_v37 = vcombine.low %v2901_v25, %v2904_v27 }
 0x4cd   :  { %5415 = vmatpush1.bf16.msra.mxu1 %v14644_v31  ;;  %v14687_v31 = vcombine.high %v2901_v25, %v2904_v27  ;;  %v5796_v25 = vld [vmem:[#allocation14 + $0x1f98] sm:$0xff] }
 0x4ce   :  { %7948 = vmatpush1.bf16.msra.mxu0 %v15027_v32  ;;  %5416 = vmatprep.subr.bf16.mxu1 %v14651_v33  ;;  %v15070_v32 = vcombine.high %v5760_v28, %v5763_v59  ;;  %v2907_v33 = vld [vmem:[#allocation14 + $0x1bd0] sm:$0xff]  ;;  %v5799_v27 = vld [vmem:[#allocation14 + $0x1ff8] sm:$0xff]  ;;  %v15099_v59 = vcombine.low %v5790_v12, %v5793_v13 }
 0x4cf   :  { %7949 = vmatprep.subr.bf16.mxu0 %v15034_v34  ;;  %v2910_v34 = vld [vmem:[#allocation14 + $0x1c30] sm:$0xff] }
 0x4d0   :  { %v14692_v15 = vcombine.low %v2907_v33, %v2910_v34 }
 0x4d1   :  { %5417 = vmatpush1.bf16.msra.mxu1 %v14650_v41  ;;  %v14693_v41 = vcombine.high %v2907_v33, %v2910_v34  ;;  %v5802_v33 = vld [vmem:[#allocation14 + $0x2058] sm:$0xff] }
 0x4d2   :  { %7950 = vmatpush1.bf16.msra.mxu0 %v15033_v46  ;;  %5418 = vmatprep.subr.bf16.mxu1 %v14657_v43  ;;  %v15076_v46 = vcombine.high %v5766_v39, %v5769_v36  ;;  %v2913_v43 = vld [vmem:[#allocation14 + $0x1c90] sm:$0xff]  ;;  %v5805_v34 = vld [vmem:[#allocation14 + $0x20b8] sm:$0xff]  ;;  %v15105_v36 = vcombine.low %v5796_v25, %v5799_v27 }
 0x4d3   :  { %7951 = vmatprep.subr.bf16.mxu0 %v15040_v44  ;;  %v2916_v44 = vld [vmem:[#allocation14 + $0x1cf0] sm:$0xff] }
 0x4d5   :  { %5419 = vmatpush1.bf16.msra.mxu1 %v14656_v48  ;;  %v14699_v48 = vcombine.high %v2913_v43, %v2916_v44 }
 0x4d6   :  { %7952 = vmatpush1.bf16.msra.mxu0 %v15039_v49  ;;  %5429 = vmatprep.subr.bf16.mxu1 %v14663_v50  ;;  %v15082_v49 = vcombine.high %v5772_v45, %v5775_v47  ;;  %v2919_v50 = vld [vmem:[#allocation14 + $0x1d50] sm:$0xff]  ;;  %v15111_v47 = vcombine.low %v5802_v33, %v5805_v34 }
 0x4d7   :  { %7962 = vmatprep.subr.bf16.mxu0 %v15046_v52  ;;  %v2922_v52 = vld [vmem:[#allocation14 + $0x1db0] sm:$0xff] }
 0x4d8   :  { %5421 = vmatmul.mubr.bf16.vlgmr.msra.gmra.mrb[16].mxu1 %v16900_v26  ;;  %v14705_v56 = vcombine.high %v2919_v50, %v2922_v52  ;;  %v14704_v3 = vcombine.low %v2919_v50, %v2922_v52  ;;  %v5814_v50 = vld [vmem:[#allocation14 + $0x21d8] sm:$0xff] }
 0x4d9   :  { %7954 = vmatmul.mubr.bf16.vlgmr.msra.gmra.mrb[20].mxu0 %v16900_v26  ;;  %5430 = vmatpush1.bf16.msra.mxu1 %v14662_v54  ;;  %v14698_v54 = vcombine.low %v2913_v43, %v2916_v44  ;;  %v5808_v43 = vld [vmem:[#allocation14 + $0x2118] sm:$0xff] }
 0x4da   :  { %5461 = vmatprep.mubr.bf16.mxu1 %v16918_v7  ;;  %7963 = vmatpush1.bf16.msra.mxu0 %v15045_v21  ;;  %v15088_v21 = vcombine.high %v5778_v53, %v5781_v35  ;;  %v5811_v44 = vld [vmem:[#allocation14 + $0x2178] sm:$0xff] }
 0x4db   :  { %7994 = vmatprep.mubr.bf16.mxu0 %v16918_v7  ;;  %5431 = vmatprep.subr.bf16.mxu1 %v14669_v58  ;;  %v2925_v58 = vld [vmem:[#allocation14 + $0x1e10] sm:$0xff]  ;;  %v5817_v52 = vld [vmem:[#allocation14 + $0x2238] sm:$0xff]  ;;  %v15117_v35 = vcombine.low %v5808_v43, %v5811_v44 }
 0x4dc   :  { %7964 = vmatprep.subr.bf16.mxu0 %v15052_v2  ;;  %v5787_v2 = vld [vmem:[#allocation14 + $0x1e78] sm:$0xff]  ;;  %v14710_v14 = vcombine.low %v2925_v58, %v2928_v0 }
 0x4dd   :  { %5432 = vmatpush1.bf16.msra.mxu1 %v14668_v5  ;;  %v14711_v5 = vcombine.high %v2925_v58, %v2928_v0  ;;  %v15093_v17 = vcombine.low %v5784_v1, %v5787_v2  ;;  %v5820_v58 = vld [vmem:[#allocation14 + $0x2298] sm:$0xff] }
 0x4de   :  { %7965 = vmatpush1.bf16.msra.mxu0 %v15051_v8  ;;  %5433 = vmatprep.subr.bf16.mxu1 %v14675_v9  ;;  %v15094_v8 = vcombine.high %v5784_v1, %v5787_v2  ;;  %v2931_v9 = vld [vmem:[#allocation14 + $0x1ed0] sm:$0xff]  ;;  %v5823_v0 = vld [vmem:[#allocation14 + $0x22f8] sm:$0xff]  ;;  %v15123_v2 = vcombine.low %v5814_v50, %v5817_v52 }
 0x4df   :  { %7966 = vmatprep.subr.bf16.mxu0 %v15058_v11  ;;  %v2934_v11 = vld [vmem:[#allocation14 + $0x1f30] sm:$0xff] }
 0x4e0   :  { %v14716_v28 = vcombine.low %v2931_v9, %v2934_v11 }
 0x4e1   :  { %5434 = vmatpush1.bf16.msra.mxu1 %v14674_v18  ;;  %v14717_v18 = vcombine.high %v2931_v9, %v2934_v11  ;;  %v5826_v9 = vld [vmem:[#allocation14 + $0x2358] sm:$0xff] }
 0x4e2   :  { %7967 = vmatpush1.bf16.msra.mxu0 %v15057_v22  ;;  %5435 = vmatprep.subr.bf16.mxu1 %v14681_v42  ;;  %v15100_v22 = vcombine.high %v5790_v12, %v5793_v13  ;;  %v2937_v42 = vld [vmem:[#allocation14 + $0x1f90] sm:$0xff]  ;;  %v5829_v11 = vld [vmem:[#allocation14 + $0x23b8] sm:$0xff]  ;;  %v15129_v13 = vcombine.low %v5820_v58, %v5823_v0 }
 0x4e3   :  { %7968 = vmatprep.subr.bf16.mxu0 %v15064_v38  ;;  %v2940_v38 = vld [vmem:[#allocation14 + $0x1ff0] sm:$0xff] }
 0x4e4   :  { %v14722_v39 = vcombine.low %v2937_v42, %v2940_v38 }
 0x4e5   :  { %5436 = vmatpush1.bf16.msra.mxu1 %v14680_v29  ;;  %v14723_v29 = vcombine.high %v2937_v42, %v2940_v38  ;;  %v5832_v42 = vld [vmem:[#allocation14 + $0x2418] sm:$0xff] }
 0x4e6   :  { %7969 = vmatpush1.bf16.msra.mxu0 %v15063_v30  ;;  %5437 = vmatprep.subr.bf16.mxu1 %v14687_v31  ;;  %v15106_v30 = vcombine.high %v5796_v25, %v5799_v27  ;;  %v2943_v31 = vld [vmem:[#allocation14 + $0x2050] sm:$0xff]  ;;  %v5835_v38 = vld [vmem:[#allocation14 + $0x2478] sm:$0xff]  ;;  %v15135_v27 = vcombine.low %v5826_v9, %v5829_v11 }
 0x4e7   :  { %7970 = vmatprep.subr.bf16.mxu0 %v15070_v32  ;;  %v2946_v32 = vld [vmem:[#allocation14 + $0x20b0] sm:$0xff] }
 0x4e8   :  { %v14728_v45 = vcombine.low %v2943_v31, %v2946_v32 }
 0x4e9   :  { %5438 = vmatpush1.bf16.msra.mxu1 %v14686_v37  ;;  %v14729_v37 = vcombine.high %v2943_v31, %v2946_v32  ;;  %v5838_v32 = vld [vmem:[#allocation14 + $0x24d8] sm:$0xff] }
 0x4ea   :  { %7971 = vmatpush1.bf16.msra.mxu0 %v15069_v40  ;;  %5439 = vmatprep.subr.bf16.mxu1 %v14693_v41  ;;  %v15112_v40 = vcombine.high %v5802_v33, %v5805_v34  ;;  %v2949_v41 = vld [vmem:[#allocation14 + $0x2110] sm:$0xff]  ;;  %v5841_v33 = vld [vmem:[#allocation14 + $0x2538] sm:$0xff]  ;;  %v15141_v34 = vcombine.low %v5832_v42, %v5835_v38 }
 0x4eb   :  { %7972 = vmatprep.subr.bf16.mxu0 %v15076_v46  ;;  %v2952_v46 = vld [vmem:[#allocation14 + $0x2170] sm:$0xff] }
 0x4ec   :  { %v14734_v53 = vcombine.low %v2949_v41, %v2952_v46 }
 0x4ed   :  { %5440 = vmatpush1.bf16.msra.mxu1 %v14692_v15  ;;  %v14735_v15 = vcombine.high %v2949_v41, %v2952_v46  ;;  %v5844_v41 = vld [vmem:[#allocation14 + $0x2598] sm:$0xff] }
 0x4ee   :  { %7973 = vmatpush1.bf16.msra.mxu0 %v15075_v63  ;;  %5441 = vmatprep.subr.bf16.mxu1 %v14699_v48  ;;  %v15118_v63 = vcombine.high %v5808_v43, %v5811_v44  ;;  %v2955_v48 = vld [vmem:[#allocation14 + $0x21d0] sm:$0xff]  ;;  %v5847_v46 = vld [vmem:[#allocation14 + $0x25f8] sm:$0xff]  ;;  %v15147_v44 = vcombine.low %v5838_v32, %v5841_v33 }
 0x4ef   :  { %7974 = vmatprep.subr.bf16.mxu0 %v15082_v49  ;;  %v2958_v49 = vld [vmem:[#allocation14 + $0x2230] sm:$0xff] }
 0x4f0   :  { %v14740_v1 = vcombine.low %v2955_v48, %v2958_v49 }
 0x4f1   :  { %5442 = vmatpush1.bf16.msra.mxu1 %v14698_v54  ;;  %v14741_v54 = vcombine.high %v2955_v48, %v2958_v49  ;;  %v5850_v48 = vld [vmem:[#allocation14 + $0x2658] sm:$0xff] }
 0x4f2   :  { %7975 = vmatpush1.bf16.msra.mxu0 %v15081_v55  ;;  %5443 = vmatprep.subr.bf16.mxu1 %v14705_v56  ;;  %v15124_v55 = vcombine.high %v5814_v50, %v5817_v52  ;;  %v2961_v56 = vld [vmem:[#allocation14 + $0x2290] sm:$0xff]  ;;  %v5853_v49 = vld [vmem:[#allocation14 + $0x26b8] sm:$0xff]  ;;  %v15153_v52 = vcombine.low %v5844_v41, %v5847_v46 }
 0x4f3   :  { %7976 = vmatprep.subr.bf16.mxu0 %v15088_v21  ;;  %v2964_v21 = vld [vmem:[#allocation14 + $0x22f0] sm:$0xff] }
 0x4f4   :  { %v14746_v12 = vcombine.low %v2961_v56, %v2964_v21 }
 0x4f5   :  { %5444 = vmatpush1.bf16.msra.mxu1 %v14704_v3  ;;  %v14747_v3 = vcombine.high %v2961_v56, %v2964_v21  ;;  %v5856_v56 = vld [vmem:[#allocation14 + $0x2718] sm:$0xff] }
 0x4f6   :  { %7977 = vmatpush1.bf16.msra.mxu0 %v15087_v4  ;;  %5445 = vmatprep.subr.bf16.mxu1 %v14711_v5  ;;  %v15130_v4 = vcombine.high %v5820_v58, %v5823_v0  ;;  %v2967_v5 = vld [vmem:[#allocation14 + $0x2350] sm:$0xff]  ;;  %v5859_v21 = vld [vmem:[#allocation14 + $0x2778] sm:$0xff]  ;;  %v15159_v0 = vcombine.low %v5850_v48, %v5853_v49 }
 0x4f7   :  { %7978 = vmatprep.subr.bf16.mxu0 %v15094_v8  ;;  %v2970_v8 = vld [vmem:[#allocation14 + $0x23b0] sm:$0xff] }
 0x4f8   :  { %v14752_v25 = vcombine.low %v2967_v5, %v2970_v8 }
 0x4f9   :  { %5446 = vmatpush1.bf16.msra.mxu1 %v14710_v14  ;;  %v14753_v14 = vcombine.high %v2967_v5, %v2970_v8  ;;  %v5862_v5 = vld [vmem:[#allocation14 + $0x27d8] sm:$0xff] }
 0x4fa   :  { %7979 = vmatpush1.bf16.msra.mxu0 %v15093_v17  ;;  %5447 = vmatprep.subr.bf16.mxu1 %v14717_v18  ;;  %v15136_v17 = vcombine.high %v5826_v9, %v5829_v11  ;;  %v2973_v18 = vld [vmem:[#allocation14 + $0x2410] sm:$0xff]  ;;  %v5865_v8 = vld [vmem:[#allocation14 + $0x2838] sm:$0xff]  ;;  %v3067_v11 = vld [vmem:[#allocation16] sm:$0x3f] }
 0x4fb   :  { %7980 = vmatprep.subr.bf16.mxu0 %v15100_v22  ;;  %v2976_v22 = vld [vmem:[#allocation14 + $0x2470] sm:$0xff] }
 0x4fc   :  { %v14758_v31 = vcombine.low %v2973_v18, %v2976_v22 }
 0x4fd   :  { %5448 = vmatpush1.bf16.msra.mxu1 %v14716_v28  ;;  %v14759_v28 = vcombine.high %v2973_v18, %v2976_v22  ;;  %v3012_v18 = vld [vmem:[#allocation14 + $0x28f0] sm:$0xff]  ;;  %v3072_v22 = vrot.slane %v3067_v11, %v16825_v60 }
 0x4fe   :  { %7981 = vmatpush1.bf16.msra.mxu0 %v15099_v59  ;;  %5449 = vmatprep.subr.bf16.mxu1 %v14723_v29  ;;  %v15142_v59 = vcombine.high %v5832_v42, %v5835_v38  ;;  %v2979_v29 = vld [vmem:[#allocation14 + $0x24d0] sm:$0xff]  ;;  %v3080_v42 = vrot.slane %v3067_v11, %v16858_v24  ;;  %v5868_v38 = vld [vmem:[#allocation14 + $0x2898] sm:$0xff] }
 0x4ff   :  { %7982 = vmatprep.subr.bf16.mxu0 %v15106_v30  ;;  %v2982_v30 = vld [vmem:[#allocation14 + $0x2530] sm:$0xff] }
 0x500   :  { %v14764_v43 = vcombine.low %v2979_v29, %v2982_v30 }
 0x501   :  { %5450 = vmatpush1.bf16.msra.mxu1 %v14722_v39  ;;  %v14765_v39 = vcombine.high %v2979_v29, %v2982_v30  ;;  %v15171_v29 = vcombine.low %v5862_v5, %v5865_v8 }
 0x502   :  { %7983 = vmatpush1.bf16.msra.mxu0 %v15105_v36  ;;  %5451 = vmatprep.subr.bf16.mxu1 %v14729_v37  ;;  %v2985_v36 = vld [vmem:[#allocation14 + $0x2590] sm:$0xff] }
 0x503   :  { %7984 = vmatprep.subr.bf16.mxu0 %v15112_v40  ;;  %v2988_v37 = vld [vmem:[#allocation14 + $0x25f0] sm:$0xff]  ;;  %v15148_v40 = vcombine.high %v5838_v32, %v5841_v33 }
 0x504   :  { %v14770_v50 = vcombine.low %v2985_v36, %v2988_v37 }
 0x505   :  { %5452 = vmatpush1.bf16.msra.mxu1 %v14728_v45  ;;  %v14771_v45 = vcombine.high %v2985_v36, %v2988_v37 }
 0x506   :  { %7985 = vmatpush1.bf16.msra.mxu0 %v15111_v47  ;;  %5453 = vmatprep.subr.bf16.mxu1 %v14735_v15  ;;  %v15154_v47 = vcombine.high %v5844_v41, %v5847_v46  ;;  %v2991_v15 = vld [vmem:[#allocation14 + $0x2650] sm:$0xff]  ;;  %v5874_v46 = vld [vmem:[#allocation14 + $0x2958] sm:$0xff] }
 0x507   :  { %7986 = vmatprep.subr.bf16.mxu0 %v15118_v63  ;;  %v2994_v63 = vld [vmem:[#allocation14 + $0x26b0] sm:$0xff] }
 0x508   :  { %v14776_v58 = vcombine.low %v2991_v15, %v2994_v63 }
 0x509   :  { %5454 = vmatpush1.bf16.msra.mxu1 %v14734_v53  ;;  %v14777_v53 = vcombine.high %v2991_v15, %v2994_v63 }
 0x50a   :  { %7987 = vmatpush1.bf16.msra.mxu0 %v15117_v35  ;;  %5455 = vmatprep.subr.bf16.mxu1 %v14741_v54  ;;  %v15160_v35 = vcombine.high %v5850_v48, %v5853_v49  ;;  %v2997_v54 = vld [vmem:[#allocation14 + $0x2710] sm:$0xff] }
 0x50b   :  { %7988 = vmatprep.subr.bf16.mxu0 %v15124_v55  ;;  %v3000_v55 = vld [vmem:[#allocation14 + $0x2770] sm:$0xff] }
 0x50c   :  { %v14782_v9 = vcombine.low %v2997_v54, %v3000_v55 }
 0x50d   :  { %5456 = vmatpush1.bf16.msra.mxu1 %v14740_v1  ;;  %v14783_v1 = vcombine.high %v2997_v54, %v3000_v55  ;;  %v3024_v54 = vld [vmem:[#allocation14 + $0x2a70] sm:$0xff]  ;;  %v5880_v55 = vld [vmem:[#allocation14 + $0x2a18] sm:$0xff] }
 0x50e   :  { %7989 = vmatpush1.bf16.msra.mxu0 %v15123_v2  ;;  %5457 = vmatprep.subr.bf16.mxu1 %v14747_v3  ;;  %v15166_v2 = vcombine.high %v5856_v56, %v5859_v21  ;;  %v3003_v3 = vld [vmem:[#allocation14 + $0x27d0] sm:$0xff] }
 0x50f   :  { %7990 = vmatprep.subr.bf16.mxu0 %v15130_v4  ;;  %v3006_v4 = vld [vmem:[#allocation14 + $0x2830] sm:$0xff] }
 0x511   :  { %5458 = vmatpush1.bf16.msra.mxu1 %v14746_v12  ;;  %v15165_v12 = vcombine.low %v5856_v56, %v5859_v21  ;;  %v5883_v56 = vld [vmem:[#allocation14 + $0x2a78] sm:$0xff] }
 0x512   :  { %7991 = vmatpush1.bf16.msra.mxu0 %v15129_v13  ;;  %5459 = vmatprep.subr.bf16.mxu1 %v14753_v14  ;;  %v14789_v13 = vcombine.high %v3003_v3, %v3006_v4  ;;  %v15172_v14 = vcombine.high %v5862_v5, %v5865_v8  ;;  %v5889_v5 = vld [vmem:[#allocation14 + $0x2b38] sm:$0xff] }
 0x513   :  { %7992 = vmatprep.subr.bf16.mxu0 %v15136_v17  ;;  %v3009_v17 = vld [vmem:[#allocation14 + $0x2890] sm:$0xff] }
 0x514   :  { %v14795_v30 = vcombine.high %v3009_v17, %v3012_v18  ;;  %v14794_v63 = vcombine.low %v3009_v17, %v3012_v18  ;;  %v5892_v18 = vld [vmem:[#allocation14 + $0x2b98] sm:$0xff] }
 0x515   :  { %5460 = vmatpush1.bf16.msra.mxu1 %v14752_v25  ;;  %v5871_v25 = vld [vmem:[#allocation14 + $0x28f8] sm:$0xff] }
 0x516   :  { %7993 = vmatpush1.bf16.msra.mxu0 %v15135_v27  ;;  %5470 = vmatprep.subr.bf16.mxu1 %v14759_v28  ;;  %v3076_v27 = vrot.slane %v3067_v11, %v16828_v62  ;;  %v3084_v28 = vrot.slane %v3067_v11, %v16835_v16  ;;  %v15178_v33 = vcombine.high %v5868_v38, %v5871_v25 }
 0x517   :  { %8003 = vmatprep.subr.bf16.mxu0 %v15142_v59  ;;  %v14788_v59 = vcombine.low %v3003_v3, %v3006_v4  ;;  %v3030_v3 = vld [vmem:[#allocation14 + $0x2b30] sm:$0xff]  ;;  %v5886_v4 = vld [vmem:[#allocation14 + $0x2ad8] sm:$0xff] }
 0x518   :  { %5462 = vmatmul.mubr.bf16.vlgmr.msra.gmra.mrb[16].mxu1 %v16920_v10 }
 0x519   :  { %7995 = vmatmul.mubr.bf16.vlgmr.msra.gmra.mrb[20].mxu0 %v16920_v10  ;;  %5471 = vmatpush1.bf16.msra.mxu1 %v14758_v31 }
 0x51a   :  { %5502 = vmatprep.mubr.bf16.mxu1 %v16924_v19  ;;  %8004 = vmatpush1.bf16.msra.mxu0 %v15141_v34  ;;  %v3015_v34 = vld [vmem:[#allocation14 + $0x2950] sm:$0xff] }
 0x51b   :  { %8035 = vmatprep.mubr.bf16.mxu0 %v16924_v19  ;;  %5472 = vmatprep.subr.bf16.mxu1 %v14765_v39  ;;  %v3018_v39 = vld [vmem:[#allocation14 + $0x29b0] sm:$0xff] }
 0x51c   :  { %8005 = vmatprep.subr.bf16.mxu0 %v15148_v40  ;;  %v14800_v21 = vcombine.low %v3015_v34, %v3018_v39 }
 0x51d   :  { %5473 = vmatpush1.bf16.msra.mxu1 %v14764_v43  ;;  %v5877_v43 = vld [vmem:[#allocation14 + $0x29b8] sm:$0xff] }
 0x51e   :  { %8006 = vmatpush1.bf16.msra.mxu0 %v15147_v44  ;;  %5474 = vmatprep.subr.bf16.mxu1 %v14771_v45 }
 0x51f   :  { %8007 = vmatprep.subr.bf16.mxu0 %v15154_v47 }
 0x521   :  { %5475 = vmatpush1.bf16.msra.mxu1 %v14770_v50  ;;  %v15177_v50 = vcombine.low %v5868_v38, %v5871_v25 }
 0x522   :  { %8008 = vmatpush1.bf16.msra.mxu0 %v15153_v52  ;;  %5476 = vmatprep.subr.bf16.mxu1 %v14777_v53  ;;  %v14801_v52 = vcombine.high %v3015_v34, %v3018_v39  ;;  %v15184_v53 = vcombine.high %v5874_v46, %v5877_v43  ;;  %v5898_v34 = vld [vmem:[#allocation14 + $0x2c58] sm:$0xff] }
 0x523   :  { %8009 = vmatprep.subr.bf16.mxu0 %v15160_v35  ;;  %v3021_v35 = vld [vmem:[#allocation14 + $0x2a10] sm:$0xff]  ;;  %v5901_v39 = vld [vmem:[#allocation14 + $0x2cb8] sm:$0xff] }
 0x524   :  { %v14806_v8 = vcombine.low %v3021_v35, %v3024_v54 }
 0x525   :  { %5477 = vmatpush1.bf16.msra.mxu1 %v14776_v58  ;;  %v15183_v58 = vcombine.low %v5874_v46, %v5877_v43  ;;  %v3045_v46 = vld [vmem:[#allocation14 + $0x2d10] sm:$0xff] }
 0x526   :  { %8010 = vmatpush1.bf16.msra.mxu0 %v15159_v0  ;;  %5478 = vmatprep.subr.bf16.mxu1 %v14783_v1  ;;  %v14807_v0 = vcombine.high %v3021_v35, %v3024_v54  ;;  %v15190_v1 = vcombine.high %v5880_v55, %v5883_v56  ;;  %v3048_v43 = vld [vmem:[#allocation14 + $0x2d70] sm:$0xff] }
 0x527   :  { %8011 = vmatprep.subr.bf16.mxu0 %v15166_v2  ;;  %v3027_v2 = vld [vmem:[#allocation14 + $0x2ad0] sm:$0xff]  ;;  %v14830_v35 = vcombine.low %v3045_v46, %v3048_v43 }
 0x528   :  { %v14813_v11 = vcombine.high %v3027_v2, %v3030_v3  ;;  %v14812_v38 = vcombine.low %v3027_v2, %v3030_v3 }
 0x529   :  { %5479 = vmatpush1.bf16.msra.mxu1 %v14782_v9  ;;  %v15189_v9 = vcombine.low %v5880_v55, %v5883_v56 }
 0x52a   :  { %8012 = vmatpush1.bf16.msra.mxu0 %v15165_v12  ;;  %5480 = vmatprep.subr.bf16.mxu1 %v14789_v13  ;;  %v15196_v12 = vcombine.high %v5886_v4, %v5889_v5  ;;  %v3033_v13 = vld [vmem:[#allocation14 + $0x2b90] sm:$0xff] }
 0x52b   :  { %v5176_v31 = vpop.f32.mrb[12].mxu1  ;;  %v5340_v32 = vpop.f32.mrb[16].mxu0  ;;  %8013 = vmatprep.subr.bf16.mxu0 %v15172_v14  ;;  %v3036_v14 = vld [vmem:[#allocation14 + $0x2bf0] sm:$0xff] }
 0x52c   :  { %v16066_v36 = vadd.f32 %v5176_v31, %v3072_v22  ;;  %v16068_v37 = vadd.f32 %v5340_v32, %v3080_v42  ;;  %v5178_v40 = vpop.f32.mrb[13].mxu1  ;;  %v5342_v41 = vpop.f32.mrb[17].mxu0  ;;  %v5895_v22 = vld [vmem:[#allocation14 + $0x2bf8] sm:$0xff]  ;;  %v3039_v31 = vld [vmem:[#allocation14 + $0x2c50] sm:$0xff] }
 0x52d   :  { %v16067_v44 = vadd.f32 %v5178_v40, %v3076_v27  ;;  %v16069_v45 = vadd.f32 %v5342_v41, %v3084_v28  ;;  %v5180_v47 = vpop.f32.mrb[14].mxu1  ;;  %v5344_v15 = vpop.f32.mrb[18].mxu0  ;;  %5481 = vmatpush1.bf16.msra.mxu1 %v14788_v59  ;;  %v15195_v27 = vcombine.low %v5886_v4, %v5889_v5  ;;  %v14819_v28 = vcombine.high %v3033_v13, %v3036_v14  ;;  %v3042_v32 = vld [vmem:[#allocation14 + $0x2cb0] sm:$0xff] }
 0x52e   :  { %16363 = vtanh.f32 %v16066_v36  ;;  %8014 = vmatpush1.bf16.msra.mxu0 %v15171_v29  ;;  %v5181_v48 = vpop.f32.mrb[15].mxu1  ;;  %v5345_v49 = vpop.f32.mrb[19].mxu0  ;;  %5482 = vmatprep.subr.bf16.mxu1 %v14795_v30  ;;  %v15202_v30 = vcombine.high %v5892_v18, %v5895_v22  ;;  %v14818_v36 = vcombine.low %v3033_v13, %v3036_v14  ;;  %v14825_v40 = vcombine.high %v3039_v31, %v3042_v32 }
 0x52f   :  { %16365 = vtanh.f32 %v16068_v37  ;;  %8015 = vmatprep.subr.bf16.mxu0 %v15178_v33  ;;  %v15201_v37 = vcombine.low %v5892_v18, %v5895_v22  ;;  %v15208_v41 = vcombine.high %v5898_v34, %v5901_v39  ;;  %v14824_v47 = vcombine.low %v3039_v31, %v3042_v32  ;;  %v3051_v49 = vld [vmem:[#allocation14 + $0x2dd0] sm:$0xff]  ;;  %v5545_v22 = vld [vmem:[#allocation14 + $0x20] sm:$0xff] }
 0x530   :  { %16367 = vtanh.f32 %v16067_v44  ;;  %v5904_v44 = vld [vmem:[#allocation14 + $0x2d18] sm:$0xff]  ;;  %v15207_v15 = vcombine.low %v5898_v34, %v5901_v39  ;;  %v5554_v31 = vld [vmem:[#allocation14 + $0x140] sm:$0xff]  ;;  %v5555_v34 = vld [vmem:[#allocation14 + $0x148] sm:$0xff] }
 0x531   :  { %16369 = vtanh.f32 %v16069_v45  ;;  %5483 = vmatpush1.bf16.msra.mxu1 %v14794_v63  ;;  %v5907_v45 = vld [vmem:[#allocation14 + $0x2d78] sm:$0xff]  ;;  %v14831_v63 = vcombine.high %v3045_v46, %v3048_v43  ;;  %v5558_v46 = vld [vmem:[#allocation14 + $0x1a8] sm:$0xff] }
 0x532   :  { %8016 = vmatpush1.bf16.msra.mxu0 %v15177_v50  ;;  %5484 = vmatprep.subr.bf16.mxu1 %v14801_v52  ;;  %v15214_v48 = vcombine.high %v5904_v44, %v5907_v45  ;;  %v3054_v50 = vld [vmem:[#allocation14 + $0x2e30] sm:$0xff]  ;;  %v5910_v52 = vld [vmem:[#allocation14 + $0x2dd8] sm:$0xff]  ;;  %v15213_v54 = vcombine.low %v5904_v44, %v5907_v45  ;;  %v5561_v43 = vld [vmem:[#allocation14 + $0x208] sm:$0xff] }
 0x533   :  { %8017 = vmatprep.subr.bf16.mxu0 %v15184_v53  ;;  %v5913_v53 = vld [vmem:[#allocation14 + $0x2e38] sm:$0xff]  ;;  %v14837_v55 = vcombine.high %v3051_v49, %v3054_v50  ;;  %v14836_v2 = vcombine.low %v3051_v49, %v3054_v50  ;;  %v5564_v49 = vld [vmem:[#allocation14 + $0x268] sm:$0xff] }
 0x534   :  { %v15220_v56 = vcombine.high %v5910_v52, %v5913_v53  ;;  %v15219_v3 = vcombine.low %v5910_v52, %v5913_v53  ;;  %v5567_v50 = vld [vmem:[#allocation14 + $0x2c8] sm:$0xff]  ;;  %v14869_v53 = vcombine.low %v5558_v46, %v5561_v43 }
 0x535   :  { %5485 = vmatpush1.bf16.msra.mxu1 %v14800_v21  ;;  %v3057_v21 = vld [vmem:[#allocation14 + $0x2e90] sm:$0xff] }
 0x536   :  { %8018 = vmatpush1.bf16.msra.mxu0 %v15183_v58  ;;  %5486 = vmatprep.subr.bf16.mxu1 %v14807_v0  ;;  %v3060_v58 = vld [vmem:[#allocation14 + $0x2ef0] sm:$0xff]  ;;  %v5916_v0 = vld [vmem:[#allocation14 + $0x2e98] sm:$0xff] }
 0x537   :  { %8019 = vmatprep.subr.bf16.mxu0 %v15190_v1  ;;  %v5919_v1 = vld [vmem:[#allocation14 + $0x2ef8] sm:$0xff]  ;;  %v14843_v4 = vcombine.high %v3057_v21, %v3060_v58  ;;  %v14842_v13 = vcombine.low %v3057_v21, %v3060_v58  ;;  %v5570_v21 = vld [vmem:[#allocation14 + $0x328] sm:$0xff] }
 0x538   :  { %v16364_v17 = vpop.eup %16363  ;;  %v15226_v5 = vcombine.high %v5916_v0, %v5919_v1  ;;  %v15225_v14 = vcombine.low %v5916_v0, %v5919_v1  ;;  %v5573_v58 = vld [vmem:[#allocation14 + $0x388] sm:$0xff]  ;;  %v14875_v1 = vcombine.low %v5564_v49, %v5567_v50 }
 0x539   :  { %v16366_v42 = vpop.eup %16365  ;;  %5487 = vmatpush1.bf16.msra.mxu1 %v14806_v8  ;;  %v3063_v8 = vld [vmem:[#allocation14 + $0x2f50] sm:$0xff] }
 0x53a   :  { %v16368_v25 = vpop.eup %16367  ;;  %8020 = vmatpush1.bf16.msra.mxu0 %v15189_v9  ;;  %5488 = vmatprep.subr.bf16.mxu1 %v14813_v11  ;;  %v3066_v9 = vld [vmem:[#allocation14 + $0x2fb0] sm:$0xff]  ;;  %v5922_v11 = vld [vmem:[#allocation14 + $0x2f58] sm:$0xff] }
 0x53b   :  { %v16370_v59 = vpop.eup %16369  ;;  %v16014_v29 = vpack.c.bf16 %v16368_v25, %v16364_v17  ;;  %8021 = vmatprep.subr.bf16.mxu0 %v15196_v12  ;;  %v5925_v12 = vld [vmem:[#allocation14 + $0x2fb8] sm:$0xff]  ;;  %v14849_v17 = vcombine.high %v3063_v8, %v3066_v9  ;;  %v5549_v25 = vld [vmem:[#allocation14 + $0x88] sm:$0xff] }
 0x53c   :  { %v16015_v33 = vpack.c.bf16 %v16370_v59, %v16366_v42  ;;  %v15232_v18 = vcombine.high %v5922_v11, %v5925_v12  ;;  %v5548_v42 = vld [vmem:[#allocation14 + $0x80] sm:$0xff] }
 0x53d   :  { %5541 = vst [vmem:[#allocation17] sm:$0xff] %v16014_v29  ;;  %5489 = vmatpush1.bf16.msra.mxu1 %v14812_v38  ;;  %v5546_v38 = vld [vmem:[#allocation14 + $0x28] sm:$0xff]  ;;  %v14856_v59 = vcombine.high %v5545_v22, %v5548_v42  ;;  %v14855_v32 = vcombine.low %v5545_v22, %v5548_v42 }
 0x53e   :  { %5542 = vst [vmem:[#allocation17 + $0x8] sm:$0xff] %v16015_v33  ;;  %8022 = vmatpush1.bf16.msra.mxu0 %v15195_v27  ;;  %5490 = vmatprep.subr.bf16.mxu1 %v14819_v28  ;;  %v14848_v27 = vcombine.low %v3063_v8, %v3066_v9  ;;  %v15231_v28 = vcombine.low %v5922_v11, %v5925_v12  ;;  %v5552_v33 = vld [vmem:[#allocation14 + $0xe8] sm:$0xff] }
 0x53f   :  { %8023 = vmatprep.subr.bf16.mxu0 %v15202_v30  ;;  %v14858_v29 = vcombine.high %v5546_v38, %v5549_v25  ;;  %v5551_v30 = vld [vmem:[#allocation14 + $0xe0] sm:$0xff]  ;;  %v14857_v39 = vcombine.low %v5546_v38, %v5549_v25  ;;  %v14863_v45 = vcombine.low %v5552_v33, %v5555_v34  ;;  %v5576_v8 = vld [vmem:[#allocation14 + $0x3e8] sm:$0xff]  ;;  %v14881_v12 = vcombine.low %v5570_v21, %v5573_v58 }
 0x540   :  { %v14861_v44 = vcombine.low %v5551_v30, %v5554_v31  ;;  %v5579_v9 = vld [vmem:[#allocation14 + $0x448] sm:$0xff] }
 0x541   :  { %5491 = vmatpush1.bf16.msra.mxu1 %v14818_v36  ;;  %v14862_v36 = vcombine.high %v5551_v30, %v5554_v31  ;;  %v5582_v22 = vld [vmem:[#allocation14 + $0x4a8] sm:$0xff]  ;;  %v14887_v25 = vcombine.low %v5576_v8, %v5579_v9 }
 0x542   :  { %8024 = vmatpush1.bf16.msra.mxu0 %v15201_v37  ;;  %5492 = vmatprep.subr.bf16.mxu1 %v14825_v40  ;;  %v5557_v37 = vld [vmem:[#allocation14 + $0x1a0] sm:$0xff]  ;;  %v5585_v42 = vld [vmem:[#allocation14 + $0x508] sm:$0xff] }
 0x543   :  { %8025 = vmatprep.subr.bf16.mxu0 %v15208_v41  ;;  %v5560_v40 = vld [vmem:[#allocation14 + $0x200] sm:$0xff]  ;;  %v14864_v41 = vcombine.high %v5552_v33, %v5555_v34  ;;  %v5588_v30 = vld [vmem:[#allocation14 + $0x568] sm:$0xff]  ;;  %v14893_v33 = vcombine.low %v5582_v22, %v5585_v42 }
 0x544   :  { %v14867_v52 = vcombine.low %v5557_v37, %v5560_v40  ;;  %v5591_v31 = vld [vmem:[#allocation14 + $0x5c8] sm:$0xff] }
 0x545   :  { %5493 = vmatpush1.bf16.msra.mxu1 %v14824_v47  ;;  %v14868_v47 = vcombine.high %v5557_v37, %v5560_v40  ;;  %v5596_v37 = vld [vmem:[#allocation14 + $0x680] sm:$0xff]  ;;  %v5594_v40 = vld [vmem:[#allocation14 + $0x628] sm:$0xff] }
 0x546   :  { %8026 = vmatpush1.bf16.msra.mxu0 %v15207_v15  ;;  %5494 = vmatprep.subr.bf16.mxu1 %v14831_v63  ;;  %v14870_v15 = vcombine.high %v5558_v46, %v5561_v43  ;;  %v5563_v63 = vld [vmem:[#allocation14 + $0x260] sm:$0xff]  ;;  %v14899_v43 = vcombine.low %v5588_v30, %v5591_v31 }
 0x547   :  { %8027 = vmatprep.subr.bf16.mxu0 %v15214_v48  ;;  %v5566_v48 = vld [vmem:[#allocation14 + $0x2c0] sm:$0xff] }
 0x548   :  { %v14873_v0 = vcombine.low %v5563_v63, %v5566_v48 }
 0x549   :  { %5495 = vmatpush1.bf16.msra.mxu1 %v14830_v35  ;;  %v14874_v35 = vcombine.high %v5563_v63, %v5566_v48  ;;  %v5600_v63 = vld [vmem:[#allocation14 + $0x6e8] sm:$0xff] }
 0x54a   :  { %8028 = vmatpush1.bf16.msra.mxu0 %v15213_v54  ;;  %5496 = vmatprep.subr.bf16.mxu1 %v14837_v55  ;;  %v14876_v54 = vcombine.high %v5564_v49, %v5567_v50  ;;  %v5569_v55 = vld [vmem:[#allocation14 + $0x320] sm:$0xff]  ;;  %v5603_v48 = vld [vmem:[#allocation14 + $0x748] sm:$0xff] }
 0x54b   :  { %8029 = vmatprep.subr.bf16.mxu0 %v15220_v56  ;;  %v5572_v56 = vld [vmem:[#allocation14 + $0x380] sm:$0xff] }
 0x54c   :  { %v14879_v11 = vcombine.low %v5569_v55, %v5572_v56 }
 0x54d   :  { %5497 = vmatpush1.bf16.msra.mxu1 %v14836_v2  ;;  %v14880_v2 = vcombine.high %v5569_v55, %v5572_v56  ;;  %v5606_v55 = vld [vmem:[#allocation14 + $0x7a8] sm:$0xff] }
 0x54e   :  { %8030 = vmatpush1.bf16.msra.mxu0 %v15219_v3  ;;  %5498 = vmatprep.subr.bf16.mxu1 %v14843_v4  ;;  %v14882_v3 = vcombine.high %v5570_v21, %v5573_v58  ;;  %v5575_v4 = vld [vmem:[#allocation14 + $0x3e0] sm:$0xff]  ;;  %v5609_v56 = vld [vmem:[#allocation14 + $0x808] sm:$0xff]  ;;  %v14911_v58 = vcombine.low %v5600_v63, %v5603_v48 }
 0x54f   :  { %8031 = vmatprep.subr.bf16.mxu0 %v15226_v5  ;;  %v5578_v5 = vld [vmem:[#allocation14 + $0x440] sm:$0xff] }
 0x550   :  { %v14885_v38 = vcombine.low %v5575_v4, %v5578_v5 }
 0x551   :  { %5499 = vmatpush1.bf16.msra.mxu1 %v14842_v13  ;;  %v14886_v13 = vcombine.high %v5575_v4, %v5578_v5  ;;  %v5612_v4 = vld [vmem:[#allocation14 + $0x868] sm:$0xff] }
 0x552   :  { %8032 = vmatpush1.bf16.msra.mxu0 %v15225_v14  ;;  %5500 = vmatprep.subr.bf16.mxu1 %v14849_v17  ;;  %v14888_v14 = vcombine.high %v5576_v8, %v5579_v9  ;;  %v5581_v17 = vld [vmem:[#allocation14 + $0x4a0] sm:$0xff]  ;;  %v5615_v5 = vld [vmem:[#allocation14 + $0x8c8] sm:$0xff]  ;;  %v14917_v9 = vcombine.low %v5606_v55, %v5609_v56 }
 0x553   :  { %8033 = vmatprep.subr.bf16.mxu0 %v15232_v18  ;;  %v5584_v18 = vld [vmem:[#allocation14 + $0x500] sm:$0xff] }
 0x555   :  { %5501 = vmatpush1.bf16.msra.mxu1 %v14848_v27  ;;  %v14892_v27 = vcombine.high %v5581_v17, %v5584_v18 }
 0x556   :  { %8034 = vmatpush1.bf16.msra.mxu0 %v15231_v28  ;;  %8044 = vmatprep.subr.bf16.mxu1 %v14856_v59  ;;  %v14894_v28 = vcombine.high %v5582_v22, %v5585_v42  ;;  %v5587_v59 = vld [vmem:[#allocation14 + $0x560] sm:$0xff]  ;;  %v14923_v42 = vcombine.low %v5612_v4, %v5615_v5 }
 0x557   :  { %8208 = vmatprep.subr.bf16.mxu0 %v14858_v29  ;;  %v5590_v29 = vld [vmem:[#allocation14 + $0x5c0] sm:$0xff] }
 0x558   :  { %5503 = vmatmul.mubr.bf16.vlgmr.msra.gmra.mrb[16].mxu1 %v16932_v51  ;;  %v14898_v34 = vcombine.high %v5587_v59, %v5590_v29  ;;  %v14897_v46 = vcombine.low %v5587_v59, %v5590_v29  ;;  %v5624_v59 = vld [vmem:[#allocation14 + $0x9e8] sm:$0xff] }
 0x559   :  { %8036 = vmatmul.mubr.bf16.vlgmr.msra.gmra.mrb[20].mxu0 %v16932_v51  ;;  %8045 = vmatpush1.bf16.msra.mxu1 %v14855_v32  ;;  %v14891_v32 = vcombine.low %v5581_v17, %v5584_v18  ;;  %v5618_v17 = vld [vmem:[#allocation14 + $0x928] sm:$0xff] }
 0x55a   :  { %8076 = vmatprep.mubr.bf16.mxu1 %v16885_v57  ;;  %8209 = vmatpush1.bf16.msra.mxu0 %v14857_v39  ;;  %v14900_v39 = vcombine.high %v5588_v30, %v5591_v31  ;;  %v5621_v18 = vld [vmem:[#allocation14 + $0x988] sm:$0xff] }
 0x55b   :  { %8240 = vmatprep.mubr.bf16.mxu0 %v16885_v57  ;;  %8046 = vmatprep.subr.bf16.mxu1 %v14862_v36  ;;  %v5593_v36 = vld [vmem:[#allocation14 + $0x620] sm:$0xff]  ;;  %v5627_v29 = vld [vmem:[#allocation14 + $0xa48] sm:$0xff]  ;;  %v14929_v31 = vcombine.low %v5618_v17, %v5621_v18 }
 0x55c   :  { %8210 = vmatprep.subr.bf16.mxu0 %v14864_v41  ;;  %v5597_v41 = vld [vmem:[#allocation14 + $0x688] sm:$0xff]  ;;  %v14903_v49 = vcombine.low %v5593_v36, %v5596_v37 }
 0x55d   :  { %8047 = vmatpush1.bf16.msra.mxu1 %v14861_v44  ;;  %v14904_v44 = vcombine.high %v5593_v36, %v5596_v37  ;;  %v14905_v50 = vcombine.low %v5594_v40, %v5597_v41  ;;  %v5630_v36 = vld [vmem:[#allocation14 + $0xaa8] sm:$0xff] }
 0x55e   :  { %8211 = vmatpush1.bf16.msra.mxu0 %v14863_v45  ;;  %8048 = vmatprep.subr.bf16.mxu1 %v14868_v47  ;;  %v14906_v45 = vcombine.high %v5594_v40, %v5597_v41  ;;  %v5599_v47 = vld [vmem:[#allocation14 + $0x6e0] sm:$0xff]  ;;  %v5633_v37 = vld [vmem:[#allocation14 + $0xb08] sm:$0xff]  ;;  %v14935_v41 = vcombine.low %v5624_v59, %v5627_v29 }
 0x55f   :  { %8212 = vmatprep.subr.bf16.mxu0 %v14870_v15  ;;  %v5602_v15 = vld [vmem:[#allocation14 + $0x740] sm:$0xff] }
 0x560   :  { %v14909_v21 = vcombine.low %v5599_v47, %v5602_v15 }
 0x561   :  { %8049 = vmatpush1.bf16.msra.mxu1 %v14867_v52  ;;  %v14910_v52 = vcombine.high %v5599_v47, %v5602_v15  ;;  %v5636_v47 = vld [vmem:[#allocation14 + $0xb68] sm:$0xff] }
 0x562   :  { %8213 = vmatpush1.bf16.msra.mxu0 %v14869_v53  ;;  %8050 = vmatprep.subr.bf16.mxu1 %v14874_v35  ;;  %v14912_v53 = vcombine.high %v5600_v63, %v5603_v48  ;;  %v5605_v35 = vld [vmem:[#allocation14 + $0x7a0] sm:$0xff]  ;;  %v5639_v15 = vld [vmem:[#allocation14 + $0xbc8] sm:$0xff]  ;;  %v14941_v48 = vcombine.low %v5630_v36, %v5633_v37 }
 0x563   :  { %8214 = vmatprep.subr.bf16.mxu0 %v14876_v54  ;;  %v5608_v54 = vld [vmem:[#allocation14 + $0x800] sm:$0xff] }
 0x564   :  { %v14915_v8 = vcombine.low %v5605_v35, %v5608_v54 }
 0x565   :  { %8051 = vmatpush1.bf16.msra.mxu1 %v14873_v0  ;;  %v14916_v0 = vcombine.high %v5605_v35, %v5608_v54  ;;  %v5642_v35 = vld [vmem:[#allocation14 + $0xc28] sm:$0xff] }
 0x566   :  { %8215 = vmatpush1.bf16.msra.mxu0 %v14875_v1  ;;  %8052 = vmatprep.subr.bf16.mxu1 %v14880_v2  ;;  %v14918_v1 = vcombine.high %v5606_v55, %v5609_v56  ;;  %v5611_v2 = vld [vmem:[#allocation14 + $0x860] sm:$0xff]  ;;  %v5645_v54 = vld [vmem:[#allocation14 + $0xc88] sm:$0xff]  ;;  %v14947_v56 = vcombine.low %v5636_v47, %v5639_v15 }
 0x567   :  { %8216 = vmatprep.subr.bf16.mxu0 %v14882_v3  ;;  %v5614_v3 = vld [vmem:[#allocation14 + $0x8c0] sm:$0xff] }
 0x568   :  { %v14921_v22 = vcombine.low %v5611_v2, %v5614_v3 }
 0x569   :  { %8053 = vmatpush1.bf16.msra.mxu1 %v14879_v11  ;;  %v14922_v11 = vcombine.high %v5611_v2, %v5614_v3  ;;  %v5648_v3 = vld [vmem:[#allocation14 + $0xce8] sm:$0xff] }
 0x56a   :  { %8217 = vmatpush1.bf16.msra.mxu0 %v14881_v12  ;;  %8054 = vmatprep.subr.bf16.mxu1 %v14886_v13  ;;  %v14924_v12 = vcombine.high %v5612_v4, %v5615_v5  ;;  %v5617_v13 = vld [vmem:[#allocation14 + $0x920] sm:$0xff]  ;;  %v5651_v4 = vld [vmem:[#allocation14 + $0xd48] sm:$0xff]  ;;  %v14953_v5 = vcombine.low %v5642_v35, %v5645_v54 }
 0x56b   :  { %8218 = vmatprep.subr.bf16.mxu0 %v14888_v14  ;;  %v5620_v14 = vld [vmem:[#allocation14 + $0x980] sm:$0xff] }
 0x56c   :  { %v14927_v30 = vcombine.low %v5617_v13, %v5620_v14 }
 0x56d   :  { %8055 = vmatpush1.bf16.msra.mxu1 %v14885_v38  ;;  %v14928_v38 = vcombine.high %v5617_v13, %v5620_v14  ;;  %v5654_v13 = vld [vmem:[#allocation14 + $0xda8] sm:$0xff] }
 0x56e   :  { %8219 = vmatpush1.bf16.msra.mxu0 %v14887_v25  ;;  %8056 = vmatprep.subr.bf16.mxu1 %v14892_v27  ;;  %v14930_v25 = vcombine.high %v5618_v17, %v5621_v18  ;;  %v5623_v27 = vld [vmem:[#allocation14 + $0x9e0] sm:$0xff]  ;;  %v5657_v14 = vld [vmem:[#allocation14 + $0xe08] sm:$0xff]  ;;  %v14959_v18 = vcombine.low %v5648_v3, %v5651_v4 }
 0x56f   :  { %8220 = vmatprep.subr.bf16.mxu0 %v14894_v28  ;;  %v5626_v28 = vld [vmem:[#allocation14 + $0xa40] sm:$0xff] }
 0x570   :  { %v14933_v40 = vcombine.low %v5623_v27, %v5626_v28 }
 0x571   :  { %8057 = vmatpush1.bf16.msra.mxu1 %v14891_v32  ;;  %v14934_v32 = vcombine.high %v5623_v27, %v5626_v28  ;;  %v5660_v27 = vld [vmem:[#allocation14 + $0xe68] sm:$0xff] }
 0x572   :  { %8221 = vmatpush1.bf16.msra.mxu0 %v14893_v33  ;;  %8058 = vmatprep.subr.bf16.mxu1 %v14898_v34  ;;  %v14936_v33 = vcombine.high %v5624_v59, %v5627_v29  ;;  %v5629_v34 = vld [vmem:[#allocation14 + $0xaa0] sm:$0xff]  ;;  %v5663_v28 = vld [vmem:[#allocation14 + $0xec8] sm:$0xff]  ;;  %v14965_v29 = vcombine.low %v5654_v13, %v5657_v14 }
 0x573   :  { %8222 = vmatprep.subr.bf16.mxu0 %v14900_v39  ;;  %v5632_v39 = vld [vmem:[#allocation14 + $0xb00] sm:$0xff] }
 0x574   :  { %v14939_v63 = vcombine.low %v5629_v34, %v5632_v39 }
 0x575   :  { %8059 = vmatpush1.bf16.msra.mxu1 %v14897_v46  ;;  %v14940_v46 = vcombine.high %v5629_v34, %v5632_v39  ;;  %v5666_v34 = vld [vmem:[#allocation14 + $0xf28] sm:$0xff] }
 0x576   :  { %8223 = vmatpush1.bf16.msra.mxu0 %v14899_v43  ;;  %8060 = vmatprep.subr.bf16.mxu1 %v14904_v44  ;;  %v14942_v43 = vcombine.high %v5630_v36, %v5633_v37  ;;  %v5635_v44 = vld [vmem:[#allocation14 + $0xb60] sm:$0xff]  ;;  %v5669_v39 = vld [vmem:[#allocation14 + $0xf88] sm:$0xff]  ;;  %v14971_v37 = vcombine.low %v5660_v27, %v5663_v28 }
 0x577   :  { %8224 = vmatprep.subr.bf16.mxu0 %v14906_v45  ;;  %v5638_v45 = vld [vmem:[#allocation14 + $0xbc0] sm:$0xff] }
 0x578   :  { %v14945_v55 = vcombine.low %v5635_v44, %v5638_v45 }
 0x579   :  { %8061 = vmatpush1.bf16.msra.mxu1 %v14903_v49  ;;  %v14946_v49 = vcombine.high %v5635_v44, %v5638_v45  ;;  %v5672_v44 = vld [vmem:[#allocation14 + $0xfe8] sm:$0xff] }
 0x57a   :  { %8225 = vmatpush1.bf16.msra.mxu0 %v14905_v50  ;;  %8062 = vmatprep.subr.bf16.mxu1 %v14910_v52  ;;  %v14948_v50 = vcombine.high %v5636_v47, %v5639_v15  ;;  %v5641_v52 = vld [vmem:[#allocation14 + $0xc20] sm:$0xff]  ;;  %v5675_v45 = vld [vmem:[#allocation14 + $0x1048] sm:$0xff]  ;;  %v14977_v15 = vcombine.low %v5666_v34, %v5669_v39 }
 0x57b   :  { %8226 = vmatprep.subr.bf16.mxu0 %v14912_v53  ;;  %v5644_v53 = vld [vmem:[#allocation14 + $0xc80] sm:$0xff] }
 0x57c   :  { %v14951_v2 = vcombine.low %v5641_v52, %v5644_v53 }
 0x57d   :  { %8063 = vmatpush1.bf16.msra.mxu1 %v14909_v21  ;;  %v14952_v21 = vcombine.high %v5641_v52, %v5644_v53  ;;  %v5678_v52 = vld [vmem:[#allocation14 + $0x10a8] sm:$0xff] }
 0x57e   :  { %8227 = vmatpush1.bf16.msra.mxu0 %v14911_v58  ;;  %8064 = vmatprep.subr.bf16.mxu1 %v14916_v0  ;;  %v14954_v58 = vcombine.high %v5642_v35, %v5645_v54  ;;  %v5647_v0 = vld [vmem:[#allocation14 + $0xce0] sm:$0xff]  ;;  %v5681_v53 = vld [vmem:[#allocation14 + $0x1108] sm:$0xff]  ;;  %v14983_v54 = vcombine.low %v5672_v44, %v5675_v45 }
 0x57f   :  { %8228 = vmatprep.subr.bf16.mxu0 %v14918_v1  ;;  %v5650_v1 = vld [vmem:[#allocation14 + $0xd40] sm:$0xff] }
 0x580   :  { %v14957_v17 = vcombine.low %v5647_v0, %v5650_v1 }
 0x581   :  { %8065 = vmatpush1.bf16.msra.mxu1 %v14915_v8  ;;  %v14958_v8 = vcombine.high %v5647_v0, %v5650_v1  ;;  %v5684_v0 = vld [vmem:[#allocation14 + $0x1168] sm:$0xff] }
 0x582   :  { %8229 = vmatpush1.bf16.msra.mxu0 %v14917_v9  ;;  %8066 = vmatprep.subr.bf16.mxu1 %v14922_v11  ;;  %v5653_v9 = vld [vmem:[#allocation14 + $0xda0] sm:$0xff]  ;;  %v5687_v1 = vld [vmem:[#allocation14 + $0x11c8] sm:$0xff] }
 0x583   :  { %8230 = vmatprep.subr.bf16.mxu0 %v14924_v12  ;;  %v5656_v11 = vld [vmem:[#allocation14 + $0xe00] sm:$0xff]  ;;  %v14960_v12 = vcombine.high %v5648_v3, %v5651_v4  ;;  %v14989_v3 = vcombine.low %v5678_v52, %v5681_v53 }
 0x584   :  { %v14963_v59 = vcombine.low %v5653_v9, %v5656_v11 }
 0x585   :  { %8067 = vmatpush1.bf16.msra.mxu1 %v14921_v22  ;;  %v14964_v22 = vcombine.high %v5653_v9, %v5656_v11  ;;  %v5692_v9 = vld [vmem:[#allocation14 + $0x1280] sm:$0xff]  ;;  %v5690_v11 = vld [vmem:[#allocation14 + $0x1228] sm:$0xff] }
 0x586   :  { %8231 = vmatpush1.bf16.msra.mxu0 %v14923_v42  ;;  %8068 = vmatprep.subr.bf16.mxu1 %v14928_v38  ;;  %v14966_v42 = vcombine.high %v5654_v13, %v5657_v14  ;;  %v5659_v38 = vld [vmem:[#allocation14 + $0xe60] sm:$0xff]  ;;  %v14995_v14 = vcombine.low %v5684_v0, %v5687_v1 }
 0x587   :  { %8232 = vmatprep.subr.bf16.mxu0 %v14930_v25  ;;  %v5662_v25 = vld [vmem:[#allocation14 + $0xec0] sm:$0xff] }
 0x588   :  { %v14969_v36 = vcombine.low %v5659_v38, %v5662_v25 }
 0x589   :  { %8069 = vmatpush1.bf16.msra.mxu1 %v14927_v30  ;;  %v14970_v30 = vcombine.high %v5659_v38, %v5662_v25  ;;  %v5696_v38 = vld [vmem:[#allocation14 + $0x12e8] sm:$0xff] }
 0x58a   :  { %8233 = vmatpush1.bf16.msra.mxu0 %v14929_v31  ;;  %8070 = vmatprep.subr.bf16.mxu1 %v14934_v32  ;;  %v14972_v31 = vcombine.high %v5660_v27, %v5663_v28  ;;  %v5665_v32 = vld [vmem:[#allocation14 + $0xf20] sm:$0xff]  ;;  %v5699_v25 = vld [vmem:[#allocation14 + $0x1348] sm:$0xff] }
 0x58b   :  { %8234 = vmatprep.subr.bf16.mxu0 %v14936_v33  ;;  %v5668_v33 = vld [vmem:[#allocation14 + $0xf80] sm:$0xff] }
 0x58c   :  { %v14975_v47 = vcombine.low %v5665_v32, %v5668_v33 }
 0x58d   :  { %8071 = vmatpush1.bf16.msra.mxu1 %v14933_v40  ;;  %v14976_v40 = vcombine.high %v5665_v32, %v5668_v33  ;;  %v5702_v32 = vld [vmem:[#allocation14 + $0x13a8] sm:$0xff] }
 0x58e   :  { %8235 = vmatpush1.bf16.msra.mxu0 %v14935_v41  ;;  %8072 = vmatprep.subr.bf16.mxu1 %v14940_v46  ;;  %v14978_v41 = vcombine.high %v5666_v34, %v5669_v39  ;;  %v5671_v46 = vld [vmem:[#allocation14 + $0xfe0] sm:$0xff]  ;;  %v5705_v33 = vld [vmem:[#allocation14 + $0x1408] sm:$0xff]  ;;  %v15007_v39 = vcombine.low %v5696_v38, %v5699_v25 }
 0x58f   :  { %8236 = vmatprep.subr.bf16.mxu0 %v14942_v43  ;;  %v5674_v43 = vld [vmem:[#allocation14 + $0x1040] sm:$0xff] }
 0x590   :  { %v14981_v35 = vcombine.low %v5671_v46, %v5674_v43 }
 0x591   :  { %8073 = vmatpush1.bf16.msra.mxu1 %v14939_v63  ;;  %v14982_v63 = vcombine.high %v5671_v46, %v5674_v43  ;;  %v5708_v46 = vld [vmem:[#allocation14 + $0x1468] sm:$0xff] }
 0x592   :  { %8237 = vmatpush1.bf16.msra.mxu0 %v14941_v48  ;;  %8074 = vmatprep.subr.bf16.mxu1 %v14946_v49  ;;  %v14984_v48 = vcombine.high %v5672_v44, %v5675_v45  ;;  %v5677_v49 = vld [vmem:[#allocation14 + $0x10a0] sm:$0xff]  ;;  %v5711_v43 = vld [vmem:[#allocation14 + $0x14c8] sm:$0xff]  ;;  %v15013_v45 = vcombine.low %v5702_v32, %v5705_v33 }
 0x593   :  { %8238 = vmatprep.subr.bf16.mxu0 %v14948_v50  ;;  %v5680_v50 = vld [vmem:[#allocation14 + $0x1100] sm:$0xff] }
 0x595   :  { %8075 = vmatpush1.bf16.msra.mxu1 %v14945_v55  ;;  %v14988_v55 = vcombine.high %v5677_v49, %v5680_v50 }
 0x596   :  { %8239 = vmatpush1.bf16.msra.mxu0 %v14947_v56  ;;  %8085 = vmatprep.subr.bf16.mxu1 %v14952_v21  ;;  %v14990_v56 = vcombine.high %v5678_v52, %v5681_v53  ;;  %v5683_v21 = vld [vmem:[#allocation14 + $0x1160] sm:$0xff]  ;;  %v15019_v53 = vcombine.low %v5708_v46, %v5711_v43 }
 0x597   :  { %8249 = vmatprep.subr.bf16.mxu0 %v14954_v58  ;;  %v5686_v58 = vld [vmem:[#allocation14 + $0x11c0] sm:$0xff] }
 0x598   :  { %8077 = vmatmul.mubr.bf16.vlgmr.msra.gmra.mrb[20].mxu1 %v16887_v61  ;;  %v14994_v4 = vcombine.high %v5683_v21, %v5686_v58  ;;  %v14993_v13 = vcombine.low %v5683_v21, %v5686_v58  ;;  %v5720_v21 = vld [vmem:[#allocation14 + $0x15e8] sm:$0xff] }
 0x599   :  { %8241 = vmatmul.mubr.bf16.vlgmr.msra.gmra.mrb[24].mxu0 %v16887_v61  ;;  %8086 = vmatpush1.bf16.msra.mxu1 %v14951_v2  ;;  %v14987_v2 = vcombine.low %v5677_v49, %v5680_v50  ;;  %v5714_v49 = vld [vmem:[#allocation14 + $0x1528] sm:$0xff] }
 0x59a   :  { %8117 = vmatprep.mubr.bf16.mxu1 %v16891_v6  ;;  %8250 = vmatpush1.bf16.msra.mxu0 %v14953_v5  ;;  %v14996_v5 = vcombine.high %v5684_v0, %v5687_v1  ;;  %v5717_v50 = vld [vmem:[#allocation14 + $0x1588] sm:$0xff] }
 0x59b   :  { %8281 = vmatprep.mubr.bf16.mxu0 %v16891_v6  ;;  %8087 = vmatprep.subr.bf16.mxu1 %v14958_v8  ;;  %v5689_v8 = vld [vmem:[#allocation14 + $0x1220] sm:$0xff]  ;;  %v5723_v58 = vld [vmem:[#allocation14 + $0x1648] sm:$0xff]  ;;  %v15025_v1 = vcombine.low %v5714_v49, %v5717_v50 }
 0x59c   :  { %8251 = vmatprep.subr.bf16.mxu0 %v14960_v12  ;;  %v5693_v12 = vld [vmem:[#allocation14 + $0x1288] sm:$0xff]  ;;  %v14999_v27 = vcombine.low %v5689_v8, %v5692_v9 }
 0x59d   :  { %8088 = vmatpush1.bf16.msra.mxu1 %v14957_v17  ;;  %v15000_v17 = vcombine.high %v5689_v8, %v5692_v9  ;;  %v15001_v28 = vcombine.low %v5690_v11, %v5693_v12  ;;  %v5726_v8 = vld [vmem:[#allocation14 + $0x16a8] sm:$0xff] }
 0x59e   :  { %8252 = vmatpush1.bf16.msra.mxu0 %v14959_v18  ;;  %8089 = vmatprep.subr.bf16.mxu1 %v14964_v22  ;;  %v15002_v18 = vcombine.high %v5690_v11, %v5693_v12  ;;  %v5695_v22 = vld [vmem:[#allocation14 + $0x12e0] sm:$0xff]  ;;  %v5729_v9 = vld [vmem:[#allocation14 + $0x1708] sm:$0xff]  ;;  %v15031_v12 = vcombine.low %v5720_v21, %v5723_v58 }
 0x59f   :  { %8253 = vmatprep.subr.bf16.mxu0 %v14966_v42  ;;  %v5698_v42 = vld [vmem:[#allocation14 + $0x1340] sm:$0xff] }
 0x5a0   :  { %v15005_v34 = vcombine.low %v5695_v22, %v5698_v42 }
 0x5a1   :  { %8090 = vmatpush1.bf16.msra.mxu1 %v14963_v59  ;;  %v15006_v59 = vcombine.high %v5695_v22, %v5698_v42  ;;  %v5732_v22 = vld [vmem:[#allocation14 + $0x1768] sm:$0xff] }
 0x5a2   :  { %8254 = vmatpush1.bf16.msra.mxu0 %v14965_v29  ;;  %8091 = vmatprep.subr.bf16.mxu1 %v14970_v30  ;;  %v15008_v29 = vcombine.high %v5696_v38, %v5699_v25  ;;  %v5701_v30 = vld [vmem:[#allocation14 + $0x13a0] sm:$0xff]  ;;  %v5735_v42 = vld [vmem:[#allocation14 + $0x17c8] sm:$0xff]  ;;  %v15037_v25 = vcombine.low %v5726_v8, %v5729_v9 }
 0x5a3   :  { %8255 = vmatprep.subr.bf16.mxu0 %v14972_v31  ;;  %v5704_v31 = vld [vmem:[#allocation14 + $0x1400] sm:$0xff] }
 0x5a4   :  { %v15011_v44 = vcombine.low %v5701_v30, %v5704_v31 }
 0x5a5   :  { %8092 = vmatpush1.bf16.msra.mxu1 %v14969_v36  ;;  %v15012_v36 = vcombine.high %v5701_v30, %v5704_v31  ;;  %v5738_v30 = vld [vmem:[#allocation14 + $0x1828] sm:$0xff] }
 0x5a6   :  { %8256 = vmatpush1.bf16.msra.mxu0 %v14971_v37  ;;  %8093 = vmatprep.subr.bf16.mxu1 %v14976_v40  ;;  %v15014_v37 = vcombine.high %v5702_v32, %v5705_v33  ;;  %v5707_v40 = vld [vmem:[#allocation14 + $0x1460] sm:$0xff]  ;;  %v5741_v31 = vld [vmem:[#allocation14 + $0x1888] sm:$0xff]  ;;  %v15043_v33 = vcombine.low %v5732_v22, %v5735_v42 }
 0x5a7   :  { %8257 = vmatprep.subr.bf16.mxu0 %v14978_v41  ;;  %v5710_v41 = vld [vmem:[#allocation14 + $0x14c0] sm:$0xff] }
 0x5a8   :  { %v15017_v52 = vcombine.low %v5707_v40, %v5710_v41 }
 0x5a9   :  { %8094 = vmatpush1.bf16.msra.mxu1 %v14975_v47  ;;  %v15018_v47 = vcombine.high %v5707_v40, %v5710_v41  ;;  %v5744_v41 = vld [vmem:[#allocation14 + $0x18e8] sm:$0xff] }
 0x5aa   :  { %8258 = vmatpush1.bf16.msra.mxu0 %v14977_v15  ;;  %8095 = vmatprep.subr.bf16.mxu1 %v14982_v63  ;;  %v15020_v15 = vcombine.high %v5708_v46, %v5711_v43  ;;  %v5713_v63 = vld [vmem:[#allocation14 + $0x1520] sm:$0xff]  ;;  %v5747_v46 = vld [vmem:[#allocation14 + $0x1948] sm:$0xff]  ;;  %v15049_v43 = vcombine.low %v5738_v30, %v5741_v31 }
 0x5ab   :  { %8259 = vmatprep.subr.bf16.mxu0 %v14984_v48  ;;  %v5716_v48 = vld [vmem:[#allocation14 + $0x1580] sm:$0xff] }
 0x5ac   :  { %v15023_v0 = vcombine.low %v5713_v63, %v5716_v48 }
 0x5ad   :  { %8096 = vmatpush1.bf16.msra.mxu1 %v14981_v35  ;;  %v15024_v35 = vcombine.high %v5713_v63, %v5716_v48  ;;  %v5750_v63 = vld [vmem:[#allocation14 + $0x19a8] sm:$0xff] }
 0x5ae   :  { %8260 = vmatpush1.bf16.msra.mxu0 %v14983_v54  ;;  %8097 = vmatprep.subr.bf16.mxu1 %v14988_v55  ;;  %v15026_v54 = vcombine.high %v5714_v49, %v5717_v50  ;;  %v5719_v55 = vld [vmem:[#allocation14 + $0x15e0] sm:$0xff]  ;;  %v5753_v48 = vld [vmem:[#allocation14 + $0x1a08] sm:$0xff]  ;;  %v15055_v50 = vcombine.low %v5744_v41, %v5747_v46 }
 0x5af   :  { %8261 = vmatprep.subr.bf16.mxu0 %v14990_v56  ;;  %v5722_v56 = vld [vmem:[#allocation14 + $0x1640] sm:$0xff] }
 0x5b0   :  { %v15029_v11 = vcombine.low %v5719_v55, %v5722_v56 }
 0x5b1   :  { %8098 = vmatpush1.bf16.msra.mxu1 %v14987_v2  ;;  %v15030_v2 = vcombine.high %v5719_v55, %v5722_v56  ;;  %v5756_v55 = vld [vmem:[#allocation14 + $0x1a68] sm:$0xff] }
 0x5b2   :  { %8262 = vmatpush1.bf16.msra.mxu0 %v14989_v3  ;;  %8099 = vmatprep.subr.bf16.mxu1 %v14994_v4  ;;  %v15032_v3 = vcombine.high %v5720_v21, %v5723_v58  ;;  %v5725_v4 = vld [vmem:[#allocation14 + $0x16a0] sm:$0xff]  ;;  %v5759_v56 = vld [vmem:[#allocation14 + $0x1ac8] sm:$0xff]  ;;  %v15061_v58 = vcombine.low %v5750_v63, %v5753_v48 }
 0x5b3   :  { %8263 = vmatprep.subr.bf16.mxu0 %v14996_v5  ;;  %v5728_v5 = vld [vmem:[#allocation14 + $0x1700] sm:$0xff] }
 0x5b4   :  { %v15035_v38 = vcombine.low %v5725_v4, %v5728_v5 }
 0x5b5   :  { %8100 = vmatpush1.bf16.msra.mxu1 %v14993_v13  ;;  %v15036_v13 = vcombine.high %v5725_v4, %v5728_v5  ;;  %v5762_v4 = vld [vmem:[#allocation14 + $0x1b28] sm:$0xff] }
 0x5b6   :  { %8264 = vmatpush1.bf16.msra.mxu0 %v14995_v14  ;;  %8101 = vmatprep.subr.bf16.mxu1 %v15000_v17  ;;  %v15038_v14 = vcombine.high %v5726_v8, %v5729_v9  ;;  %v5731_v17 = vld [vmem:[#allocation14 + $0x1760] sm:$0xff]  ;;  %v5765_v5 = vld [vmem:[#allocation14 + $0x1b88] sm:$0xff]  ;;  %v15067_v9 = vcombine.low %v5756_v55, %v5759_v56 }
 0x5b7   :  { %8265 = vmatprep.subr.bf16.mxu0 %v15002_v18  ;;  %v5734_v18 = vld [vmem:[#allocation14 + $0x17c0] sm:$0xff] }
 0x5b8   :  { %v15041_v32 = vcombine.low %v5731_v17, %v5734_v18 }
 0x5b9   :  { %8102 = vmatpush1.bf16.msra.mxu1 %v14999_v27  ;;  %v15042_v27 = vcombine.high %v5731_v17, %v5734_v18  ;;  %v5768_v17 = vld [vmem:[#allocation14 + $0x1be8] sm:$0xff] }
 0x5ba   :  { %8266 = vmatpush1.bf16.msra.mxu0 %v15001_v28  ;;  %8103 = vmatprep.subr.bf16.mxu1 %v15006_v59  ;;  %v15044_v28 = vcombine.high %v5732_v22, %v5735_v42  ;;  %v5737_v59 = vld [vmem:[#allocation14 + $0x1820] sm:$0xff]  ;;  %v5771_v18 = vld [vmem:[#allocation14 + $0x1c48] sm:$0xff]  ;;  %v15073_v42 = vcombine.low %v5762_v4, %v5765_v5 }
 0x5bb   :  { %8267 = vmatprep.subr.bf16.mxu0 %v15008_v29  ;;  %v5740_v29 = vld [vmem:[#allocation14 + $0x1880] sm:$0xff] }
 0x5bc   :  { %v15047_v40 = vcombine.low %v5737_v59, %v5740_v29 }
 0x5bd   :  { %8104 = vmatpush1.bf16.msra.mxu1 %v15005_v34  ;;  %v15048_v34 = vcombine.high %v5737_v59, %v5740_v29  ;;  %v5774_v59 = vld [vmem:[#allocation14 + $0x1ca8] sm:$0xff] }
 0x5be   :  { %8268 = vmatpush1.bf16.msra.mxu0 %v15007_v39  ;;  %8105 = vmatprep.subr.bf16.mxu1 %v15012_v36  ;;  %v15050_v39 = vcombine.high %v5738_v30, %v5741_v31  ;;  %v5743_v36 = vld [vmem:[#allocation14 + $0x18e0] sm:$0xff]  ;;  %v5777_v29 = vld [vmem:[#allocation14 + $0x1d08] sm:$0xff]  ;;  %v15079_v31 = vcombine.low %v5768_v17, %v5771_v18 }
 0x5bf   :  { %8269 = vmatprep.subr.bf16.mxu0 %v15014_v37  ;;  %v5746_v37 = vld [vmem:[#allocation14 + $0x1940] sm:$0xff] }
 0x5c0   :  { %v15053_v49 = vcombine.low %v5743_v36, %v5746_v37 }
 0x5c1   :  { %8106 = vmatpush1.bf16.msra.mxu1 %v15011_v44  ;;  %v15054_v44 = vcombine.high %v5743_v36, %v5746_v37  ;;  %v5780_v36 = vld [vmem:[#allocation14 + $0x1d68] sm:$0xff] }
 0x5c2   :  { %8270 = vmatpush1.bf16.msra.mxu0 %v15013_v45  ;;  %8107 = vmatprep.subr.bf16.mxu1 %v15018_v47  ;;  %v5749_v45 = vld [vmem:[#allocation14 + $0x19a0] sm:$0xff]  ;;  %v5783_v37 = vld [vmem:[#allocation14 + $0x1dc8] sm:$0xff] }
 0x5c3   :  { %8271 = vmatprep.subr.bf16.mxu0 %v15020_v15  ;;  %v5752_v47 = vld [vmem:[#allocation14 + $0x1a00] sm:$0xff]  ;;  %v15056_v15 = vcombine.high %v5744_v41, %v5747_v46  ;;  %v15085_v41 = vcombine.low %v5774_v59, %v5777_v29 }
 0x5c4   :  { %v15059_v21 = vcombine.low %v5749_v45, %v5752_v47 }
 0x5c5   :  { %8108 = vmatpush1.bf16.msra.mxu1 %v15017_v52  ;;  %v15060_v52 = vcombine.high %v5749_v45, %v5752_v47  ;;  %v5788_v45 = vld [vmem:[#allocation14 + $0x1e80] sm:$0xff]  ;;  %v5786_v47 = vld [vmem:[#allocation14 + $0x1e28] sm:$0xff] }
 0x5c6   :  { %8272 = vmatpush1.bf16.msra.mxu0 %v15019_v53  ;;  %8109 = vmatprep.subr.bf16.mxu1 %v15024_v35  ;;  %v15062_v53 = vcombine.high %v5750_v63, %v5753_v48  ;;  %v5755_v35 = vld [vmem:[#allocation14 + $0x1a60] sm:$0xff]  ;;  %v15091_v48 = vcombine.low %v5780_v36, %v5783_v37 }
 0x5c7   :  { %8273 = vmatprep.subr.bf16.mxu0 %v15026_v54  ;;  %v5758_v54 = vld [vmem:[#allocation14 + $0x1ac0] sm:$0xff] }
 0x5c8   :  { %v15065_v8 = vcombine.low %v5755_v35, %v5758_v54 }
 0x5c9   :  { %8110 = vmatpush1.bf16.msra.mxu1 %v15023_v0  ;;  %v15066_v0 = vcombine.high %v5755_v35, %v5758_v54  ;;  %v5792_v35 = vld [vmem:[#allocation14 + $0x1ee8] sm:$0xff] }
 0x5ca   :  { %8274 = vmatpush1.bf16.msra.mxu0 %v15025_v1  ;;  %8111 = vmatprep.subr.bf16.mxu1 %v15030_v2  ;;  %v15068_v1 = vcombine.high %v5756_v55, %v5759_v56  ;;  %v5761_v2 = vld [vmem:[#allocation14 + $0x1b20] sm:$0xff]  ;;  %v5795_v54 = vld [vmem:[#allocation14 + $0x1f48] sm:$0xff] }
 0x5cb   :  { %8275 = vmatprep.subr.bf16.mxu0 %v15032_v3  ;;  %v5764_v3 = vld [vmem:[#allocation14 + $0x1b80] sm:$0xff] }
 0x5cc   :  { %v15071_v22 = vcombine.low %v5761_v2, %v5764_v3 }
 0x5cd   :  { %8112 = vmatpush1.bf16.msra.mxu1 %v15029_v11  ;;  %v15072_v11 = vcombine.high %v5761_v2, %v5764_v3  ;;  %v5798_v2 = vld [vmem:[#allocation14 + $0x1fa8] sm:$0xff] }
 0x5ce   :  { %8276 = vmatpush1.bf16.msra.mxu0 %v15031_v12  ;;  %8113 = vmatprep.subr.bf16.mxu1 %v15036_v13  ;;  %v15074_v12 = vcombine.high %v5762_v4, %v5765_v5  ;;  %v5767_v13 = vld [vmem:[#allocation14 + $0x1be0] sm:$0xff]  ;;  %v5801_v3 = vld [vmem:[#allocation14 + $0x2008] sm:$0xff]  ;;  %v15103_v5 = vcombine.low %v5792_v35, %v5795_v54 }
 0x5cf   :  { %8277 = vmatprep.subr.bf16.mxu0 %v15038_v14  ;;  %v5770_v14 = vld [vmem:[#allocation14 + $0x1c40] sm:$0xff] }
 0x5d0   :  { %v15077_v30 = vcombine.low %v5767_v13, %v5770_v14 }
 0x5d1   :  { %8114 = vmatpush1.bf16.msra.mxu1 %v15035_v38  ;;  %v15078_v38 = vcombine.high %v5767_v13, %v5770_v14  ;;  %v5804_v13 = vld [vmem:[#allocation14 + $0x2068] sm:$0xff] }
 0x5d2   :  { %8278 = vmatpush1.bf16.msra.mxu0 %v15037_v25  ;;  %8115 = vmatprep.subr.bf16.mxu1 %v15042_v27  ;;  %v15080_v25 = vcombine.high %v5768_v17, %v5771_v18  ;;  %v5773_v27 = vld [vmem:[#allocation14 + $0x1ca0] sm:$0xff]  ;;  %v5807_v14 = vld [vmem:[#allocation14 + $0x20c8] sm:$0xff]  ;;  %v15109_v18 = vcombine.low %v5798_v2, %v5801_v3 }
 0x5d3   :  { %8279 = vmatprep.subr.bf16.mxu0 %v15044_v28  ;;  %v5776_v28 = vld [vmem:[#allocation14 + $0x1d00] sm:$0xff] }
 0x5d5   :  { %8116 = vmatpush1.bf16.msra.mxu1 %v15041_v32  ;;  %v15084_v32 = vcombine.high %v5773_v27, %v5776_v28 }
 0x5d6   :  { %8280 = vmatpush1.bf16.msra.mxu0 %v15043_v33  ;;  %8126 = vmatprep.subr.bf16.mxu1 %v15048_v34  ;;  %v15086_v33 = vcombine.high %v5774_v59, %v5777_v29  ;;  %v5779_v34 = vld [vmem:[#allocation14 + $0x1d60] sm:$0xff]  ;;  %v15115_v29 = vcombine.low %v5804_v13, %v5807_v14 }
 0x5d7   :  { %8290 = vmatprep.subr.bf16.mxu0 %v15050_v39  ;;  %v5782_v39 = vld [vmem:[#allocation14 + $0x1dc0] sm:$0xff] }
 0x5d8   :  { %8118 = vmatmul.mubr.bf16.vlgmr.msra.gmra.mrb[20].mxu1 %v16900_v26  ;;  %v15090_v46 = vcombine.high %v5779_v34, %v5782_v39  ;;  %v15089_v63 = vcombine.low %v5779_v34, %v5782_v39  ;;  %v5816_v34 = vld [vmem:[#allocation14 + $0x21e8] sm:$0xff] }
 0x5d9   :  { %8282 = vmatmul.mubr.bf16.vlgmr.msra.gmra.mrb[24].mxu0 %v16900_v26  ;;  %8127 = vmatpush1.bf16.msra.mxu1 %v15047_v40  ;;  %v15083_v40 = vcombine.low %v5773_v27, %v5776_v28  ;;  %v5810_v27 = vld [vmem:[#allocation14 + $0x2128] sm:$0xff] }
 0x5da   :  { %8158 = vmatprep.mubr.bf16.mxu1 %v16918_v7  ;;  %8291 = vmatpush1.bf16.msra.mxu0 %v15049_v43  ;;  %v15092_v43 = vcombine.high %v5780_v36, %v5783_v37  ;;  %v5813_v28 = vld [vmem:[#allocation14 + $0x2188] sm:$0xff] }
 0x5db   :  { %8322 = vmatprep.mubr.bf16.mxu0 %v16918_v7  ;;  %8128 = vmatprep.subr.bf16.mxu1 %v15054_v44  ;;  %v5785_v44 = vld [vmem:[#allocation14 + $0x1e20] sm:$0xff]  ;;  %v5819_v39 = vld [vmem:[#allocation14 + $0x2248] sm:$0xff]  ;;  %v15121_v37 = vcombine.low %v5810_v27, %v5813_v28 }
 0x5dc   :  { %8292 = vmatprep.subr.bf16.mxu0 %v15056_v15  ;;  %v5789_v15 = vld [vmem:[#allocation14 + $0x1e88] sm:$0xff]  ;;  %v15095_v55 = vcombine.low %v5785_v44, %v5788_v45 }
 0x5dd   :  { %8129 = vmatpush1.bf16.msra.mxu1 %v15053_v49  ;;  %v15096_v49 = vcombine.high %v5785_v44, %v5788_v45  ;;  %v15097_v56 = vcombine.low %v5786_v47, %v5789_v15  ;;  %v5822_v44 = vld [vmem:[#allocation14 + $0x22a8] sm:$0xff] }
 0x5de   :  { %8293 = vmatpush1.bf16.msra.mxu0 %v15055_v50  ;;  %8130 = vmatprep.subr.bf16.mxu1 %v15060_v52  ;;  %v15098_v50 = vcombine.high %v5786_v47, %v5789_v15  ;;  %v5791_v52 = vld [vmem:[#allocation14 + $0x1ee0] sm:$0xff]  ;;  %v5825_v45 = vld [vmem:[#allocation14 + $0x2308] sm:$0xff]  ;;  %v15127_v15 = vcombine.low %v5816_v34, %v5819_v39 }
 0x5df   :  { %8294 = vmatprep.subr.bf16.mxu0 %v15062_v53  ;;  %v5794_v53 = vld [vmem:[#allocation14 + $0x1f40] sm:$0xff] }
 0x5e0   :  { %v15101_v4 = vcombine.low %v5791_v52, %v5794_v53 }
 0x5e1   :  { %8131 = vmatpush1.bf16.msra.mxu1 %v15059_v21  ;;  %v15102_v21 = vcombine.high %v5791_v52, %v5794_v53  ;;  %v5828_v52 = vld [vmem:[#allocation14 + $0x2368] sm:$0xff] }
 0x5e2   :  { %8295 = vmatpush1.bf16.msra.mxu0 %v15061_v58  ;;  %8132 = vmatprep.subr.bf16.mxu1 %v15066_v0  ;;  %v15104_v58 = vcombine.high %v5792_v35, %v5795_v54  ;;  %v5797_v0 = vld [vmem:[#allocation14 + $0x1fa0] sm:$0xff]  ;;  %v5831_v53 = vld [vmem:[#allocation14 + $0x23c8] sm:$0xff]  ;;  %v15133_v54 = vcombine.low %v5822_v44, %v5825_v45 }
 0x5e3   :  { %8296 = vmatprep.subr.bf16.mxu0 %v15068_v1  ;;  %v5800_v1 = vld [vmem:[#allocation14 + $0x2000] sm:$0xff] }
 0x5e4   :  { %v15107_v17 = vcombine.low %v5797_v0, %v5800_v1 }
 0x5e5   :  { %8133 = vmatpush1.bf16.msra.mxu1 %v15065_v8  ;;  %v15108_v8 = vcombine.high %v5797_v0, %v5800_v1  ;;  %v5834_v0 = vld [vmem:[#allocation14 + $0x2428] sm:$0xff] }
 0x5e6   :  { %8297 = vmatpush1.bf16.msra.mxu0 %v15067_v9  ;;  %8134 = vmatprep.subr.bf16.mxu1 %v15072_v11  ;;  %v15110_v9 = vcombine.high %v5798_v2, %v5801_v3  ;;  %v5803_v11 = vld [vmem:[#allocation14 + $0x2060] sm:$0xff]  ;;  %v5837_v1 = vld [vmem:[#allocation14 + $0x2488] sm:$0xff]  ;;  %v15139_v3 = vcombine.low %v5828_v52, %v5831_v53 }
 0x5e7   :  { %8298 = vmatprep.subr.bf16.mxu0 %v15074_v12  ;;  %v5806_v12 = vld [vmem:[#allocation14 + $0x20c0] sm:$0xff] }
 0x5e8   :  { %v15113_v59 = vcombine.low %v5803_v11, %v5806_v12 }
 0x5e9   :  { %8135 = vmatpush1.bf16.msra.mxu1 %v15071_v22  ;;  %v15114_v22 = vcombine.high %v5803_v11, %v5806_v12  ;;  %v5840_v12 = vld [vmem:[#allocation14 + $0x24e8] sm:$0xff] }
 0x5ea   :  { %8299 = vmatpush1.bf16.msra.mxu0 %v15073_v42  ;;  %8136 = vmatprep.subr.bf16.mxu1 %v15078_v38  ;;  %v15116_v42 = vcombine.high %v5804_v13, %v5807_v14  ;;  %v5809_v38 = vld [vmem:[#allocation14 + $0x2120] sm:$0xff]  ;;  %v5843_v13 = vld [vmem:[#allocation14 + $0x2548] sm:$0xff]  ;;  %v15145_v14 = vcombine.low %v5834_v0, %v5837_v1 }
 0x5eb   :  { %8300 = vmatprep.subr.bf16.mxu0 %v15080_v25  ;;  %v5812_v25 = vld [vmem:[#allocation14 + $0x2180] sm:$0xff] }
 0x5ec   :  { %v15119_v36 = vcombine.low %v5809_v38, %v5812_v25 }
 0x5ed   :  { %8137 = vmatpush1.bf16.msra.mxu1 %v15077_v30  ;;  %v15120_v30 = vcombine.high %v5809_v38, %v5812_v25  ;;  %v5846_v38 = vld [vmem:[#allocation14 + $0x25a8] sm:$0xff] }
 0x5ee   :  { %8301 = vmatpush1.bf16.msra.mxu0 %v15079_v31  ;;  %8138 = vmatprep.subr.bf16.mxu1 %v15084_v32  ;;  %v15122_v31 = vcombine.high %v5810_v27, %v5813_v28  ;;  %v5815_v32 = vld [vmem:[#allocation14 + $0x21e0] sm:$0xff]  ;;  %v5849_v25 = vld [vmem:[#allocation14 + $0x2608] sm:$0xff]  ;;  %v15151_v28 = vcombine.low %v5840_v12, %v5843_v13 }
 0x5ef   :  { %8302 = vmatprep.subr.bf16.mxu0 %v15086_v33  ;;  %v5818_v33 = vld [vmem:[#allocation14 + $0x2240] sm:$0xff] }
 0x5f0   :  { %v15125_v47 = vcombine.low %v5815_v32, %v5818_v33 }
 0x5f1   :  { %8139 = vmatpush1.bf16.msra.mxu1 %v15083_v40  ;;  %v15126_v40 = vcombine.high %v5815_v32, %v5818_v33  ;;  %v5852_v32 = vld [vmem:[#allocation14 + $0x2668] sm:$0xff] }
 0x5f2   :  { %8303 = vmatpush1.bf16.msra.mxu0 %v15085_v41  ;;  %8140 = vmatprep.subr.bf16.mxu1 %v15090_v46  ;;  %v15128_v41 = vcombine.high %v5816_v34, %v5819_v39  ;;  %v5821_v46 = vld [vmem:[#allocation14 + $0x22a0] sm:$0xff]  ;;  %v5855_v33 = vld [vmem:[#allocation14 + $0x26c8] sm:$0xff]  ;;  %v15157_v39 = vcombine.low %v5846_v38, %v5849_v25 }
 0x5f3   :  { %8304 = vmatprep.subr.bf16.mxu0 %v15092_v43  ;;  %v5824_v43 = vld [vmem:[#allocation14 + $0x2300] sm:$0xff] }
 0x5f4   :  { %v15131_v35 = vcombine.low %v5821_v46, %v5824_v43 }
 0x5f5   :  { %8141 = vmatpush1.bf16.msra.mxu1 %v15089_v63  ;;  %v15132_v63 = vcombine.high %v5821_v46, %v5824_v43  ;;  %v5858_v46 = vld [vmem:[#allocation14 + $0x2728] sm:$0xff] }
 0x5f6   :  { %8305 = vmatpush1.bf16.msra.mxu0 %v15091_v48  ;;  %8142 = vmatprep.subr.bf16.mxu1 %v15096_v49  ;;  %v15134_v48 = vcombine.high %v5822_v44, %v5825_v45  ;;  %v5827_v49 = vld [vmem:[#allocation14 + $0x2360] sm:$0xff]  ;;  %v5861_v43 = vld [vmem:[#allocation14 + $0x2788] sm:$0xff]  ;;  %v15163_v45 = vcombine.low %v5852_v32, %v5855_v33 }
 0x5f7   :  { %8306 = vmatprep.subr.bf16.mxu0 %v15098_v50  ;;  %v5830_v50 = vld [vmem:[#allocation14 + $0x23c0] sm:$0xff] }
 0x5f8   :  { %v15137_v2 = vcombine.low %v5827_v49, %v5830_v50 }
 0x5f9   :  { %8143 = vmatpush1.bf16.msra.mxu1 %v15095_v55  ;;  %v15138_v55 = vcombine.high %v5827_v49, %v5830_v50  ;;  %v5864_v49 = vld [vmem:[#allocation14 + $0x27e8] sm:$0xff] }
 0x5fa   :  { %8307 = vmatpush1.bf16.msra.mxu0 %v15097_v56  ;;  %8144 = vmatprep.subr.bf16.mxu1 %v15102_v21  ;;  %v15140_v56 = vcombine.high %v5828_v52, %v5831_v53  ;;  %v5833_v21 = vld [vmem:[#allocation14 + $0x2420] sm:$0xff]  ;;  %v5867_v50 = vld [vmem:[#allocation14 + $0x2848] sm:$0xff]  ;;  %v15169_v53 = vcombine.low %v5858_v46, %v5861_v43 }
 0x5fb   :  { %8308 = vmatprep.subr.bf16.mxu0 %v15104_v58  ;;  %v5836_v58 = vld [vmem:[#allocation14 + $0x2480] sm:$0xff] }
 0x5fc   :  { %v15143_v11 = vcombine.low %v5833_v21, %v5836_v58 }
 0x5fd   :  { %8145 = vmatpush1.bf16.msra.mxu1 %v15101_v4  ;;  %v15144_v4 = vcombine.high %v5833_v21, %v5836_v58  ;;  %v5872_v21 = vld [vmem:[#allocation14 + $0x2900] sm:$0xff] }
 0x5fe   :  { %8309 = vmatpush1.bf16.msra.mxu0 %v15103_v5  ;;  %8146 = vmatprep.subr.bf16.mxu1 %v15108_v8  ;;  %v15146_v5 = vcombine.high %v5834_v0, %v5837_v1  ;;  %v5839_v8 = vld [vmem:[#allocation14 + $0x24e0] sm:$0xff]  ;;  %v5870_v1 = vld [vmem:[#allocation14 + $0x28a8] sm:$0xff] }
 0x5ff   :  { %8310 = vmatprep.subr.bf16.mxu0 %v15110_v9  ;;  %v5842_v9 = vld [vmem:[#allocation14 + $0x2540] sm:$0xff] }
 0x600   :  { %v15149_v27 = vcombine.low %v5839_v8, %v5842_v9  ;;  %v16412_v58 = vld [vmem:[#allocation16] sm:$0x3f] }
 0x601   :  { %8147 = vmatpush1.bf16.msra.mxu1 %v15107_v17  ;;  %v15150_v17 = vcombine.high %v5839_v8, %v5842_v9  ;;  %v3088_v0 = vrot.slane %v16412_v58, %v16905_v20  ;;  %v15175_v9 = vcombine.low %v5864_v49, %v5867_v50 }
 0x602   :  { %8311 = vmatpush1.bf16.msra.mxu0 %v15109_v18  ;;  %8148 = vmatprep.subr.bf16.mxu1 %v15114_v22  ;;  %v5845_v18 = vld [vmem:[#allocation14 + $0x25a0] sm:$0xff] }
 0x603   :  { %8312 = vmatprep.subr.bf16.mxu0 %v15116_v42  ;;  %v5848_v22 = vld [vmem:[#allocation14 + $0x2600] sm:$0xff]  ;;  %v15152_v42 = vcombine.high %v5840_v12, %v5843_v13 }
 0x604   :  { %v15155_v34 = vcombine.low %v5845_v18, %v5848_v22 }
 0x605   :  { %8149 = vmatpush1.bf16.msra.mxu1 %v15113_v59  ;;  %v15156_v59 = vcombine.high %v5845_v18, %v5848_v22 }
 0x606   :  { %8313 = vmatpush1.bf16.msra.mxu0 %v15115_v29  ;;  %8150 = vmatprep.subr.bf16.mxu1 %v15120_v30  ;;  %v15158_v29 = vcombine.high %v5846_v38, %v5849_v25  ;;  %v5851_v30 = vld [vmem:[#allocation14 + $0x2660] sm:$0xff]  ;;  %v5876_v38 = vld [vmem:[#allocation14 + $0x2968] sm:$0xff] }
 0x607   :  { %8314 = vmatprep.subr.bf16.mxu0 %v15122_v31  ;;  %v5854_v31 = vld [vmem:[#allocation14 + $0x26c0] sm:$0xff]  ;;  %v5879_v25 = vld [vmem:[#allocation14 + $0x29c8] sm:$0xff] }
 0x608   :  { %v15161_v44 = vcombine.low %v5851_v30, %v5854_v31 }
 0x609   :  { %8151 = vmatpush1.bf16.msra.mxu1 %v15119_v36  ;;  %v15162_v36 = vcombine.high %v5851_v30, %v5854_v31 }
 0x60a   :  { %8315 = vmatpush1.bf16.msra.mxu0 %v15121_v37  ;;  %8152 = vmatprep.subr.bf16.mxu1 %v15126_v40  ;;  %v15164_v37 = vcombine.high %v5852_v32, %v5855_v33  ;;  %v5857_v40 = vld [vmem:[#allocation14 + $0x2720] sm:$0xff] }
 0x60b   :  { %8316 = vmatprep.subr.bf16.mxu0 %v15128_v41  ;;  %v5860_v41 = vld [vmem:[#allocation14 + $0x2780] sm:$0xff] }
 0x60c   :  { %v15167_v52 = vcombine.low %v5857_v40, %v5860_v41 }
 0x60d   :  { %8153 = vmatpush1.bf16.msra.mxu1 %v15125_v47  ;;  %v15168_v47 = vcombine.high %v5857_v40, %v5860_v41  ;;  %v5881_v40 = vld [vmem:[#allocation14 + $0x2a20] sm:$0xff] }
 0x60e   :  { %8317 = vmatpush1.bf16.msra.mxu0 %v15127_v15  ;;  %8154 = vmatprep.subr.bf16.mxu1 %v15132_v63  ;;  %v15170_v15 = vcombine.high %v5858_v46, %v5861_v43  ;;  %v5863_v63 = vld [vmem:[#allocation14 + $0x27e0] sm:$0xff]  ;;  %v5882_v46 = vld [vmem:[#allocation14 + $0x2a28] sm:$0xff] }
 0x60f   :  { %8318 = vmatprep.subr.bf16.mxu0 %v15134_v48  ;;  %v5866_v48 = vld [vmem:[#allocation14 + $0x2840] sm:$0xff]  ;;  %v5885_v43 = vld [vmem:[#allocation14 + $0x2a88] sm:$0xff] }
 0x610   :  { %v5884_v41 = vld [vmem:[#allocation14 + $0x2a80] sm:$0xff] }
 0x611   :  { %8155 = vmatpush1.bf16.msra.mxu1 %v15131_v35  ;;  %v5928_v35 = vld [vmem:[#allocation16 + $0x6] sm:$0x3f] }
 0x612   :  { %8319 = vmatpush1.bf16.msra.mxu0 %v15133_v54  ;;  %8156 = vmatprep.subr.bf16.mxu1 %v15138_v55  ;;  %v15174_v54 = vcombine.high %v5863_v63, %v5866_v48  ;;  %v15176_v55 = vcombine.high %v5864_v49, %v5867_v50  ;;  %v5937_v8 = vrot.slane %v5928_v35, %v16828_v62  ;;  %v5888_v49 = vld [vmem:[#allocation14 + $0x2ae8] sm:$0xff] }
 0x613   :  { %8320 = vmatprep.subr.bf16.mxu0 %v15140_v56  ;;  %v5869_v56 = vld [vmem:[#allocation14 + $0x28a0] sm:$0xff]  ;;  %v5891_v50 = vld [vmem:[#allocation14 + $0x2b48] sm:$0xff] }
 0x614   :  { %v15179_v30 = vcombine.low %v5869_v56, %v5872_v21 }
 0x615   :  { %8157 = vmatpush1.bf16.msra.mxu1 %v15137_v2  ;;  %v5873_v2 = vld [vmem:[#allocation14 + $0x2908] sm:$0xff] }
 0x616   :  { %8321 = vmatpush1.bf16.msra.mxu0 %v15139_v3  ;;  %8167 = vmatprep.subr.bf16.mxu1 %v15144_v4  ;;  %v5933_v3 = vrot.slane %v5928_v35, %v16825_v60  ;;  %v3092_v4 = vrot.slane %v16412_v58, %v16908_v23  ;;  %v15182_v13 = vcombine.high %v5870_v1, %v5873_v2  ;;  %v5894_v58 = vld [vmem:[#allocation14 + $0x2ba8] sm:$0xff] }
 0x617   :  { %8331 = vmatprep.subr.bf16.mxu0 %v15146_v5  ;;  %v15173_v5 = vcombine.low %v5863_v63, %v5866_v48  ;;  %v5887_v63 = vld [vmem:[#allocation14 + $0x2ae0] sm:$0xff] }
 0x618   :  { %8159 = vmatmul.mubr.bf16.vlgmr.msra.gmra.mrb[20].mxu1 %v16920_v10  ;;  %v5890_v48 = vld [vmem:[#allocation14 + $0x2b40] sm:$0xff] }
 0x619   :  { %8323 = vmatmul.mubr.bf16.vlgmr.msra.gmra.mrb[24].mxu0 %v16920_v10  ;;  %8168 = vmatpush1.bf16.msra.mxu1 %v15143_v11  ;;  %v15180_v11 = vcombine.high %v5869_v56, %v5872_v21  ;;  %v15198_v35 = vcombine.high %v5887_v63, %v5890_v48  ;;  %v5896_v56 = vld [vmem:[#allocation14 + $0x2c00] sm:$0xff] }
 0x61a   :  { %8199 = vmatprep.mubr.bf16.mxu1 %v16924_v19  ;;  %8332 = vmatpush1.bf16.msra.mxu0 %v15145_v14  ;;  %v5875_v14 = vld [vmem:[#allocation14 + $0x2960] sm:$0xff] }
 0x61b   :  { %8363 = vmatprep.mubr.bf16.mxu0 %v16924_v19  ;;  %8169 = vmatprep.subr.bf16.mxu1 %v15150_v17  ;;  %v5878_v17 = vld [vmem:[#allocation14 + $0x29c0] sm:$0xff] }
 0x61c   :  { %8333 = vmatprep.subr.bf16.mxu0 %v15152_v42 }
 0x61d   :  { %8170 = vmatpush1.bf16.msra.mxu1 %v15149_v27 }
 0x61e   :  { %8334 = vmatpush1.bf16.msra.mxu0 %v15151_v28  ;;  %8171 = vmatprep.subr.bf16.mxu1 %v15156_v59 }
 0x61f   :  { %8335 = vmatprep.subr.bf16.mxu0 %v15158_v29 }
 0x621   :  { %8172 = vmatpush1.bf16.msra.mxu1 %v15155_v34  ;;  %v15181_v34 = vcombine.low %v5870_v1, %v5873_v2  ;;  %v15197_v2 = vcombine.low %v5887_v63, %v5890_v48 }
 0x622   :  { %8336 = vmatpush1.bf16.msra.mxu0 %v15157_v39  ;;  %8173 = vmatprep.subr.bf16.mxu1 %v15162_v36  ;;  %v15186_v39 = vcombine.high %v5875_v14, %v5878_v17 }
 0x623   :  { %8337 = vmatprep.subr.bf16.mxu0 %v15164_v37  ;;  %v15188_v37 = vcombine.high %v5876_v38, %v5879_v25 }
 0x625   :  { %8174 = vmatpush1.bf16.msra.mxu1 %v15161_v44  ;;  %v15185_v44 = vcombine.low %v5875_v14, %v5878_v17  ;;  %v5900_v17 = vld [vmem:[#allocation14 + $0x2c68] sm:$0xff] }
 0x626   :  { %8338 = vmatpush1.bf16.msra.mxu0 %v15163_v45  ;;  %8175 = vmatprep.subr.bf16.mxu1 %v15168_v47  ;;  %v15187_v45 = vcombine.low %v5876_v38, %v5879_v25  ;;  %v15192_v47 = vcombine.high %v5881_v40, %v5884_v41 }
 0x627   :  { %8339 = vmatprep.subr.bf16.mxu0 %v15170_v15  ;;  %v15194_v15 = vcombine.high %v5882_v46, %v5885_v43 }
 0x629   :  { %8176 = vmatpush1.bf16.msra.mxu1 %v15167_v52  ;;  %v15191_v52 = vcombine.low %v5881_v40, %v5884_v41 }
 0x62a   :  { %8340 = vmatpush1.bf16.msra.mxu0 %v15169_v53  ;;  %8177 = vmatprep.subr.bf16.mxu1 %v15174_v54  ;;  %v15193_v53 = vcombine.low %v5882_v46, %v5885_v43  ;;  %v15200_v54 = vcombine.high %v5888_v49, %v5891_v50 }
 0x62b   :  { %v5504_v12 = vpop.f32.mrb[16].mxu1  ;;  %8341 = vmatprep.subr.bf16.mxu0 %v15176_v55  ;;  %v5893_v55 = vld [vmem:[#allocation14 + $0x2ba0] sm:$0xff] }
 0x62c   :  { %v16070_v18 = vadd.f32 %v5504_v12, %v3088_v0  ;;  %v8037_v22 = vpop.f32.mrb[20].mxu0  ;;  %v5506_v42 = vpop.f32.mrb[17].mxu1  ;;  %v5897_v0 = vld [vmem:[#allocation14 + $0x2c08] sm:$0xff]  ;;  %v5899_v12 = vld [vmem:[#allocation14 + $0x2c60] sm:$0xff] }
 0x62d   :  { %v16072_v27 = vadd.f32 %v8037_v22, %v5933_v3  ;;  %v16071_v28 = vadd.f32 %v5506_v42, %v3092_v4  ;;  %v8039_v59 = vpop.f32.mrb[21].mxu0  ;;  %v5508_v29 = vpop.f32.mrb[18].mxu1  ;;  %8178 = vmatpush1.bf16.msra.mxu1 %v15173_v5  ;;  %v15199_v4 = vcombine.low %v5888_v49, %v5891_v50  ;;  %v15204_v5 = vcombine.high %v5893_v55, %v5896_v56 }
 0x62e   :  { %16371 = vtanh.f32 %v16070_v18  ;;  %v16073_v31 = vadd.f32 %v8039_v59, %v5937_v8  ;;  %v8041_v32 = vpop.f32.mrb[22].mxu0  ;;  %8342 = vmatpush1.bf16.msra.mxu0 %v15175_v9  ;;  %v5509_v33 = vpop.f32.mrb[19].mxu1  ;;  %8179 = vmatprep.subr.bf16.mxu1 %v15180_v11  ;;  %v15206_v11 = vcombine.high %v5894_v58, %v5897_v0  ;;  %v5903_v18 = vld [vmem:[#allocation14 + $0x2cc8] sm:$0xff]  ;;  %v15203_v22 = vcombine.low %v5893_v55, %v5896_v56 }
 0x62f   :  { %16373 = vtanh.f32 %v16072_v27  ;;  %v8042_v36 = vpop.f32.mrb[23].mxu0  ;;  %8343 = vmatprep.subr.bf16.mxu0 %v15182_v13  ;;  %v5902_v13 = vld [vmem:[#allocation14 + $0x2cc0] sm:$0xff]  ;;  %v15205_v42 = vcombine.low %v5894_v58, %v5897_v0  ;;  %v15212_v25 = vcombine.high %v5900_v17, %v5903_v18  ;;  %v5906_v59 = vld [vmem:[#allocation14 + $0x2d28] sm:$0xff]  ;;  %v8405_v0 = vld [vmem:[#allocation14 + $0x30] sm:$0xff] }
 0x630   :  { %16375 = vtanh.f32 %v16071_v28  ;;  %v15210_v38 = vcombine.high %v5899_v12, %v5902_v13  ;;  %v5905_v27 = vld [vmem:[#allocation14 + $0x2d20] sm:$0xff]  ;;  %v5909_v29 = vld [vmem:[#allocation14 + $0x2d88] sm:$0xff] }
 0x631   :  { %16377 = vtanh.f32 %v16073_v31  ;;  %8180 = vmatpush1.bf16.msra.mxu1 %v15179_v30  ;;  %v5908_v28 = vld [vmem:[#allocation14 + $0x2d80] sm:$0xff]  ;;  %v15209_v30 = vcombine.low %v5899_v12, %v5902_v13  ;;  %v15211_v31 = vcombine.low %v5900_v17, %v5903_v18  ;;  %v15218_v33 = vcombine.high %v5906_v59, %v5909_v29  ;;  %v5912_v36 = vld [vmem:[#allocation14 + $0x2de8] sm:$0xff]  ;;  %v8414_v12 = vld [vmem:[#allocation14 + $0x150] sm:$0xff] }
 0x632   :  { %8344 = vmatpush1.bf16.msra.mxu0 %v15181_v34  ;;  %8181 = vmatprep.subr.bf16.mxu1 %v15186_v39  ;;  %v15216_v32 = vcombine.high %v5905_v27, %v5908_v28  ;;  %v5911_v34 = vld [vmem:[#allocation14 + $0x2de0] sm:$0xff]  ;;  %v15215_v40 = vcombine.low %v5905_v27, %v5908_v28  ;;  %v15217_v41 = vcombine.low %v5906_v59, %v5909_v29  ;;  %v8415_v17 = vld [vmem:[#allocation14 + $0x158] sm:$0xff] }
 0x633   :  { %8345 = vmatprep.subr.bf16.mxu0 %v15188_v37  ;;  %v5914_v39 = vld [vmem:[#allocation14 + $0x2e40] sm:$0xff]  ;;  %v5915_v37 = vld [vmem:[#allocation14 + $0x2e48] sm:$0xff]  ;;  %v8418_v27 = vld [vmem:[#allocation14 + $0x1b8] sm:$0xff] }
 0x634   :  { %v15222_v46 = vcombine.high %v5911_v34, %v5914_v39  ;;  %v15224_v43 = vcombine.high %v5912_v36, %v5915_v37  ;;  %v15221_v63 = vcombine.low %v5911_v34, %v5914_v39  ;;  %v15223_v48 = vcombine.low %v5912_v36, %v5915_v37  ;;  %v8421_v28 = vld [vmem:[#allocation14 + $0x218] sm:$0xff] }
 0x635   :  { %8182 = vmatpush1.bf16.msra.mxu1 %v15185_v44  ;;  %v5917_v44 = vld [vmem:[#allocation14 + $0x2ea0] sm:$0xff]  ;;  %v8424_v34 = vld [vmem:[#allocation14 + $0x278] sm:$0xff]  ;;  %v15254_v37 = vcombine.low %v8418_v27, %v8421_v28 }
 0x636   :  { %8346 = vmatpush1.bf16.msra.mxu0 %v15187_v45  ;;  %8183 = vmatprep.subr.bf16.mxu1 %v15192_v47  ;;  %v5920_v45 = vld [vmem:[#allocation14 + $0x2f00] sm:$0xff]  ;;  %v5918_v47 = vld [vmem:[#allocation14 + $0x2ea8] sm:$0xff]  ;;  %v8427_v39 = vld [vmem:[#allocation14 + $0x2d8] sm:$0xff] }
 0x637   :  { %8347 = vmatprep.subr.bf16.mxu0 %v15194_v15  ;;  %v5921_v15 = vld [vmem:[#allocation14 + $0x2f08] sm:$0xff]  ;;  %v15228_v49 = vcombine.high %v5917_v44, %v5920_v45  ;;  %v15227_v55 = vcombine.low %v5917_v44, %v5920_v45  ;;  %v8430_v44 = vld [vmem:[#allocation14 + $0x338] sm:$0xff] }
 0x638   :  { %v16372_v21 = vpop.eup %16371  ;;  %v15230_v50 = vcombine.high %v5918_v47, %v5921_v15  ;;  %v15229_v56 = vcombine.low %v5918_v47, %v5921_v15  ;;  %v8433_v45 = vld [vmem:[#allocation14 + $0x398] sm:$0xff]  ;;  %v15260_v15 = vcombine.low %v8424_v34, %v8427_v39 }
 0x639   :  { %v16374_v1 = vpop.eup %16373  ;;  %8184 = vmatpush1.bf16.msra.mxu1 %v15191_v52  ;;  %v5923_v52 = vld [vmem:[#allocation14 + $0x2f60] sm:$0xff] }
 0x63a   :  { %v16376_v3 = vpop.eup %16375  ;;  %8348 = vmatpush1.bf16.msra.mxu0 %v15193_v53  ;;  %8185 = vmatprep.subr.bf16.mxu1 %v15198_v35  ;;  %v5926_v53 = vld [vmem:[#allocation14 + $0x2fc0] sm:$0xff]  ;;  %v5924_v35 = vld [vmem:[#allocation14 + $0x2f68] sm:$0xff] }
 0x63b   :  { %v16378_v8 = vpop.eup %16377  ;;  %v16016_v9 = vpack.c.bf16 %v16376_v3, %v16372_v21  ;;  %8349 = vmatprep.subr.bf16.mxu0 %v15200_v54  ;;  %v5927_v54 = vld [vmem:[#allocation14 + $0x2fc8] sm:$0xff]  ;;  %v15234_v21 = vcombine.high %v5923_v52, %v5926_v53  ;;  %v8409_v3 = vld [vmem:[#allocation14 + $0x98] sm:$0xff] }
 0x63c   :  { %v16017_v14 = vpack.c.bf16 %v16378_v8, %v16374_v1  ;;  %v15236_v58 = vcombine.high %v5924_v35, %v5927_v54  ;;  %v8408_v1 = vld [vmem:[#allocation14 + $0x90] sm:$0xff] }
 0x63d   :  { %5543 = vst [vmem:[#allocation17 + $0x10] sm:$0xff] %v16016_v9  ;;  %8186 = vmatpush1.bf16.msra.mxu1 %v15197_v2  ;;  %v8406_v2 = vld [vmem:[#allocation14 + $0x38] sm:$0xff]  ;;  %v15241_v8 = vcombine.high %v8405_v0, %v8408_v1  ;;  %v15240_v13 = vcombine.low %v8405_v0, %v8408_v1 }
 0x63e   :  { %8402 = vst [vmem:[#allocation17 + $0x18] sm:$0xff] %v16017_v14  ;;  %8350 = vmatpush1.bf16.msra.mxu0 %v15199_v4  ;;  %8187 = vmatprep.subr.bf16.mxu1 %v15204_v5  ;;  %v15233_v4 = vcombine.low %v5923_v52, %v5926_v53  ;;  %v15235_v5 = vcombine.low %v5924_v35, %v5927_v54  ;;  %v8412_v14 = vld [vmem:[#allocation14 + $0xf8] sm:$0xff] }
 0x63f   :  { %8351 = vmatprep.subr.bf16.mxu0 %v15206_v11  ;;  %v15243_v9 = vcombine.high %v8406_v2, %v8409_v3  ;;  %v8411_v11 = vld [vmem:[#allocation14 + $0xf0] sm:$0xff]  ;;  %v15242_v18 = vcombine.low %v8406_v2, %v8409_v3  ;;  %v15248_v29 = vcombine.low %v8412_v14, %v8415_v17  ;;  %v8436_v52 = vld [vmem:[#allocation14 + $0x3f8] sm:$0xff]  ;;  %v15266_v54 = vcombine.low %v8430_v44, %v8433_v45 }
 0x640   :  { %v15246_v59 = vcombine.low %v8411_v11, %v8414_v12  ;;  %v8439_v53 = vld [vmem:[#allocation14 + $0x458] sm:$0xff] }
 0x641   :  { %8188 = vmatpush1.bf16.msra.mxu1 %v15203_v22  ;;  %v15247_v22 = vcombine.high %v8411_v11, %v8414_v12  ;;  %v8442_v0 = vld [vmem:[#allocation14 + $0x4b8] sm:$0xff]  ;;  %v15272_v3 = vcombine.low %v8436_v52, %v8439_v53 }
 0x642   :  { %8352 = vmatpush1.bf16.msra.mxu0 %v15205_v42  ;;  %8189 = vmatprep.subr.bf16.mxu1 %v15210_v38  ;;  %v8417_v42 = vld [vmem:[#allocation14 + $0x1b0] sm:$0xff]  ;;  %v8445_v1 = vld [vmem:[#allocation14 + $0x518] sm:$0xff] }
 0x643   :  { %8353 = vmatprep.subr.bf16.mxu0 %v15212_v25  ;;  %v8420_v38 = vld [vmem:[#allocation14 + $0x210] sm:$0xff]  ;;  %v15249_v25 = vcombine.high %v8412_v14, %v8415_v17  ;;  %v8448_v11 = vld [vmem:[#allocation14 + $0x578] sm:$0xff]  ;;  %v15278_v14 = vcombine.low %v8442_v0, %v8445_v1 }
 0x644   :  { %v15252_v36 = vcombine.low %v8417_v42, %v8420_v38  ;;  %v8451_v12 = vld [vmem:[#allocation14 + $0x5d8] sm:$0xff] }
 0x645   :  { %8190 = vmatpush1.bf16.msra.mxu1 %v15209_v30  ;;  %v15253_v30 = vcombine.high %v8417_v42, %v8420_v38  ;;  %v8456_v42 = vld [vmem:[#allocation14 + $0x690] sm:$0xff]  ;;  %v8454_v38 = vld [vmem:[#allocation14 + $0x638] sm:$0xff] }
 0x646   :  { %8354 = vmatpush1.bf16.msra.mxu0 %v15211_v31  ;;  %8191 = vmatprep.subr.bf16.mxu1 %v15216_v32  ;;  %v15255_v31 = vcombine.high %v8418_v27, %v8421_v28  ;;  %v8423_v32 = vld [vmem:[#allocation14 + $0x270] sm:$0xff]  ;;  %v15284_v28 = vcombine.low %v8448_v11, %v8451_v12 }
 0x647   :  { %8355 = vmatprep.subr.bf16.mxu0 %v15218_v33  ;;  %v8426_v33 = vld [vmem:[#allocation14 + $0x2d0] sm:$0xff] }
 0x648   :  { %v15258_v47 = vcombine.low %v8423_v32, %v8426_v33 }
 0x649   :  { %8192 = vmatpush1.bf16.msra.mxu1 %v15215_v40  ;;  %v15259_v40 = vcombine.high %v8423_v32, %v8426_v33  ;;  %v8460_v32 = vld [vmem:[#allocation14 + $0x6f8] sm:$0xff] }
 0x64a   :  { %8356 = vmatpush1.bf16.msra.mxu0 %v15217_v41  ;;  %8193 = vmatprep.subr.bf16.mxu1 %v15222_v46  ;;  %v15261_v41 = vcombine.high %v8424_v34, %v8427_v39  ;;  %v8429_v46 = vld [vmem:[#allocation14 + $0x330] sm:$0xff]  ;;  %v8463_v33 = vld [vmem:[#allocation14 + $0x758] sm:$0xff] }
 0x64b   :  { %8357 = vmatprep.subr.bf16.mxu0 %v15224_v43  ;;  %v8432_v43 = vld [vmem:[#allocation14 + $0x390] sm:$0xff] }
 0x64c   :  { %v15264_v35 = vcombine.low %v8429_v46, %v8432_v43 }
 0x64d   :  { %8194 = vmatpush1.bf16.msra.mxu1 %v15221_v63  ;;  %v15265_v63 = vcombine.high %v8429_v46, %v8432_v43  ;;  %v8466_v46 = vld [vmem:[#allocation14 + $0x7b8] sm:$0xff] }
 0x64e   :  { %8358 = vmatpush1.bf16.msra.mxu0 %v15223_v48  ;;  %8195 = vmatprep.subr.bf16.mxu1 %v15228_v49  ;;  %v15267_v48 = vcombine.high %v8430_v44, %v8433_v45  ;;  %v8435_v49 = vld [vmem:[#allocation14 + $0x3f0] sm:$0xff]  ;;  %v8469_v43 = vld [vmem:[#allocation14 + $0x818] sm:$0xff]  ;;  %v15296_v45 = vcombine.low %v8460_v32, %v8463_v33 }
 0x64f   :  { %8359 = vmatprep.subr.bf16.mxu0 %v15230_v50  ;;  %v8438_v50 = vld [vmem:[#allocation14 + $0x450] sm:$0xff] }
 0x650   :  { %v15270_v2 = vcombine.low %v8435_v49, %v8438_v50 }
 0x651   :  { %8196 = vmatpush1.bf16.msra.mxu1 %v15227_v55  ;;  %v15271_v55 = vcombine.high %v8435_v49, %v8438_v50  ;;  %v8472_v49 = vld [vmem:[#allocation14 + $0x878] sm:$0xff] }
 0x652   :  { %8360 = vmatpush1.bf16.msra.mxu0 %v15229_v56  ;;  %8197 = vmatprep.subr.bf16.mxu1 %v15234_v21  ;;  %v15273_v56 = vcombine.high %v8436_v52, %v8439_v53  ;;  %v8441_v21 = vld [vmem:[#allocation14 + $0x4b0] sm:$0xff]  ;;  %v8475_v50 = vld [vmem:[#allocation14 + $0x8d8] sm:$0xff]  ;;  %v15302_v53 = vcombine.low %v8466_v46, %v8469_v43 }
 0x653   :  { %8361 = vmatprep.subr.bf16.mxu0 %v15236_v58  ;;  %v8444_v58 = vld [vmem:[#allocation14 + $0x510] sm:$0xff] }
 0x655   :  { %8198 = vmatpush1.bf16.msra.mxu1 %v15233_v4  ;;  %v15277_v4 = vcombine.high %v8441_v21, %v8444_v58 }
 0x656   :  { %8362 = vmatpush1.bf16.msra.mxu0 %v15235_v5  ;;  %10741 = vmatprep.subr.bf16.mxu1 %v15241_v8  ;;  %v15279_v5 = vcombine.high %v8442_v0, %v8445_v1  ;;  %v8447_v8 = vld [vmem:[#allocation14 + $0x570] sm:$0xff]  ;;  %v15308_v1 = vcombine.low %v8472_v49, %v8475_v50 }
 0x657   :  { %10905 = vmatprep.subr.bf16.mxu0 %v15243_v9  ;;  %v8450_v9 = vld [vmem:[#allocation14 + $0x5d0] sm:$0xff] }
 0x658   :  { %8200 = vmatmul.mubr.bf16.vlgmr.msra.gmra.mrb[20].mxu1 %v16932_v51  ;;  %v15283_v17 = vcombine.high %v8447_v8, %v8450_v9  ;;  %v15282_v27 = vcombine.low %v8447_v8, %v8450_v9  ;;  %v8484_v8 = vld [vmem:[#allocation14 + $0x9f8] sm:$0xff] }
 0x659   :  { %8364 = vmatmul.mubr.bf16.vlgmr.msra.gmra.mrb[24].mxu0 %v16932_v51  ;;  %10742 = vmatpush1.bf16.msra.mxu1 %v15240_v13  ;;  %v15276_v13 = vcombine.low %v8441_v21, %v8444_v58  ;;  %v8478_v21 = vld [vmem:[#allocation14 + $0x938] sm:$0xff] }
 0x65a   :  { %10773 = vmatprep.mubr.bf16.mxu1 %v16885_v57  ;;  %10906 = vmatpush1.bf16.msra.mxu0 %v15242_v18  ;;  %v15285_v18 = vcombine.high %v8448_v11, %v8451_v12  ;;  %v8481_v58 = vld [vmem:[#allocation14 + $0x998] sm:$0xff] }
 0x65b   :  { %10937 = vmatprep.mubr.bf16.mxu0 %v16885_v57  ;;  %10743 = vmatprep.subr.bf16.mxu1 %v15247_v22  ;;  %v8453_v22 = vld [vmem:[#allocation14 + $0x630] sm:$0xff]  ;;  %v8487_v9 = vld [vmem:[#allocation14 + $0xa58] sm:$0xff]  ;;  %v15314_v12 = vcombine.low %v8478_v21, %v8481_v58 }
 0x65c   :  { %10907 = vmatprep.subr.bf16.mxu0 %v15249_v25  ;;  %v8457_v25 = vld [vmem:[#allocation14 + $0x698] sm:$0xff]  ;;  %v15288_v34 = vcombine.low %v8453_v22, %v8456_v42 }
 0x65d   :  { %10744 = vmatpush1.bf16.msra.mxu1 %v15246_v59  ;;  %v15289_v59 = vcombine.high %v8453_v22, %v8456_v42  ;;  %v15290_v39 = vcombine.low %v8454_v38, %v8457_v25  ;;  %v8490_v22 = vld [vmem:[#allocation14 + $0xab8] sm:$0xff] }
 0x65e   :  { %10908 = vmatpush1.bf16.msra.mxu0 %v15248_v29  ;;  %10745 = vmatprep.subr.bf16.mxu1 %v15253_v30  ;;  %v15291_v29 = vcombine.high %v8454_v38, %v8457_v25  ;;  %v8459_v30 = vld [vmem:[#allocation14 + $0x6f0] sm:$0xff]  ;;  %v8493_v42 = vld [vmem:[#allocation14 + $0xb18] sm:$0xff]  ;;  %v15320_v25 = vcombine.low %v8484_v8, %v8487_v9 }
 0x65f   :  { %10909 = vmatprep.subr.bf16.mxu0 %v15255_v31  ;;  %v8462_v31 = vld [vmem:[#allocation14 + $0x750] sm:$0xff] }
 0x660   :  { %v15294_v44 = vcombine.low %v8459_v30, %v8462_v31 }
 0x661   :  { %10746 = vmatpush1.bf16.msra.mxu1 %v15252_v36  ;;  %v15295_v36 = vcombine.high %v8459_v30, %v8462_v31  ;;  %v8496_v30 = vld [vmem:[#allocation14 + $0xb78] sm:$0xff] }
 0x662   :  { %10910 = vmatpush1.bf16.msra.mxu0 %v15254_v37  ;;  %10747 = vmatprep.subr.bf16.mxu1 %v15259_v40  ;;  %v15297_v37 = vcombine.high %v8460_v32, %v8463_v33  ;;  %v8465_v40 = vld [vmem:[#allocation14 + $0x7b0] sm:$0xff]  ;;  %v8499_v31 = vld [vmem:[#allocation14 + $0xbd8] sm:$0xff]  ;;  %v15326_v33 = vcombine.low %v8490_v22, %v8493_v42 }
 0x663   :  { %10911 = vmatprep.subr.bf16.mxu0 %v15261_v41  ;;  %v8468_v41 = vld [vmem:[#allocation14 + $0x810] sm:$0xff] }
 0x664   :  { %v15300_v52 = vcombine.low %v8465_v40, %v8468_v41 }
 0x665   :  { %10748 = vmatpush1.bf16.msra.mxu1 %v15258_v47  ;;  %v15301_v47 = vcombine.high %v8465_v40, %v8468_v41  ;;  %v8502_v40 = vld [vmem:[#allocation14 + $0xc38] sm:$0xff] }
 0x666   :  { %10912 = vmatpush1.bf16.msra.mxu0 %v15260_v15  ;;  %10749 = vmatprep.subr.bf16.mxu1 %v15265_v63  ;;  %v15303_v15 = vcombine.high %v8466_v46, %v8469_v43  ;;  %v8471_v63 = vld [vmem:[#allocation14 + $0x870] sm:$0xff]  ;;  %v8505_v41 = vld [vmem:[#allocation14 + $0xc98] sm:$0xff]  ;;  %v15332_v43 = vcombine.low %v8496_v30, %v8499_v31 }
 0x667   :  { %10913 = vmatprep.subr.bf16.mxu0 %v15267_v48  ;;  %v8474_v48 = vld [vmem:[#allocation14 + $0x8d0] sm:$0xff] }
 0x668   :  { %v15306_v0 = vcombine.low %v8471_v63, %v8474_v48 }
 0x669   :  { %10750 = vmatpush1.bf16.msra.mxu1 %v15264_v35  ;;  %v15307_v35 = vcombine.high %v8471_v63, %v8474_v48  ;;  %v8508_v48 = vld [vmem:[#allocation14 + $0xcf8] sm:$0xff] }
 0x66a   :  { %10914 = vmatpush1.bf16.msra.mxu0 %v15266_v54  ;;  %10751 = vmatprep.subr.bf16.mxu1 %v15271_v55  ;;  %v15309_v54 = vcombine.high %v8472_v49, %v8475_v50  ;;  %v8477_v55 = vld [vmem:[#allocation14 + $0x930] sm:$0xff]  ;;  %v8511_v49 = vld [vmem:[#allocation14 + $0xd58] sm:$0xff]  ;;  %v15338_v50 = vcombine.low %v8502_v40, %v8505_v41 }
 0x66b   :  { %10915 = vmatprep.subr.bf16.mxu0 %v15273_v56  ;;  %v8480_v56 = vld [vmem:[#allocation14 + $0x990] sm:$0xff] }
 0x66c   :  { %v15312_v11 = vcombine.low %v8477_v55, %v8480_v56 }
 0x66d   :  { %10752 = vmatpush1.bf16.msra.mxu1 %v15270_v2  ;;  %v15313_v2 = vcombine.high %v8477_v55, %v8480_v56  ;;  %v8514_v55 = vld [vmem:[#allocation14 + $0xdb8] sm:$0xff] }
 0x66e   :  { %10916 = vmatpush1.bf16.msra.mxu0 %v15272_v3  ;;  %10753 = vmatprep.subr.bf16.mxu1 %v15277_v4  ;;  %v15315_v3 = vcombine.high %v8478_v21, %v8481_v58  ;;  %v8483_v4 = vld [vmem:[#allocation14 + $0x9f0] sm:$0xff]  ;;  %v8517_v56 = vld [vmem:[#allocation14 + $0xe18] sm:$0xff]  ;;  %v15344_v58 = vcombine.low %v8508_v48, %v8511_v49 }
 0x66f   :  { %10917 = vmatprep.subr.bf16.mxu0 %v15279_v5  ;;  %v8486_v5 = vld [vmem:[#allocation14 + $0xa50] sm:$0xff] }
 0x670   :  { %v15318_v38 = vcombine.low %v8483_v4, %v8486_v5 }
 0x671   :  { %10754 = vmatpush1.bf16.msra.mxu1 %v15276_v13  ;;  %v15319_v13 = vcombine.high %v8483_v4, %v8486_v5  ;;  %v8520_v4 = vld [vmem:[#allocation14 + $0xe78] sm:$0xff] }
 0x672   :  { %10918 = vmatpush1.bf16.msra.mxu0 %v15278_v14  ;;  %10755 = vmatprep.subr.bf16.mxu1 %v15283_v17  ;;  %v15321_v14 = vcombine.high %v8484_v8, %v8487_v9  ;;  %v8489_v17 = vld [vmem:[#allocation14 + $0xab0] sm:$0xff]  ;;  %v8523_v5 = vld [vmem:[#allocation14 + $0xed8] sm:$0xff]  ;;  %v15350_v9 = vcombine.low %v8514_v55, %v8517_v56 }
 0x673   :  { %10919 = vmatprep.subr.bf16.mxu0 %v15285_v18  ;;  %v8492_v18 = vld [vmem:[#allocation14 + $0xb10] sm:$0xff] }
 0x674   :  { %v15324_v32 = vcombine.low %v8489_v17, %v8492_v18 }
 0x675   :  { %10756 = vmatpush1.bf16.msra.mxu1 %v15282_v27  ;;  %v15325_v27 = vcombine.high %v8489_v17, %v8492_v18  ;;  %v8526_v17 = vld [vmem:[#allocation14 + $0xf38] sm:$0xff] }
 0x676   :  { %10920 = vmatpush1.bf16.msra.mxu0 %v15284_v28  ;;  %10757 = vmatprep.subr.bf16.mxu1 %v15289_v59  ;;  %v15327_v28 = vcombine.high %v8490_v22, %v8493_v42  ;;  %v8495_v59 = vld [vmem:[#allocation14 + $0xb70] sm:$0xff]  ;;  %v8529_v18 = vld [vmem:[#allocation14 + $0xf98] sm:$0xff]  ;;  %v15356_v42 = vcombine.low %v8520_v4, %v8523_v5 }
 0x677   :  { %10921 = vmatprep.subr.bf16.mxu0 %v15291_v29  ;;  %v8498_v29 = vld [vmem:[#allocation14 + $0xbd0] sm:$0xff] }
 0x678   :  { %v15330_v46 = vcombine.low %v8495_v59, %v8498_v29 }
 0x679   :  { %10758 = vmatpush1.bf16.msra.mxu1 %v15288_v34  ;;  %v15331_v34 = vcombine.high %v8495_v59, %v8498_v29  ;;  %v8532_v59 = vld [vmem:[#allocation14 + $0xff8] sm:$0xff] }
 0x67a   :  { %10922 = vmatpush1.bf16.msra.mxu0 %v15290_v39  ;;  %10759 = vmatprep.subr.bf16.mxu1 %v15295_v36  ;;  %v15333_v39 = vcombine.high %v8496_v30, %v8499_v31  ;;  %v8501_v36 = vld [vmem:[#allocation14 + $0xc30] sm:$0xff]  ;;  %v8535_v29 = vld [vmem:[#allocation14 + $0x1058] sm:$0xff]  ;;  %v15362_v31 = vcombine.low %v8526_v17, %v8529_v18 }
 0x67b   :  { %10923 = vmatprep.subr.bf16.mxu0 %v15297_v37  ;;  %v8504_v37 = vld [vmem:[#allocation14 + $0xc90] sm:$0xff] }
 0x67c   :  { %v15336_v63 = vcombine.low %v8501_v36, %v8504_v37 }
 0x67d   :  { %10760 = vmatpush1.bf16.msra.mxu1 %v15294_v44  ;;  %v15337_v44 = vcombine.high %v8501_v36, %v8504_v37  ;;  %v8538_v36 = vld [vmem:[#allocation14 + $0x10b8] sm:$0xff] }
 0x67e   :  { %10924 = vmatpush1.bf16.msra.mxu0 %v15296_v45  ;;  %10761 = vmatprep.subr.bf16.mxu1 %v15301_v47  ;;  %v15339_v45 = vcombine.high %v8502_v40, %v8505_v41  ;;  %v8507_v47 = vld [vmem:[#allocation14 + $0xcf0] sm:$0xff]  ;;  %v8541_v37 = vld [vmem:[#allocation14 + $0x1118] sm:$0xff]  ;;  %v15368_v41 = vcombine.low %v8532_v59, %v8535_v29 }
 0x67f   :  { %10925 = vmatprep.subr.bf16.mxu0 %v15303_v15  ;;  %v8510_v15 = vld [vmem:[#allocation14 + $0xd50] sm:$0xff] }
 0x680   :  { %v15342_v21 = vcombine.low %v8507_v47, %v8510_v15 }
 0x681   :  { %10762 = vmatpush1.bf16.msra.mxu1 %v15300_v52  ;;  %v15343_v52 = vcombine.high %v8507_v47, %v8510_v15  ;;  %v8544_v47 = vld [vmem:[#allocation14 + $0x1178] sm:$0xff] }
 0x682   :  { %10926 = vmatpush1.bf16.msra.mxu0 %v15302_v53  ;;  %10763 = vmatprep.subr.bf16.mxu1 %v15307_v35  ;;  %v8513_v53 = vld [vmem:[#allocation14 + $0xdb0] sm:$0xff]  ;;  %v8547_v15 = vld [vmem:[#allocation14 + $0x11d8] sm:$0xff] }
 0x683   :  { %10927 = vmatprep.subr.bf16.mxu0 %v15309_v54  ;;  %v8516_v35 = vld [vmem:[#allocation14 + $0xe10] sm:$0xff]  ;;  %v15345_v54 = vcombine.high %v8508_v48, %v8511_v49  ;;  %v15374_v48 = vcombine.low %v8538_v36, %v8541_v37 }
 0x684   :  { %v15348_v8 = vcombine.low %v8513_v53, %v8516_v35 }
 0x685   :  { %10764 = vmatpush1.bf16.msra.mxu1 %v15306_v0  ;;  %v15349_v0 = vcombine.high %v8513_v53, %v8516_v35  ;;  %v8552_v53 = vld [vmem:[#allocation14 + $0x1290] sm:$0xff]  ;;  %v8550_v35 = vld [vmem:[#allocation14 + $0x1238] sm:$0xff] }
 0x686   :  { %10928 = vmatpush1.bf16.msra.mxu0 %v15308_v1  ;;  %10765 = vmatprep.subr.bf16.mxu1 %v15313_v2  ;;  %v15351_v1 = vcombine.high %v8514_v55, %v8517_v56  ;;  %v8519_v2 = vld [vmem:[#allocation14 + $0xe70] sm:$0xff]  ;;  %v15380_v56 = vcombine.low %v8544_v47, %v8547_v15 }
 0x687   :  { %10929 = vmatprep.subr.bf16.mxu0 %v15315_v3  ;;  %v8522_v3 = vld [vmem:[#allocation14 + $0xed0] sm:$0xff] }
 0x688   :  { %v15354_v22 = vcombine.low %v8519_v2, %v8522_v3 }
 0x689   :  { %10766 = vmatpush1.bf16.msra.mxu1 %v15312_v11  ;;  %v15355_v11 = vcombine.high %v8519_v2, %v8522_v3  ;;  %v8556_v2 = vld [vmem:[#allocation14 + $0x12f8] sm:$0xff] }
 0x68a   :  { %10930 = vmatpush1.bf16.msra.mxu0 %v15314_v12  ;;  %10767 = vmatprep.subr.bf16.mxu1 %v15319_v13  ;;  %v15357_v12 = vcombine.high %v8520_v4, %v8523_v5  ;;  %v8525_v13 = vld [vmem:[#allocation14 + $0xf30] sm:$0xff]  ;;  %v8559_v3 = vld [vmem:[#allocation14 + $0x1358] sm:$0xff] }
 0x68b   :  { %10931 = vmatprep.subr.bf16.mxu0 %v15321_v14  ;;  %v8528_v14 = vld [vmem:[#allocation14 + $0xf90] sm:$0xff] }
 0x68c   :  { %v15360_v30 = vcombine.low %v8525_v13, %v8528_v14 }
 0x68d   :  { %10768 = vmatpush1.bf16.msra.mxu1 %v15318_v38  ;;  %v15361_v38 = vcombine.high %v8525_v13, %v8528_v14  ;;  %v8562_v13 = vld [vmem:[#allocation14 + $0x13b8] sm:$0xff] }
 0x68e   :  { %10932 = vmatpush1.bf16.msra.mxu0 %v15320_v25  ;;  %10769 = vmatprep.subr.bf16.mxu1 %v15325_v27  ;;  %v15363_v25 = vcombine.high %v8526_v17, %v8529_v18  ;;  %v8531_v27 = vld [vmem:[#allocation14 + $0xff0] sm:$0xff]  ;;  %v8565_v14 = vld [vmem:[#allocation14 + $0x1418] sm:$0xff]  ;;  %v15392_v18 = vcombine.low %v8556_v2, %v8559_v3 }
 0x68f   :  { %10933 = vmatprep.subr.bf16.mxu0 %v15327_v28  ;;  %v8534_v28 = vld [vmem:[#allocation14 + $0x1050] sm:$0xff] }
 0x690   :  { %v15366_v40 = vcombine.low %v8531_v27, %v8534_v28 }
 0x691   :  { %10770 = vmatpush1.bf16.msra.mxu1 %v15324_v32  ;;  %v15367_v32 = vcombine.high %v8531_v27, %v8534_v28  ;;  %v8568_v27 = vld [vmem:[#allocation14 + $0x1478] sm:$0xff] }
 0x692   :  { %10934 = vmatpush1.bf16.msra.mxu0 %v15326_v33  ;;  %10771 = vmatprep.subr.bf16.mxu1 %v15331_v34  ;;  %v15369_v33 = vcombine.high %v8532_v59, %v8535_v29  ;;  %v8537_v34 = vld [vmem:[#allocation14 + $0x10b0] sm:$0xff]  ;;  %v8571_v28 = vld [vmem:[#allocation14 + $0x14d8] sm:$0xff]  ;;  %v15398_v29 = vcombine.low %v8562_v13, %v8565_v14 }
 0x693   :  { %10935 = vmatprep.subr.bf16.mxu0 %v15333_v39  ;;  %v8540_v39 = vld [vmem:[#allocation14 + $0x1110] sm:$0xff] }
 0x695   :  { %10772 = vmatpush1.bf16.msra.mxu1 %v15330_v46  ;;  %v15373_v46 = vcombine.high %v8537_v34, %v8540_v39 }
 0x696   :  { %10936 = vmatpush1.bf16.msra.mxu0 %v15332_v43  ;;  %10782 = vmatprep.subr.bf16.mxu1 %v15337_v44  ;;  %v15375_v43 = vcombine.high %v8538_v36, %v8541_v37  ;;  %v8543_v44 = vld [vmem:[#allocation14 + $0x1170] sm:$0xff]  ;;  %v15404_v37 = vcombine.low %v8568_v27, %v8571_v28 }
 0x697   :  { %10946 = vmatprep.subr.bf16.mxu0 %v15339_v45  ;;  %v8546_v45 = vld [vmem:[#allocation14 + $0x11d0] sm:$0xff] }
 0x698   :  { %10774 = vmatmul.mubr.bf16.vlgmr.msra.gmra.mrb[24].mxu1 %v16887_v61  ;;  %v15379_v49 = vcombine.high %v8543_v44, %v8546_v45  ;;  %v15378_v55 = vcombine.low %v8543_v44, %v8546_v45  ;;  %v8580_v44 = vld [vmem:[#allocation14 + $0x15f8] sm:$0xff] }
 0x699   :  { %10938 = vmatmul.mubr.bf16.vlgmr.msra.gmra.mrb[28].mxu0 %v16887_v61  ;;  %10783 = vmatpush1.bf16.msra.mxu1 %v15336_v63  ;;  %v15372_v63 = vcombine.low %v8537_v34, %v8540_v39  ;;  %v8574_v34 = vld [vmem:[#allocation14 + $0x1538] sm:$0xff] }
 0x69a   :  { %10814 = vmatprep.mubr.bf16.mxu1 %v16891_v6  ;;  %10947 = vmatpush1.bf16.msra.mxu0 %v15338_v50  ;;  %v15381_v50 = vcombine.high %v8544_v47, %v8547_v15  ;;  %v8577_v39 = vld [vmem:[#allocation14 + $0x1598] sm:$0xff] }
 0x69b   :  { %10978 = vmatprep.mubr.bf16.mxu0 %v16891_v6  ;;  %10784 = vmatprep.subr.bf16.mxu1 %v15343_v52  ;;  %v8549_v52 = vld [vmem:[#allocation14 + $0x1230] sm:$0xff]  ;;  %v8583_v45 = vld [vmem:[#allocation14 + $0x1658] sm:$0xff]  ;;  %v15410_v15 = vcombine.low %v8574_v34, %v8577_v39 }
 0x69c   :  { %10948 = vmatprep.subr.bf16.mxu0 %v15345_v54  ;;  %v8553_v54 = vld [vmem:[#allocation14 + $0x1298] sm:$0xff]  ;;  %v15384_v4 = vcombine.low %v8549_v52, %v8552_v53 }
 0x69d   :  { %10785 = vmatpush1.bf16.msra.mxu1 %v15342_v21  ;;  %v15385_v21 = vcombine.high %v8549_v52, %v8552_v53  ;;  %v15386_v5 = vcombine.low %v8550_v35, %v8553_v54  ;;  %v8586_v52 = vld [vmem:[#allocation14 + $0x16b8] sm:$0xff] }
 0x69e   :  { %10949 = vmatpush1.bf16.msra.mxu0 %v15344_v58  ;;  %10786 = vmatprep.subr.bf16.mxu1 %v15349_v0  ;;  %v15387_v58 = vcombine.high %v8550_v35, %v8553_v54  ;;  %v8555_v0 = vld [vmem:[#allocation14 + $0x12f0] sm:$0xff]  ;;  %v8589_v53 = vld [vmem:[#allocation14 + $0x1718] sm:$0xff]  ;;  %v15416_v54 = vcombine.low %v8580_v44, %v8583_v45 }
 0x69f   :  { %10950 = vmatprep.subr.bf16.mxu0 %v15351_v1  ;;  %v8558_v1 = vld [vmem:[#allocation14 + $0x1350] sm:$0xff] }
 0x6a0   :  { %v15390_v17 = vcombine.low %v8555_v0, %v8558_v1 }
 0x6a1   :  { %10787 = vmatpush1.bf16.msra.mxu1 %v15348_v8  ;;  %v15391_v8 = vcombine.high %v8555_v0, %v8558_v1  ;;  %v8592_v0 = vld [vmem:[#allocation14 + $0x1778] sm:$0xff] }
 0x6a2   :  { %10951 = vmatpush1.bf16.msra.mxu0 %v15350_v9  ;;  %10788 = vmatprep.subr.bf16.mxu1 %v15355_v11  ;;  %v15393_v9 = vcombine.high %v8556_v2, %v8559_v3  ;;  %v8561_v11 = vld [vmem:[#allocation14 + $0x13b0] sm:$0xff]  ;;  %v8595_v1 = vld [vmem:[#allocation14 + $0x17d8] sm:$0xff]  ;;  %v15422_v3 = vcombine.low %v8586_v52, %v8589_v53 }
 0x6a3   :  { %10952 = vmatprep.subr.bf16.mxu0 %v15357_v12  ;;  %v8564_v12 = vld [vmem:[#allocation14 + $0x1410] sm:$0xff] }
 0x6a4   :  { %v15396_v59 = vcombine.low %v8561_v11, %v8564_v12 }
 0x6a5   :  { %10789 = vmatpush1.bf16.msra.mxu1 %v15354_v22  ;;  %v15397_v22 = vcombine.high %v8561_v11, %v8564_v12  ;;  %v8598_v11 = vld [vmem:[#allocation14 + $0x1838] sm:$0xff] }
 0x6a6   :  { %10953 = vmatpush1.bf16.msra.mxu0 %v15356_v42  ;;  %10790 = vmatprep.subr.bf16.mxu1 %v15361_v38  ;;  %v15399_v42 = vcombine.high %v8562_v13, %v8565_v14  ;;  %v8567_v38 = vld [vmem:[#allocation14 + $0x1470] sm:$0xff]  ;;  %v8601_v12 = vld [vmem:[#allocation14 + $0x1898] sm:$0xff]  ;;  %v15428_v14 = vcombine.low %v8592_v0, %v8595_v1 }
 0x6a7   :  { %10954 = vmatprep.subr.bf16.mxu0 %v15363_v25  ;;  %v8570_v25 = vld [vmem:[#allocation14 + $0x14d0] sm:$0xff] }
 0x6a8   :  { %v15402_v36 = vcombine.low %v8567_v38, %v8570_v25 }
 0x6a9   :  { %10791 = vmatpush1.bf16.msra.mxu1 %v15360_v30  ;;  %v15403_v30 = vcombine.high %v8567_v38, %v8570_v25  ;;  %v8604_v25 = vld [vmem:[#allocation14 + $0x18f8] sm:$0xff] }
 0x6aa   :  { %10955 = vmatpush1.bf16.msra.mxu0 %v15362_v31  ;;  %10792 = vmatprep.subr.bf16.mxu1 %v15367_v32  ;;  %v15405_v31 = vcombine.high %v8568_v27, %v8571_v28  ;;  %v8573_v32 = vld [vmem:[#allocation14 + $0x1530] sm:$0xff]  ;;  %v8607_v27 = vld [vmem:[#allocation14 + $0x1958] sm:$0xff]  ;;  %v15434_v28 = vcombine.low %v8598_v11, %v8601_v12 }
 0x6ab   :  { %10956 = vmatprep.subr.bf16.mxu0 %v15369_v33  ;;  %v8576_v33 = vld [vmem:[#allocation14 + $0x1590] sm:$0xff] }
 0x6ac   :  { %v15408_v47 = vcombine.low %v8573_v32, %v8576_v33 }
 0x6ad   :  { %10793 = vmatpush1.bf16.msra.mxu1 %v15366_v40  ;;  %v15409_v40 = vcombine.high %v8573_v32, %v8576_v33  ;;  %v8610_v32 = vld [vmem:[#allocation14 + $0x19b8] sm:$0xff] }
 0x6ae   :  { %10957 = vmatpush1.bf16.msra.mxu0 %v15368_v41  ;;  %10794 = vmatprep.subr.bf16.mxu1 %v15373_v46  ;;  %v15411_v41 = vcombine.high %v8574_v34, %v8577_v39  ;;  %v8579_v46 = vld [vmem:[#allocation14 + $0x15f0] sm:$0xff]  ;;  %v8613_v33 = vld [vmem:[#allocation14 + $0x1a18] sm:$0xff]  ;;  %v15440_v39 = vcombine.low %v8604_v25, %v8607_v27 }
 0x6af   :  { %10958 = vmatprep.subr.bf16.mxu0 %v15375_v43  ;;  %v8582_v43 = vld [vmem:[#allocation14 + $0x1650] sm:$0xff] }
 0x6b0   :  { %v15414_v35 = vcombine.low %v8579_v46, %v8582_v43 }
 0x6b1   :  { %10795 = vmatpush1.bf16.msra.mxu1 %v15372_v63  ;;  %v15415_v63 = vcombine.high %v8579_v46, %v8582_v43  ;;  %v8616_v46 = vld [vmem:[#allocation14 + $0x1a78] sm:$0xff] }
 0x6b2   :  { %10959 = vmatpush1.bf16.msra.mxu0 %v15374_v48  ;;  %10796 = vmatprep.subr.bf16.mxu1 %v15379_v49  ;;  %v15417_v48 = vcombine.high %v8580_v44, %v8583_v45  ;;  %v8585_v49 = vld [vmem:[#allocation14 + $0x16b0] sm:$0xff]  ;;  %v8619_v43 = vld [vmem:[#allocation14 + $0x1ad8] sm:$0xff]  ;;  %v15446_v45 = vcombine.low %v8610_v32, %v8613_v33 }
 0x6b3   :  { %10960 = vmatprep.subr.bf16.mxu0 %v15381_v50  ;;  %v8588_v50 = vld [vmem:[#allocation14 + $0x1710] sm:$0xff] }
 0x6b4   :  { %v15420_v2 = vcombine.low %v8585_v49, %v8588_v50 }
 0x6b5   :  { %10797 = vmatpush1.bf16.msra.mxu1 %v15378_v55  ;;  %v15421_v55 = vcombine.high %v8585_v49, %v8588_v50  ;;  %v8622_v49 = vld [vmem:[#allocation14 + $0x1b38] sm:$0xff] }
 0x6b6   :  { %10961 = vmatpush1.bf16.msra.mxu0 %v15380_v56  ;;  %10798 = vmatprep.subr.bf16.mxu1 %v15385_v21  ;;  %v15423_v56 = vcombine.high %v8586_v52, %v8589_v53  ;;  %v8591_v21 = vld [vmem:[#allocation14 + $0x1770] sm:$0xff]  ;;  %v8625_v50 = vld [vmem:[#allocation14 + $0x1b98] sm:$0xff]  ;;  %v15452_v53 = vcombine.low %v8616_v46, %v8619_v43 }
 0x6b7   :  { %10962 = vmatprep.subr.bf16.mxu0 %v15387_v58  ;;  %v8594_v58 = vld [vmem:[#allocation14 + $0x17d0] sm:$0xff] }
 0x6b8   :  { %v15426_v13 = vcombine.low %v8591_v21, %v8594_v58 }
 0x6b9   :  { %10799 = vmatpush1.bf16.msra.mxu1 %v15384_v4  ;;  %v15427_v4 = vcombine.high %v8591_v21, %v8594_v58  ;;  %v8628_v21 = vld [vmem:[#allocation14 + $0x1bf8] sm:$0xff] }
 0x6ba   :  { %10963 = vmatpush1.bf16.msra.mxu0 %v15386_v5  ;;  %10800 = vmatprep.subr.bf16.mxu1 %v15391_v8  ;;  %v15429_v5 = vcombine.high %v8592_v0, %v8595_v1  ;;  %v8597_v8 = vld [vmem:[#allocation14 + $0x1830] sm:$0xff]  ;;  %v8631_v58 = vld [vmem:[#allocation14 + $0x1c58] sm:$0xff]  ;;  %v15458_v1 = vcombine.low %v8622_v49, %v8625_v50 }
 0x6bb   :  { %10964 = vmatprep.subr.bf16.mxu0 %v15393_v9  ;;  %v8600_v9 = vld [vmem:[#allocation14 + $0x1890] sm:$0xff] }
 0x6bc   :  { %v15432_v38 = vcombine.low %v8597_v8, %v8600_v9 }
 0x6bd   :  { %10801 = vmatpush1.bf16.msra.mxu1 %v15390_v17  ;;  %v15433_v17 = vcombine.high %v8597_v8, %v8600_v9  ;;  %v8634_v8 = vld [vmem:[#allocation14 + $0x1cb8] sm:$0xff] }
 0x6be   :  { %10965 = vmatpush1.bf16.msra.mxu0 %v15392_v18  ;;  %10802 = vmatprep.subr.bf16.mxu1 %v15397_v22  ;;  %v15435_v18 = vcombine.high %v8598_v11, %v8601_v12  ;;  %v8603_v22 = vld [vmem:[#allocation14 + $0x18f0] sm:$0xff]  ;;  %v8637_v9 = vld [vmem:[#allocation14 + $0x1d18] sm:$0xff]  ;;  %v15464_v12 = vcombine.low %v8628_v21, %v8631_v58 }
 0x6bf   :  { %10966 = vmatprep.subr.bf16.mxu0 %v15399_v42  ;;  %v8606_v42 = vld [vmem:[#allocation14 + $0x1950] sm:$0xff] }
 0x6c0   :  { %v15438_v34 = vcombine.low %v8603_v22, %v8606_v42 }
 0x6c1   :  { %10803 = vmatpush1.bf16.msra.mxu1 %v15396_v59  ;;  %v15439_v59 = vcombine.high %v8603_v22, %v8606_v42  ;;  %v8640_v22 = vld [vmem:[#allocation14 + $0x1d78] sm:$0xff] }
 0x6c2   :  { %10967 = vmatpush1.bf16.msra.mxu0 %v15398_v29  ;;  %10804 = vmatprep.subr.bf16.mxu1 %v15403_v30  ;;  %v8609_v29 = vld [vmem:[#allocation14 + $0x19b0] sm:$0xff]  ;;  %v8643_v42 = vld [vmem:[#allocation14 + $0x1dd8] sm:$0xff] }
 0x6c3   :  { %10968 = vmatprep.subr.bf16.mxu0 %v15405_v31  ;;  %v8612_v30 = vld [vmem:[#allocation14 + $0x1a10] sm:$0xff]  ;;  %v15441_v31 = vcombine.high %v8604_v25, %v8607_v27  ;;  %v15470_v25 = vcombine.low %v8634_v8, %v8637_v9 }
 0x6c4   :  { %v15444_v44 = vcombine.low %v8609_v29, %v8612_v30 }
 0x6c5   :  { %10805 = vmatpush1.bf16.msra.mxu1 %v15402_v36  ;;  %v15445_v36 = vcombine.high %v8609_v29, %v8612_v30  ;;  %v8648_v29 = vld [vmem:[#allocation14 + $0x1e90] sm:$0xff]  ;;  %v8646_v30 = vld [vmem:[#allocation14 + $0x1e38] sm:$0xff] }
 0x6c6   :  { %10969 = vmatpush1.bf16.msra.mxu0 %v15404_v37  ;;  %10806 = vmatprep.subr.bf16.mxu1 %v15409_v40  ;;  %v15447_v37 = vcombine.high %v8610_v32, %v8613_v33  ;;  %v8615_v40 = vld [vmem:[#allocation14 + $0x1a70] sm:$0xff]  ;;  %v15476_v33 = vcombine.low %v8640_v22, %v8643_v42 }
 0x6c7   :  { %10970 = vmatprep.subr.bf16.mxu0 %v15411_v41  ;;  %v8618_v41 = vld [vmem:[#allocation14 + $0x1ad0] sm:$0xff] }
 0x6c8   :  { %v15450_v52 = vcombine.low %v8615_v40, %v8618_v41 }
 0x6c9   :  { %10807 = vmatpush1.bf16.msra.mxu1 %v15408_v47  ;;  %v15451_v47 = vcombine.high %v8615_v40, %v8618_v41  ;;  %v8652_v40 = vld [vmem:[#allocation14 + $0x1ef8] sm:$0xff] }
 0x6ca   :  { %10971 = vmatpush1.bf16.msra.mxu0 %v15410_v15  ;;  %10808 = vmatprep.subr.bf16.mxu1 %v15415_v63  ;;  %v15453_v15 = vcombine.high %v8616_v46, %v8619_v43  ;;  %v8621_v63 = vld [vmem:[#allocation14 + $0x1b30] sm:$0xff]  ;;  %v8655_v41 = vld [vmem:[#allocation14 + $0x1f58] sm:$0xff] }
 0x6cb   :  { %10972 = vmatprep.subr.bf16.mxu0 %v15417_v48  ;;  %v8624_v48 = vld [vmem:[#allocation14 + $0x1b90] sm:$0xff] }
 0x6cc   :  { %v15456_v0 = vcombine.low %v8621_v63, %v8624_v48 }
 0x6cd   :  { %10809 = vmatpush1.bf16.msra.mxu1 %v15414_v35  ;;  %v15457_v35 = vcombine.high %v8621_v63, %v8624_v48  ;;  %v8658_v63 = vld [vmem:[#allocation14 + $0x1fb8] sm:$0xff] }
 0x6ce   :  { %10973 = vmatpush1.bf16.msra.mxu0 %v15416_v54  ;;  %10810 = vmatprep.subr.bf16.mxu1 %v15421_v55  ;;  %v15459_v54 = vcombine.high %v8622_v49, %v8625_v50  ;;  %v8627_v55 = vld [vmem:[#allocation14 + $0x1bf0] sm:$0xff]  ;;  %v8661_v48 = vld [vmem:[#allocation14 + $0x2018] sm:$0xff]  ;;  %v15488_v50 = vcombine.low %v8652_v40, %v8655_v41 }
 0x6cf   :  { %10974 = vmatprep.subr.bf16.mxu0 %v15423_v56  ;;  %v8630_v56 = vld [vmem:[#allocation14 + $0x1c50] sm:$0xff] }
 0x6d0   :  { %v15462_v11 = vcombine.low %v8627_v55, %v8630_v56 }
 0x6d1   :  { %10811 = vmatpush1.bf16.msra.mxu1 %v15420_v2  ;;  %v15463_v2 = vcombine.high %v8627_v55, %v8630_v56  ;;  %v8664_v55 = vld [vmem:[#allocation14 + $0x2078] sm:$0xff] }
 0x6d2   :  { %10975 = vmatpush1.bf16.msra.mxu0 %v15422_v3  ;;  %10812 = vmatprep.subr.bf16.mxu1 %v15427_v4  ;;  %v15465_v3 = vcombine.high %v8628_v21, %v8631_v58  ;;  %v8633_v4 = vld [vmem:[#allocation14 + $0x1cb0] sm:$0xff]  ;;  %v8667_v56 = vld [vmem:[#allocation14 + $0x20d8] sm:$0xff]  ;;  %v15494_v58 = vcombine.low %v8658_v63, %v8661_v48 }
 0x6d3   :  { %10976 = vmatprep.subr.bf16.mxu0 %v15429_v5  ;;  %v8636_v5 = vld [vmem:[#allocation14 + $0x1d10] sm:$0xff] }
 0x6d5   :  { %10813 = vmatpush1.bf16.msra.mxu1 %v15426_v13  ;;  %v15469_v13 = vcombine.high %v8633_v4, %v8636_v5 }
 0x6d6   :  { %10977 = vmatpush1.bf16.msra.mxu0 %v15428_v14  ;;  %10823 = vmatprep.subr.bf16.mxu1 %v15433_v17  ;;  %v15471_v14 = vcombine.high %v8634_v8, %v8637_v9  ;;  %v8639_v17 = vld [vmem:[#allocation14 + $0x1d70] sm:$0xff]  ;;  %v15500_v9 = vcombine.low %v8664_v55, %v8667_v56 }
 0x6d7   :  { %10987 = vmatprep.subr.bf16.mxu0 %v15435_v18  ;;  %v8642_v18 = vld [vmem:[#allocation14 + $0x1dd0] sm:$0xff] }
 0x6d8   :  { %10815 = vmatmul.mubr.bf16.vlgmr.msra.gmra.mrb[24].mxu1 %v16900_v26  ;;  %v15475_v27 = vcombine.high %v8639_v17, %v8642_v18  ;;  %v15474_v32 = vcombine.low %v8639_v17, %v8642_v18  ;;  %v8676_v17 = vld [vmem:[#allocation14 + $0x21f8] sm:$0xff] }
 0x6d9   :  { %10979 = vmatmul.mubr.bf16.vlgmr.msra.gmra.mrb[28].mxu0 %v16900_v26  ;;  %10824 = vmatpush1.bf16.msra.mxu1 %v15432_v38  ;;  %v15468_v38 = vcombine.low %v8633_v4, %v8636_v5  ;;  %v8670_v4 = vld [vmem:[#allocation14 + $0x2138] sm:$0xff] }
 0x6da   :  { %10855 = vmatprep.mubr.bf16.mxu1 %v16918_v7  ;;  %10988 = vmatpush1.bf16.msra.mxu0 %v15434_v28  ;;  %v15477_v28 = vcombine.high %v8640_v22, %v8643_v42  ;;  %v8673_v5 = vld [vmem:[#allocation14 + $0x2198] sm:$0xff] }
 0x6db   :  { %11019 = vmatprep.mubr.bf16.mxu0 %v16918_v7  ;;  %10825 = vmatprep.subr.bf16.mxu1 %v15439_v59  ;;  %v8645_v59 = vld [vmem:[#allocation14 + $0x1e30] sm:$0xff]  ;;  %v8679_v18 = vld [vmem:[#allocation14 + $0x2258] sm:$0xff]  ;;  %v15506_v42 = vcombine.low %v8670_v4, %v8673_v5 }
 0x6dc   :  { %10989 = vmatprep.subr.bf16.mxu0 %v15441_v31  ;;  %v8649_v31 = vld [vmem:[#allocation14 + $0x1e98] sm:$0xff]  ;;  %v15480_v46 = vcombine.low %v8645_v59, %v8648_v29 }
 0x6dd   :  { %10826 = vmatpush1.bf16.msra.mxu1 %v15438_v34  ;;  %v15481_v34 = vcombine.high %v8645_v59, %v8648_v29  ;;  %v15482_v43 = vcombine.low %v8646_v30, %v8649_v31  ;;  %v8682_v59 = vld [vmem:[#allocation14 + $0x22b8] sm:$0xff] }
 0x6de   :  { %10990 = vmatpush1.bf16.msra.mxu0 %v15440_v39  ;;  %10827 = vmatprep.subr.bf16.mxu1 %v15445_v36  ;;  %v15483_v39 = vcombine.high %v8646_v30, %v8649_v31  ;;  %v8651_v36 = vld [vmem:[#allocation14 + $0x1ef0] sm:$0xff]  ;;  %v8685_v29 = vld [vmem:[#allocation14 + $0x2318] sm:$0xff]  ;;  %v15512_v31 = vcombine.low %v8676_v17, %v8679_v18 }
 0x6df   :  { %10991 = vmatprep.subr.bf16.mxu0 %v15447_v37  ;;  %v8654_v37 = vld [vmem:[#allocation14 + $0x1f50] sm:$0xff] }
 0x6e0   :  { %v15486_v49 = vcombine.low %v8651_v36, %v8654_v37 }
 0x6e1   :  { %10828 = vmatpush1.bf16.msra.mxu1 %v15444_v44  ;;  %v15487_v44 = vcombine.high %v8651_v36, %v8654_v37  ;;  %v8688_v36 = vld [vmem:[#allocation14 + $0x2378] sm:$0xff] }
 0x6e2   :  { %10992 = vmatpush1.bf16.msra.mxu0 %v15446_v45  ;;  %10829 = vmatprep.subr.bf16.mxu1 %v15451_v47  ;;  %v15489_v45 = vcombine.high %v8652_v40, %v8655_v41  ;;  %v8657_v47 = vld [vmem:[#allocation14 + $0x1fb0] sm:$0xff]  ;;  %v8691_v37 = vld [vmem:[#allocation14 + $0x23d8] sm:$0xff]  ;;  %v15518_v41 = vcombine.low %v8682_v59, %v8685_v29 }
 0x6e3   :  { %10993 = vmatprep.subr.bf16.mxu0 %v15453_v15  ;;  %v8660_v15 = vld [vmem:[#allocation14 + $0x2010] sm:$0xff] }
 0x6e4   :  { %v15492_v21 = vcombine.low %v8657_v47, %v8660_v15 }
 0x6e5   :  { %10830 = vmatpush1.bf16.msra.mxu1 %v15450_v52  ;;  %v15493_v52 = vcombine.high %v8657_v47, %v8660_v15  ;;  %v8694_v47 = vld [vmem:[#allocation14 + $0x2438] sm:$0xff] }
 0x6e6   :  { %10994 = vmatpush1.bf16.msra.mxu0 %v15452_v53  ;;  %10831 = vmatprep.subr.bf16.mxu1 %v15457_v35  ;;  %v15495_v53 = vcombine.high %v8658_v63, %v8661_v48  ;;  %v8663_v35 = vld [vmem:[#allocation14 + $0x2070] sm:$0xff]  ;;  %v8697_v15 = vld [vmem:[#allocation14 + $0x2498] sm:$0xff]  ;;  %v15524_v48 = vcombine.low %v8688_v36, %v8691_v37 }
 0x6e7   :  { %10995 = vmatprep.subr.bf16.mxu0 %v15459_v54  ;;  %v8666_v54 = vld [vmem:[#allocation14 + $0x20d0] sm:$0xff] }
 0x6e8   :  { %v15498_v8 = vcombine.low %v8663_v35, %v8666_v54 }
 0x6e9   :  { %10832 = vmatpush1.bf16.msra.mxu1 %v15456_v0  ;;  %v15499_v0 = vcombine.high %v8663_v35, %v8666_v54  ;;  %v8700_v54 = vld [vmem:[#allocation14 + $0x24f8] sm:$0xff] }
 0x6ea   :  { %10996 = vmatpush1.bf16.msra.mxu0 %v15458_v1  ;;  %10833 = vmatprep.subr.bf16.mxu1 %v15463_v2  ;;  %v15501_v1 = vcombine.high %v8664_v55, %v8667_v56  ;;  %v8669_v2 = vld [vmem:[#allocation14 + $0x2130] sm:$0xff]  ;;  %v8703_v55 = vld [vmem:[#allocation14 + $0x2558] sm:$0xff]  ;;  %v15530_v56 = vcombine.low %v8694_v47, %v8697_v15 }
 0x6eb   :  { %10997 = vmatprep.subr.bf16.mxu0 %v15465_v3  ;;  %v8672_v3 = vld [vmem:[#allocation14 + $0x2190] sm:$0xff] }
 0x6ec   :  { %v15504_v22 = vcombine.low %v8669_v2, %v8672_v3 }
 0x6ed   :  { %10834 = vmatpush1.bf16.msra.mxu1 %v15462_v11  ;;  %v15505_v11 = vcombine.high %v8669_v2, %v8672_v3  ;;  %v8706_v2 = vld [vmem:[#allocation14 + $0x25b8] sm:$0xff] }
 0x6ee   :  { %10998 = vmatpush1.bf16.msra.mxu0 %v15464_v12  ;;  %10835 = vmatprep.subr.bf16.mxu1 %v15469_v13  ;;  %v15507_v12 = vcombine.high %v8670_v4, %v8673_v5  ;;  %v8675_v13 = vld [vmem:[#allocation14 + $0x21f0] sm:$0xff]  ;;  %v8709_v3 = vld [vmem:[#allocation14 + $0x2618] sm:$0xff]  ;;  %v15536_v5 = vcombine.low %v8700_v54, %v8703_v55 }
 0x6ef   :  { %10999 = vmatprep.subr.bf16.mxu0 %v15471_v14  ;;  %v8678_v14 = vld [vmem:[#allocation14 + $0x2250] sm:$0xff] }
 0x6f0   :  { %v15510_v30 = vcombine.low %v8675_v13, %v8678_v14 }
 0x6f1   :  { %10836 = vmatpush1.bf16.msra.mxu1 %v15468_v38  ;;  %v15511_v38 = vcombine.high %v8675_v13, %v8678_v14  ;;  %v8712_v13 = vld [vmem:[#allocation14 + $0x2678] sm:$0xff] }
 0x6f2   :  { %11000 = vmatpush1.bf16.msra.mxu0 %v15470_v25  ;;  %10837 = vmatprep.subr.bf16.mxu1 %v15475_v27  ;;  %v15513_v25 = vcombine.high %v8676_v17, %v8679_v18  ;;  %v8681_v27 = vld [vmem:[#allocation14 + $0x22b0] sm:$0xff]  ;;  %v8715_v14 = vld [vmem:[#allocation14 + $0x26d8] sm:$0xff]  ;;  %v15542_v18 = vcombine.low %v8706_v2, %v8709_v3 }
 0x6f3   :  { %11001 = vmatprep.subr.bf16.mxu0 %v15477_v28  ;;  %v8684_v28 = vld [vmem:[#allocation14 + $0x2310] sm:$0xff] }
 0x6f4   :  { %v15516_v40 = vcombine.low %v8681_v27, %v8684_v28 }
 0x6f5   :  { %10838 = vmatpush1.bf16.msra.mxu1 %v15474_v32  ;;  %v15517_v32 = vcombine.high %v8681_v27, %v8684_v28  ;;  %v8718_v27 = vld [vmem:[#allocation14 + $0x2738] sm:$0xff] }
 0x6f6   :  { %11002 = vmatpush1.bf16.msra.mxu0 %v15476_v33  ;;  %10839 = vmatprep.subr.bf16.mxu1 %v15481_v34  ;;  %v15519_v33 = vcombine.high %v8682_v59, %v8685_v29  ;;  %v8687_v34 = vld [vmem:[#allocation14 + $0x2370] sm:$0xff]  ;;  %v8721_v28 = vld [vmem:[#allocation14 + $0x2798] sm:$0xff]  ;;  %v15548_v29 = vcombine.low %v8712_v13, %v8715_v14 }
 0x6f7   :  { %11003 = vmatprep.subr.bf16.mxu0 %v15483_v39  ;;  %v8690_v39 = vld [vmem:[#allocation14 + $0x23d0] sm:$0xff] }
 0x6f8   :  { %v15522_v63 = vcombine.low %v8687_v34, %v8690_v39 }
 0x6f9   :  { %10840 = vmatpush1.bf16.msra.mxu1 %v15480_v46  ;;  %v15523_v46 = vcombine.high %v8687_v34, %v8690_v39  ;;  %v8724_v34 = vld [vmem:[#allocation14 + $0x27f8] sm:$0xff] }
 0x6fa   :  { %11004 = vmatpush1.bf16.msra.mxu0 %v15482_v43  ;;  %10841 = vmatprep.subr.bf16.mxu1 %v15487_v44  ;;  %v15525_v43 = vcombine.high %v8688_v36, %v8691_v37  ;;  %v8693_v44 = vld [vmem:[#allocation14 + $0x2430] sm:$0xff]  ;;  %v8727_v39 = vld [vmem:[#allocation14 + $0x2858] sm:$0xff]  ;;  %v15554_v37 = vcombine.low %v8718_v27, %v8721_v28 }
 0x6fb   :  { %11005 = vmatprep.subr.bf16.mxu0 %v15489_v45  ;;  %v8696_v45 = vld [vmem:[#allocation14 + $0x2490] sm:$0xff] }
 0x6fc   :  { %v15528_v35 = vcombine.low %v8693_v44, %v8696_v45 }
 0x6fd   :  { %10842 = vmatpush1.bf16.msra.mxu1 %v15486_v49  ;;  %v15529_v49 = vcombine.high %v8693_v44, %v8696_v45  ;;  %v16413_v44 = vld [vmem:[#allocation16 + $0x6] sm:$0x3f] }
 0x6fe   :  { %11006 = vmatpush1.bf16.msra.mxu0 %v15488_v50  ;;  %10843 = vmatprep.subr.bf16.mxu1 %v15493_v52  ;;  %v15531_v50 = vcombine.high %v8694_v47, %v8697_v15  ;;  %v8699_v52 = vld [vmem:[#allocation14 + $0x24f0] sm:$0xff]  ;;  %v5941_v45 = vrot.slane %v16413_v44, %v16858_v24  ;;  %v8730_v47 = vld [vmem:[#allocation14 + $0x28b8] sm:$0xff] }
 0x6ff   :  { %11007 = vmatprep.subr.bf16.mxu0 %v15495_v53  ;;  %v8702_v53 = vld [vmem:[#allocation14 + $0x2550] sm:$0xff]  ;;  %v8733_v15 = vld [vmem:[#allocation14 + $0x2918] sm:$0xff] }
 0x700   :  { %v15534_v4 = vcombine.low %v8699_v52, %v8702_v53 }
 0x701   :  { %10844 = vmatpush1.bf16.msra.mxu1 %v15492_v21  ;;  %v15535_v21 = vcombine.high %v8699_v52, %v8702_v53  ;;  %v15560_v52 = vcombine.low %v8724_v34, %v8727_v39 }
 0x702   :  { %11008 = vmatpush1.bf16.msra.mxu0 %v15494_v58  ;;  %10845 = vmatprep.subr.bf16.mxu1 %v15499_v0  ;;  %v8705_v58 = vld [vmem:[#allocation14 + $0x25b0] sm:$0xff] }
 0x703   :  { %11009 = vmatprep.subr.bf16.mxu0 %v15501_v1  ;;  %v8708_v0 = vld [vmem:[#allocation14 + $0x2610] sm:$0xff]  ;;  %v15537_v1 = vcombine.high %v8700_v54, %v8703_v55  ;;  %v15567_v54 = vcombine.high %v8730_v47, %v8733_v15 }
 0x704   :  { %v15540_v17 = vcombine.low %v8705_v58, %v8708_v0  ;;  %v8735_v55 = vld [vmem:[#allocation14 + $0x2970] sm:$0xff] }
 0x705   :  { %10846 = vmatpush1.bf16.msra.mxu1 %v15498_v8  ;;  %v15541_v8 = vcombine.high %v8705_v58, %v8708_v0 }
 0x706   :  { %11010 = vmatpush1.bf16.msra.mxu0 %v15500_v9  ;;  %10847 = vmatprep.subr.bf16.mxu1 %v15505_v11  ;;  %v15543_v9 = vcombine.high %v8706_v2, %v8709_v3  ;;  %v8711_v11 = vld [vmem:[#allocation14 + $0x2670] sm:$0xff]  ;;  %v8739_v2 = vld [vmem:[#allocation14 + $0x29d8] sm:$0xff] }
 0x707   :  { %11011 = vmatprep.subr.bf16.mxu0 %v15507_v12  ;;  %v8714_v12 = vld [vmem:[#allocation14 + $0x26d0] sm:$0xff] }
 0x708   :  { %v15546_v59 = vcombine.low %v8711_v11, %v8714_v12 }
 0x709   :  { %10848 = vmatpush1.bf16.msra.mxu1 %v15504_v22  ;;  %v15547_v22 = vcombine.high %v8711_v11, %v8714_v12 }
 0x70a   :  { %11012 = vmatpush1.bf16.msra.mxu0 %v15506_v42  ;;  %10849 = vmatprep.subr.bf16.mxu1 %v15511_v38  ;;  %v15549_v42 = vcombine.high %v8712_v13, %v8715_v14  ;;  %v8717_v38 = vld [vmem:[#allocation14 + $0x2730] sm:$0xff]  ;;  %v15566_v14 = vcombine.low %v8730_v47, %v8733_v15 }
 0x70b   :  { %11013 = vmatprep.subr.bf16.mxu0 %v15513_v25  ;;  %v8720_v25 = vld [vmem:[#allocation14 + $0x2790] sm:$0xff] }
 0x70c   :  { %v15552_v36 = vcombine.low %v8717_v38, %v8720_v25 }
 0x70d   :  { %10850 = vmatpush1.bf16.msra.mxu1 %v15510_v30  ;;  %v15553_v30 = vcombine.high %v8717_v38, %v8720_v25  ;;  %v8744_v38 = vld [vmem:[#allocation14 + $0x2a90] sm:$0xff]  ;;  %v8742_v25 = vld [vmem:[#allocation14 + $0x2a38] sm:$0xff] }
 0x70e   :  { %11014 = vmatpush1.bf16.msra.mxu0 %v15512_v31  ;;  %10851 = vmatprep.subr.bf16.mxu1 %v15517_v32  ;;  %v15555_v31 = vcombine.high %v8718_v27, %v8721_v28  ;;  %v8723_v32 = vld [vmem:[#allocation14 + $0x27f0] sm:$0xff]  ;;  %v8745_v27 = vld [vmem:[#allocation14 + $0x2a98] sm:$0xff] }
 0x70f   :  { %11015 = vmatprep.subr.bf16.mxu0 %v15519_v33  ;;  %v8726_v33 = vld [vmem:[#allocation14 + $0x2850] sm:$0xff] }
 0x711   :  { %10852 = vmatpush1.bf16.msra.mxu1 %v15516_v40  ;;  %v15559_v40 = vcombine.high %v8723_v32, %v8726_v33 }
 0x712   :  { %11016 = vmatpush1.bf16.msra.mxu0 %v15518_v41  ;;  %10853 = vmatprep.subr.bf16.mxu1 %v15523_v46  ;;  %v15561_v41 = vcombine.high %v8724_v34, %v8727_v39  ;;  %v8729_v46 = vld [vmem:[#allocation14 + $0x28b0] sm:$0xff]  ;;  %v8751_v34 = vld [vmem:[#allocation14 + $0x2b58] sm:$0xff] }
 0x713   :  { %11017 = vmatprep.subr.bf16.mxu0 %v15525_v43  ;;  %v8732_v43 = vld [vmem:[#allocation14 + $0x2910] sm:$0xff] }
 0x714   :  { %v15565_v53 = vcombine.high %v8729_v46, %v8732_v43 }
 0x715   :  { %10854 = vmatpush1.bf16.msra.mxu1 %v15522_v63  ;;  %v5949_v63 = vrot.slane %v16413_v44, %v16905_v20 }
 0x716   :  { %11018 = vmatpush1.bf16.msra.mxu0 %v15524_v48  ;;  %10864 = vmatprep.subr.bf16.mxu1 %v15529_v49  ;;  %v5945_v48 = vrot.slane %v16413_v44, %v16835_v16  ;;  %v15558_v49 = vcombine.low %v8723_v32, %v8726_v33  ;;  %v8750_v32 = vld [vmem:[#allocation14 + $0x2b50] sm:$0xff]  ;;  %v8748_v33 = vld [vmem:[#allocation14 + $0x2af8] sm:$0xff] }
 0x717   :  { %11028 = vmatprep.subr.bf16.mxu0 %v15531_v50  ;;  %v5953_v50 = vrot.slane %v16413_v44, %v16908_v23  ;;  %v8754_v44 = vld [vmem:[#allocation14 + $0x2bb8] sm:$0xff] }
 0x718   :  { %10856 = vmatmul.mubr.bf16.vlgmr.msra.gmra.mrb[24].mxu1 %v16920_v10 }
 0x719   :  { %11020 = vmatmul.mubr.bf16.vlgmr.msra.gmra.mrb[28].mxu0 %v16920_v10  ;;  %10865 = vmatpush1.bf16.msra.mxu1 %v15528_v35 }
 0x71a   :  { %10896 = vmatprep.mubr.bf16.mxu1 %v16924_v19  ;;  %11029 = vmatpush1.bf16.msra.mxu0 %v15530_v56  ;;  %v8738_v56 = vld [vmem:[#allocation14 + $0x29d0] sm:$0xff] }
 0x71b   :  { %11060 = vmatprep.mubr.bf16.mxu0 %v16924_v19  ;;  %10866 = vmatprep.subr.bf16.mxu1 %v15535_v21  ;;  %v15570_v28 = vcombine.low %v8735_v55, %v8738_v56 }
 0x71c   :  { %11030 = vmatprep.subr.bf16.mxu0 %v15537_v1  ;;  %v8736_v1 = vld [vmem:[#allocation14 + $0x2978] sm:$0xff] }
 0x71d   :  { %10867 = vmatpush1.bf16.msra.mxu1 %v15534_v4 }
 0x71e   :  { %11031 = vmatpush1.bf16.msra.mxu0 %v15536_v5  ;;  %10868 = vmatprep.subr.bf16.mxu1 %v15541_v8 }
 0x71f   :  { %11032 = vmatprep.subr.bf16.mxu0 %v15543_v9  ;;  %v15564_v9 = vcombine.low %v8729_v46, %v8732_v43  ;;  %v8756_v46 = vld [vmem:[#allocation14 + $0x2c10] sm:$0xff] }
 0x721   :  { %10869 = vmatpush1.bf16.msra.mxu1 %v15540_v17  ;;  %v15571_v17 = vcombine.high %v8735_v55, %v8738_v56  ;;  %v8760_v56 = vld [vmem:[#allocation14 + $0x2c78] sm:$0xff] }
 0x722   :  { %11033 = vmatpush1.bf16.msra.mxu0 %v15542_v18  ;;  %10870 = vmatprep.subr.bf16.mxu1 %v15547_v22  ;;  %v15573_v22 = vcombine.high %v8736_v1, %v8739_v2 }
 0x723   :  { %11034 = vmatprep.subr.bf16.mxu0 %v15549_v42  ;;  %v8741_v42 = vld [vmem:[#allocation14 + $0x2a30] sm:$0xff] }
 0x724   :  { %v15576_v39 = vcombine.low %v8741_v42, %v8744_v38 }
 0x725   :  { %10871 = vmatpush1.bf16.msra.mxu1 %v15546_v59  ;;  %v15572_v59 = vcombine.low %v8736_v1, %v8739_v2 }
 0x726   :  { %11035 = vmatpush1.bf16.msra.mxu0 %v15548_v29  ;;  %10872 = vmatprep.subr.bf16.mxu1 %v15553_v30  ;;  %v15577_v29 = vcombine.high %v8741_v42, %v8744_v38  ;;  %v15579_v30 = vcombine.high %v8742_v25, %v8745_v27 }
 0x727   :  { %11036 = vmatprep.subr.bf16.mxu0 %v15555_v31  ;;  %v8747_v31 = vld [vmem:[#allocation14 + $0x2af0] sm:$0xff] }
 0x728   :  { %v15582_v15 = vcombine.low %v8747_v31, %v8750_v32 }
 0x729   :  { %10873 = vmatpush1.bf16.msra.mxu1 %v15552_v36  ;;  %v15578_v36 = vcombine.low %v8742_v25, %v8745_v27 }
 0x72a   :  { %11037 = vmatpush1.bf16.msra.mxu0 %v15554_v37  ;;  %10874 = vmatprep.subr.bf16.mxu1 %v15559_v40  ;;  %v15583_v37 = vcombine.high %v8747_v31, %v8750_v32  ;;  %v15585_v40 = vcombine.high %v8748_v33, %v8751_v34 }
 0x72b   :  { %v8201_v35 = vpop.f32.mrb[20].mxu1  ;;  %11038 = vmatprep.subr.bf16.mxu0 %v15561_v41  ;;  %v8753_v41 = vld [vmem:[#allocation14 + $0x2bb0] sm:$0xff] }
 0x72c   :  { %v16074_v21 = vadd.f32 %v8201_v35, %v5941_v45  ;;  %v8365_v58 = vpop.f32.mrb[24].mxu0  ;;  %v8203_v0 = vpop.f32.mrb[21].mxu1  ;;  %v8757_v45 = vld [vmem:[#allocation14 + $0x2c18] sm:$0xff]  ;;  %v8759_v35 = vld [vmem:[#allocation14 + $0x2c70] sm:$0xff] }
 0x72d   :  { %v16076_v3 = vadd.f32 %v8365_v58, %v5949_v63  ;;  %v16075_v4 = vadd.f32 %v8203_v0, %v5945_v48  ;;  %v8367_v5 = vpop.f32.mrb[25].mxu0  ;;  %v8205_v8 = vpop.f32.mrb[22].mxu1  ;;  %10875 = vmatpush1.bf16.msra.mxu1 %v15558_v49  ;;  %v15584_v48 = vcombine.low %v8748_v33, %v8751_v34  ;;  %v15589_v49 = vcombine.high %v8753_v41, %v8756_v46 }
 0x72e   :  { %16379 = vtanh.f32 %v16074_v21  ;;  %v16077_v11 = vadd.f32 %v8367_v5, %v5953_v50  ;;  %v8369_v12 = vpop.f32.mrb[26].mxu0  ;;  %11039 = vmatpush1.bf16.msra.mxu0 %v15560_v52  ;;  %v8206_v13 = vpop.f32.mrb[23].mxu1  ;;  %10876 = vmatprep.subr.bf16.mxu1 %v15565_v53  ;;  %v15591_v53 = vcombine.high %v8754_v44, %v8757_v45  ;;  %v8763_v21 = vld [vmem:[#allocation14 + $0x2cd8] sm:$0xff]  ;;  %v15588_v58 = vcombine.low %v8753_v41, %v8756_v46 }
 0x72f   :  { %16381 = vtanh.f32 %v16076_v3  ;;  %v8370_v18 = vpop.f32.mrb[27].mxu0  ;;  %11040 = vmatprep.subr.bf16.mxu0 %v15567_v54  ;;  %v8762_v54 = vld [vmem:[#allocation14 + $0x2cd0] sm:$0xff]  ;;  %v15590_v0 = vcombine.low %v8754_v44, %v8757_v45  ;;  %v15597_v2 = vcombine.high %v8760_v56, %v8763_v21  ;;  %v8766_v5 = vld [vmem:[#allocation14 + $0x2d38] sm:$0xff]  ;;  %v8407_v45 = vld [vmem:[#allocation14 + $0x40] sm:$0xff] }
 0x730   :  { %16383 = vtanh.f32 %v16075_v4  ;;  %v15595_v1 = vcombine.high %v8759_v35, %v8762_v54  ;;  %v8765_v3 = vld [vmem:[#allocation14 + $0x2d30] sm:$0xff]  ;;  %v8769_v8 = vld [vmem:[#allocation14 + $0x2d98] sm:$0xff] }
 0x731   :  { %16385 = vtanh.f32 %v16077_v11  ;;  %10877 = vmatpush1.bf16.msra.mxu1 %v15564_v9  ;;  %v8768_v4 = vld [vmem:[#allocation14 + $0x2d90] sm:$0xff]  ;;  %v15594_v9 = vcombine.low %v8759_v35, %v8762_v54  ;;  %v15596_v11 = vcombine.low %v8760_v56, %v8763_v21  ;;  %v15603_v13 = vcombine.high %v8766_v5, %v8769_v8  ;;  %v8772_v18 = vld [vmem:[#allocation14 + $0x2df8] sm:$0xff]  ;;  %v8416_v35 = vld [vmem:[#allocation14 + $0x160] sm:$0xff] }
 0x732   :  { %11041 = vmatpush1.bf16.msra.mxu0 %v15566_v14  ;;  %10878 = vmatprep.subr.bf16.mxu1 %v15571_v17  ;;  %v15601_v12 = vcombine.high %v8765_v3, %v8768_v4  ;;  %v8771_v14 = vld [vmem:[#allocation14 + $0x2df0] sm:$0xff]  ;;  %v15600_v42 = vcombine.low %v8765_v3, %v8768_v4  ;;  %v15602_v38 = vcombine.low %v8766_v5, %v8769_v8  ;;  %v11275_v56 = vld [vmem:[#allocation14 + $0x168] sm:$0xff] }
 0x733   :  { %11042 = vmatprep.subr.bf16.mxu0 %v15573_v22  ;;  %v8774_v17 = vld [vmem:[#allocation14 + $0x2e50] sm:$0xff]  ;;  %v8775_v22 = vld [vmem:[#allocation14 + $0x2e58] sm:$0xff]  ;;  %v11278_v3 = vld [vmem:[#allocation14 + $0x1c8] sm:$0xff] }
 0x734   :  { %v15607_v25 = vcombine.high %v8771_v14, %v8774_v17  ;;  %v15609_v27 = vcombine.high %v8772_v18, %v8775_v22  ;;  %v15606_v31 = vcombine.low %v8771_v14, %v8774_v17  ;;  %v15608_v32 = vcombine.low %v8772_v18, %v8775_v22  ;;  %v11281_v4 = vld [vmem:[#allocation14 + $0x228] sm:$0xff] }
 0x735   :  { %10879 = vmatpush1.bf16.msra.mxu1 %v15570_v28  ;;  %v8777_v28 = vld [vmem:[#allocation14 + $0x2eb0] sm:$0xff]  ;;  %v11284_v14 = vld [vmem:[#allocation14 + $0x288] sm:$0xff]  ;;  %v15639_v22 = vcombine.low %v11278_v3, %v11281_v4 }
 0x736   :  { %11043 = vmatpush1.bf16.msra.mxu0 %v15572_v59  ;;  %10880 = vmatprep.subr.bf16.mxu1 %v15577_v29  ;;  %v8780_v59 = vld [vmem:[#allocation14 + $0x2f10] sm:$0xff]  ;;  %v8778_v29 = vld [vmem:[#allocation14 + $0x2eb8] sm:$0xff]  ;;  %v11287_v17 = vld [vmem:[#allocation14 + $0x2e8] sm:$0xff] }
 0x737   :  { %11044 = vmatprep.subr.bf16.mxu0 %v15579_v30  ;;  %v8781_v30 = vld [vmem:[#allocation14 + $0x2f18] sm:$0xff]  ;;  %v15613_v33 = vcombine.high %v8777_v28, %v8780_v59  ;;  %v15612_v41 = vcombine.low %v8777_v28, %v8780_v59  ;;  %v11290_v28 = vld [vmem:[#allocation14 + $0x348] sm:$0xff] }
 0x738   :  { %v16380_v43 = vpop.eup %16379  ;;  %v15615_v34 = vcombine.high %v8778_v29, %v8781_v30  ;;  %v15614_v46 = vcombine.low %v8778_v29, %v8781_v30  ;;  %v11293_v59 = vld [vmem:[#allocation14 + $0x3a8] sm:$0xff]  ;;  %v15645_v30 = vcombine.low %v11284_v14, %v11287_v17 }
 0x739   :  { %v16382_v47 = vpop.eup %16381  ;;  %10881 = vmatpush1.bf16.msra.mxu1 %v15576_v39  ;;  %v8783_v39 = vld [vmem:[#allocation14 + $0x2f70] sm:$0xff] }
 0x73a   :  { %v16384_v63 = vpop.eup %16383  ;;  %11045 = vmatpush1.bf16.msra.mxu0 %v15578_v36  ;;  %10882 = vmatprep.subr.bf16.mxu1 %v15583_v37  ;;  %v8786_v36 = vld [vmem:[#allocation14 + $0x2fd0] sm:$0xff]  ;;  %v8784_v37 = vld [vmem:[#allocation14 + $0x2f78] sm:$0xff] }
 0x73b   :  { %v16386_v50 = vpop.eup %16385  ;;  %v16018_v52 = vpack.c.bf16 %v16384_v63, %v16380_v43  ;;  %11046 = vmatprep.subr.bf16.mxu0 %v15585_v40  ;;  %v8787_v40 = vld [vmem:[#allocation14 + $0x2fd8] sm:$0xff]  ;;  %v15619_v43 = vcombine.high %v8783_v39, %v8786_v36  ;;  %v11269_v63 = vld [vmem:[#allocation14 + $0xa8] sm:$0xff] }
 0x73c   :  { %v16019_v55 = vpack.c.bf16 %v16386_v50, %v16382_v47  ;;  %v15621_v44 = vcombine.high %v8784_v37, %v8787_v40  ;;  %v8410_v47 = vld [vmem:[#allocation14 + $0xa0] sm:$0xff] }
 0x73d   :  { %8403 = vst [vmem:[#allocation17 + $0x20] sm:$0xff] %v16018_v52  ;;  %10883 = vmatpush1.bf16.msra.mxu1 %v15582_v15  ;;  %v11266_v15 = vld [vmem:[#allocation14 + $0x48] sm:$0xff]  ;;  %v15245_v50 = vcombine.high %v8407_v45, %v8410_v47  ;;  %v15244_v54 = vcombine.low %v8407_v45, %v8410_v47 }
 0x73e   :  { %8404 = vst [vmem:[#allocation17 + $0x28] sm:$0xff] %v16019_v55  ;;  %11047 = vmatpush1.bf16.msra.mxu0 %v15584_v48  ;;  %10884 = vmatprep.subr.bf16.mxu1 %v15589_v49  ;;  %v15618_v48 = vcombine.low %v8783_v39, %v8786_v36  ;;  %v15620_v49 = vcombine.low %v8784_v37, %v8787_v40  ;;  %v11272_v55 = vld [vmem:[#allocation14 + $0x108] sm:$0xff] }
 0x73f   :  { %11048 = vmatprep.subr.bf16.mxu0 %v15591_v53  ;;  %v15628_v52 = vcombine.high %v11266_v15, %v11269_v63  ;;  %v8413_v53 = vld [vmem:[#allocation14 + $0x100] sm:$0xff]  ;;  %v15627_v21 = vcombine.low %v11266_v15, %v11269_v63  ;;  %v15633_v8 = vcombine.low %v11272_v55, %v11275_v56  ;;  %v11296_v39 = vld [vmem:[#allocation14 + $0x408] sm:$0xff]  ;;  %v15651_v40 = vcombine.low %v11290_v28, %v11293_v59 }
 0x740   :  { %v15250_v5 = vcombine.low %v8413_v53, %v8416_v35  ;;  %v11299_v36 = vld [vmem:[#allocation14 + $0x468] sm:$0xff] }
 0x741   :  { %10885 = vmatpush1.bf16.msra.mxu1 %v15588_v58  ;;  %v15251_v58 = vcombine.high %v8413_v53, %v8416_v35  ;;  %v11302_v45 = vld [vmem:[#allocation14 + $0x4c8] sm:$0xff]  ;;  %v15657_v63 = vcombine.low %v11296_v39, %v11299_v36 }
 0x742   :  { %11049 = vmatpush1.bf16.msra.mxu0 %v15590_v0  ;;  %10886 = vmatprep.subr.bf16.mxu1 %v15595_v1  ;;  %v8419_v0 = vld [vmem:[#allocation14 + $0x1c0] sm:$0xff]  ;;  %v11305_v47 = vld [vmem:[#allocation14 + $0x528] sm:$0xff] }
 0x743   :  { %11050 = vmatprep.subr.bf16.mxu0 %v15597_v2  ;;  %v8422_v1 = vld [vmem:[#allocation14 + $0x220] sm:$0xff]  ;;  %v15634_v2 = vcombine.high %v11272_v55, %v11275_v56  ;;  %v11308_v53 = vld [vmem:[#allocation14 + $0x588] sm:$0xff]  ;;  %v15663_v55 = vcombine.low %v11302_v45, %v11305_v47 }
 0x744   :  { %v15256_v18 = vcombine.low %v8419_v0, %v8422_v1  ;;  %v11311_v35 = vld [vmem:[#allocation14 + $0x5e8] sm:$0xff] }
 0x745   :  { %10887 = vmatpush1.bf16.msra.mxu1 %v15594_v9  ;;  %v15257_v9 = vcombine.high %v8419_v0, %v8422_v1  ;;  %v8458_v0 = vld [vmem:[#allocation14 + $0x6a0] sm:$0xff]  ;;  %v11314_v1 = vld [vmem:[#allocation14 + $0x648] sm:$0xff] }
 0x746   :  { %11051 = vmatpush1.bf16.msra.mxu0 %v15596_v11  ;;  %10888 = vmatprep.subr.bf16.mxu1 %v15601_v12  ;;  %v15640_v11 = vcombine.high %v11278_v3, %v11281_v4  ;;  %v8425_v12 = vld [vmem:[#allocation14 + $0x280] sm:$0xff]  ;;  %v15669_v4 = vcombine.low %v11308_v53, %v11311_v35 }
 0x747   :  { %11052 = vmatprep.subr.bf16.mxu0 %v15603_v13  ;;  %v8428_v13 = vld [vmem:[#allocation14 + $0x2e0] sm:$0xff] }
 0x748   :  { %v15262_v29 = vcombine.low %v8425_v12, %v8428_v13 }
 0x749   :  { %10889 = vmatpush1.bf16.msra.mxu1 %v15600_v42  ;;  %v15263_v42 = vcombine.high %v8425_v12, %v8428_v13  ;;  %v11320_v12 = vld [vmem:[#allocation14 + $0x708] sm:$0xff] }
 0x74a   :  { %11053 = vmatpush1.bf16.msra.mxu0 %v15602_v38  ;;  %10890 = vmatprep.subr.bf16.mxu1 %v15607_v25  ;;  %v15646_v38 = vcombine.high %v11284_v14, %v11287_v17  ;;  %v8431_v25 = vld [vmem:[#allocation14 + $0x340] sm:$0xff]  ;;  %v11323_v13 = vld [vmem:[#allocation14 + $0x768] sm:$0xff] }
 0x74b   :  { %11054 = vmatprep.subr.bf16.mxu0 %v15609_v27  ;;  %v8434_v27 = vld [vmem:[#allocation14 + $0x3a0] sm:$0xff] }
 0x74c   :  { %v15268_v37 = vcombine.low %v8431_v25, %v8434_v27 }
 0x74d   :  { %10891 = vmatpush1.bf16.msra.mxu1 %v15606_v31  ;;  %v15269_v31 = vcombine.high %v8431_v25, %v8434_v27  ;;  %v11326_v25 = vld [vmem:[#allocation14 + $0x7c8] sm:$0xff] }
 0x74e   :  { %11055 = vmatpush1.bf16.msra.mxu0 %v15608_v32  ;;  %10892 = vmatprep.subr.bf16.mxu1 %v15613_v33  ;;  %v15652_v32 = vcombine.high %v11290_v28, %v11293_v59  ;;  %v8437_v33 = vld [vmem:[#allocation14 + $0x400] sm:$0xff]  ;;  %v11329_v27 = vld [vmem:[#allocation14 + $0x828] sm:$0xff]  ;;  %v15681_v59 = vcombine.low %v11320_v12, %v11323_v13 }
 0x74f   :  { %11056 = vmatprep.subr.bf16.mxu0 %v15615_v34  ;;  %v8440_v34 = vld [vmem:[#allocation14 + $0x460] sm:$0xff] }
 0x750   :  { %v15274_v15 = vcombine.low %v8437_v33, %v8440_v34 }
 0x751   :  { %10893 = vmatpush1.bf16.msra.mxu1 %v15612_v41  ;;  %v15275_v41 = vcombine.high %v8437_v33, %v8440_v34  ;;  %v11332_v33 = vld [vmem:[#allocation14 + $0x888] sm:$0xff] }
 0x752   :  { %11057 = vmatpush1.bf16.msra.mxu0 %v15614_v46  ;;  %10894 = vmatprep.subr.bf16.mxu1 %v15619_v43  ;;  %v15658_v46 = vcombine.high %v11296_v39, %v11299_v36  ;;  %v8443_v43 = vld [vmem:[#allocation14 + $0x4c0] sm:$0xff]  ;;  %v11335_v34 = vld [vmem:[#allocation14 + $0x8e8] sm:$0xff]  ;;  %v15687_v36 = vcombine.low %v11326_v25, %v11329_v27 }
 0x753   :  { %11058 = vmatprep.subr.bf16.mxu0 %v15621_v44  ;;  %v8446_v44 = vld [vmem:[#allocation14 + $0x520] sm:$0xff] }
 0x755   :  { %10895 = vmatpush1.bf16.msra.mxu1 %v15618_v48  ;;  %v15281_v48 = vcombine.high %v8443_v43, %v8446_v44 }
 0x756   :  { %11059 = vmatpush1.bf16.msra.mxu0 %v15620_v49  ;;  %11069 = vmatprep.subr.bf16.mxu1 %v15245_v50  ;;  %v15664_v49 = vcombine.high %v11302_v45, %v11305_v47  ;;  %v8449_v50 = vld [vmem:[#allocation14 + $0x580] sm:$0xff]  ;;  %v15693_v47 = vcombine.low %v11332_v33, %v11335_v34 }
 0x757   :  { %13602 = vmatprep.subr.bf16.mxu0 %v15628_v52  ;;  %v8452_v52 = vld [vmem:[#allocation14 + $0x5e0] sm:$0xff] }
 0x758   :  { %10897 = vmatmul.mubr.bf16.vlgmr.msra.gmra.mrb[24].mxu1 %v16932_v51  ;;  %v15287_v56 = vcombine.high %v8449_v50, %v8452_v52  ;;  %v15286_v3 = vcombine.low %v8449_v50, %v8452_v52  ;;  %v11344_v50 = vld [vmem:[#allocation14 + $0xa08] sm:$0xff] }
 0x759   :  { %11061 = vmatmul.mubr.bf16.vlgmr.msra.gmra.mrb[28].mxu0 %v16932_v51  ;;  %11070 = vmatpush1.bf16.msra.mxu1 %v15244_v54  ;;  %v15280_v54 = vcombine.low %v8443_v43, %v8446_v44  ;;  %v11338_v43 = vld [vmem:[#allocation14 + $0x948] sm:$0xff] }
 0x75a   :  { %11101 = vmatprep.mubr.bf16.mxu1 %v16885_v57  ;;  %13603 = vmatpush1.bf16.msra.mxu0 %v15627_v21  ;;  %v15670_v21 = vcombine.high %v11308_v53, %v11311_v35  ;;  %v11341_v44 = vld [vmem:[#allocation14 + $0x9a8] sm:$0xff] }
 0x75b   :  { %13634 = vmatprep.mubr.bf16.mxu0 %v16885_v57  ;;  %11071 = vmatprep.subr.bf16.mxu1 %v15251_v58  ;;  %v8455_v58 = vld [vmem:[#allocation14 + $0x640] sm:$0xff]  ;;  %v11347_v52 = vld [vmem:[#allocation14 + $0xa68] sm:$0xff]  ;;  %v15699_v35 = vcombine.low %v11338_v43, %v11341_v44 }
 0x75c   :  { %13604 = vmatprep.subr.bf16.mxu0 %v15634_v2  ;;  %v11317_v2 = vld [vmem:[#allocation14 + $0x6a8] sm:$0xff]  ;;  %v15292_v14 = vcombine.low %v8455_v58, %v8458_v0 }
 0x75d   :  { %11072 = vmatpush1.bf16.msra.mxu1 %v15250_v5  ;;  %v15293_v5 = vcombine.high %v8455_v58, %v8458_v0  ;;  %v15675_v17 = vcombine.low %v11314_v1, %v11317_v2  ;;  %v11350_v58 = vld [vmem:[#allocation14 + $0xac8] sm:$0xff] }
 0x75e   :  { %13605 = vmatpush1.bf16.msra.mxu0 %v15633_v8  ;;  %11073 = vmatprep.subr.bf16.mxu1 %v15257_v9  ;;  %v15676_v8 = vcombine.high %v11314_v1, %v11317_v2  ;;  %v8461_v9 = vld [vmem:[#allocation14 + $0x700] sm:$0xff]  ;;  %v11353_v0 = vld [vmem:[#allocation14 + $0xb28] sm:$0xff]  ;;  %v15705_v2 = vcombine.low %v11344_v50, %v11347_v52 }
 0x75f   :  { %13606 = vmatprep.subr.bf16.mxu0 %v15640_v11  ;;  %v8464_v11 = vld [vmem:[#allocation14 + $0x760] sm:$0xff] }
 0x760   :  { %v15298_v28 = vcombine.low %v8461_v9, %v8464_v11 }
 0x761   :  { %11074 = vmatpush1.bf16.msra.mxu1 %v15256_v18  ;;  %v15299_v18 = vcombine.high %v8461_v9, %v8464_v11  ;;  %v11356_v9 = vld [vmem:[#allocation14 + $0xb88] sm:$0xff] }
 0x762   :  { %13607 = vmatpush1.bf16.msra.mxu0 %v15639_v22  ;;  %11075 = vmatprep.subr.bf16.mxu1 %v15263_v42  ;;  %v15682_v22 = vcombine.high %v11320_v12, %v11323_v13  ;;  %v8467_v42 = vld [vmem:[#allocation14 + $0x7c0] sm:$0xff]  ;;  %v11359_v11 = vld [vmem:[#allocation14 + $0xbe8] sm:$0xff]  ;;  %v15711_v13 = vcombine.low %v11350_v58, %v11353_v0 }
 0x763   :  { %13608 = vmatprep.subr.bf16.mxu0 %v15646_v38  ;;  %v8470_v38 = vld [vmem:[#allocation14 + $0x820] sm:$0xff] }
 0x764   :  { %v15304_v39 = vcombine.low %v8467_v42, %v8470_v38 }
 0x765   :  { %11076 = vmatpush1.bf16.msra.mxu1 %v15262_v29  ;;  %v15305_v29 = vcombine.high %v8467_v42, %v8470_v38  ;;  %v11362_v42 = vld [vmem:[#allocation14 + $0xc48] sm:$0xff] }
 0x766   :  { %13609 = vmatpush1.bf16.msra.mxu0 %v15645_v30  ;;  %11077 = vmatprep.subr.bf16.mxu1 %v15269_v31  ;;  %v15688_v30 = vcombine.high %v11326_v25, %v11329_v27  ;;  %v8473_v31 = vld [vmem:[#allocation14 + $0x880] sm:$0xff]  ;;  %v11365_v38 = vld [vmem:[#allocation14 + $0xca8] sm:$0xff]  ;;  %v15717_v27 = vcombine.low %v11356_v9, %v11359_v11 }
 0x767   :  { %13610 = vmatprep.subr.bf16.mxu0 %v15652_v32  ;;  %v8476_v32 = vld [vmem:[#allocation14 + $0x8e0] sm:$0xff] }
 0x768   :  { %v15310_v45 = vcombine.low %v8473_v31, %v8476_v32 }
 0x769   :  { %11078 = vmatpush1.bf16.msra.mxu1 %v15268_v37  ;;  %v15311_v37 = vcombine.high %v8473_v31, %v8476_v32  ;;  %v11368_v32 = vld [vmem:[#allocation14 + $0xd08] sm:$0xff] }
 0x76a   :  { %13611 = vmatpush1.bf16.msra.mxu0 %v15651_v40  ;;  %11079 = vmatprep.subr.bf16.mxu1 %v15275_v41  ;;  %v15694_v40 = vcombine.high %v11332_v33, %v11335_v34  ;;  %v8479_v41 = vld [vmem:[#allocation14 + $0x940] sm:$0xff]  ;;  %v11371_v33 = vld [vmem:[#allocation14 + $0xd68] sm:$0xff]  ;;  %v15723_v34 = vcombine.low %v11362_v42, %v11365_v38 }
 0x76b   :  { %13612 = vmatprep.subr.bf16.mxu0 %v15658_v46  ;;  %v8482_v46 = vld [vmem:[#allocation14 + $0x9a0] sm:$0xff] }
 0x76c   :  { %v15316_v53 = vcombine.low %v8479_v41, %v8482_v46 }
 0x76d   :  { %11080 = vmatpush1.bf16.msra.mxu1 %v15274_v15  ;;  %v15317_v15 = vcombine.high %v8479_v41, %v8482_v46  ;;  %v11374_v41 = vld [vmem:[#allocation14 + $0xdc8] sm:$0xff] }
 0x76e   :  { %13613 = vmatpush1.bf16.msra.mxu0 %v15657_v63  ;;  %11081 = vmatprep.subr.bf16.mxu1 %v15281_v48  ;;  %v15700_v63 = vcombine.high %v11338_v43, %v11341_v44  ;;  %v8485_v48 = vld [vmem:[#allocation14 + $0xa00] sm:$0xff]  ;;  %v11377_v46 = vld [vmem:[#allocation14 + $0xe28] sm:$0xff]  ;;  %v15729_v44 = vcombine.low %v11368_v32, %v11371_v33 }
 0x76f   :  { %13614 = vmatprep.subr.bf16.mxu0 %v15664_v49  ;;  %v8488_v49 = vld [vmem:[#allocation14 + $0xa60] sm:$0xff] }
 0x770   :  { %v15322_v1 = vcombine.low %v8485_v48, %v8488_v49 }
 0x771   :  { %11082 = vmatpush1.bf16.msra.mxu1 %v15280_v54  ;;  %v15323_v54 = vcombine.high %v8485_v48, %v8488_v49  ;;  %v11380_v48 = vld [vmem:[#allocation14 + $0xe88] sm:$0xff] }
 0x772   :  { %13615 = vmatpush1.bf16.msra.mxu0 %v15663_v55  ;;  %11083 = vmatprep.subr.bf16.mxu1 %v15287_v56  ;;  %v15706_v55 = vcombine.high %v11344_v50, %v11347_v52  ;;  %v8491_v56 = vld [vmem:[#allocation14 + $0xac0] sm:$0xff]  ;;  %v11383_v49 = vld [vmem:[#allocation14 + $0xee8] sm:$0xff]  ;;  %v15735_v52 = vcombine.low %v11374_v41, %v11377_v46 }
 0x773   :  { %13616 = vmatprep.subr.bf16.mxu0 %v15670_v21  ;;  %v8494_v21 = vld [vmem:[#allocation14 + $0xb20] sm:$0xff] }
 0x774   :  { %v15328_v12 = vcombine.low %v8491_v56, %v8494_v21 }
 0x775   :  { %11084 = vmatpush1.bf16.msra.mxu1 %v15286_v3  ;;  %v15329_v3 = vcombine.high %v8491_v56, %v8494_v21  ;;  %v11386_v56 = vld [vmem:[#allocation14 + $0xf48] sm:$0xff] }
 0x776   :  { %13617 = vmatpush1.bf16.msra.mxu0 %v15669_v4  ;;  %11085 = vmatprep.subr.bf16.mxu1 %v15293_v5  ;;  %v15712_v4 = vcombine.high %v11350_v58, %v11353_v0  ;;  %v8497_v5 = vld [vmem:[#allocation14 + $0xb80] sm:$0xff]  ;;  %v11389_v21 = vld [vmem:[#allocation14 + $0xfa8] sm:$0xff]  ;;  %v15741_v0 = vcombine.low %v11380_v48, %v11383_v49 }
 0x777   :  { %13618 = vmatprep.subr.bf16.mxu0 %v15676_v8  ;;  %v8500_v8 = vld [vmem:[#allocation14 + $0xbe0] sm:$0xff] }
 0x778   :  { %v15334_v25 = vcombine.low %v8497_v5, %v8500_v8 }
 0x779   :  { %11086 = vmatpush1.bf16.msra.mxu1 %v15292_v14  ;;  %v15335_v14 = vcombine.high %v8497_v5, %v8500_v8  ;;  %v11392_v5 = vld [vmem:[#allocation14 + $0x1008] sm:$0xff] }
 0x77a   :  { %13619 = vmatpush1.bf16.msra.mxu0 %v15675_v17  ;;  %11087 = vmatprep.subr.bf16.mxu1 %v15299_v18  ;;  %v15718_v17 = vcombine.high %v11356_v9, %v11359_v11  ;;  %v8503_v18 = vld [vmem:[#allocation14 + $0xc40] sm:$0xff]  ;;  %v11395_v8 = vld [vmem:[#allocation14 + $0x1068] sm:$0xff]  ;;  %v15747_v11 = vcombine.low %v11386_v56, %v11389_v21 }
 0x77b   :  { %13620 = vmatprep.subr.bf16.mxu0 %v15682_v22  ;;  %v8506_v22 = vld [vmem:[#allocation14 + $0xca0] sm:$0xff] }
 0x77c   :  { %v15340_v31 = vcombine.low %v8503_v18, %v8506_v22 }
 0x77d   :  { %11088 = vmatpush1.bf16.msra.mxu1 %v15298_v28  ;;  %v15341_v28 = vcombine.high %v8503_v18, %v8506_v22  ;;  %v11398_v18 = vld [vmem:[#allocation14 + $0x10c8] sm:$0xff] }
 0x77e   :  { %13621 = vmatpush1.bf16.msra.mxu0 %v15681_v59  ;;  %11089 = vmatprep.subr.bf16.mxu1 %v15305_v29  ;;  %v15724_v59 = vcombine.high %v11362_v42, %v11365_v38  ;;  %v8509_v29 = vld [vmem:[#allocation14 + $0xd00] sm:$0xff]  ;;  %v11401_v22 = vld [vmem:[#allocation14 + $0x1128] sm:$0xff]  ;;  %v15753_v38 = vcombine.low %v11392_v5, %v11395_v8 }
 0x77f   :  { %13622 = vmatprep.subr.bf16.mxu0 %v15688_v30  ;;  %v8512_v30 = vld [vmem:[#allocation14 + $0xd60] sm:$0xff] }
 0x780   :  { %v15346_v43 = vcombine.low %v8509_v29, %v8512_v30 }
 0x781   :  { %11090 = vmatpush1.bf16.msra.mxu1 %v15304_v39  ;;  %v15347_v39 = vcombine.high %v8509_v29, %v8512_v30  ;;  %v11404_v29 = vld [vmem:[#allocation14 + $0x1188] sm:$0xff] }
 0x782   :  { %13623 = vmatpush1.bf16.msra.mxu0 %v15687_v36  ;;  %11091 = vmatprep.subr.bf16.mxu1 %v15311_v37  ;;  %v8515_v36 = vld [vmem:[#allocation14 + $0xdc0] sm:$0xff]  ;;  %v11407_v30 = vld [vmem:[#allocation14 + $0x11e8] sm:$0xff] }
 0x783   :  { %13624 = vmatprep.subr.bf16.mxu0 %v15694_v40  ;;  %v8518_v37 = vld [vmem:[#allocation14 + $0xe20] sm:$0xff]  ;;  %v15730_v40 = vcombine.high %v11368_v32, %v11371_v33  ;;  %v15759_v32 = vcombine.low %v11398_v18, %v11401_v22 }
 0x784   :  { %v15352_v50 = vcombine.low %v8515_v36, %v8518_v37 }
 0x785   :  { %11092 = vmatpush1.bf16.msra.mxu1 %v15310_v45  ;;  %v15353_v45 = vcombine.high %v8515_v36, %v8518_v37  ;;  %v8554_v36 = vld [vmem:[#allocation14 + $0x12a0] sm:$0xff]  ;;  %v11410_v37 = vld [vmem:[#allocation14 + $0x1248] sm:$0xff] }
 0x786   :  { %13625 = vmatpush1.bf16.msra.mxu0 %v15693_v47  ;;  %11093 = vmatprep.subr.bf16.mxu1 %v15317_v15  ;;  %v15736_v47 = vcombine.high %v11374_v41, %v11377_v46  ;;  %v8521_v15 = vld [vmem:[#allocation14 + $0xe80] sm:$0xff]  ;;  %v15765_v46 = vcombine.low %v11404_v29, %v11407_v30 }
 0x787   :  { %13626 = vmatprep.subr.bf16.mxu0 %v15700_v63  ;;  %v8524_v63 = vld [vmem:[#allocation14 + $0xee0] sm:$0xff] }
 0x788   :  { %v15358_v58 = vcombine.low %v8521_v15, %v8524_v63 }
 0x789   :  { %11094 = vmatpush1.bf16.msra.mxu1 %v15316_v53  ;;  %v15359_v53 = vcombine.high %v8521_v15, %v8524_v63  ;;  %v11416_v15 = vld [vmem:[#allocation14 + $0x1308] sm:$0xff] }
 0x78a   :  { %13627 = vmatpush1.bf16.msra.mxu0 %v15699_v35  ;;  %11095 = vmatprep.subr.bf16.mxu1 %v15323_v54  ;;  %v15742_v35 = vcombine.high %v11380_v48, %v11383_v49  ;;  %v8527_v54 = vld [vmem:[#allocation14 + $0xf40] sm:$0xff]  ;;  %v11419_v63 = vld [vmem:[#allocation14 + $0x1368] sm:$0xff] }
 0x78b   :  { %13628 = vmatprep.subr.bf16.mxu0 %v15706_v55  ;;  %v8530_v55 = vld [vmem:[#allocation14 + $0xfa0] sm:$0xff] }
 0x78c   :  { %v15364_v9 = vcombine.low %v8527_v54, %v8530_v55 }
 0x78d   :  { %11096 = vmatpush1.bf16.msra.mxu1 %v15322_v1  ;;  %v15365_v1 = vcombine.high %v8527_v54, %v8530_v55  ;;  %v11422_v54 = vld [vmem:[#allocation14 + $0x13c8] sm:$0xff] }
 0x78e   :  { %13629 = vmatpush1.bf16.msra.mxu0 %v15705_v2  ;;  %11097 = vmatprep.subr.bf16.mxu1 %v15329_v3  ;;  %v15748_v2 = vcombine.high %v11386_v56, %v11389_v21  ;;  %v8533_v3 = vld [vmem:[#allocation14 + $0x1000] sm:$0xff]  ;;  %v11425_v55 = vld [vmem:[#allocation14 + $0x1428] sm:$0xff]  ;;  %v15777_v21 = vcombine.low %v11416_v15, %v11419_v63 }
 0x78f   :  { %13630 = vmatprep.subr.bf16.mxu0 %v15712_v4  ;;  %v8536_v4 = vld [vmem:[#allocation14 + $0x1060] sm:$0xff] }
 0x790   :  { %v15370_v42 = vcombine.low %v8533_v3, %v8536_v4 }
 0x791   :  { %11098 = vmatpush1.bf16.msra.mxu1 %v15328_v12  ;;  %v15371_v12 = vcombine.high %v8533_v3, %v8536_v4  ;;  %v11428_v3 = vld [vmem:[#allocation14 + $0x1488] sm:$0xff] }
 0x792   :  { %13631 = vmatpush1.bf16.msra.mxu0 %v15711_v13  ;;  %11099 = vmatprep.subr.bf16.mxu1 %v15335_v14  ;;  %v15754_v13 = vcombine.high %v11392_v5, %v11395_v8  ;;  %v8539_v14 = vld [vmem:[#allocation14 + $0x10c0] sm:$0xff]  ;;  %v11431_v4 = vld [vmem:[#allocation14 + $0x14e8] sm:$0xff]  ;;  %v15783_v8 = vcombine.low %v11422_v54, %v11425_v55 }
 0x793   :  { %13632 = vmatprep.subr.bf16.mxu0 %v15718_v17  ;;  %v8542_v17 = vld [vmem:[#allocation14 + $0x1120] sm:$0xff] }
 0x795   :  { %11100 = vmatpush1.bf16.msra.mxu1 %v15334_v25  ;;  %v15377_v25 = vcombine.high %v8539_v14, %v8542_v17 }
 0x796   :  { %13633 = vmatpush1.bf16.msra.mxu0 %v15717_v27  ;;  %11110 = vmatprep.subr.bf16.mxu1 %v15341_v28  ;;  %v15760_v27 = vcombine.high %v11398_v18, %v11401_v22  ;;  %v8545_v28 = vld [vmem:[#allocation14 + $0x1180] sm:$0xff]  ;;  %v15789_v22 = vcombine.low %v11428_v3, %v11431_v4 }
 0x797   :  { %13643 = vmatprep.subr.bf16.mxu0 %v15724_v59  ;;  %v8548_v59 = vld [vmem:[#allocation14 + $0x11e0] sm:$0xff] }
 0x798   :  { %11102 = vmatmul.mubr.bf16.vlgmr.msra.gmra.mrb[28].mxu1 %v16887_v61  ;;  %v15383_v33 = vcombine.high %v8545_v28, %v8548_v59  ;;  %v15382_v41 = vcombine.low %v8545_v28, %v8548_v59  ;;  %v11440_v28 = vld [vmem:[#allocation14 + $0x1608] sm:$0xff] }
 0x799   :  { %13635 = vmatmul.mubr.bf16.vlgmr.msra.gmra.mrb[32].mxu0 %v16887_v61  ;;  %11111 = vmatpush1.bf16.msra.mxu1 %v15340_v31  ;;  %v15376_v31 = vcombine.low %v8539_v14, %v8542_v17  ;;  %v11434_v14 = vld [vmem:[#allocation14 + $0x1548] sm:$0xff] }
 0x79a   :  { %11142 = vmatprep.mubr.bf16.mxu1 %v16891_v6  ;;  %13644 = vmatpush1.bf16.msra.mxu0 %v15723_v34  ;;  %v15766_v34 = vcombine.high %v11404_v29, %v11407_v30  ;;  %v11437_v17 = vld [vmem:[#allocation14 + $0x15a8] sm:$0xff] }
 0x79b   :  { %13675 = vmatprep.mubr.bf16.mxu0 %v16891_v6  ;;  %11112 = vmatprep.subr.bf16.mxu1 %v15347_v39  ;;  %v8551_v39 = vld [vmem:[#allocation14 + $0x1240] sm:$0xff]  ;;  %v11443_v59 = vld [vmem:[#allocation14 + $0x1668] sm:$0xff]  ;;  %v15795_v30 = vcombine.low %v11434_v14, %v11437_v17 }
 0x79c   :  { %13645 = vmatprep.subr.bf16.mxu0 %v15730_v40  ;;  %v11413_v40 = vld [vmem:[#allocation14 + $0x12a8] sm:$0xff]  ;;  %v15388_v48 = vcombine.low %v8551_v39, %v8554_v36 }
 0x79d   :  { %11113 = vmatpush1.bf16.msra.mxu1 %v15346_v43  ;;  %v15389_v43 = vcombine.high %v8551_v39, %v8554_v36  ;;  %v15771_v49 = vcombine.low %v11410_v37, %v11413_v40  ;;  %v11446_v39 = vld [vmem:[#allocation14 + $0x16c8] sm:$0xff] }
 0x79e   :  { %13646 = vmatpush1.bf16.msra.mxu0 %v15729_v44  ;;  %11114 = vmatprep.subr.bf16.mxu1 %v15353_v45  ;;  %v15772_v44 = vcombine.high %v11410_v37, %v11413_v40  ;;  %v8557_v45 = vld [vmem:[#allocation14 + $0x1300] sm:$0xff]  ;;  %v11449_v36 = vld [vmem:[#allocation14 + $0x1728] sm:$0xff]  ;;  %v15801_v40 = vcombine.low %v11440_v28, %v11443_v59 }
 0x79f   :  { %13647 = vmatprep.subr.bf16.mxu0 %v15736_v47  ;;  %v8560_v47 = vld [vmem:[#allocation14 + $0x1360] sm:$0xff] }
 0x7a0   :  { %v15394_v56 = vcombine.low %v8557_v45, %v8560_v47 }
 0x7a1   :  { %11115 = vmatpush1.bf16.msra.mxu1 %v15352_v50  ;;  %v15395_v50 = vcombine.high %v8557_v45, %v8560_v47  ;;  %v11452_v45 = vld [vmem:[#allocation14 + $0x1788] sm:$0xff] }
 0x7a2   :  { %13648 = vmatpush1.bf16.msra.mxu0 %v15735_v52  ;;  %11116 = vmatprep.subr.bf16.mxu1 %v15359_v53  ;;  %v15778_v52 = vcombine.high %v11416_v15, %v11419_v63  ;;  %v8563_v53 = vld [vmem:[#allocation14 + $0x13c0] sm:$0xff]  ;;  %v11455_v47 = vld [vmem:[#allocation14 + $0x17e8] sm:$0xff]  ;;  %v15807_v63 = vcombine.low %v11446_v39, %v11449_v36 }
 0x7a3   :  { %13649 = vmatprep.subr.bf16.mxu0 %v15742_v35  ;;  %v8566_v35 = vld [vmem:[#allocation14 + $0x1420] sm:$0xff] }
 0x7a4   :  { %v15400_v5 = vcombine.low %v8563_v53, %v8566_v35 }
 0x7a5   :  { %11117 = vmatpush1.bf16.msra.mxu1 %v15358_v58  ;;  %v15401_v58 = vcombine.high %v8563_v53, %v8566_v35  ;;  %v11458_v53 = vld [vmem:[#allocation14 + $0x1848] sm:$0xff] }
 0x7a6   :  { %13650 = vmatpush1.bf16.msra.mxu0 %v15741_v0  ;;  %11118 = vmatprep.subr.bf16.mxu1 %v15365_v1  ;;  %v15784_v0 = vcombine.high %v11422_v54, %v11425_v55  ;;  %v8569_v1 = vld [vmem:[#allocation14 + $0x1480] sm:$0xff]  ;;  %v11461_v35 = vld [vmem:[#allocation14 + $0x18a8] sm:$0xff]  ;;  %v15813_v55 = vcombine.low %v11452_v45, %v11455_v47 }
 0x7a7   :  { %13651 = vmatprep.subr.bf16.mxu0 %v15748_v2  ;;  %v8572_v2 = vld [vmem:[#allocation14 + $0x14e0] sm:$0xff] }
 0x7a8   :  { %v15406_v18 = vcombine.low %v8569_v1, %v8572_v2 }
 0x7a9   :  { %11119 = vmatpush1.bf16.msra.mxu1 %v15364_v9  ;;  %v15407_v9 = vcombine.high %v8569_v1, %v8572_v2  ;;  %v11464_v2 = vld [vmem:[#allocation14 + $0x1908] sm:$0xff] }
 0x7aa   :  { %13652 = vmatpush1.bf16.msra.mxu0 %v15747_v11  ;;  %11120 = vmatprep.subr.bf16.mxu1 %v15371_v12  ;;  %v15790_v11 = vcombine.high %v11428_v3, %v11431_v4  ;;  %v8575_v12 = vld [vmem:[#allocation14 + $0x1540] sm:$0xff]  ;;  %v11467_v3 = vld [vmem:[#allocation14 + $0x1968] sm:$0xff]  ;;  %v15819_v4 = vcombine.low %v11458_v53, %v11461_v35 }
 0x7ab   :  { %13653 = vmatprep.subr.bf16.mxu0 %v15754_v13  ;;  %v8578_v13 = vld [vmem:[#allocation14 + $0x15a0] sm:$0xff] }
 0x7ac   :  { %v15412_v29 = vcombine.low %v8575_v12, %v8578_v13 }
 0x7ad   :  { %11121 = vmatpush1.bf16.msra.mxu1 %v15370_v42  ;;  %v15413_v42 = vcombine.high %v8575_v12, %v8578_v13  ;;  %v11470_v12 = vld [vmem:[#allocation14 + $0x19c8] sm:$0xff] }
 0x7ae   :  { %13654 = vmatpush1.bf16.msra.mxu0 %v15753_v38  ;;  %11122 = vmatprep.subr.bf16.mxu1 %v15377_v25  ;;  %v15796_v38 = vcombine.high %v11434_v14, %v11437_v17  ;;  %v8581_v25 = vld [vmem:[#allocation14 + $0x1600] sm:$0xff]  ;;  %v11473_v13 = vld [vmem:[#allocation14 + $0x1a28] sm:$0xff]  ;;  %v15825_v17 = vcombine.low %v11464_v2, %v11467_v3 }
 0x7af   :  { %13655 = vmatprep.subr.bf16.mxu0 %v15760_v27  ;;  %v8584_v27 = vld [vmem:[#allocation14 + $0x1660] sm:$0xff] }
 0x7b0   :  { %v15418_v37 = vcombine.low %v8581_v25, %v8584_v27 }
 0x7b1   :  { %11123 = vmatpush1.bf16.msra.mxu1 %v15376_v31  ;;  %v15419_v31 = vcombine.high %v8581_v25, %v8584_v27  ;;  %v11476_v25 = vld [vmem:[#allocation14 + $0x1a88] sm:$0xff] }
 0x7b2   :  { %13656 = vmatpush1.bf16.msra.mxu0 %v15759_v32  ;;  %11124 = vmatprep.subr.bf16.mxu1 %v15383_v33  ;;  %v15802_v32 = vcombine.high %v11440_v28, %v11443_v59  ;;  %v8587_v33 = vld [vmem:[#allocation14 + $0x16c0] sm:$0xff]  ;;  %v11479_v27 = vld [vmem:[#allocation14 + $0x1ae8] sm:$0xff]  ;;  %v15831_v59 = vcombine.low %v11470_v12, %v11473_v13 }
 0x7b3   :  { %13657 = vmatprep.subr.bf16.mxu0 %v15766_v34  ;;  %v8590_v34 = vld [vmem:[#allocation14 + $0x1720] sm:$0xff] }
 0x7b4   :  { %v15424_v15 = vcombine.low %v8587_v33, %v8590_v34 }
 0x7b5   :  { %11125 = vmatpush1.bf16.msra.mxu1 %v15382_v41  ;;  %v15425_v41 = vcombine.high %v8587_v33, %v8590_v34  ;;  %v11482_v33 = vld [vmem:[#allocation14 + $0x1b48] sm:$0xff] }
 0x7b6   :  { %13658 = vmatpush1.bf16.msra.mxu0 %v15765_v46  ;;  %11126 = vmatprep.subr.bf16.mxu1 %v15389_v43  ;;  %v15808_v46 = vcombine.high %v11446_v39, %v11449_v36  ;;  %v8593_v43 = vld [vmem:[#allocation14 + $0x1780] sm:$0xff]  ;;  %v11485_v34 = vld [vmem:[#allocation14 + $0x1ba8] sm:$0xff]  ;;  %v15837_v36 = vcombine.low %v11476_v25, %v11479_v27 }
 0x7b7   :  { %13659 = vmatprep.subr.bf16.mxu0 %v15772_v44  ;;  %v8596_v44 = vld [vmem:[#allocation14 + $0x17e0] sm:$0xff] }
 0x7b8   :  { %v15430_v54 = vcombine.low %v8593_v43, %v8596_v44 }
 0x7b9   :  { %11127 = vmatpush1.bf16.msra.mxu1 %v15388_v48  ;;  %v15431_v48 = vcombine.high %v8593_v43, %v8596_v44  ;;  %v11488_v43 = vld [vmem:[#allocation14 + $0x1c08] sm:$0xff] }
 0x7ba   :  { %13660 = vmatpush1.bf16.msra.mxu0 %v15771_v49  ;;  %11128 = vmatprep.subr.bf16.mxu1 %v15395_v50  ;;  %v15814_v49 = vcombine.high %v11452_v45, %v11455_v47  ;;  %v8599_v50 = vld [vmem:[#allocation14 + $0x1840] sm:$0xff]  ;;  %v11491_v44 = vld [vmem:[#allocation14 + $0x1c68] sm:$0xff]  ;;  %v15843_v47 = vcombine.low %v11482_v33, %v11485_v34 }
 0x7bb   :  { %13661 = vmatprep.subr.bf16.mxu0 %v15778_v52  ;;  %v8602_v52 = vld [vmem:[#allocation14 + $0x18a0] sm:$0xff] }
 0x7bc   :  { %v15436_v1 = vcombine.low %v8599_v50, %v8602_v52 }
 0x7bd   :  { %11129 = vmatpush1.bf16.msra.mxu1 %v15394_v56  ;;  %v15437_v56 = vcombine.high %v8599_v50, %v8602_v52  ;;  %v11494_v50 = vld [vmem:[#allocation14 + $0x1cc8] sm:$0xff] }
 0x7be   :  { %13662 = vmatpush1.bf16.msra.mxu0 %v15777_v21  ;;  %11130 = vmatprep.subr.bf16.mxu1 %v15401_v58  ;;  %v15820_v21 = vcombine.high %v11458_v53, %v11461_v35  ;;  %v8605_v58 = vld [vmem:[#allocation14 + $0x1900] sm:$0xff]  ;;  %v11497_v52 = vld [vmem:[#allocation14 + $0x1d28] sm:$0xff]  ;;  %v15849_v35 = vcombine.low %v11488_v43, %v11491_v44 }
 0x7bf   :  { %13663 = vmatprep.subr.bf16.mxu0 %v15784_v0  ;;  %v8608_v0 = vld [vmem:[#allocation14 + $0x1960] sm:$0xff] }
 0x7c0   :  { %v15442_v14 = vcombine.low %v8605_v58, %v8608_v0 }
 0x7c1   :  { %11131 = vmatpush1.bf16.msra.mxu1 %v15400_v5  ;;  %v15443_v5 = vcombine.high %v8605_v58, %v8608_v0  ;;  %v11500_v58 = vld [vmem:[#allocation14 + $0x1d88] sm:$0xff] }
 0x7c2   :  { %13664 = vmatpush1.bf16.msra.mxu0 %v15783_v8  ;;  %11132 = vmatprep.subr.bf16.mxu1 %v15407_v9  ;;  %v8611_v8 = vld [vmem:[#allocation14 + $0x19c0] sm:$0xff]  ;;  %v11503_v0 = vld [vmem:[#allocation14 + $0x1de8] sm:$0xff] }
 0x7c3   :  { %13665 = vmatprep.subr.bf16.mxu0 %v15790_v11  ;;  %v8614_v9 = vld [vmem:[#allocation14 + $0x1a20] sm:$0xff]  ;;  %v15826_v11 = vcombine.high %v11464_v2, %v11467_v3  ;;  %v15855_v2 = vcombine.low %v11494_v50, %v11497_v52 }
 0x7c4   :  { %v15448_v28 = vcombine.low %v8611_v8, %v8614_v9 }
 0x7c5   :  { %11133 = vmatpush1.bf16.msra.mxu1 %v15406_v18  ;;  %v15449_v18 = vcombine.high %v8611_v8, %v8614_v9  ;;  %v8650_v8 = vld [vmem:[#allocation14 + $0x1ea0] sm:$0xff]  ;;  %v11506_v9 = vld [vmem:[#allocation14 + $0x1e48] sm:$0xff] }
 0x7c6   :  { %13666 = vmatpush1.bf16.msra.mxu0 %v15789_v22  ;;  %11134 = vmatprep.subr.bf16.mxu1 %v15413_v42  ;;  %v15832_v22 = vcombine.high %v11470_v12, %v11473_v13  ;;  %v8617_v42 = vld [vmem:[#allocation14 + $0x1a80] sm:$0xff]  ;;  %v15861_v13 = vcombine.low %v11500_v58, %v11503_v0 }
 0x7c7   :  { %13667 = vmatprep.subr.bf16.mxu0 %v15796_v38  ;;  %v8620_v38 = vld [vmem:[#allocation14 + $0x1ae0] sm:$0xff] }
 0x7c8   :  { %v15454_v39 = vcombine.low %v8617_v42, %v8620_v38 }
 0x7c9   :  { %11135 = vmatpush1.bf16.msra.mxu1 %v15412_v29  ;;  %v15455_v29 = vcombine.high %v8617_v42, %v8620_v38  ;;  %v11512_v42 = vld [vmem:[#allocation14 + $0x1f08] sm:$0xff] }
 0x7ca   :  { %13668 = vmatpush1.bf16.msra.mxu0 %v15795_v30  ;;  %11136 = vmatprep.subr.bf16.mxu1 %v15419_v31  ;;  %v15838_v30 = vcombine.high %v11476_v25, %v11479_v27  ;;  %v8623_v31 = vld [vmem:[#allocation14 + $0x1b40] sm:$0xff]  ;;  %v11515_v38 = vld [vmem:[#allocation14 + $0x1f68] sm:$0xff] }
 0x7cb   :  { %13669 = vmatprep.subr.bf16.mxu0 %v15802_v32  ;;  %v8626_v32 = vld [vmem:[#allocation14 + $0x1ba0] sm:$0xff] }
 0x7cc   :  { %v15460_v45 = vcombine.low %v8623_v31, %v8626_v32 }
 0x7cd   :  { %11137 = vmatpush1.bf16.msra.mxu1 %v15418_v37  ;;  %v15461_v37 = vcombine.high %v8623_v31, %v8626_v32  ;;  %v11518_v31 = vld [vmem:[#allocation14 + $0x1fc8] sm:$0xff] }
 0x7ce   :  { %13670 = vmatpush1.bf16.msra.mxu0 %v15801_v40  ;;  %11138 = vmatprep.subr.bf16.mxu1 %v15425_v41  ;;  %v15844_v40 = vcombine.high %v11482_v33, %v11485_v34  ;;  %v8629_v41 = vld [vmem:[#allocation14 + $0x1c00] sm:$0xff]  ;;  %v11521_v32 = vld [vmem:[#allocation14 + $0x2028] sm:$0xff]  ;;  %v15873_v34 = vcombine.low %v11512_v42, %v11515_v38 }
 0x7cf   :  { %13671 = vmatprep.subr.bf16.mxu0 %v15808_v46  ;;  %v8632_v46 = vld [vmem:[#allocation14 + $0x1c60] sm:$0xff] }
 0x7d0   :  { %v15466_v53 = vcombine.low %v8629_v41, %v8632_v46 }
 0x7d1   :  { %11139 = vmatpush1.bf16.msra.mxu1 %v15424_v15  ;;  %v15467_v15 = vcombine.high %v8629_v41, %v8632_v46  ;;  %v11524_v41 = vld [vmem:[#allocation14 + $0x2088] sm:$0xff] }
 0x7d2   :  { %13672 = vmatpush1.bf16.msra.mxu0 %v15807_v63  ;;  %11140 = vmatprep.subr.bf16.mxu1 %v15431_v48  ;;  %v15850_v63 = vcombine.high %v11488_v43, %v11491_v44  ;;  %v8635_v48 = vld [vmem:[#allocation14 + $0x1cc0] sm:$0xff]  ;;  %v11527_v46 = vld [vmem:[#allocation14 + $0x20e8] sm:$0xff]  ;;  %v15879_v44 = vcombine.low %v11518_v31, %v11521_v32 }
 0x7d3   :  { %13673 = vmatprep.subr.bf16.mxu0 %v15814_v49  ;;  %v8638_v49 = vld [vmem:[#allocation14 + $0x1d20] sm:$0xff] }
 0x7d5   :  { %11141 = vmatpush1.bf16.msra.mxu1 %v15430_v54  ;;  %v15473_v54 = vcombine.high %v8635_v48, %v8638_v49 }
 0x7d6   :  { %13674 = vmatpush1.bf16.msra.mxu0 %v15813_v55  ;;  %11151 = vmatprep.subr.bf16.mxu1 %v15437_v56  ;;  %v15856_v55 = vcombine.high %v11494_v50, %v11497_v52  ;;  %v8641_v56 = vld [vmem:[#allocation14 + $0x1d80] sm:$0xff]  ;;  %v15885_v52 = vcombine.low %v11524_v41, %v11527_v46 }
 0x7d7   :  { %13684 = vmatprep.subr.bf16.mxu0 %v15820_v21  ;;  %v8644_v21 = vld [vmem:[#allocation14 + $0x1de0] sm:$0xff] }
 0x7d8   :  { %11143 = vmatmul.mubr.bf16.vlgmr.msra.gmra.mrb[28].mxu1 %v16900_v26  ;;  %v15479_v3 = vcombine.high %v8641_v56, %v8644_v21  ;;  %v15478_v12 = vcombine.low %v8641_v56, %v8644_v21  ;;  %v11536_v56 = vld [vmem:[#allocation14 + $0x2208] sm:$0xff] }
 0x7d9   :  { %13676 = vmatmul.mubr.bf16.vlgmr.msra.gmra.mrb[32].mxu0 %v16900_v26  ;;  %11152 = vmatpush1.bf16.msra.mxu1 %v15436_v1  ;;  %v15472_v1 = vcombine.low %v8635_v48, %v8638_v49  ;;  %v11530_v48 = vld [vmem:[#allocation14 + $0x2148] sm:$0xff] }
 0x7da   :  { %11183 = vmatprep.mubr.bf16.mxu1 %v16918_v7  ;;  %13685 = vmatpush1.bf16.msra.mxu0 %v15819_v4  ;;  %v15862_v4 = vcombine.high %v11500_v58, %v11503_v0  ;;  %v11533_v49 = vld [vmem:[#allocation14 + $0x21a8] sm:$0xff] }
 0x7db   :  { %13716 = vmatprep.mubr.bf16.mxu0 %v16918_v7  ;;  %11153 = vmatprep.subr.bf16.mxu1 %v15443_v5  ;;  %v8647_v5 = vld [vmem:[#allocation14 + $0x1e40] sm:$0xff]  ;;  %v11539_v21 = vld [vmem:[#allocation14 + $0x2268] sm:$0xff]  ;;  %v15891_v0 = vcombine.low %v11530_v48, %v11533_v49 }
 0x7dc   :  { %13686 = vmatprep.subr.bf16.mxu0 %v15826_v11  ;;  %v11509_v11 = vld [vmem:[#allocation14 + $0x1ea8] sm:$0xff]  ;;  %v15484_v25 = vcombine.low %v8647_v5, %v8650_v8 }
 0x7dd   :  { %11154 = vmatpush1.bf16.msra.mxu1 %v15442_v14  ;;  %v15485_v14 = vcombine.high %v8647_v5, %v8650_v8  ;;  %v15867_v27 = vcombine.low %v11506_v9, %v11509_v11  ;;  %v11542_v5 = vld [vmem:[#allocation14 + $0x22c8] sm:$0xff] }
 0x7de   :  { %13687 = vmatpush1.bf16.msra.mxu0 %v15825_v17  ;;  %11155 = vmatprep.subr.bf16.mxu1 %v15449_v18  ;;  %v15868_v17 = vcombine.high %v11506_v9, %v11509_v11  ;;  %v8653_v18 = vld [vmem:[#allocation14 + $0x1f00] sm:$0xff]  ;;  %v11545_v8 = vld [vmem:[#allocation14 + $0x2328] sm:$0xff]  ;;  %v15897_v11 = vcombine.low %v11536_v56, %v11539_v21 }
 0x7df   :  { %13688 = vmatprep.subr.bf16.mxu0 %v15832_v22  ;;  %v8656_v22 = vld [vmem:[#allocation14 + $0x1f60] sm:$0xff] }
 0x7e0   :  { %v15490_v33 = vcombine.low %v8653_v18, %v8656_v22 }
 0x7e1   :  { %11156 = vmatpush1.bf16.msra.mxu1 %v15448_v28  ;;  %v15491_v28 = vcombine.high %v8653_v18, %v8656_v22  ;;  %v11548_v18 = vld [vmem:[#allocation14 + $0x2388] sm:$0xff] }
 0x7e2   :  { %13689 = vmatpush1.bf16.msra.mxu0 %v15831_v59  ;;  %11157 = vmatprep.subr.bf16.mxu1 %v15455_v29  ;;  %v15874_v59 = vcombine.high %v11512_v42, %v11515_v38  ;;  %v8659_v29 = vld [vmem:[#allocation14 + $0x1fc0] sm:$0xff]  ;;  %v11551_v22 = vld [vmem:[#allocation14 + $0x23e8] sm:$0xff]  ;;  %v15903_v38 = vcombine.low %v11542_v5, %v11545_v8 }
 0x7e3   :  { %13690 = vmatprep.subr.bf16.mxu0 %v15838_v30  ;;  %v8662_v30 = vld [vmem:[#allocation14 + $0x2020] sm:$0xff] }
 0x7e4   :  { %v15496_v43 = vcombine.low %v8659_v29, %v8662_v30 }
 0x7e5   :  { %11158 = vmatpush1.bf16.msra.mxu1 %v15454_v39  ;;  %v15497_v39 = vcombine.high %v8659_v29, %v8662_v30  ;;  %v11554_v29 = vld [vmem:[#allocation14 + $0x2448] sm:$0xff] }
 0x7e6   :  { %13691 = vmatpush1.bf16.msra.mxu0 %v15837_v36  ;;  %11159 = vmatprep.subr.bf16.mxu1 %v15461_v37  ;;  %v15880_v36 = vcombine.high %v11518_v31, %v11521_v32  ;;  %v8665_v37 = vld [vmem:[#allocation14 + $0x2080] sm:$0xff]  ;;  %v11557_v30 = vld [vmem:[#allocation14 + $0x24a8] sm:$0xff]  ;;  %v15909_v32 = vcombine.low %v11548_v18, %v11551_v22 }
 0x7e7   :  { %13692 = vmatprep.subr.bf16.mxu0 %v15844_v40  ;;  %v8668_v40 = vld [vmem:[#allocation14 + $0x20e0] sm:$0xff] }
 0x7e8   :  { %v15502_v50 = vcombine.low %v8665_v37, %v8668_v40 }
 0x7e9   :  { %11160 = vmatpush1.bf16.msra.mxu1 %v15460_v45  ;;  %v15503_v45 = vcombine.high %v8665_v37, %v8668_v40  ;;  %v11560_v40 = vld [vmem:[#allocation14 + $0x2508] sm:$0xff] }
 0x7ea   :  { %13693 = vmatpush1.bf16.msra.mxu0 %v15843_v47  ;;  %11161 = vmatprep.subr.bf16.mxu1 %v15467_v15  ;;  %v15886_v47 = vcombine.high %v11524_v41, %v11527_v46  ;;  %v8671_v15 = vld [vmem:[#allocation14 + $0x2140] sm:$0xff]  ;;  %v11563_v41 = vld [vmem:[#allocation14 + $0x2568] sm:$0xff]  ;;  %v15915_v46 = vcombine.low %v11554_v29, %v11557_v30 }
 0x7eb   :  { %13694 = vmatprep.subr.bf16.mxu0 %v15850_v63  ;;  %v8674_v63 = vld [vmem:[#allocation14 + $0x21a0] sm:$0xff] }
 0x7ec   :  { %v15508_v58 = vcombine.low %v8671_v15, %v8674_v63 }
 0x7ed   :  { %11162 = vmatpush1.bf16.msra.mxu1 %v15466_v53  ;;  %v15509_v53 = vcombine.high %v8671_v15, %v8674_v63  ;;  %v11566_v15 = vld [vmem:[#allocation14 + $0x25c8] sm:$0xff] }
 0x7ee   :  { %13695 = vmatpush1.bf16.msra.mxu0 %v15849_v35  ;;  %11163 = vmatprep.subr.bf16.mxu1 %v15473_v54  ;;  %v15892_v35 = vcombine.high %v11530_v48, %v11533_v49  ;;  %v8677_v54 = vld [vmem:[#allocation14 + $0x2200] sm:$0xff]  ;;  %v11569_v63 = vld [vmem:[#allocation14 + $0x2628] sm:$0xff]  ;;  %v15921_v49 = vcombine.low %v11560_v40, %v11563_v41 }
 0x7ef   :  { %13696 = vmatprep.subr.bf16.mxu0 %v15856_v55  ;;  %v8680_v55 = vld [vmem:[#allocation14 + $0x2260] sm:$0xff] }
 0x7f0   :  { %v15514_v9 = vcombine.low %v8677_v54, %v8680_v55 }
 0x7f1   :  { %11164 = vmatpush1.bf16.msra.mxu1 %v15472_v1  ;;  %v15515_v1 = vcombine.high %v8677_v54, %v8680_v55  ;;  %v11572_v54 = vld [vmem:[#allocation14 + $0x2688] sm:$0xff] }
 0x7f2   :  { %13697 = vmatpush1.bf16.msra.mxu0 %v15855_v2  ;;  %11165 = vmatprep.subr.bf16.mxu1 %v15479_v3  ;;  %v15898_v2 = vcombine.high %v11536_v56, %v11539_v21  ;;  %v8683_v3 = vld [vmem:[#allocation14 + $0x22c0] sm:$0xff]  ;;  %v11575_v55 = vld [vmem:[#allocation14 + $0x26e8] sm:$0xff]  ;;  %v15927_v21 = vcombine.low %v11566_v15, %v11569_v63 }
 0x7f3   :  { %13698 = vmatprep.subr.bf16.mxu0 %v15862_v4  ;;  %v8686_v4 = vld [vmem:[#allocation14 + $0x2320] sm:$0xff] }
 0x7f4   :  { %v15520_v42 = vcombine.low %v8683_v3, %v8686_v4 }
 0x7f5   :  { %11166 = vmatpush1.bf16.msra.mxu1 %v15478_v12  ;;  %v15521_v12 = vcombine.high %v8683_v3, %v8686_v4  ;;  %v11578_v3 = vld [vmem:[#allocation14 + $0x2748] sm:$0xff] }
 0x7f6   :  { %13699 = vmatpush1.bf16.msra.mxu0 %v15861_v13  ;;  %11167 = vmatprep.subr.bf16.mxu1 %v15485_v14  ;;  %v15904_v13 = vcombine.high %v11542_v5, %v11545_v8  ;;  %v8689_v14 = vld [vmem:[#allocation14 + $0x2380] sm:$0xff]  ;;  %v11581_v4 = vld [vmem:[#allocation14 + $0x27a8] sm:$0xff]  ;;  %v15933_v8 = vcombine.low %v11572_v54, %v11575_v55 }
 0x7f7   :  { %13700 = vmatprep.subr.bf16.mxu0 %v15868_v17  ;;  %v8692_v17 = vld [vmem:[#allocation14 + $0x23e0] sm:$0xff] }
 0x7f8   :  { %v15526_v31 = vcombine.low %v8689_v14, %v8692_v17 }
 0x7f9   :  { %11168 = vmatpush1.bf16.msra.mxu1 %v15484_v25  ;;  %v15527_v25 = vcombine.high %v8689_v14, %v8692_v17  ;;  %v11584_v14 = vld [vmem:[#allocation14 + $0x2808] sm:$0xff] }
 0x7fa   :  { %13701 = vmatpush1.bf16.msra.mxu0 %v15867_v27  ;;  %11169 = vmatprep.subr.bf16.mxu1 %v15491_v28  ;;  %v15910_v27 = vcombine.high %v11548_v18, %v11551_v22  ;;  %v8695_v28 = vld [vmem:[#allocation14 + $0x2440] sm:$0xff]  ;;  %v11587_v17 = vld [vmem:[#allocation14 + $0x2868] sm:$0xff] }
 0x7fb   :  { %13702 = vmatprep.subr.bf16.mxu0 %v15874_v59  ;;  %v8698_v59 = vld [vmem:[#allocation14 + $0x24a0] sm:$0xff]  ;;  %v8789_v22 = vld [vmem:[#allocation16 + $0xc] sm:$0x3f] }
 0x7fc   :  { %v15532_v37 = vcombine.low %v8695_v28, %v8698_v59 }
 0x7fd   :  { %11170 = vmatpush1.bf16.msra.mxu1 %v15490_v33  ;;  %v15533_v33 = vcombine.high %v8695_v28, %v8698_v59  ;;  %v8734_v28 = vld [vmem:[#allocation14 + $0x2920] sm:$0xff]  ;;  %v8794_v59 = vrot.slane %v8789_v22, %v16825_v60 }
 0x7fe   :  { %13703 = vmatpush1.bf16.msra.mxu0 %v15873_v34  ;;  %11171 = vmatprep.subr.bf16.mxu1 %v15497_v39  ;;  %v15916_v34 = vcombine.high %v11554_v29, %v11557_v30  ;;  %v8701_v39 = vld [vmem:[#allocation14 + $0x2500] sm:$0xff]  ;;  %v11590_v29 = vld [vmem:[#allocation14 + $0x28c8] sm:$0xff] }
 0x7ff   :  { %13704 = vmatprep.subr.bf16.mxu0 %v15880_v36  ;;  %v8704_v36 = vld [vmem:[#allocation14 + $0x2560] sm:$0xff]  ;;  %v11593_v30 = vld [vmem:[#allocation14 + $0x2928] sm:$0xff] }
 0x800   :  { %v15538_v48 = vcombine.low %v8701_v39, %v8704_v36 }
 0x801   :  { %11172 = vmatpush1.bf16.msra.mxu1 %v15496_v43  ;;  %v15539_v43 = vcombine.high %v8701_v39, %v8704_v36  ;;  %v15945_v39 = vcombine.low %v11584_v14, %v11587_v17 }
 0x802   :  { %13705 = vmatpush1.bf16.msra.mxu0 %v15879_v44  ;;  %11173 = vmatprep.subr.bf16.mxu1 %v15503_v45  ;;  %v8707_v44 = vld [vmem:[#allocation14 + $0x25c0] sm:$0xff] }
 0x803   :  { %13706 = vmatprep.subr.bf16.mxu0 %v15886_v47  ;;  %v8710_v45 = vld [vmem:[#allocation14 + $0x2620] sm:$0xff]  ;;  %v15922_v47 = vcombine.high %v11560_v40, %v11563_v41  ;;  %v15952_v40 = vcombine.high %v11590_v29, %v11593_v30 }
 0x804   :  { %v15544_v56 = vcombine.low %v8707_v44, %v8710_v45  ;;  %v8737_v41 = vld [vmem:[#allocation14 + $0x2980] sm:$0xff] }
 0x805   :  { %11174 = vmatpush1.bf16.msra.mxu1 %v15502_v50  ;;  %v15545_v50 = vcombine.high %v8707_v44, %v8710_v45 }
 0x806   :  { %13707 = vmatpush1.bf16.msra.mxu0 %v15885_v52  ;;  %11175 = vmatprep.subr.bf16.mxu1 %v15509_v53  ;;  %v15928_v52 = vcombine.high %v11566_v15, %v11569_v63  ;;  %v8713_v53 = vld [vmem:[#allocation14 + $0x2680] sm:$0xff]  ;;  %v11599_v15 = vld [vmem:[#allocation14 + $0x29e8] sm:$0xff] }
 0x807   :  { %13708 = vmatprep.subr.bf16.mxu0 %v15892_v35  ;;  %v8716_v35 = vld [vmem:[#allocation14 + $0x26e0] sm:$0xff] }
 0x808   :  { %v15550_v5 = vcombine.low %v8713_v53, %v8716_v35 }
 0x809   :  { %11176 = vmatpush1.bf16.msra.mxu1 %v15508_v58  ;;  %v15551_v58 = vcombine.high %v8713_v53, %v8716_v35 }
 0x80a   :  { %13709 = vmatpush1.bf16.msra.mxu0 %v15891_v0  ;;  %11177 = vmatprep.subr.bf16.mxu1 %v15515_v1  ;;  %v15934_v0 = vcombine.high %v11572_v54, %v11575_v55  ;;  %v8719_v1 = vld [vmem:[#allocation14 + $0x2740] sm:$0xff]  ;;  %v15951_v55 = vcombine.low %v11590_v29, %v11593_v30 }
 0x80b   :  { %13710 = vmatprep.subr.bf16.mxu0 %v15898_v2  ;;  %v8722_v2 = vld [vmem:[#allocation14 + $0x27a0] sm:$0xff] }
 0x80c   :  { %v15556_v18 = vcombine.low %v8719_v1, %v8722_v2 }
 0x80d   :  { %11178 = vmatpush1.bf16.msra.mxu1 %v15514_v9  ;;  %v15557_v9 = vcombine.high %v8719_v1, %v8722_v2  ;;  %v8746_v1 = vld [vmem:[#allocation14 + $0x2aa0] sm:$0xff]  ;;  %v11602_v2 = vld [vmem:[#allocation14 + $0x2a48] sm:$0xff] }
 0x80e   :  { %13711 = vmatpush1.bf16.msra.mxu0 %v15897_v11  ;;  %11179 = vmatprep.subr.bf16.mxu1 %v15521_v12  ;;  %v15940_v11 = vcombine.high %v11578_v3, %v11581_v4  ;;  %v8725_v12 = vld [vmem:[#allocation14 + $0x2800] sm:$0xff] }
 0x80f   :  { %13712 = vmatprep.subr.bf16.mxu0 %v15904_v13  ;;  %v8728_v13 = vld [vmem:[#allocation14 + $0x2860] sm:$0xff] }
 0x811   :  { %11180 = vmatpush1.bf16.msra.mxu1 %v15520_v42  ;;  %v15939_v42 = vcombine.low %v11578_v3, %v11581_v4  ;;  %v11605_v3 = vld [vmem:[#allocation14 + $0x2aa8] sm:$0xff] }
 0x812   :  { %13713 = vmatpush1.bf16.msra.mxu0 %v15903_v38  ;;  %11181 = vmatprep.subr.bf16.mxu1 %v15527_v25  ;;  %v15563_v38 = vcombine.high %v8725_v12, %v8728_v13  ;;  %v15946_v25 = vcombine.high %v11584_v14, %v11587_v17  ;;  %v11611_v14 = vld [vmem:[#allocation14 + $0x2b68] sm:$0xff] }
 0x813   :  { %13714 = vmatprep.subr.bf16.mxu0 %v15910_v27  ;;  %v8731_v27 = vld [vmem:[#allocation14 + $0x28c0] sm:$0xff] }
 0x814   :  { %v15569_v36 = vcombine.high %v8731_v27, %v8734_v28 }
 0x815   :  { %11182 = vmatpush1.bf16.msra.mxu1 %v15526_v31  ;;  %v8802_v31 = vrot.slane %v8789_v22, %v16858_v24 }
 0x816   :  { %13715 = vmatpush1.bf16.msra.mxu0 %v15909_v32  ;;  %11192 = vmatprep.subr.bf16.mxu1 %v15533_v33  ;;  %v8798_v32 = vrot.slane %v8789_v22, %v16828_v62  ;;  %v15562_v33 = vcombine.low %v8725_v12, %v8728_v13  ;;  %v8752_v12 = vld [vmem:[#allocation14 + $0x2b60] sm:$0xff]  ;;  %v11608_v13 = vld [vmem:[#allocation14 + $0x2b08] sm:$0xff] }
 0x817   :  { %13725 = vmatprep.subr.bf16.mxu0 %v15916_v34  ;;  %v8806_v34 = vrot.slane %v8789_v22, %v16835_v16 }
 0x818   :  { %11184 = vmatmul.mubr.bf16.vlgmr.msra.gmra.mrb[28].mxu1 %v16920_v10 }
 0x819   :  { %13717 = vmatmul.mubr.bf16.vlgmr.msra.gmra.mrb[32].mxu0 %v16920_v10  ;;  %11193 = vmatpush1.bf16.msra.mxu1 %v15532_v37 }
 0x81a   :  { %11224 = vmatprep.mubr.bf16.mxu1 %v16924_v19  ;;  %13726 = vmatpush1.bf16.msra.mxu0 %v15915_v46  ;;  %v8740_v46 = vld [vmem:[#allocation14 + $0x29e0] sm:$0xff] }
 0x81b   :  { %13757 = vmatprep.mubr.bf16.mxu0 %v16924_v19  ;;  %11194 = vmatprep.subr.bf16.mxu1 %v15539_v43  ;;  %v15574_v4 = vcombine.low %v8737_v41, %v8740_v46 }
 0x81c   :  { %13727 = vmatprep.subr.bf16.mxu0 %v15922_v47  ;;  %v11596_v47 = vld [vmem:[#allocation14 + $0x2988] sm:$0xff] }
 0x81d   :  { %11195 = vmatpush1.bf16.msra.mxu1 %v15538_v48 }
 0x81e   :  { %13728 = vmatpush1.bf16.msra.mxu0 %v15921_v49  ;;  %11196 = vmatprep.subr.bf16.mxu1 %v15545_v50 }
 0x81f   :  { %13729 = vmatprep.subr.bf16.mxu0 %v15928_v52  ;;  %v15568_v52 = vcombine.low %v8731_v27, %v8734_v28  ;;  %v11614_v28 = vld [vmem:[#allocation14 + $0x2bc8] sm:$0xff] }
 0x821   :  { %11197 = vmatpush1.bf16.msra.mxu1 %v15544_v56  ;;  %v15575_v56 = vcombine.high %v8737_v41, %v8740_v46  ;;  %v11620_v46 = vld [vmem:[#allocation14 + $0x2c88] sm:$0xff] }
 0x822   :  { %13730 = vmatpush1.bf16.msra.mxu0 %v15927_v21  ;;  %11198 = vmatprep.subr.bf16.mxu1 %v15551_v58  ;;  %v15958_v58 = vcombine.high %v11596_v47, %v11599_v15 }
 0x823   :  { %13731 = vmatprep.subr.bf16.mxu0 %v15934_v0  ;;  %v8743_v0 = vld [vmem:[#allocation14 + $0x2a40] sm:$0xff] }
 0x824   :  { %v15580_v17 = vcombine.low %v8743_v0, %v8746_v1 }
 0x825   :  { %11199 = vmatpush1.bf16.msra.mxu1 %v15550_v5  ;;  %v15957_v5 = vcombine.low %v11596_v47, %v11599_v15 }
 0x826   :  { %13732 = vmatpush1.bf16.msra.mxu0 %v15933_v8  ;;  %11200 = vmatprep.subr.bf16.mxu1 %v15557_v9  ;;  %v15581_v8 = vcombine.high %v8743_v0, %v8746_v1  ;;  %v15964_v9 = vcombine.high %v11602_v2, %v11605_v3 }
 0x827   :  { %13733 = vmatprep.subr.bf16.mxu0 %v15940_v11  ;;  %v8749_v11 = vld [vmem:[#allocation14 + $0x2b00] sm:$0xff] }
 0x828   :  { %v15587_v22 = vcombine.high %v8749_v11, %v8752_v12  ;;  %v15586_v30 = vcombine.low %v8749_v11, %v8752_v12 }
 0x829   :  { %11201 = vmatpush1.bf16.msra.mxu1 %v15556_v18  ;;  %v15963_v18 = vcombine.low %v11602_v2, %v11605_v3 }
 0x82a   :  { %13734 = vmatpush1.bf16.msra.mxu0 %v15939_v42  ;;  %11202 = vmatprep.subr.bf16.mxu1 %v15563_v38  ;;  %v15970_v42 = vcombine.high %v11608_v13, %v11611_v14  ;;  %v8755_v38 = vld [vmem:[#allocation14 + $0x2bc0] sm:$0xff] }
 0x82b   :  { %v10898_v37 = vpop.f32.mrb[24].mxu1  ;;  %13735 = vmatprep.subr.bf16.mxu0 %v15946_v25  ;;  %v8758_v25 = vld [vmem:[#allocation14 + $0x2c20] sm:$0xff] }
 0x82c   :  { %v16078_v43 = vadd.f32 %v10898_v37, %v8794_v59  ;;  %v11062_v44 = vpop.f32.mrb[28].mxu0  ;;  %v10900_v45 = vpop.f32.mrb[25].mxu1  ;;  %v11617_v59 = vld [vmem:[#allocation14 + $0x2c28] sm:$0xff]  ;;  %v8761_v37 = vld [vmem:[#allocation14 + $0x2c80] sm:$0xff] }
 0x82d   :  { %v16080_v63 = vadd.f32 %v11062_v44, %v8802_v31  ;;  %v16079_v48 = vadd.f32 %v10900_v45, %v8798_v32  ;;  %v11064_v49 = vpop.f32.mrb[29].mxu0  ;;  %v10902_v50 = vpop.f32.mrb[26].mxu1  ;;  %11203 = vmatpush1.bf16.msra.mxu1 %v15562_v33  ;;  %v15969_v32 = vcombine.low %v11608_v13, %v11611_v14  ;;  %v15593_v33 = vcombine.high %v8755_v38, %v8758_v25 }
 0x82e   :  { %16387 = vtanh.f32 %v16078_v43  ;;  %v16081_v53 = vadd.f32 %v11064_v49, %v8806_v34  ;;  %v11066_v35 = vpop.f32.mrb[30].mxu0  ;;  %13736 = vmatpush1.bf16.msra.mxu0 %v15945_v39  ;;  %v10903_v54 = vpop.f32.mrb[27].mxu1  ;;  %11204 = vmatprep.subr.bf16.mxu1 %v15569_v36  ;;  %v15976_v36 = vcombine.high %v11614_v28, %v11617_v59  ;;  %v11623_v43 = vld [vmem:[#allocation14 + $0x2ce8] sm:$0xff]  ;;  %v15592_v44 = vcombine.low %v8755_v38, %v8758_v25 }
 0x82f   :  { %16389 = vtanh.f32 %v16080_v63  ;;  %v11067_v21 = vpop.f32.mrb[31].mxu0  ;;  %13737 = vmatprep.subr.bf16.mxu0 %v15952_v40  ;;  %v8764_v40 = vld [vmem:[#allocation14 + $0x2ce0] sm:$0xff]  ;;  %v15975_v45 = vcombine.low %v11614_v28, %v11617_v59  ;;  %v15982_v15 = vcombine.high %v11620_v46, %v11623_v43  ;;  %v11626_v49 = vld [vmem:[#allocation14 + $0x2d48] sm:$0xff]  ;;  %v11267_v59 = vld [vmem:[#allocation14 + $0x50] sm:$0xff] }
 0x830   :  { %16391 = vtanh.f32 %v16079_v48  ;;  %v15599_v47 = vcombine.high %v8761_v37, %v8764_v40  ;;  %v8767_v63 = vld [vmem:[#allocation14 + $0x2d40] sm:$0xff]  ;;  %v11629_v50 = vld [vmem:[#allocation14 + $0x2da8] sm:$0xff] }
 0x831   :  { %16393 = vtanh.f32 %v16081_v53  ;;  %11205 = vmatpush1.bf16.msra.mxu1 %v15568_v52  ;;  %v8770_v48 = vld [vmem:[#allocation14 + $0x2da0] sm:$0xff]  ;;  %v15598_v52 = vcombine.low %v8761_v37, %v8764_v40  ;;  %v15981_v53 = vcombine.low %v11620_v46, %v11623_v43  ;;  %v15988_v54 = vcombine.high %v11626_v49, %v11629_v50  ;;  %v11632_v21 = vld [vmem:[#allocation14 + $0x2e08] sm:$0xff]  ;;  %v11276_v37 = vld [vmem:[#allocation14 + $0x170] sm:$0xff] }
 0x832   :  { %13738 = vmatpush1.bf16.msra.mxu0 %v15951_v55  ;;  %11206 = vmatprep.subr.bf16.mxu1 %v15575_v56  ;;  %v15605_v35 = vcombine.high %v8767_v63, %v8770_v48  ;;  %v8773_v55 = vld [vmem:[#allocation14 + $0x2e00] sm:$0xff]  ;;  %v15604_v0 = vcombine.low %v8767_v63, %v8770_v48  ;;  %v15987_v1 = vcombine.low %v11626_v49, %v11629_v50  ;;  %v11277_v46 = vld [vmem:[#allocation14 + $0x178] sm:$0xff] }
 0x833   :  { %13739 = vmatprep.subr.bf16.mxu0 %v15958_v58  ;;  %v8776_v56 = vld [vmem:[#allocation14 + $0x2e60] sm:$0xff]  ;;  %v11635_v58 = vld [vmem:[#allocation14 + $0x2e68] sm:$0xff]  ;;  %v11280_v63 = vld [vmem:[#allocation14 + $0x1d8] sm:$0xff] }
 0x834   :  { %v15611_v2 = vcombine.high %v8773_v55, %v8776_v56  ;;  %v15994_v3 = vcombine.high %v11632_v21, %v11635_v58  ;;  %v15610_v11 = vcombine.low %v8773_v55, %v8776_v56  ;;  %v15993_v12 = vcombine.low %v11632_v21, %v11635_v58  ;;  %v11283_v48 = vld [vmem:[#allocation14 + $0x238] sm:$0xff] }
 0x835   :  { %11207 = vmatpush1.bf16.msra.mxu1 %v15574_v4  ;;  %v8779_v4 = vld [vmem:[#allocation14 + $0x2ec0] sm:$0xff]  ;;  %v11286_v55 = vld [vmem:[#allocation14 + $0x298] sm:$0xff]  ;;  %v15643_v58 = vcombine.low %v11280_v63, %v11283_v48 }
 0x836   :  { %13740 = vmatpush1.bf16.msra.mxu0 %v15957_v5  ;;  %11208 = vmatprep.subr.bf16.mxu1 %v15581_v8  ;;  %v8782_v5 = vld [vmem:[#allocation14 + $0x2f20] sm:$0xff]  ;;  %v11638_v8 = vld [vmem:[#allocation14 + $0x2ec8] sm:$0xff]  ;;  %v11289_v56 = vld [vmem:[#allocation14 + $0x2f8] sm:$0xff] }
 0x837   :  { %13741 = vmatprep.subr.bf16.mxu0 %v15964_v9  ;;  %v11641_v9 = vld [vmem:[#allocation14 + $0x2f28] sm:$0xff]  ;;  %v15617_v13 = vcombine.high %v8779_v4, %v8782_v5  ;;  %v15616_v38 = vcombine.low %v8779_v4, %v8782_v5  ;;  %v11292_v4 = vld [vmem:[#allocation14 + $0x358] sm:$0xff] }
 0x838   :  { %v16388_v27 = vpop.eup %16387  ;;  %v16000_v14 = vcombine.high %v11638_v8, %v11641_v9  ;;  %v15999_v25 = vcombine.low %v11638_v8, %v11641_v9  ;;  %v11295_v5 = vld [vmem:[#allocation14 + $0x3b8] sm:$0xff]  ;;  %v15649_v8 = vcombine.low %v11286_v55, %v11289_v56 }
 0x839   :  { %v16390_v29 = vpop.eup %16389  ;;  %11209 = vmatpush1.bf16.msra.mxu1 %v15580_v17  ;;  %v8785_v17 = vld [vmem:[#allocation14 + $0x2f80] sm:$0xff] }
 0x83a   :  { %v16392_v31 = vpop.eup %16391  ;;  %13742 = vmatpush1.bf16.msra.mxu0 %v15963_v18  ;;  %11210 = vmatprep.subr.bf16.mxu1 %v15587_v22  ;;  %v8788_v18 = vld [vmem:[#allocation14 + $0x2fe0] sm:$0xff]  ;;  %v11644_v22 = vld [vmem:[#allocation14 + $0x2f88] sm:$0xff] }
 0x83b   :  { %v16394_v34 = vpop.eup %16393  ;;  %v16020_v39 = vpack.c.bf16 %v16392_v31, %v16388_v27  ;;  %13743 = vmatprep.subr.bf16.mxu0 %v15970_v42  ;;  %v11647_v42 = vld [vmem:[#allocation14 + $0x2fe8] sm:$0xff]  ;;  %v15623_v27 = vcombine.high %v8785_v17, %v8788_v18  ;;  %v11271_v31 = vld [vmem:[#allocation14 + $0xb8] sm:$0xff] }
 0x83c   :  { %v16021_v41 = vpack.c.bf16 %v16394_v34, %v16390_v29  ;;  %v16006_v28 = vcombine.high %v11644_v22, %v11647_v42  ;;  %v11270_v29 = vld [vmem:[#allocation14 + $0xb0] sm:$0xff] }
 0x83d   :  { %11263 = vst [vmem:[#allocation17 + $0x30] sm:$0xff] %v16020_v39  ;;  %11211 = vmatpush1.bf16.msra.mxu1 %v15586_v30  ;;  %v11268_v30 = vld [vmem:[#allocation14 + $0x58] sm:$0xff]  ;;  %v15630_v34 = vcombine.high %v11267_v59, %v11270_v29  ;;  %v15629_v40 = vcombine.low %v11267_v59, %v11270_v29 }
 0x83e   :  { %11264 = vst [vmem:[#allocation17 + $0x38] sm:$0xff] %v16021_v41  ;;  %13744 = vmatpush1.bf16.msra.mxu0 %v15969_v32  ;;  %11212 = vmatprep.subr.bf16.mxu1 %v15593_v33  ;;  %v15622_v32 = vcombine.low %v8785_v17, %v8788_v18  ;;  %v16005_v33 = vcombine.low %v11644_v22, %v11647_v42  ;;  %v11274_v41 = vld [vmem:[#allocation14 + $0x118] sm:$0xff] }
 0x83f   :  { %13745 = vmatprep.subr.bf16.mxu0 %v15976_v36  ;;  %v15632_v39 = vcombine.high %v11268_v30, %v11271_v31  ;;  %v11273_v36 = vld [vmem:[#allocation14 + $0x110] sm:$0xff]  ;;  %v15631_v43 = vcombine.low %v11268_v30, %v11271_v31  ;;  %v15637_v50 = vcombine.low %v11274_v41, %v11277_v46  ;;  %v11301_v17 = vld [vmem:[#allocation14 + $0x478] sm:$0xff]  ;;  %v15655_v22 = vcombine.low %v11292_v4, %v11295_v5 }
 0x840   :  { %v15635_v49 = vcombine.low %v11273_v36, %v11276_v37  ;;  %v11307_v59 = vld [vmem:[#allocation14 + $0x538] sm:$0xff] }
 0x841   :  { %11213 = vmatpush1.bf16.msra.mxu1 %v15592_v44  ;;  %v15636_v44 = vcombine.high %v11273_v36, %v11276_v37  ;;  %v11313_v36 = vld [vmem:[#allocation14 + $0x5f8] sm:$0xff] }
 0x842   :  { %13746 = vmatpush1.bf16.msra.mxu0 %v15975_v45  ;;  %11214 = vmatprep.subr.bf16.mxu1 %v15599_v47  ;;  %v11279_v45 = vld [vmem:[#allocation14 + $0x1d0] sm:$0xff] }
 0x843   :  { %13747 = vmatprep.subr.bf16.mxu0 %v15982_v15  ;;  %v11282_v47 = vld [vmem:[#allocation14 + $0x230] sm:$0xff]  ;;  %v15638_v15 = vcombine.high %v11274_v41, %v11277_v46 }
 0x844   :  { %v15641_v21 = vcombine.low %v11279_v45, %v11282_v47 }
 0x845   :  { %11215 = vmatpush1.bf16.msra.mxu1 %v15598_v52  ;;  %v15642_v52 = vcombine.high %v11279_v45, %v11282_v47  ;;  %v11316_v45 = vld [vmem:[#allocation14 + $0x658] sm:$0xff] }
 0x846   :  { %13748 = vmatpush1.bf16.msra.mxu0 %v15981_v53  ;;  %11216 = vmatprep.subr.bf16.mxu1 %v15605_v35  ;;  %v15644_v53 = vcombine.high %v11280_v63, %v11283_v48  ;;  %v11285_v35 = vld [vmem:[#allocation14 + $0x290] sm:$0xff]  ;;  %v11319_v47 = vld [vmem:[#allocation14 + $0x6b8] sm:$0xff] }
 0x847   :  { %13749 = vmatprep.subr.bf16.mxu0 %v15988_v54  ;;  %v11288_v54 = vld [vmem:[#allocation14 + $0x2f0] sm:$0xff] }
 0x849   :  { %11217 = vmatpush1.bf16.msra.mxu1 %v15604_v0  ;;  %v15648_v0 = vcombine.high %v11285_v35, %v11288_v54 }
 0x84a   :  { %13750 = vmatpush1.bf16.msra.mxu0 %v15987_v1  ;;  %11218 = vmatprep.subr.bf16.mxu1 %v15611_v2  ;;  %v15650_v1 = vcombine.high %v11286_v55, %v11289_v56  ;;  %v11291_v2 = vld [vmem:[#allocation14 + $0x350] sm:$0xff]  ;;  %v15679_v55 = vcombine.low %v11316_v45, %v11319_v47 }
 0x84b   :  { %13751 = vmatprep.subr.bf16.mxu0 %v15994_v3  ;;  %v11294_v3 = vld [vmem:[#allocation14 + $0x3b0] sm:$0xff] }
 0x84c   :  { %v15654_v9 = vcombine.high %v11291_v2, %v11294_v3  ;;  %v15653_v18 = vcombine.low %v11291_v2, %v11294_v3  ;;  %v11331_v2 = vld [vmem:[#allocation14 + $0x838] sm:$0xff] }
 0x84d   :  { %11219 = vmatpush1.bf16.msra.mxu1 %v15610_v11  ;;  %v15656_v11 = vcombine.high %v11292_v4, %v11295_v5 }
 0x84e   :  { %13752 = vmatpush1.bf16.msra.mxu0 %v15993_v12  ;;  %11220 = vmatprep.subr.bf16.mxu1 %v15617_v13  ;;  %v11297_v12 = vld [vmem:[#allocation14 + $0x410] sm:$0xff] }
 0x84f   :  { %13753 = vmatprep.subr.bf16.mxu0 %v16000_v14  ;;  %v11300_v13 = vld [vmem:[#allocation14 + $0x470] sm:$0xff]  ;;  %v11298_v14 = vld [vmem:[#allocation14 + $0x418] sm:$0xff] }
 0x850   :  { %v15660_v42 = vcombine.high %v11297_v12, %v11300_v13  ;;  %v15659_v29 = vcombine.low %v11297_v12, %v11300_v13  ;;  %v15661_v30 = vcombine.low %v11298_v14, %v11301_v17  ;;  %v11337_v12 = vld [vmem:[#allocation14 + $0x8f8] sm:$0xff] }
 0x851   :  { %11221 = vmatpush1.bf16.msra.mxu1 %v15616_v38  ;;  %v15662_v38 = vcombine.high %v11298_v14, %v11301_v17 }
 0x852   :  { %13754 = vmatpush1.bf16.msra.mxu0 %v15999_v25  ;;  %11222 = vmatprep.subr.bf16.mxu1 %v15623_v27  ;;  %v11303_v25 = vld [vmem:[#allocation14 + $0x4d0] sm:$0xff] }
 0x853   :  { %13755 = vmatprep.subr.bf16.mxu0 %v16006_v28  ;;  %v11306_v27 = vld [vmem:[#allocation14 + $0x530] sm:$0xff]  ;;  %v11304_v28 = vld [vmem:[#allocation14 + $0x4d8] sm:$0xff] }
 0x854   :  { %v15666_v31 = vcombine.high %v11303_v25, %v11306_v27  ;;  %v15665_v37 = vcombine.low %v11303_v25, %v11306_v27  ;;  %v11343_v25 = vld [vmem:[#allocation14 + $0x9b8] sm:$0xff] }
 0x855   :  { %11223 = vmatpush1.bf16.msra.mxu1 %v15622_v32  ;;  %v15668_v32 = vcombine.high %v11304_v28, %v11307_v59 }
 0x856   :  { %13756 = vmatpush1.bf16.msra.mxu0 %v16005_v33  ;;  %13766 = vmatprep.subr.bf16.mxu1 %v15630_v34  ;;  %v11309_v33 = vld [vmem:[#allocation14 + $0x590] sm:$0xff] }
 0x857   :  { %13930 = vmatprep.subr.bf16.mxu0 %v15632_v39  ;;  %v11312_v34 = vld [vmem:[#allocation14 + $0x5f0] sm:$0xff]  ;;  %v11310_v39 = vld [vmem:[#allocation14 + $0x598] sm:$0xff] }
 0x858   :  { %11225 = vmatmul.mubr.bf16.vlgmr.msra.gmra.mrb[28].mxu1 %v16932_v51  ;;  %v15672_v41 = vcombine.high %v11309_v33, %v11312_v34  ;;  %v15674_v46 = vcombine.high %v11310_v39, %v11313_v36  ;;  %v15673_v63 = vcombine.low %v11310_v39, %v11313_v36 }
 0x859   :  { %13758 = vmatmul.mubr.bf16.vlgmr.msra.gmra.mrb[32].mxu0 %v16932_v51  ;;  %13767 = vmatpush1.bf16.msra.mxu1 %v15629_v40  ;;  %v15667_v40 = vcombine.low %v11304_v28, %v11307_v59 }
 0x85a   :  { %13798 = vmatprep.mubr.bf16.mxu1 %v16885_v57  ;;  %13931 = vmatpush1.bf16.msra.mxu0 %v15631_v43  ;;  %v11315_v43 = vld [vmem:[#allocation14 + $0x650] sm:$0xff] }
 0x85b   :  { %13962 = vmatprep.mubr.bf16.mxu0 %v16885_v57  ;;  %13768 = vmatprep.subr.bf16.mxu1 %v15636_v44  ;;  %v15647_v57 = vcombine.low %v11285_v35, %v11288_v54  ;;  %v11318_v44 = vld [vmem:[#allocation14 + $0x6b0] sm:$0xff]  ;;  %v11325_v35 = vld [vmem:[#allocation14 + $0x778] sm:$0xff] }
 0x85c   :  { %13932 = vmatprep.subr.bf16.mxu0 %v15638_v15  ;;  %v15671_v15 = vcombine.low %v11309_v33, %v11312_v34  ;;  %v15678_v48 = vcombine.high %v11315_v43, %v11318_v44  ;;  %v15677_v54 = vcombine.low %v11315_v43, %v11318_v44  ;;  %v11349_v33 = vld [vmem:[#allocation14 + $0xa78] sm:$0xff] }
 0x85d   :  { %13769 = vmatpush1.bf16.msra.mxu1 %v15635_v49  ;;  %v15680_v49 = vcombine.high %v11316_v45, %v11319_v47  ;;  %v11355_v43 = vld [vmem:[#allocation14 + $0xb38] sm:$0xff] }
 0x85e   :  { %13933 = vmatpush1.bf16.msra.mxu0 %v15637_v50  ;;  %13770 = vmatprep.subr.bf16.mxu1 %v15642_v52  ;;  %v11321_v50 = vld [vmem:[#allocation14 + $0x710] sm:$0xff] }
 0x85f   :  { %13934 = vmatprep.subr.bf16.mxu0 %v15644_v53  ;;  %v11324_v52 = vld [vmem:[#allocation14 + $0x770] sm:$0xff]  ;;  %v11322_v53 = vld [vmem:[#allocation14 + $0x718] sm:$0xff] }
 0x860   :  { %v15684_v56 = vcombine.high %v11321_v50, %v11324_v52  ;;  %v15683_v3 = vcombine.low %v11321_v50, %v11324_v52  ;;  %v15685_v4 = vcombine.low %v11322_v53, %v11325_v35  ;;  %v11361_v50 = vld [vmem:[#allocation14 + $0xbf8] sm:$0xff] }
 0x861   :  { %13771 = vmatpush1.bf16.msra.mxu1 %v15641_v21  ;;  %v15686_v21 = vcombine.high %v11322_v53, %v11325_v35 }
 0x862   :  { %13935 = vmatpush1.bf16.msra.mxu0 %v15643_v58  ;;  %13772 = vmatprep.subr.bf16.mxu1 %v15648_v0  ;;  %v11327_v58 = vld [vmem:[#allocation14 + $0x7d0] sm:$0xff] }
 0x863   :  { %13936 = vmatprep.subr.bf16.mxu0 %v15650_v1  ;;  %v11330_v0 = vld [vmem:[#allocation14 + $0x830] sm:$0xff]  ;;  %v11328_v1 = vld [vmem:[#allocation14 + $0x7d8] sm:$0xff] }
 0x864   :  { %v15690_v5 = vcombine.high %v11327_v58, %v11330_v0  ;;  %v15689_v13 = vcombine.low %v11327_v58, %v11330_v0  ;;  %v15691_v14 = vcombine.low %v11328_v1, %v11331_v2  ;;  %v11367_v58 = vld [vmem:[#allocation14 + $0xcb8] sm:$0xff] }
 0x865   :  { %13773 = vmatpush1.bf16.msra.mxu1 %v15647_v57  ;;  %v15692_v57 = vcombine.high %v11328_v1, %v11331_v2 }
 0x866   :  { %13937 = vmatpush1.bf16.msra.mxu0 %v15649_v8  ;;  %13774 = vmatprep.subr.bf16.mxu1 %v15654_v9  ;;  %v11333_v8 = vld [vmem:[#allocation14 + $0x890] sm:$0xff] }
 0x867   :  { %13938 = vmatprep.subr.bf16.mxu0 %v15656_v11  ;;  %v11336_v9 = vld [vmem:[#allocation14 + $0x8f0] sm:$0xff]  ;;  %v11334_v11 = vld [vmem:[#allocation14 + $0x898] sm:$0xff] }
 0x868   :  { %v15696_v17 = vcombine.high %v11333_v8, %v11336_v9  ;;  %v15695_v27 = vcombine.low %v11333_v8, %v11336_v9  ;;  %v15697_v28 = vcombine.low %v11334_v11, %v11337_v12  ;;  %v11370_v8 = vld [vmem:[#allocation14 + $0xd18] sm:$0xff] }
 0x869   :  { %13775 = vmatpush1.bf16.msra.mxu1 %v15653_v18  ;;  %v15698_v18 = vcombine.high %v11334_v11, %v11337_v12  ;;  %v11373_v9 = vld [vmem:[#allocation14 + $0xd78] sm:$0xff] }
 0x86a   :  { %13939 = vmatpush1.bf16.msra.mxu0 %v15655_v22  ;;  %13776 = vmatprep.subr.bf16.mxu1 %v15660_v42  ;;  %v11339_v22 = vld [vmem:[#allocation14 + $0x950] sm:$0xff] }
 0x86b   :  { %13940 = vmatprep.subr.bf16.mxu0 %v15662_v38  ;;  %v11342_v42 = vld [vmem:[#allocation14 + $0x9b0] sm:$0xff]  ;;  %v11340_v38 = vld [vmem:[#allocation14 + $0x958] sm:$0xff] }
 0x86c   :  { %v15702_v59 = vcombine.high %v11339_v22, %v11342_v42  ;;  %v15701_v34 = vcombine.low %v11339_v22, %v11342_v42  ;;  %v15703_v39 = vcombine.low %v11340_v38, %v11343_v25  ;;  %v11379_v22 = vld [vmem:[#allocation14 + $0xe38] sm:$0xff] }
 0x86d   :  { %13777 = vmatpush1.bf16.msra.mxu1 %v15659_v29  ;;  %v15704_v29 = vcombine.high %v11340_v38, %v11343_v25  ;;  %v15733_v38 = vcombine.low %v11370_v8, %v11373_v9 }
 0x86e   :  { %13941 = vmatpush1.bf16.msra.mxu0 %v15661_v30  ;;  %13778 = vmatprep.subr.bf16.mxu1 %v15666_v31  ;;  %v11345_v30 = vld [vmem:[#allocation14 + $0xa10] sm:$0xff] }
 0x86f   :  { %13942 = vmatprep.subr.bf16.mxu0 %v15668_v32  ;;  %v11348_v31 = vld [vmem:[#allocation14 + $0xa70] sm:$0xff]  ;;  %v11346_v32 = vld [vmem:[#allocation14 + $0xa18] sm:$0xff] }
 0x870   :  { %v15708_v36 = vcombine.high %v11345_v30, %v11348_v31  ;;  %v15707_v44 = vcombine.low %v11345_v30, %v11348_v31  ;;  %v15709_v45 = vcombine.low %v11346_v32, %v11349_v33  ;;  %v11385_v30 = vld [vmem:[#allocation14 + $0xef8] sm:$0xff] }
 0x871   :  { %13779 = vmatpush1.bf16.msra.mxu1 %v15665_v37  ;;  %v15710_v37 = vcombine.high %v11346_v32, %v11349_v33 }
 0x872   :  { %13943 = vmatpush1.bf16.msra.mxu0 %v15667_v40  ;;  %13780 = vmatprep.subr.bf16.mxu1 %v15672_v41  ;;  %v11351_v40 = vld [vmem:[#allocation14 + $0xad0] sm:$0xff] }
 0x873   :  { %13944 = vmatprep.subr.bf16.mxu0 %v15674_v46  ;;  %v11354_v41 = vld [vmem:[#allocation14 + $0xb30] sm:$0xff]  ;;  %v11352_v46 = vld [vmem:[#allocation14 + $0xad8] sm:$0xff] }
 0x874   :  { %v15714_v47 = vcombine.high %v11351_v40, %v11354_v41  ;;  %v15713_v52 = vcombine.low %v11351_v40, %v11354_v41  ;;  %v15715_v53 = vcombine.low %v11352_v46, %v11355_v43 }
 0x875   :  { %13781 = vmatpush1.bf16.msra.mxu1 %v15671_v15  ;;  %v15716_v15 = vcombine.high %v11352_v46, %v11355_v43  ;;  %v11393_v43 = vld [vmem:[#allocation14 + $0x1010] sm:$0xff] }
 0x876   :  { %13945 = vmatpush1.bf16.msra.mxu0 %v15673_v63  ;;  %13782 = vmatprep.subr.bf16.mxu1 %v15678_v48  ;;  %v11357_v63 = vld [vmem:[#allocation14 + $0xb90] sm:$0xff] }
 0x877   :  { %13946 = vmatprep.subr.bf16.mxu0 %v15680_v49  ;;  %v11360_v48 = vld [vmem:[#allocation14 + $0xbf0] sm:$0xff]  ;;  %v11358_v49 = vld [vmem:[#allocation14 + $0xb98] sm:$0xff] }
 0x878   :  { %v15720_v35 = vcombine.high %v11357_v63, %v11360_v48  ;;  %v15719_v0 = vcombine.low %v11357_v63, %v11360_v48  ;;  %v15721_v1 = vcombine.low %v11358_v49, %v11361_v50 }
 0x879   :  { %13783 = vmatpush1.bf16.msra.mxu1 %v15677_v54  ;;  %v15722_v54 = vcombine.high %v11358_v49, %v11361_v50  ;;  %v11399_v50 = vld [vmem:[#allocation14 + $0x10d0] sm:$0xff] }
 0x87a   :  { %13947 = vmatpush1.bf16.msra.mxu0 %v15679_v55  ;;  %13784 = vmatprep.subr.bf16.mxu1 %v15684_v56  ;;  %v11363_v55 = vld [vmem:[#allocation14 + $0xc50] sm:$0xff] }
 0x87b   :  { %13948 = vmatprep.subr.bf16.mxu0 %v15686_v21  ;;  %v11366_v56 = vld [vmem:[#allocation14 + $0xcb0] sm:$0xff]  ;;  %v11364_v21 = vld [vmem:[#allocation14 + $0xc58] sm:$0xff] }
 0x87c   :  { %v15726_v2 = vcombine.high %v11363_v55, %v11366_v56  ;;  %v15727_v11 = vcombine.low %v11364_v21, %v11367_v58 }
 0x87d   :  { %13785 = vmatpush1.bf16.msra.mxu1 %v15683_v3  ;;  %v15728_v3 = vcombine.high %v11364_v21, %v11367_v58  ;;  %v11405_v58 = vld [vmem:[#allocation14 + $0x1190] sm:$0xff] }
 0x87e   :  { %13949 = vmatpush1.bf16.msra.mxu0 %v15685_v4  ;;  %13786 = vmatprep.subr.bf16.mxu1 %v15690_v5  ;;  %v11369_v4 = vld [vmem:[#allocation14 + $0xd10] sm:$0xff] }
 0x87f   :  { %13950 = vmatprep.subr.bf16.mxu0 %v15692_v57  ;;  %v11372_v5 = vld [vmem:[#allocation14 + $0xd70] sm:$0xff]  ;;  %v15725_v57 = vcombine.low %v11363_v55, %v11366_v56 }
 0x880   :  { %v15732_v12 = vcombine.high %v11369_v4, %v11372_v5  ;;  %v15731_v42 = vcombine.low %v11369_v4, %v11372_v5 }
 0x881   :  { %13787 = vmatpush1.bf16.msra.mxu1 %v15689_v13  ;;  %v11375_v13 = vld [vmem:[#allocation14 + $0xdd0] sm:$0xff] }
 0x882   :  { %13951 = vmatpush1.bf16.msra.mxu0 %v15691_v14  ;;  %13788 = vmatprep.subr.bf16.mxu1 %v15696_v17  ;;  %v11378_v14 = vld [vmem:[#allocation14 + $0xe30] sm:$0xff]  ;;  %v15734_v17 = vcombine.high %v11370_v8, %v11373_v9 }
 0x883   :  { %13952 = vmatprep.subr.bf16.mxu0 %v15698_v18  ;;  %v11376_v18 = vld [vmem:[#allocation14 + $0xdd8] sm:$0xff]  ;;  %v15738_v25 = vcombine.high %v11375_v13, %v11378_v14  ;;  %v15737_v31 = vcombine.low %v11375_v13, %v11378_v14  ;;  %v11411_v8 = vld [vmem:[#allocation14 + $0x1250] sm:$0xff] }
 0x884   :  { %v11414_v9 = vld [vmem:[#allocation14 + $0x12b0] sm:$0xff] }
 0x885   :  { %13789 = vmatpush1.bf16.msra.mxu1 %v15695_v27  ;;  %v15740_v27 = vcombine.high %v11376_v18, %v11379_v22 }
 0x886   :  { %13953 = vmatpush1.bf16.msra.mxu0 %v15697_v28  ;;  %13790 = vmatprep.subr.bf16.mxu1 %v15702_v59  ;;  %v11381_v28 = vld [vmem:[#allocation14 + $0xe90] sm:$0xff] }
 0x887   :  { %13954 = vmatprep.subr.bf16.mxu0 %v15704_v29  ;;  %v11384_v59 = vld [vmem:[#allocation14 + $0xef0] sm:$0xff]  ;;  %v11382_v29 = vld [vmem:[#allocation14 + $0xe98] sm:$0xff] }
 0x888   :  { %v15744_v32 = vcombine.high %v11381_v28, %v11384_v59  ;;  %v15746_v33 = vcombine.high %v11382_v29, %v11385_v30  ;;  %v15745_v40 = vcombine.low %v11382_v29, %v11385_v30  ;;  %v11423_v30 = vld [vmem:[#allocation14 + $0x13d0] sm:$0xff] }
 0x889   :  { %13791 = vmatpush1.bf16.msra.mxu1 %v15701_v34  ;;  %v11387_v34 = vld [vmem:[#allocation14 + $0xf50] sm:$0xff] }
 0x88a   :  { %13955 = vmatpush1.bf16.msra.mxu0 %v15703_v39  ;;  %13792 = vmatprep.subr.bf16.mxu1 %v15708_v36  ;;  %v11390_v39 = vld [vmem:[#allocation14 + $0xfb0] sm:$0xff]  ;;  %v11388_v36 = vld [vmem:[#allocation14 + $0xf58] sm:$0xff] }
 0x88b   :  { %13956 = vmatprep.subr.bf16.mxu0 %v15710_v37  ;;  %v11391_v37 = vld [vmem:[#allocation14 + $0xfb8] sm:$0xff]  ;;  %v15750_v41 = vcombine.high %v11387_v34, %v11390_v39 }
 0x88c   :  { %v15752_v46 = vcombine.high %v11388_v36, %v11391_v37  ;;  %v15751_v63 = vcombine.low %v11388_v36, %v11391_v37  ;;  %v11429_v37 = vld [vmem:[#allocation14 + $0x1490] sm:$0xff] }
 0x88d   :  { %13793 = vmatpush1.bf16.msra.mxu1 %v15707_v44  ;;  %v11396_v44 = vld [vmem:[#allocation14 + $0x1070] sm:$0xff] }
 0x88e   :  { %13957 = vmatpush1.bf16.msra.mxu0 %v15709_v45  ;;  %13794 = vmatprep.subr.bf16.mxu1 %v15714_v47  ;;  %v11394_v45 = vld [vmem:[#allocation14 + $0x1018] sm:$0xff]  ;;  %v15756_v48 = vcombine.high %v11393_v43, %v11396_v44 }
 0x88f   :  { %13958 = vmatprep.subr.bf16.mxu0 %v15716_v15  ;;  %v11397_v47 = vld [vmem:[#allocation14 + $0x1078] sm:$0xff]  ;;  %v15749_v15 = vcombine.low %v11387_v34, %v11390_v39 }
 0x890   :  { %v15758_v49 = vcombine.high %v11394_v45, %v11397_v47  ;;  %v15757_v55 = vcombine.low %v11394_v45, %v11397_v47  ;;  %v11435_v47 = vld [vmem:[#allocation14 + $0x1550] sm:$0xff] }
 0x891   :  { %13795 = vmatpush1.bf16.msra.mxu1 %v15713_v52  ;;  %v11402_v52 = vld [vmem:[#allocation14 + $0x1130] sm:$0xff] }
 0x892   :  { %13959 = vmatpush1.bf16.msra.mxu0 %v15715_v53  ;;  %13796 = vmatprep.subr.bf16.mxu1 %v15720_v35  ;;  %v11400_v53 = vld [vmem:[#allocation14 + $0x10d8] sm:$0xff]  ;;  %v15762_v56 = vcombine.high %v11399_v50, %v11402_v52 }
 0x893   :  { %13960 = vmatprep.subr.bf16.mxu0 %v15722_v54  ;;  %v11403_v35 = vld [vmem:[#allocation14 + $0x1138] sm:$0xff]  ;;  %v15755_v54 = vcombine.low %v11393_v43, %v11396_v44 }
 0x894   :  { %v15764_v21 = vcombine.high %v11400_v53, %v11403_v35  ;;  %v15763_v4 = vcombine.low %v11400_v53, %v11403_v35  ;;  %v11441_v35 = vld [vmem:[#allocation14 + $0x1610] sm:$0xff] }
 0x895   :  { %13797 = vmatpush1.bf16.msra.mxu1 %v15719_v0  ;;  %v11408_v0 = vld [vmem:[#allocation14 + $0x11f0] sm:$0xff] }
 0x896   :  { %13961 = vmatpush1.bf16.msra.mxu0 %v15721_v1  ;;  %13807 = vmatprep.subr.bf16.mxu1 %v15726_v2  ;;  %v11406_v1 = vld [vmem:[#allocation14 + $0x1198] sm:$0xff]  ;;  %v15768_v5 = vcombine.high %v11405_v58, %v11408_v0  ;;  %v15767_v13 = vcombine.low %v11405_v58, %v11408_v0 }
 0x897   :  { %13971 = vmatprep.subr.bf16.mxu0 %v15728_v3  ;;  %v11409_v2 = vld [vmem:[#allocation14 + $0x11f8] sm:$0xff]  ;;  %v15761_v3 = vcombine.low %v11399_v50, %v11402_v52 }
 0x898   :  { %13799 = vmatmul.mubr.bf16.vlgmr.msra.gmra.mrb[32].mxu1 %v16887_v61  ;;  %v15769_v14 = vcombine.low %v11406_v1, %v11409_v2 }
 0x899   :  { %13963 = vmatmul.mubr.bf16.vlgmr.msra.gmra.mrb[36].mxu0 %v16887_v61  ;;  %13808 = vmatpush1.bf16.msra.mxu1 %v15725_v57  ;;  %v15739_v61 = vcombine.low %v11376_v18, %v11379_v22  ;;  %v15770_v57 = vcombine.high %v11406_v1, %v11409_v2  ;;  %v11417_v22 = vld [vmem:[#allocation14 + $0x1310] sm:$0xff] }
 0x89a   :  { %13839 = vmatprep.mubr.bf16.mxu1 %v16891_v6  ;;  %13972 = vmatpush1.bf16.msra.mxu0 %v15727_v11  ;;  %v11412_v11 = vld [vmem:[#allocation14 + $0x1258] sm:$0xff]  ;;  %v11447_v2 = vld [vmem:[#allocation14 + $0x16d0] sm:$0xff] }
 0x89b   :  { %14003 = vmatprep.mubr.bf16.mxu0 %v16891_v6  ;;  %13809 = vmatprep.subr.bf16.mxu1 %v15732_v12  ;;  %v15743_v6 = vcombine.low %v11381_v28, %v11384_v59  ;;  %v11415_v12 = vld [vmem:[#allocation14 + $0x12b8] sm:$0xff] }
 0x89c   :  { %13973 = vmatprep.subr.bf16.mxu0 %v15734_v17  ;;  %v15774_v17 = vcombine.high %v11411_v8, %v11414_v9  ;;  %v15776_v18 = vcombine.high %v11412_v11, %v11415_v12  ;;  %v15775_v28 = vcombine.low %v11412_v11, %v11415_v12  ;;  %v11453_v12 = vld [vmem:[#allocation14 + $0x1790] sm:$0xff] }
 0x89d   :  { %13810 = vmatpush1.bf16.msra.mxu1 %v15731_v42  ;;  %v11420_v42 = vld [vmem:[#allocation14 + $0x1370] sm:$0xff] }
 0x89e   :  { %13974 = vmatpush1.bf16.msra.mxu0 %v15733_v38  ;;  %13811 = vmatprep.subr.bf16.mxu1 %v15738_v25  ;;  %v11418_v38 = vld [vmem:[#allocation14 + $0x1318] sm:$0xff]  ;;  %v15780_v59 = vcombine.high %v11417_v22, %v11420_v42 }
 0x89f   :  { %13975 = vmatprep.subr.bf16.mxu0 %v15740_v27  ;;  %v11421_v25 = vld [vmem:[#allocation14 + $0x1378] sm:$0xff]  ;;  %v15773_v27 = vcombine.low %v11411_v8, %v11414_v9 }
 0x8a0   :  { %v15782_v29 = vcombine.high %v11418_v38, %v11421_v25  ;;  %v15781_v34 = vcombine.low %v11418_v38, %v11421_v25  ;;  %v11459_v25 = vld [vmem:[#allocation14 + $0x1850] sm:$0xff] }
 0x8a1   :  { %13812 = vmatpush1.bf16.msra.mxu1 %v15737_v31  ;;  %v11426_v31 = vld [vmem:[#allocation14 + $0x1430] sm:$0xff] }
 0x8a2   :  { %13976 = vmatpush1.bf16.msra.mxu0 %v15739_v61  ;;  %13813 = vmatprep.subr.bf16.mxu1 %v15744_v32  ;;  %v11424_v61 = vld [vmem:[#allocation14 + $0x13d8] sm:$0xff]  ;;  %v15786_v39 = vcombine.high %v11423_v30, %v11426_v31 }
 0x8a3   :  { %13977 = vmatprep.subr.bf16.mxu0 %v15746_v33  ;;  %v11427_v32 = vld [vmem:[#allocation14 + $0x1438] sm:$0xff]  ;;  %v15779_v33 = vcombine.low %v11417_v22, %v11420_v42 }
 0x8a4   :  { %v15788_v36 = vcombine.high %v11424_v61, %v11427_v32  ;;  %v15787_v43 = vcombine.low %v11424_v61, %v11427_v32  ;;  %v11465_v32 = vld [vmem:[#allocation14 + $0x1910] sm:$0xff] }
 0x8a5   :  { %13814 = vmatpush1.bf16.msra.mxu1 %v15743_v6  ;;  %v11432_v6 = vld [vmem:[#allocation14 + $0x14f0] sm:$0xff] }
 0x8a6   :  { %13978 = vmatpush1.bf16.msra.mxu0 %v15745_v40  ;;  %13815 = vmatprep.subr.bf16.mxu1 %v15750_v41  ;;  %v11430_v40 = vld [vmem:[#allocation14 + $0x1498] sm:$0xff]  ;;  %v15792_v44 = vcombine.high %v11429_v37, %v11432_v6 }
 0x8a7   :  { %13979 = vmatprep.subr.bf16.mxu0 %v15752_v46  ;;  %v11433_v41 = vld [vmem:[#allocation14 + $0x14f8] sm:$0xff]  ;;  %v15785_v46 = vcombine.low %v11423_v30, %v11426_v31 }
 0x8a8   :  { %v15794_v45 = vcombine.high %v11430_v40, %v11433_v41  ;;  %v15793_v50 = vcombine.low %v11430_v40, %v11433_v41  ;;  %v11471_v40 = vld [vmem:[#allocation14 + $0x19d0] sm:$0xff] }
 0x8a9   :  { %13816 = vmatpush1.bf16.msra.mxu1 %v15749_v15  ;;  %v11438_v15 = vld [vmem:[#allocation14 + $0x15b0] sm:$0xff] }
 0x8aa   :  { %13980 = vmatpush1.bf16.msra.mxu0 %v15751_v63  ;;  %13817 = vmatprep.subr.bf16.mxu1 %v15756_v48  ;;  %v11436_v63 = vld [vmem:[#allocation14 + $0x1558] sm:$0xff]  ;;  %v15798_v52 = vcombine.high %v11435_v47, %v11438_v15  ;;  %v11474_v41 = vld [vmem:[#allocation14 + $0x1a30] sm:$0xff] }
 0x8ab   :  { %13981 = vmatprep.subr.bf16.mxu0 %v15758_v49  ;;  %v11439_v48 = vld [vmem:[#allocation14 + $0x15b8] sm:$0xff]  ;;  %v15791_v49 = vcombine.low %v11429_v37, %v11432_v6 }
 0x8ac   :  { %v15800_v53 = vcombine.high %v11436_v63, %v11439_v48  ;;  %v15799_v58 = vcombine.low %v11436_v63, %v11439_v48  ;;  %v11477_v48 = vld [vmem:[#allocation14 + $0x1a90] sm:$0xff] }
 0x8ad   :  { %13818 = vmatpush1.bf16.msra.mxu1 %v15755_v54  ;;  %v11444_v54 = vld [vmem:[#allocation14 + $0x1670] sm:$0xff] }
 0x8ae   :  { %13982 = vmatpush1.bf16.msra.mxu0 %v15757_v55  ;;  %13819 = vmatprep.subr.bf16.mxu1 %v15762_v56  ;;  %v11442_v55 = vld [vmem:[#allocation14 + $0x1618] sm:$0xff]  ;;  %v15804_v0 = vcombine.high %v11441_v35, %v11444_v54 }
 0x8af   :  { %13983 = vmatprep.subr.bf16.mxu0 %v15764_v21  ;;  %v11445_v56 = vld [vmem:[#allocation14 + $0x1678] sm:$0xff]  ;;  %v15797_v21 = vcombine.low %v11435_v47, %v11438_v15  ;;  %v15834_v15 = vcombine.high %v11471_v40, %v11474_v41 }
 0x8b0   :  { %v15806_v1 = vcombine.high %v11442_v55, %v11445_v56  ;;  %v15805_v8 = vcombine.low %v11442_v55, %v11445_v56  ;;  %v11483_v55 = vld [vmem:[#allocation14 + $0x1b50] sm:$0xff] }
 0x8b1   :  { %13820 = vmatpush1.bf16.msra.mxu1 %v15761_v3  ;;  %v11450_v3 = vld [vmem:[#allocation14 + $0x1730] sm:$0xff] }
 0x8b2   :  { %13984 = vmatpush1.bf16.msra.mxu0 %v15763_v4  ;;  %13821 = vmatprep.subr.bf16.mxu1 %v15768_v5  ;;  %v11448_v4 = vld [vmem:[#allocation14 + $0x16d8] sm:$0xff]  ;;  %v15810_v9 = vcombine.high %v11447_v2, %v11450_v3  ;;  %v11486_v56 = vld [vmem:[#allocation14 + $0x1bb0] sm:$0xff] }
 0x8b3   :  { %13985 = vmatprep.subr.bf16.mxu0 %v15770_v57  ;;  %v11451_v5 = vld [vmem:[#allocation14 + $0x1738] sm:$0xff]  ;;  %v15803_v57 = vcombine.low %v11441_v35, %v11444_v54 }
 0x8b4   :  { %v15812_v11 = vcombine.high %v11448_v4, %v11451_v5  ;;  %v15811_v22 = vcombine.low %v11448_v4, %v11451_v5  ;;  %v11492_v4 = vld [vmem:[#allocation14 + $0x1c70] sm:$0xff]  ;;  %v11490_v5 = vld [vmem:[#allocation14 + $0x1c18] sm:$0xff] }
 0x8b5   :  { %13822 = vmatpush1.bf16.msra.mxu1 %v15767_v13  ;;  %v11456_v13 = vld [vmem:[#allocation14 + $0x17f0] sm:$0xff] }
 0x8b6   :  { %13986 = vmatpush1.bf16.msra.mxu0 %v15769_v14  ;;  %13823 = vmatprep.subr.bf16.mxu1 %v15774_v17  ;;  %v11454_v14 = vld [vmem:[#allocation14 + $0x1798] sm:$0xff]  ;;  %v15816_v42 = vcombine.high %v11453_v12, %v11456_v13 }
 0x8b7   :  { %13987 = vmatprep.subr.bf16.mxu0 %v15776_v18  ;;  %v11457_v17 = vld [vmem:[#allocation14 + $0x17f8] sm:$0xff]  ;;  %v15809_v18 = vcombine.low %v11447_v2, %v11450_v3  ;;  %v11489_v3 = vld [vmem:[#allocation14 + $0x1c10] sm:$0xff] }
 0x8b8   :  { %v15818_v38 = vcombine.high %v11454_v14, %v11457_v17  ;;  %v15817_v30 = vcombine.low %v11454_v14, %v11457_v17  ;;  %v11498_v14 = vld [vmem:[#allocation14 + $0x1d30] sm:$0xff]  ;;  %v11496_v17 = vld [vmem:[#allocation14 + $0x1cd8] sm:$0xff] }
 0x8b9   :  { %13824 = vmatpush1.bf16.msra.mxu1 %v15773_v27  ;;  %v11462_v27 = vld [vmem:[#allocation14 + $0x18b0] sm:$0xff] }
 0x8ba   :  { %13988 = vmatpush1.bf16.msra.mxu0 %v15775_v28  ;;  %13825 = vmatprep.subr.bf16.mxu1 %v15780_v59  ;;  %v11460_v28 = vld [vmem:[#allocation14 + $0x1858] sm:$0xff]  ;;  %v15822_v31 = vcombine.high %v11459_v25, %v11462_v27 }
 0x8bb   :  { %13989 = vmatprep.subr.bf16.mxu0 %v15782_v29  ;;  %v11463_v59 = vld [vmem:[#allocation14 + $0x18b8] sm:$0xff]  ;;  %v15815_v29 = vcombine.low %v11453_v12, %v11456_v13  ;;  %v11495_v13 = vld [vmem:[#allocation14 + $0x1cd0] sm:$0xff] }
 0x8bc   :  { %v15824_v61 = vcombine.high %v11460_v28, %v11463_v59  ;;  %v15823_v37 = vcombine.low %v11460_v28, %v11463_v59  ;;  %v11504_v28 = vld [vmem:[#allocation14 + $0x1df0] sm:$0xff]  ;;  %v11502_v59 = vld [vmem:[#allocation14 + $0x1d98] sm:$0xff] }
 0x8bd   :  { %13826 = vmatpush1.bf16.msra.mxu1 %v15779_v33  ;;  %v11468_v33 = vld [vmem:[#allocation14 + $0x1970] sm:$0xff] }
 0x8be   :  { %13990 = vmatpush1.bf16.msra.mxu0 %v15781_v34  ;;  %13827 = vmatprep.subr.bf16.mxu1 %v15786_v39  ;;  %v15821_v34 = vcombine.low %v11459_v25, %v11462_v27  ;;  %v11466_v39 = vld [vmem:[#allocation14 + $0x1918] sm:$0xff]  ;;  %v15828_v6 = vcombine.high %v11465_v32, %v11468_v33  ;;  %v11501_v27 = vld [vmem:[#allocation14 + $0x1d90] sm:$0xff] }
 0x8bf   :  { %13991 = vmatprep.subr.bf16.mxu0 %v15788_v36  ;;  %v11469_v36 = vld [vmem:[#allocation14 + $0x1978] sm:$0xff] }
 0x8c0   :  { %v15829_v47 = vcombine.low %v11466_v39, %v11469_v36 }
 0x8c1   :  { %13828 = vmatpush1.bf16.msra.mxu1 %v15785_v46  ;;  %v15830_v46 = vcombine.high %v11466_v39, %v11469_v36  ;;  %v11508_v39 = vld [vmem:[#allocation14 + $0x1e58] sm:$0xff] }
 0x8c2   :  { %13992 = vmatpush1.bf16.msra.mxu0 %v15787_v43  ;;  %13829 = vmatprep.subr.bf16.mxu1 %v15792_v44  ;;  %v11472_v43 = vld [vmem:[#allocation14 + $0x19d8] sm:$0xff] }
 0x8c3   :  { %13993 = vmatprep.subr.bf16.mxu0 %v15794_v45  ;;  %v11475_v44 = vld [vmem:[#allocation14 + $0x1a38] sm:$0xff]  ;;  %v15827_v45 = vcombine.low %v11465_v32, %v11468_v33  ;;  %v11507_v33 = vld [vmem:[#allocation14 + $0x1e50] sm:$0xff] }
 0x8c4   :  { %v15836_v63 = vcombine.high %v11472_v43, %v11475_v44  ;;  %v11511_v36 = vld [vmem:[#allocation14 + $0x1eb8] sm:$0xff] }
 0x8c5   :  { %13830 = vmatpush1.bf16.msra.mxu1 %v15791_v49  ;;  %v11480_v49 = vld [vmem:[#allocation14 + $0x1af0] sm:$0xff] }
 0x8c6   :  { %13994 = vmatpush1.bf16.msra.mxu0 %v15793_v50  ;;  %13831 = vmatprep.subr.bf16.mxu1 %v15798_v52  ;;  %v11478_v50 = vld [vmem:[#allocation14 + $0x1a98] sm:$0xff]  ;;  %v15840_v35 = vcombine.high %v11477_v48, %v11480_v49 }
 0x8c7   :  { %13995 = vmatprep.subr.bf16.mxu0 %v15800_v53  ;;  %v11481_v52 = vld [vmem:[#allocation14 + $0x1af8] sm:$0xff]  ;;  %v15833_v53 = vcombine.low %v11471_v40, %v11474_v41  ;;  %v15872_v41 = vcombine.high %v11508_v39, %v11511_v36 }
 0x8c8   :  { %v15842_v54 = vcombine.high %v11478_v50, %v11481_v52 }
 0x8c9   :  { %13832 = vmatpush1.bf16.msra.mxu1 %v15797_v21  ;;  %v11484_v21 = vld [vmem:[#allocation14 + $0x1b58] sm:$0xff] }
 0x8ca   :  { %13996 = vmatpush1.bf16.msra.mxu0 %v15799_v58  ;;  %13833 = vmatprep.subr.bf16.mxu1 %v15804_v0  ;;  %v11487_v58 = vld [vmem:[#allocation14 + $0x1bb8] sm:$0xff]  ;;  %v15841_v0 = vcombine.low %v11478_v50, %v11481_v52  ;;  %v11522_v50 = vld [vmem:[#allocation14 + $0x2030] sm:$0xff] }
 0x8cb   :  { %13997 = vmatprep.subr.bf16.mxu0 %v15806_v1  ;;  %v15846_v1 = vcombine.high %v11483_v55, %v11486_v56  ;;  %v15848_v2 = vcombine.high %v11484_v21, %v11487_v58  ;;  %v11520_v52 = vld [vmem:[#allocation14 + $0x1fd8] sm:$0xff] }
 0x8cd   :  { %13834 = vmatpush1.bf16.msra.mxu1 %v15803_v57  ;;  %v11493_v57 = vld [vmem:[#allocation14 + $0x1c78] sm:$0xff] }
 0x8ce   :  { %13998 = vmatpush1.bf16.msra.mxu0 %v15805_v8  ;;  %13835 = vmatprep.subr.bf16.mxu1 %v15810_v9  ;;  %v15845_v8 = vcombine.low %v11483_v55, %v11486_v56  ;;  %v15847_v9 = vcombine.low %v11484_v21, %v11487_v58  ;;  %v15854_v12 = vcombine.high %v11490_v5, %v11493_v57  ;;  %v11525_v56 = vld [vmem:[#allocation14 + $0x2090] sm:$0xff]  ;;  %v11526_v58 = vld [vmem:[#allocation14 + $0x2098] sm:$0xff] }
 0x8cf   :  { %13999 = vmatprep.subr.bf16.mxu0 %v15812_v11  ;;  %v15852_v11 = vcombine.high %v11489_v3, %v11492_v4  ;;  %v11528_v21 = vld [vmem:[#allocation14 + $0x20f0] sm:$0xff] }
 0x8d1   :  { %13836 = vmatpush1.bf16.msra.mxu1 %v15809_v18  ;;  %v11499_v18 = vld [vmem:[#allocation14 + $0x1d38] sm:$0xff] }
 0x8d2   :  { %14000 = vmatpush1.bf16.msra.mxu0 %v15811_v22  ;;  %13837 = vmatprep.subr.bf16.mxu1 %v15816_v42  ;;  %v15851_v22 = vcombine.low %v11489_v3, %v11492_v4  ;;  %v15853_v42 = vcombine.low %v11490_v5, %v11493_v57  ;;  %v15860_v25 = vcombine.high %v11496_v17, %v11499_v18  ;;  %v11531_v4 = vld [vmem:[#allocation14 + $0x2150] sm:$0xff]  ;;  %v11532_v57 = vld [vmem:[#allocation14 + $0x2158] sm:$0xff] }
 0x8d3   :  { %14001 = vmatprep.subr.bf16.mxu0 %v15818_v38  ;;  %v15858_v38 = vcombine.high %v11495_v13, %v11498_v14  ;;  %v11534_v5 = vld [vmem:[#allocation14 + $0x21b0] sm:$0xff] }
 0x8d5   :  { %13838 = vmatpush1.bf16.msra.mxu1 %v15815_v29  ;;  %v11505_v29 = vld [vmem:[#allocation14 + $0x1df8] sm:$0xff] }
 0x8d6   :  { %14002 = vmatpush1.bf16.msra.mxu0 %v15817_v30  ;;  %13848 = vmatprep.subr.bf16.mxu1 %v15822_v31  ;;  %v15857_v30 = vcombine.low %v11495_v13, %v11498_v14  ;;  %v15859_v31 = vcombine.low %v11496_v17, %v11499_v18  ;;  %v15866_v32 = vcombine.high %v11502_v59, %v11505_v29  ;;  %v11537_v14 = vld [vmem:[#allocation14 + $0x2210] sm:$0xff]  ;;  %v11538_v18 = vld [vmem:[#allocation14 + $0x2218] sm:$0xff] }
 0x8d7   :  { %14012 = vmatprep.subr.bf16.mxu0 %v15824_v61  ;;  %v15864_v61 = vcombine.high %v11501_v27, %v11504_v28  ;;  %v11540_v17 = vld [vmem:[#allocation14 + $0x2270] sm:$0xff] }
 0x8d8   :  { %13840 = vmatmul.mubr.bf16.vlgmr.msra.gmra.mrb[32].mxu1 %v16900_v26 }
 0x8d9   :  { %14004 = vmatmul.mubr.bf16.vlgmr.msra.gmra.mrb[36].mxu0 %v16900_v26  ;;  %13849 = vmatpush1.bf16.msra.mxu1 %v15821_v34  ;;  %v15835_v26 = vcombine.low %v11472_v43, %v11475_v44  ;;  %v11510_v34 = vld [vmem:[#allocation14 + $0x1eb0] sm:$0xff]  ;;  %v11514_v44 = vld [vmem:[#allocation14 + $0x1f18] sm:$0xff] }
 0x8da   :  { %13880 = vmatprep.mubr.bf16.mxu1 %v16918_v7  ;;  %14013 = vmatpush1.bf16.msra.mxu0 %v15823_v37  ;;  %v15863_v37 = vcombine.low %v11501_v27, %v11504_v28  ;;  %v15870_v40 = vcombine.high %v11507_v33, %v11510_v34  ;;  %v11516_v43 = vld [vmem:[#allocation14 + $0x1f70] sm:$0xff] }
 0x8db   :  { %14044 = vmatprep.mubr.bf16.mxu0 %v16918_v7  ;;  %13850 = vmatprep.subr.bf16.mxu1 %v15828_v6  ;;  %v15839_v7 = vcombine.low %v11477_v48, %v11480_v49  ;;  %v15865_v6 = vcombine.low %v11502_v59, %v11505_v29  ;;  %v11519_v49 = vld [vmem:[#allocation14 + $0x1fd0] sm:$0xff]  ;;  %v11544_v29 = vld [vmem:[#allocation14 + $0x22d8] sm:$0xff] }
 0x8dc   :  { %14014 = vmatprep.subr.bf16.mxu0 %v15830_v46  ;;  %v11513_v46 = vld [vmem:[#allocation14 + $0x1f10] sm:$0xff] }
 0x8dd   :  { %13851 = vmatpush1.bf16.msra.mxu1 %v15827_v45  ;;  %v11517_v45 = vld [vmem:[#allocation14 + $0x1f78] sm:$0xff]  ;;  %v11543_v28 = vld [vmem:[#allocation14 + $0x22d0] sm:$0xff] }
 0x8de   :  { %14015 = vmatpush1.bf16.msra.mxu0 %v15829_v47  ;;  %13852 = vmatprep.subr.bf16.mxu1 %v15834_v15  ;;  %v15869_v47 = vcombine.low %v11507_v33, %v11510_v34  ;;  %v15871_v15 = vcombine.low %v11508_v39, %v11511_v36  ;;  %v15878_v48 = vcombine.high %v11514_v44, %v11517_v45  ;;  %v11546_v59 = vld [vmem:[#allocation14 + $0x2330] sm:$0xff]  ;;  %v11550_v36 = vld [vmem:[#allocation14 + $0x2398] sm:$0xff] }
 0x8df   :  { %14016 = vmatprep.subr.bf16.mxu0 %v15836_v63  ;;  %v15876_v63 = vcombine.high %v11513_v46, %v11516_v43  ;;  %v11549_v34 = vld [vmem:[#allocation14 + $0x2390] sm:$0xff] }
 0x8e0   :  { %v11552_v39 = vld [vmem:[#allocation14 + $0x23f0] sm:$0xff] }
 0x8e1   :  { %13853 = vmatpush1.bf16.msra.mxu1 %v15833_v53  ;;  %v11523_v53 = vld [vmem:[#allocation14 + $0x2038] sm:$0xff] }
 0x8e2   :  { %14017 = vmatpush1.bf16.msra.mxu0 %v15835_v26  ;;  %13854 = vmatprep.subr.bf16.mxu1 %v15840_v35  ;;  %v15875_v26 = vcombine.low %v11513_v46, %v11516_v43  ;;  %v15877_v35 = vcombine.low %v11514_v44, %v11517_v45  ;;  %v15884_v55 = vcombine.high %v11520_v52, %v11523_v53  ;;  %v11555_v43 = vld [vmem:[#allocation14 + $0x2450] sm:$0xff]  ;;  %v11556_v45 = vld [vmem:[#allocation14 + $0x2458] sm:$0xff] }
 0x8e3   :  { %14018 = vmatprep.subr.bf16.mxu0 %v15842_v54  ;;  %v15882_v54 = vcombine.high %v11519_v49, %v11522_v50  ;;  %v11558_v44 = vld [vmem:[#allocation14 + $0x24b0] sm:$0xff] }
 0x8e5   :  { %13855 = vmatpush1.bf16.msra.mxu1 %v15839_v7  ;;  %v11529_v7 = vld [vmem:[#allocation14 + $0x20f8] sm:$0xff] }
 0x8e6   :  { %14019 = vmatpush1.bf16.msra.mxu0 %v15841_v0  ;;  %13856 = vmatprep.subr.bf16.mxu1 %v15846_v1  ;;  %v15881_v0 = vcombine.low %v11519_v49, %v11522_v50  ;;  %v15883_v1 = vcombine.low %v11520_v52, %v11523_v53  ;;  %v15890_v3 = vcombine.high %v11526_v58, %v11529_v7  ;;  %v11561_v50 = vld [vmem:[#allocation14 + $0x2510] sm:$0xff] }
 0x8e7   :  { %14020 = vmatprep.subr.bf16.mxu0 %v15848_v2  ;;  %v15888_v2 = vcombine.high %v11525_v56, %v11528_v21  ;;  %v11564_v52 = vld [vmem:[#allocation14 + $0x2570] sm:$0xff]  ;;  %v15917_v53 = vcombine.low %v11555_v43, %v11558_v44 }
 0x8e9   :  { %13857 = vmatpush1.bf16.msra.mxu1 %v15845_v8  ;;  %v11535_v8 = vld [vmem:[#allocation14 + $0x21b8] sm:$0xff] }
 0x8ea   :  { %14021 = vmatpush1.bf16.msra.mxu0 %v15847_v9  ;;  %13858 = vmatprep.subr.bf16.mxu1 %v15852_v11  ;;  %v15887_v9 = vcombine.low %v11525_v56, %v11528_v21  ;;  %v15889_v11 = vcombine.low %v11526_v58, %v11529_v7  ;;  %v15896_v13 = vcombine.high %v11532_v57, %v11535_v8  ;;  %v11567_v56 = vld [vmem:[#allocation14 + $0x25d0] sm:$0xff]  ;;  %v11568_v7 = vld [vmem:[#allocation14 + $0x25d8] sm:$0xff] }
 0x8eb   :  { %14022 = vmatprep.subr.bf16.mxu0 %v15854_v12  ;;  %v15894_v12 = vcombine.high %v11531_v4, %v11534_v5  ;;  %v11570_v21 = vld [vmem:[#allocation14 + $0x2630] sm:$0xff] }
 0x8ed   :  { %13859 = vmatpush1.bf16.msra.mxu1 %v15851_v22  ;;  %v11541_v22 = vld [vmem:[#allocation14 + $0x2278] sm:$0xff] }
 0x8ee   :  { %14023 = vmatpush1.bf16.msra.mxu0 %v15853_v42  ;;  %13860 = vmatprep.subr.bf16.mxu1 %v15858_v38  ;;  %v15893_v42 = vcombine.low %v11531_v4, %v11534_v5  ;;  %v15895_v38 = vcombine.low %v11532_v57, %v11535_v8  ;;  %v15902_v27 = vcombine.high %v11538_v18, %v11541_v22  ;;  %v11573_v5 = vld [vmem:[#allocation14 + $0x2690] sm:$0xff]  ;;  %v11574_v8 = vld [vmem:[#allocation14 + $0x2698] sm:$0xff] }
 0x8ef   :  { %14024 = vmatprep.subr.bf16.mxu0 %v15860_v25  ;;  %v15900_v25 = vcombine.high %v11537_v14, %v11540_v17  ;;  %v11576_v57 = vld [vmem:[#allocation14 + $0x26f0] sm:$0xff] }
 0x8f1   :  { %13861 = vmatpush1.bf16.msra.mxu1 %v15857_v30  ;;  %v11547_v30 = vld [vmem:[#allocation14 + $0x2338] sm:$0xff] }
 0x8f2   :  { %14025 = vmatpush1.bf16.msra.mxu0 %v15859_v31  ;;  %13862 = vmatprep.subr.bf16.mxu1 %v15864_v61  ;;  %v15899_v31 = vcombine.low %v11537_v14, %v11540_v17  ;;  %v15901_v61 = vcombine.low %v11538_v18, %v11541_v22  ;;  %v15908_v33 = vcombine.high %v11544_v29, %v11547_v30  ;;  %v11579_v14 = vld [vmem:[#allocation14 + $0x2750] sm:$0xff]  ;;  %v11580_v18 = vld [vmem:[#allocation14 + $0x2758] sm:$0xff] }
 0x8f3   :  { %14026 = vmatprep.subr.bf16.mxu0 %v15866_v32  ;;  %v15906_v32 = vcombine.high %v11543_v28, %v11546_v59  ;;  %v11582_v17 = vld [vmem:[#allocation14 + $0x27b0] sm:$0xff]  ;;  %v11583_v22 = vld [vmem:[#allocation14 + $0x27b8] sm:$0xff] }
 0x8f5   :  { %13863 = vmatpush1.bf16.msra.mxu1 %v15863_v37  ;;  %v11553_v37 = vld [vmem:[#allocation14 + $0x23f8] sm:$0xff] }
 0x8f6   :  { %14027 = vmatpush1.bf16.msra.mxu0 %v15865_v6  ;;  %13864 = vmatprep.subr.bf16.mxu1 %v15870_v40  ;;  %v15905_v6 = vcombine.low %v11543_v28, %v11546_v59  ;;  %v15907_v40 = vcombine.low %v11544_v29, %v11547_v30  ;;  %v15914_v46 = vcombine.high %v11550_v36, %v11553_v37  ;;  %v11588_v28 = vld [vmem:[#allocation14 + $0x2870] sm:$0xff]  ;;  %v11586_v59 = vld [vmem:[#allocation14 + $0x2818] sm:$0xff] }
 0x8f7   :  { %14028 = vmatprep.subr.bf16.mxu0 %v15872_v41  ;;  %v15912_v41 = vcombine.high %v11549_v34, %v11552_v39  ;;  %v11589_v29 = vld [vmem:[#allocation14 + $0x2878] sm:$0xff]  ;;  %v15941_v30 = vcombine.low %v11579_v14, %v11582_v17 }
 0x8f9   :  { %13865 = vmatpush1.bf16.msra.mxu1 %v15869_v47  ;;  %v11559_v47 = vld [vmem:[#allocation14 + $0x24b8] sm:$0xff] }
 0x8fa   :  { %14029 = vmatpush1.bf16.msra.mxu0 %v15871_v15  ;;  %13866 = vmatprep.subr.bf16.mxu1 %v15876_v63  ;;  %v15911_v15 = vcombine.low %v11549_v34, %v11552_v39  ;;  %v15913_v63 = vcombine.low %v11550_v36, %v11553_v37  ;;  %v15920_v49 = vcombine.high %v11556_v45, %v11559_v47  ;;  %v11591_v34 = vld [vmem:[#allocation14 + $0x28d0] sm:$0xff] }
 0x8fb   :  { %14030 = vmatprep.subr.bf16.mxu0 %v15878_v48  ;;  %v15918_v48 = vcombine.high %v11555_v43, %v11558_v44  ;;  %v11594_v39 = vld [vmem:[#allocation14 + $0x2930] sm:$0xff] }
 0x8fc   :  { %v16414_v36 = vld [vmem:[#allocation16 + $0xc] sm:$0x3f] }
 0x8fd   :  { %13867 = vmatpush1.bf16.msra.mxu1 %v15875_v26  ;;  %v11562_v26 = vld [vmem:[#allocation14 + $0x2518] sm:$0xff]  ;;  %v8810_v37 = vrot.slane %v16414_v36, %v16905_v20 }
 0x8fe   :  { %14031 = vmatpush1.bf16.msra.mxu0 %v15877_v35  ;;  %13868 = vmatprep.subr.bf16.mxu1 %v15882_v54  ;;  %v11565_v35 = vld [vmem:[#allocation14 + $0x2578] sm:$0xff]  ;;  %v15919_v54 = vcombine.low %v11556_v45, %v11559_v47  ;;  %v15949_v45 = vcombine.low %v11586_v59, %v11589_v29  ;;  %v15954_v47 = vcombine.high %v11591_v34, %v11594_v39 }
 0x8ff   :  { %14032 = vmatprep.subr.bf16.mxu0 %v15884_v55  ;;  %v15924_v55 = vcombine.high %v11561_v50, %v11564_v52  ;;  %v15926_v58 = vcombine.high %v11562_v26, %v11565_v35 }
 0x901   :  { %13869 = vmatpush1.bf16.msra.mxu1 %v15881_v0  ;;  %v11571_v0 = vld [vmem:[#allocation14 + $0x2638] sm:$0xff] }
 0x902   :  { %14033 = vmatpush1.bf16.msra.mxu0 %v15883_v1  ;;  %13870 = vmatprep.subr.bf16.mxu1 %v15888_v2  ;;  %v15923_v1 = vcombine.low %v11561_v50, %v11564_v52  ;;  %v15925_v2 = vcombine.low %v11562_v26, %v11565_v35  ;;  %v15932_v4 = vcombine.high %v11568_v7, %v11571_v0  ;;  %v11598_v26 = vld [vmem:[#allocation14 + $0x2998] sm:$0xff] }
 0x903   :  { %14034 = vmatprep.subr.bf16.mxu0 %v15890_v3  ;;  %v15930_v3 = vcombine.high %v11567_v56, %v11570_v21 }
 0x905   :  { %13871 = vmatpush1.bf16.msra.mxu1 %v15887_v9  ;;  %v11577_v9 = vld [vmem:[#allocation14 + $0x26f8] sm:$0xff] }
 0x906   :  { %14035 = vmatpush1.bf16.msra.mxu0 %v15889_v11  ;;  %13872 = vmatprep.subr.bf16.mxu1 %v15894_v12  ;;  %v15929_v11 = vcombine.low %v11567_v56, %v11570_v21  ;;  %v15936_v12 = vcombine.high %v11573_v5, %v11576_v57  ;;  %v15953_v21 = vcombine.low %v11591_v34, %v11594_v39 }
 0x907   :  { %14036 = vmatprep.subr.bf16.mxu0 %v15896_v13  ;;  %v15938_v13 = vcombine.high %v11574_v8, %v11577_v9 }
 0x909   :  { %13873 = vmatpush1.bf16.msra.mxu1 %v15893_v42  ;;  %v15937_v42 = vcombine.low %v11574_v8, %v11577_v9  ;;  %v11607_v8 = vld [vmem:[#allocation14 + $0x2ab8] sm:$0xff] }
 0x90a   :  { %14037 = vmatpush1.bf16.msra.mxu0 %v15895_v38  ;;  %13874 = vmatprep.subr.bf16.mxu1 %v15900_v25  ;;  %v15942_v38 = vcombine.high %v11579_v14, %v11582_v17  ;;  %v15944_v25 = vcombine.high %v11580_v18, %v11583_v22  ;;  %v11612_v14 = vld [vmem:[#allocation14 + $0x2b70] sm:$0xff]  ;;  %v11610_v17 = vld [vmem:[#allocation14 + $0x2b18] sm:$0xff] }
 0x90b   :  { %14038 = vmatprep.subr.bf16.mxu0 %v15902_v27  ;;  %v11585_v27 = vld [vmem:[#allocation14 + $0x2810] sm:$0xff] }
 0x90c   :  { %v15947_v43 = vcombine.low %v11585_v27, %v11588_v28 }
 0x90d   :  { %13875 = vmatpush1.bf16.msra.mxu1 %v15899_v31  ;;  %v15943_v31 = vcombine.low %v11580_v18, %v11583_v22  ;;  %v11613_v18 = vld [vmem:[#allocation14 + $0x2b78] sm:$0xff] }
 0x90e   :  { %14039 = vmatpush1.bf16.msra.mxu0 %v15901_v61  ;;  %13876 = vmatprep.subr.bf16.mxu1 %v15906_v32  ;;  %v17030_v61 = vld [vmem:[#allocation16 + $0x12] sm:$0x3f]  ;;  %v15948_v32 = vcombine.high %v11585_v27, %v11588_v28 }
 0x90f   :  { %14040 = vmatprep.subr.bf16.mxu0 %v15908_v33  ;;  %v15950_v33 = vcombine.high %v11586_v59, %v11589_v29  ;;  %v11659_v44 = vrot.slane %v17030_v61, %v16828_v62  ;;  %v11618_v27 = vld [vmem:[#allocation14 + $0x2c30] sm:$0xff]  ;;  %v11616_v59 = vld [vmem:[#allocation14 + $0x2bd8] sm:$0xff] }
 0x910   :  { %v11619_v29 = vld [vmem:[#allocation14 + $0x2c38] sm:$0xff] }
 0x911   :  { %13877 = vmatpush1.bf16.msra.mxu1 %v15905_v6  ;;  %v11592_v6 = vld [vmem:[#allocation14 + $0x28d8] sm:$0xff] }
 0x912   :  { %14041 = vmatpush1.bf16.msra.mxu0 %v15907_v40  ;;  %13878 = vmatprep.subr.bf16.mxu1 %v15912_v41  ;;  %v11595_v40 = vld [vmem:[#allocation14 + $0x2938] sm:$0xff]  ;;  %v11655_v41 = vrot.slane %v17030_v61, %v16825_v60 }
 0x913   :  { %14042 = vmatprep.subr.bf16.mxu0 %v15914_v46  ;;  %v8814_v46 = vrot.slane %v16414_v36, %v16908_v23  ;;  %v11601_v60 = vld [vmem:[#allocation14 + $0x29f8] sm:$0xff] }
 0x915   :  { %13879 = vmatpush1.bf16.msra.mxu1 %v15911_v15 }
 0x916   :  { %14043 = vmatpush1.bf16.msra.mxu0 %v15913_v63  ;;  %13889 = vmatprep.subr.bf16.mxu1 %v15918_v48  ;;  %v15956_v63 = vcombine.high %v11592_v6, %v11595_v40  ;;  %v11597_v48 = vld [vmem:[#allocation14 + $0x2990] sm:$0xff] }
 0x917   :  { %14053 = vmatprep.subr.bf16.mxu0 %v15920_v49  ;;  %v11600_v49 = vld [vmem:[#allocation14 + $0x29f0] sm:$0xff] }
 0x918   :  { %13881 = vmatmul.mubr.bf16.vlgmr.msra.gmra.mrb[32].mxu1 %v16920_v10  ;;  %v15959_v9 = vcombine.low %v11597_v48, %v11600_v49 }
 0x919   :  { %14045 = vmatmul.mubr.bf16.vlgmr.msra.gmra.mrb[36].mxu0 %v16920_v10  ;;  %13890 = vmatpush1.bf16.msra.mxu1 %v15917_v53  ;;  %v15931_v10 = vcombine.low %v11568_v7, %v11571_v0  ;;  %v15955_v0 = vcombine.low %v11592_v6, %v11595_v40  ;;  %v11621_v6 = vld [vmem:[#allocation14 + $0x2c90] sm:$0xff] }
 0x91a   :  { %13921 = vmatprep.mubr.bf16.mxu1 %v16924_v19  ;;  %14054 = vmatpush1.bf16.msra.mxu0 %v15919_v54  ;;  %v11624_v40 = vld [vmem:[#allocation14 + $0x2cf0] sm:$0xff] }
 0x91b   :  { %14085 = vmatprep.mubr.bf16.mxu0 %v16924_v19  ;;  %13891 = vmatprep.subr.bf16.mxu1 %v15924_v55  ;;  %v15935_v19 = vcombine.low %v11573_v5, %v11576_v57  ;;  %v11606_v5 = vld [vmem:[#allocation14 + $0x2ab0] sm:$0xff]  ;;  %v11604_v57 = vld [vmem:[#allocation14 + $0x2a58] sm:$0xff] }
 0x91c   :  { %14055 = vmatprep.subr.bf16.mxu0 %v15926_v58 }
 0x91d   :  { %13892 = vmatpush1.bf16.msra.mxu1 %v15923_v1  ;;  %v15960_v1 = vcombine.high %v11597_v48, %v11600_v49  ;;  %v11630_v48 = vld [vmem:[#allocation14 + $0x2db0] sm:$0xff]  ;;  %v11628_v49 = vld [vmem:[#allocation14 + $0x2d58] sm:$0xff] }
 0x91e   :  { %14056 = vmatpush1.bf16.msra.mxu0 %v15925_v2  ;;  %13893 = vmatprep.subr.bf16.mxu1 %v15930_v3  ;;  %v15962_v3 = vcombine.high %v11598_v26, %v11601_v60 }
 0x91f   :  { %14057 = vmatprep.subr.bf16.mxu0 %v15932_v4  ;;  %v11603_v4 = vld [vmem:[#allocation14 + $0x2a50] sm:$0xff] }
 0x920   :  { %v15965_v22 = vcombine.low %v11603_v4, %v11606_v5 }
 0x921   :  { %13894 = vmatpush1.bf16.msra.mxu1 %v15929_v11  ;;  %v15961_v11 = vcombine.low %v11598_v26, %v11601_v60 }
 0x922   :  { %14058 = vmatpush1.bf16.msra.mxu0 %v15931_v10  ;;  %13895 = vmatprep.subr.bf16.mxu1 %v15936_v12  ;;  %v15966_v10 = vcombine.high %v11603_v4, %v11606_v5  ;;  %v15968_v12 = vcombine.high %v11604_v57, %v11607_v8 }
 0x923   :  { %14059 = vmatprep.subr.bf16.mxu0 %v15938_v13  ;;  %v11609_v13 = vld [vmem:[#allocation14 + $0x2b10] sm:$0xff] }
 0x925   :  { %13896 = vmatpush1.bf16.msra.mxu1 %v15935_v19  ;;  %v15967_v19 = vcombine.low %v11604_v57, %v11607_v8 }
 0x926   :  { %14060 = vmatpush1.bf16.msra.mxu0 %v15937_v42  ;;  %13897 = vmatprep.subr.bf16.mxu1 %v15942_v38  ;;  %v15972_v42 = vcombine.high %v11609_v13, %v11612_v14  ;;  %v15974_v38 = vcombine.high %v11610_v17, %v11613_v18 }
 0x927   :  { %14061 = vmatprep.subr.bf16.mxu0 %v15944_v25  ;;  %v11615_v25 = vld [vmem:[#allocation14 + $0x2bd0] sm:$0xff] }
 0x928   :  { %v15978_v34 = vcombine.high %v11615_v25, %v11618_v27 }
 0x929   :  { %13898 = vmatpush1.bf16.msra.mxu1 %v15941_v30 }
 0x92a   :  { %14062 = vmatpush1.bf16.msra.mxu0 %v15943_v31  ;;  %13899 = vmatprep.subr.bf16.mxu1 %v15948_v32  ;;  %v15971_v31 = vcombine.low %v11609_v13, %v11612_v14 }
 0x92b   :  { %v11226_v15 = vpop.f32.mrb[28].mxu1  ;;  %14063 = vmatprep.subr.bf16.mxu0 %v15950_v33  ;;  %v15973_v33 = vcombine.low %v11610_v17, %v11613_v18 }
 0x92c   :  { %v16082_v50 = vadd.f32 %v11226_v15, %v8810_v37  ;;  %v13759_v52 = vpop.f32.mrb[32].mxu0  ;;  %v11228_v53 = vpop.f32.mrb[29].mxu1  ;;  %v15980_v37 = vcombine.high %v11616_v59, %v11619_v29 }
 0x92d   :  { %v16084_v35 = vadd.f32 %v13759_v52, %v11655_v41  ;;  %v16083_v54 = vadd.f32 %v11228_v53, %v8814_v46  ;;  %v13761_v55 = vpop.f32.mrb[33].mxu0  ;;  %v11230_v56 = vpop.f32.mrb[30].mxu1  ;;  %13900 = vmatpush1.bf16.msra.mxu1 %v15947_v43  ;;  %v11622_v46 = vld [vmem:[#allocation14 + $0x2c98] sm:$0xff]  ;;  %v15983_v52 = vcombine.low %v11621_v6, %v11624_v40 }
 0x92e   :  { %16395 = vtanh.f32 %v16082_v50  ;;  %v16085_v62 = vadd.f32 %v13761_v55, %v11659_v44  ;;  %v13763_v58 = vpop.f32.mrb[34].mxu0  ;;  %14064 = vmatpush1.bf16.msra.mxu0 %v15949_v45  ;;  %v11231_v7 = vpop.f32.mrb[31].mxu1  ;;  %13901 = vmatprep.subr.bf16.mxu1 %v15954_v47  ;;  %v11625_v43 = vld [vmem:[#allocation14 + $0x2cf8] sm:$0xff]  ;;  %v15977_v44 = vcombine.low %v11615_v25, %v11618_v27  ;;  %v15979_v45 = vcombine.low %v11616_v59, %v11619_v29 }
 0x92f   :  { %16397 = vtanh.f32 %v16084_v35  ;;  %v13764_v2 = vpop.f32.mrb[35].mxu0  ;;  %14065 = vmatprep.subr.bf16.mxu0 %v15956_v63  ;;  %v15984_v47 = vcombine.high %v11621_v6, %v11624_v40  ;;  %v15986_v15 = vcombine.high %v11622_v46, %v11625_v43  ;;  %v11627_v63 = vld [vmem:[#allocation14 + $0x2d50] sm:$0xff]  ;;  %v11631_v50 = vld [vmem:[#allocation14 + $0x2db8] sm:$0xff]  ;;  %v15985_v53 = vcombine.low %v11622_v46, %v11625_v43 }
 0x930   :  { %16399 = vtanh.f32 %v16083_v54  ;;  %v15990_v26 = vcombine.high %v11627_v63, %v11630_v48  ;;  %v15992_v60 = vcombine.high %v11628_v49, %v11631_v50  ;;  %v11633_v35 = vld [vmem:[#allocation14 + $0x2e10] sm:$0xff]  ;;  %v11634_v55 = vld [vmem:[#allocation14 + $0x2e18] sm:$0xff]  ;;  %v11667_v25 = vrot.slane %v17030_v61, %v16835_v16 }
 0x931   :  { %16401 = vtanh.f32 %v16085_v62  ;;  %13902 = vmatpush1.bf16.msra.mxu1 %v15953_v21  ;;  %v11636_v54 = vld [vmem:[#allocation14 + $0x2e70] sm:$0xff]  ;;  %v11637_v56 = vld [vmem:[#allocation14 + $0x2e78] sm:$0xff]  ;;  %v15989_v21 = vcombine.low %v11627_v63, %v11630_v48  ;;  %v15991_v62 = vcombine.low %v11628_v49, %v11631_v50  ;;  %v11675_v27 = vrot.slane %v17030_v61, %v16908_v23 }
 0x932   :  { %14066 = vmatpush1.bf16.msra.mxu0 %v15955_v0  ;;  %13903 = vmatprep.subr.bf16.mxu1 %v15960_v1  ;;  %v15996_v58 = vcombine.high %v11633_v35, %v11636_v54  ;;  %v15998_v7 = vcombine.high %v11634_v55, %v11637_v56  ;;  %v11639_v0 = vld [vmem:[#allocation14 + $0x2ed0] sm:$0xff]  ;;  %v11640_v2 = vld [vmem:[#allocation14 + $0x2ed8] sm:$0xff]  ;;  %v15995_v4 = vcombine.low %v11633_v35, %v11636_v54 }
 0x933   :  { %14067 = vmatprep.subr.bf16.mxu0 %v15962_v3  ;;  %v11642_v1 = vld [vmem:[#allocation14 + $0x2f30] sm:$0xff]  ;;  %v11643_v3 = vld [vmem:[#allocation14 + $0x2f38] sm:$0xff]  ;;  %v15997_v5 = vcombine.low %v11634_v55, %v11637_v56 }
 0x934   :  { %v16002_v57 = vcombine.high %v11639_v0, %v11642_v1  ;;  %v16004_v8 = vcombine.high %v11640_v2, %v11643_v3  ;;  %v16001_v13 = vcombine.low %v11639_v0, %v11642_v1  ;;  %v16003_v14 = vcombine.low %v11640_v2, %v11643_v3 }
 0x935   :  { %13904 = vmatpush1.bf16.msra.mxu1 %v15959_v9  ;;  %v11645_v9 = vld [vmem:[#allocation14 + $0x2f90] sm:$0xff] }
 0x936   :  { %14068 = vmatpush1.bf16.msra.mxu0 %v15961_v11  ;;  %13905 = vmatprep.subr.bf16.mxu1 %v15966_v10  ;;  %v11648_v11 = vld [vmem:[#allocation14 + $0x2ff0] sm:$0xff]  ;;  %v11646_v10 = vld [vmem:[#allocation14 + $0x2f98] sm:$0xff] }
 0x937   :  { %14069 = vmatprep.subr.bf16.mxu0 %v15968_v12  ;;  %v11649_v12 = vld [vmem:[#allocation14 + $0x2ff8] sm:$0xff]  ;;  %v16008_v17 = vcombine.high %v11645_v9, %v11648_v11 }
 0x938   :  { %v16396_v28 = vpop.eup %16395  ;;  %v16010_v18 = vcombine.high %v11646_v10, %v11649_v12 }
 0x939   :  { %v16398_v30 = vpop.eup %16397  ;;  %13906 = vmatpush1.bf16.msra.mxu1 %v15965_v22  ;;  %v16007_v22 = vcombine.low %v11645_v9, %v11648_v11 }
 0x93a   :  { %v16400_v32 = vpop.eup %16399  ;;  %14070 = vmatpush1.bf16.msra.mxu0 %v15967_v19  ;;  %13907 = vmatprep.subr.bf16.mxu1 %v15972_v42  ;;  %v16009_v19 = vcombine.low %v11646_v10, %v11649_v12  ;;  %v11663_v42 = vrot.slane %v17030_v61, %v16858_v24 }
 0x93b   :  { %v16402_v39 = vpop.eup %16401  ;;  %v16022_v36 = vpack.c.bf16 %v16400_v32, %v16396_v28  ;;  %14071 = vmatprep.subr.bf16.mxu0 %v15974_v38  ;;  %v11671_v38 = vrot.slane %v17030_v61, %v16905_v20 }
 0x93c   :  { %v16023_v41 = vpack.c.bf16 %v16402_v39, %v16398_v30 }
 0x93d   :  { %11265 = vst [vmem:[#allocation17 + $0x40] sm:$0xff] %v16022_v36  ;;  %13908 = vmatpush1.bf16.msra.mxu1 %v15971_v31 }
 0x93e   :  { %14124 = vst [vmem:[#allocation17 + $0x48] sm:$0xff] %v16023_v41  ;;  %14072 = vmatpush1.bf16.msra.mxu0 %v15973_v33  ;;  %13909 = vmatprep.subr.bf16.mxu1 %v15978_v34 }
 0x93f   :  { %14073 = vmatprep.subr.bf16.mxu0 %v15980_v37 }
 0x941   :  { %13910 = vmatpush1.bf16.msra.mxu1 %v15977_v44 }
 0x942   :  { %14074 = vmatpush1.bf16.msra.mxu0 %v15979_v45  ;;  %13911 = vmatprep.subr.bf16.mxu1 %v15984_v47 }
 0x943   :  { %14075 = vmatprep.subr.bf16.mxu0 %v15986_v15 }
 0x945   :  { %13912 = vmatpush1.bf16.msra.mxu1 %v15983_v52 }
 0x946   :  { %14076 = vmatpush1.bf16.msra.mxu0 %v15985_v53  ;;  %13913 = vmatprep.subr.bf16.mxu1 %v15990_v26 }
 0x947   :  { %14077 = vmatprep.subr.bf16.mxu0 %v15992_v60 }
 0x949   :  { %13914 = vmatpush1.bf16.msra.mxu1 %v15989_v21 }
 0x94a   :  { %14078 = vmatpush1.bf16.msra.mxu0 %v15991_v62  ;;  %13915 = vmatprep.subr.bf16.mxu1 %v15996_v58 }
 0x94b   :  { %14079 = vmatprep.subr.bf16.mxu0 %v15998_v7 }
 0x94d   :  { %13916 = vmatpush1.bf16.msra.mxu1 %v15995_v4 }
 0x94e   :  { %14080 = vmatpush1.bf16.msra.mxu0 %v15997_v5  ;;  %13917 = vmatprep.subr.bf16.mxu1 %v16002_v57 }
 0x94f   :  { %14081 = vmatprep.subr.bf16.mxu0 %v16004_v8 }
 0x951   :  { %13918 = vmatpush1.bf16.msra.mxu1 %v16001_v13 }
 0x952   :  { %14082 = vmatpush1.bf16.msra.mxu0 %v16003_v14  ;;  %13919 = vmatprep.subr.bf16.mxu1 %v16008_v17 }
 0x953   :  { %14083 = vmatprep.subr.bf16.mxu0 %v16010_v18 }
 0x955   :  { %13920 = vmatpush1.bf16.msra.mxu1 %v16007_v22 }
 0x956   :  { %14084 = vmatpush1.bf16.msra.mxu0 %v16009_v19 }
 0x958   :  { %13922 = vmatmul.mubr.bf16.vlgmr.msra.gmra.mrb[32].mxu1 %v16932_v51 }
 0x959   :  { %14086 = vmatmul.mubr.bf16.vlgmr.msra.gmra.mrb[36].mxu0 %v16932_v51 }
 0xa2b   :  { %v13923_v28 = vpop.f32.mrb[32].mxu1 }
 0xa2c   :  { %v16086_v59 = vadd.f32 %v13923_v28, %v11663_v42  ;;  %v14087_v29 = vpop.f32.mrb[36].mxu0  ;;  %v13925_v30 = vpop.f32.mrb[33].mxu1 }
 0xa2d   :  { %v16088_v31 = vadd.f32 %v14087_v29, %v11671_v38  ;;  %v16087_v32 = vadd.f32 %v13925_v30, %v11667_v25  ;;  %v14089_v33 = vpop.f32.mrb[37].mxu0  ;;  %v13927_v51 = vpop.f32.mrb[34].mxu1 }
 0xa2e   :  { %16403 = vtanh.f32 %v16086_v59  ;;  %v16089_v34 = vadd.f32 %v14089_v33, %v11675_v27  ;;  %v14091_v24 = vpop.f32.mrb[38].mxu0  ;;  %v13928_v39 = vpop.f32.mrb[35].mxu1 }
 0xa2f   :  { %16405 = vtanh.f32 %v16088_v31  ;;  %v14092_v20 = vpop.f32.mrb[39].mxu0 }
 0xa30   :  { %16407 = vtanh.f32 %v16087_v32 }
 0xa31   :  { %16409 = vtanh.f32 %v16089_v34 }
 0xa38   :  { %v16404_v16 = vpop.eup %16403 }
 0xa39   :  { %v16406_v36 = vpop.eup %16405 }
 0xa3a   :  { %v16408_v23 = vpop.eup %16407 }
 0xa3b   :  { %v16410_v61 = vpop.eup %16409  ;;  %v16024_v37 = vpack.c.bf16 %v16408_v23, %v16404_v16 }
 0xa3c   :  { %v16025_v6 = vpack.c.bf16 %v16410_v61, %v16406_v36 }
 0xa3d   :  { %14125 = vst [vmem:[#allocation17 + $0x50] sm:$0xff] %v16024_v37 }
 0xa3e   :  { %14126 = vst [vmem:[#allocation17 + $0x58] sm:$0xff] %v16025_v6 }
 0xa3f   :  { %16624 = shalt.err (!%p16621_p6)
}
 0xa40   :  { %s16625_s2 = scalar_lea.hbm %s17069_s9, 1536 }
 0xa41   :  { %p16626_p7 = scmp.ne.s32.totalorder %s17069_s9, %s16625_s2  ;;  %p16629_p8 = scmp.lt.u32.totalorder %s16625_s2, %s17069_s9 }
 0xa43   :  { %p16631_p9 = pnand %p16629_p8, %p16626_p7 }
 0xa45   :  { %16634 = shalt.err (!%p16631_p9)
}
 0xa46   :  { %14136 = dma.vmem_to_hbm [thread:$0]  %s14134_s3, 1536, %s17069_s9, [#allocation4]  }
 0xa47   :  { %16645 = dma.done.wait [#allocation4], 1536  }
 0xa48   :  { %16646 = vsyncadd [#allocation4], 4294965760 }
 0xa49   :  { %14140 = vsyncpa [#allocation3], 1 }
 0xa4a   :  { %14141 = vsyncpa [#allocation6], 1 }
 0xa4b   :  { %14142 = vsyncpa [#allocation9], 1 }
 0xa4c   :  { %14143 = vsyncpa [#allocation12], 1 }
 0xa4d   :  { %14144 = vsyncpa [#allocation15], 1 }
 0xa4e   :  { %14145 = vsyncpa [#allocation4], 1 }

</bundles_post_ra>
